<compile_context>
chip_gen: v7x
topology: tpu7x:2x2x1
jax: 0.10.0
libtpu: 0.0.40
codegen_flags: <defaults>
</compile_context>

<pallas_src>
import functools

import jax
import jax.numpy as jnp
from jax import lax
from jax.experimental import pallas as pl
from jax.experimental.pallas import tpu as pltpu


# --------------------------------------------------------------------------
# helpers
# --------------------------------------------------------------------------
def _round_up(x, m):
    return ((x + m - 1) // m) * m


def _elu(r):
    # exact ELU in f32
    return jnp.where(r > 0, r, jnp.exp(jnp.minimum(r, 0.0)) - 1.0)


def _pad2(a, rows, cols):
    r, c = a.shape
    if r == rows and c == cols:
        return a
    return jnp.pad(a, ((0, rows - r), (0, cols - c)))


def _pick_block(n, cap=8):
    for c in (8, 4, 2, 1):
        if c <= cap and n % c == 0:
            return c
    return 1


# --------------------------------------------------------------------------
# Pallas matmul kernels (bf16 operands on the MXU, f32 accumulate)
# --------------------------------------------------------------------------
def _matmul_tiled_kernel(x_ref, w_ref, b_ref, o_ref, acc_ref, *, activation):
    @pl.when(pl.program_id(2) == 0)
    def _():
        acc_ref[...] = jnp.zeros_like(acc_ref)

    acc_ref[...] += jnp.dot(x_ref[...], w_ref[...],
                            preferred_element_type=jnp.float32)

    @pl.when(pl.program_id(2) == pl.num_programs(2) - 1)
    def _():
        r = acc_ref[...] + b_ref[...]
        if activation == "elu":
            r = _elu(r)
        o_ref[...] = r.astype(o_ref.dtype)


def _matmul_small_kernel(x_ref, w_ref, b_ref, o_ref, *, activation):
    r = jnp.dot(x_ref[...], w_ref[...], preferred_element_type=jnp.float32)
    r = r + b_ref[...]
    if activation == "elu":
        r = _elu(r)
    o_ref[...] = r.astype(o_ref.dtype)


def _matmul2_small_kernel(x1_ref, w1_ref, x2_ref, w2_ref, b_ref, o_ref, *,
                          activation):
    """y = act(x1@w1 + x2@w2 + b) in one block -- replaces concat+linear."""
    r = jnp.dot(x1_ref[...], w1_ref[...], preferred_element_type=jnp.float32)
    r = r + jnp.dot(x2_ref[...], w2_ref[...], preferred_element_type=jnp.float32)
    r = r + b_ref[...]
    if activation == "elu":
        r = _elu(r)
    o_ref[...] = r.astype(o_ref.dtype)


def pallas_linear(x, w, b=None, activation="none"):
    """y = activation(x @ w + b); x:(M,K), w:(K,N), b:(N,)."""
    M, K = x.shape
    K2, N = w.shape
    assert K == K2
    Kp = _round_up(K, 128)
    Np = _round_up(N, 128)
    xb = _pad2(x.astype(jnp.bfloat16), M, Kp)
    wb = _pad2(w.astype(jnp.bfloat16), Kp, Np)
    if b is None:
        bb = jnp.zeros((1, Np), jnp.float32)
    else:
        bb = _pad2(b.astype(jnp.float32).reshape(1, N), 1, Np)

    # single-block path for the small linears (pos-aware proj, classifier...)
    small_bytes = M * Kp * 2 + Kp * Np * 2 + M * Np * 4
    if M <= 512 and small_bytes <= (12 << 20):
        out = pl.pallas_call(
            functools.partial(_matmul_small_kernel, activation=activation),
            out_shape=jax.ShapeDtypeStruct((M, Np), jnp.float32),
            compiler_params=pltpu.CompilerParams(
                vmem_limit_bytes=32 * 1024 * 1024),
        )(xb, wb, bb)
        return out[:, :N]

    # tiled path for the large matmuls (LSTM input projection).
    # tm=512 and tn=Np (when Np<=512) keep the weight tile resident.
    tm = 512
    Mp = _round_up(M, tm)
    xb = _pad2(xb, Mp, Kp)
    if Np <= 512:
        tn = Np
    elif Np % 512 == 0:
        tn = 512
    elif Np % 256 == 0:
        tn = 256
    else:
        tn = 128
    if Kp % 512 == 0:
        tk = 512
    elif Kp % 256 == 0:
        tk = 256
    else:
        tk = 128
    grid = (Mp // tm, Np // tn, Kp // tk)
    out = pl.pallas_call(
        functools.partial(_matmul_tiled_kernel, activation=activation),
        out_shape=jax.ShapeDtypeStruct((Mp, Np), jnp.float32),
        grid_spec=pltpu.PrefetchScalarGridSpec(
            num_scalar_prefetch=0,
            grid=grid,
            in_specs=[
                pl.BlockSpec((tm, tk), lambda i, j, k: (i, k)),
                pl.BlockSpec((tk, tn), lambda i, j, k: (k, j)),
                pl.BlockSpec((1, tn), lambda i, j, k: (0, j)),
            ],
            out_specs=pl.BlockSpec((tm, tn), lambda i, j, k: (i, j)),
            scratch_shapes=[pltpu.VMEM((tm, tn), jnp.float32)],
        ),
        compiler_params=pltpu.CompilerParams(
            dimension_semantics=("parallel", "parallel", "arbitrary")),
    )(xb, wb, bb)
    return out[:M, :N]


def pallas_linear2(x1, w1, x2, w2, b=None, activation="none"):
    """y = act(x1@w1 + x2@w2 + b); fused replacement of concat([x1,x2])@W."""
    M, K1 = x1.shape
    _, N = w1.shape
    K2 = x2.shape[1]
    K1p, K2p, Np = _round_up(K1, 128), _round_up(K2, 128), _round_up(N, 128)
    x1b = _pad2(x1.astype(jnp.bfloat16), M, K1p)
    w1b = _pad2(w1.astype(jnp.bfloat16), K1p, Np)
    x2b = _pad2(x2.astype(jnp.bfloat16), M, K2p)
    w2b = _pad2(w2.astype(jnp.bfloat16), K2p, Np)
    if b is None:
        bb = jnp.zeros((1, Np), jnp.float32)
    else:
        bb = _pad2(b.astype(jnp.float32).reshape(1, N), 1, Np)
    out = pl.pallas_call(
        functools.partial(_matmul2_small_kernel, activation=activation),
        out_shape=jax.ShapeDtypeStruct((M, Np), jnp.float32),
        compiler_params=pltpu.CompilerParams(
            vmem_limit_bytes=32 * 1024 * 1024),
    )(x1b, w1b, x2b, w2b, bb)
    return out[:, :N]


# --------------------------------------------------------------------------
# Pallas 3x3 conv + ELU (no im2col, weights resident across the batch sweep)
# --------------------------------------------------------------------------
def _conv3x3_kernel(x_ref, w_ref, b_ref, mask_ref, o_ref, *,
                    tap_offsets, rows, guard):
    to = o_ref.shape[2]
    acc = jnp.zeros((rows, to), jnp.float32)
    # 9 shifted matmuls, one per 3x3 tap, accumulated on the MXU in f32.
    # TODO(synk): the dx=+/-1 taps are sublane-unaligned slices; a
    # pltpu.roll-based variant would move that shuffle onto the XLU.
    for t, off in enumerate(tap_offsets):
        acc = acc + jnp.dot(x_ref[0, pl.ds(off, rows), :], w_ref[t],
                            preferred_element_type=jnp.float32)
    r = _elu(acc + b_ref[...]) * mask_ref[...]
    zeros = jnp.zeros((guard, to), o_ref.dtype)
    o_ref[0, 0:guard, :] = zeros
    o_ref[0, guard:guard + rows, :] = r.astype(o_ref.dtype)
    o_ref[0, guard + rows:guard + rows + guard, :] = zeros


def _conv_layer(xg, w_oihw, bias, mask, *, rows, guard, wq):
    """3x3 conv (padding=1) + ELU on a zero-padded, flattened image `xg` of
    shape (B, rows + 2*guard, Cp).  Returns the same (masked, guarded) layout
    with padded output channels, in bf16, so it can feed the next conv
    directly with no crop / re-pad."""
    B = xg.shape[0]
    Cp = xg.shape[2]
    O, C = w_oihw.shape[0], w_oihw.shape[1]
    Op = _round_up(O, 128)

    w_taps = jnp.transpose(w_oihw, (2, 3, 1, 0)).reshape(9, C, O)
    w_taps = jnp.pad(w_taps.astype(jnp.bfloat16),
                     ((0, 0), (0, Cp - C), (0, Op - O)))
    b2 = jnp.pad(bias.astype(jnp.float32).reshape(1, O), ((0, 0), (0, Op - O)))

    # keep the whole (9, Cp, O) weight resident when it is modest
    if 2 * 9 * Cp * Op * 2 <= 20 * 1024 * 1024:
        to = Op
    elif Op % 256 == 0:
        to = 256
    else:
        to = 128

    tap_offsets = tuple(guard + (dy - 1) * wq + (dx - 1)
                        for dy in range(3) for dx in range(3))

    return pl.pallas_call(
        functools.partial(_conv3x3_kernel, tap_offsets=tap_offsets,
                          rows=rows, guard=guard),
        out_shape=jax.ShapeDtypeStruct((B, rows + 2 * guard, Op), jnp.bfloat16),
        grid_spec=pltpu.PrefetchScalarGridSpec(
            num_scalar_prefetch=0,
            # weight tile in the OUTER axis, batch inner: the (9,Cp,to) weight
            # block index is constant while b sweeps, so it is DMA'd once per
            # output tile instead of once per (tile, batch item).
            grid=(Op // to, B),
            in_specs=[
                pl.BlockSpec((1, rows + 2 * guard, Cp), lambda j, b: (b, 0, 0)),
                pl.BlockSpec((9, Cp, to), lambda j, b: (0, 0, j)),
                pl.BlockSpec((1, to), lambda j, b: (0, j)),
                pl.BlockSpec((rows, 1), lambda j, b: (0, 0)),
            ],
            out_specs=pl.BlockSpec((1, rows + 2 * guard, to),
                                   lambda j, b: (b, 0, j)),
        ),
        compiler_params=pltpu.CompilerParams(
            dimension_semantics=("parallel", "parallel"),
            vmem_limit_bytes=48 * 1024 * 1024),
    )(xg, w_taps, b2, mask)


def conv_stem(image, params):
    """Dropout(id) -> Conv3x3 -> ELU -> Dropout(id) -> Conv3x3 -> ELU,
    returning knowledge of shape (B, H*W, hidden) in bf16."""
    hidden = params["conv1_b"].shape[0]
    B, C, H, W = image.shape
    Hp, Wp = H + 2, W + 2
    Wq = _round_up(Wp, 8)          # width padded so dy-shifted taps stay aligned
    rows = Hp * Wq
    guard = Wq + 8                 # flat guard rows (multiple of 8) for tap shifts
    Cp = _round_up(C, 128)

    x = jnp.transpose(image, (0, 2, 3, 1)).astype(jnp.bfloat16)
    x = jnp.pad(x, ((0, 0), (1, 1), (1, Wq - W - 1), (0, Cp - C)))
    xg = jnp.pad(x.reshape(B, rows, Cp), ((0, 0), (guard, guard), (0, 0)))

    pidx = jnp.arange(rows)
    valid = ((pidx // Wq >= 1) & (pidx // Wq <= H)
             & (pidx % Wq >= 1) & (pidx % Wq <= W))
    mask = valid.astype(jnp.float32).reshape(rows, 1)

    y1 = _conv_layer(xg, params["conv1_w"], params["conv1_b"], mask,
                     rows=rows, guard=guard, wq=Wq)
    y2 = _conv_layer(y1, params["conv2_w"], params["conv2_b"], mask,
                     rows=rows, guard=guard, wq=Wq)
    y2 = y2[:, guard:guard + rows, :].reshape(B, Hp, Wq, -1)
    knowledge = y2[:, 1:1 + H, 1:1 + W, :hidden].reshape(B, H * W, hidden)
    return knowledge                               # bf16, matches NCHW view+permute


# --------------------------------------------------------------------------
# Pallas LSTM recurrence (one direction, w_hh resident, batch-block grid)
# --------------------------------------------------------------------------
def _lstm_kernel(xp_ref, whh_ref, len_ref, out_ref, hf_ref, *, reverse):
    T = xp_ref.shape[0]
    Bb = xp_ref.shape[1]
    hid = whh_ref.shape[0]

    def step(s, carry):
        h, c = carry
        t = (T - 1 - s) if reverse else s
        gates = xp_ref[t] + jnp.dot(h.astype(jnp.bfloat16), whh_ref[...],
                                    preferred_element_type=jnp.float32)
        i = jax.nn.sigmoid(gates[:, 0 * hid:1 * hid])
        f = jax.nn.sigmoid(gates[:, 1 * hid:2 * hid])
        g = jnp.tanh(gates[:, 2 * hid:3 * hid])
        o = jax.nn.sigmoid(gates[:, 3 * hid:4 * hid])
        c_new = f * c + i * g
        h_new = o * jnp.tanh(c_new)
        valid = t < len_ref[...]                           # (Bb, 1) bool
        out_ref[t] = jnp.where(valid, h_new, 0.0).astype(out_ref.dtype)
        return (jnp.where(valid, h_new, h), jnp.where(valid, c_new, c))

    h0 = jnp.zeros((Bb, hid), jnp.float32)
    h_fin, _ = lax.fori_loop(0, T, step, (h0, h0))
    hf_ref[...] = h_fin


def lstm_recurrence(xproj_tbh, w_hh_t, lengths, *, reverse):
    """xproj_tbh: (T, B, 4*hid) f32 (x@W_ih.T + b_ih + b_hh precomputed);
    w_hh_t: (hid, 4*hid).  Returns (outs (T,B,hid) bf16, h_final (B,hid) f32)
    with pack_padded_sequence masking semantics."""
    T, B, G4 = xproj_tbh.shape
    hid = G4 // 4
    Bb = _pick_block(B)
    lengths2 = lengths.astype(jnp.int32).reshape(B, 1)
    outs, h_fin = pl.pallas_call(
        functools.partial(_lstm_kernel, reverse=reverse),
        out_shape=(jax.ShapeDtypeStruct((T, B, hid), jnp.bfloat16),
                   jax.ShapeDtypeStruct((B, hid), jnp.float32)),
        grid_spec=pltpu.PrefetchScalarGridSpec(
            num_scalar_prefetch=0,
            grid=(B // Bb,),
            in_specs=[
                pl.BlockSpec((T, Bb, G4), lambda i: (0, i, 0)),
                pl.BlockSpec((hid, G4), lambda i: (0, 0)),
                pl.BlockSpec((Bb, 1), lambda i: (i, 0)),
            ],
            out_specs=(
                pl.BlockSpec((T, Bb, hid), lambda i: (0, i, 0)),
                pl.BlockSpec((Bb, hid), lambda i: (i, 0)),
            ),
        ),
        compiler_params=pltpu.CompilerParams(
            dimension_semantics=("parallel",),
            vmem_limit_bytes=32 * 1024 * 1024),
    )(xproj_tbh, w_hh_t.astype(jnp.bfloat16), lengths2)
    return outs, h_fin


# --------------------------------------------------------------------------
# Fused MAC reasoning loop: the whole L-step recurrence in one pallas_call
# --------------------------------------------------------------------------
# packed (H,H) weight slabs in wstack
_W_CQ_C, _W_CQ_P, _W_RM, _W_MK, _W_K, _W_WR_R, _W_WR_M = range(7)
# packed (1,H) vectors in vstack
_B_CQ, _A_CTRL, _B_RM, _B_CAT, _A_READ, _B_WR, _W_GATE, _MEM0 = range(8)


def _mac_loop_kernel(words_ref, question_ref, pos_ref, know_ref,
                     wstack_ref, vstack_ref, gateb_ref,
                     mem_ref, knproj_scr, *, gate_bias):
    f32 = jnp.float32
    bf16 = jnp.bfloat16
    Bb, T, H = words_ref.shape
    N = know_ref.shape[1]
    L = pos_ref.shape[1]

    def W(i):                       # i-th (H,H) slab, loaded from VMEM at use
        return wstack_ref[i * H:(i + 1) * H, :]

    vstack = vstack_ref[...]        # (8, H) f32, tiny

    def V(i):
        return vstack[i:i + 1, :]

    question = question_ref[...]                       # (Bb, H) f32
    g_bias = gateb_ref[...] + gate_bias                 # (1, 1)
    pos_all = pos_ref[...]                              # (Bb, L, H) f32

    # step-invariant half of the ReadUnit projection (knowledge @ W_k + b),
    # computed once per batch block into VMEM scratch.
    for b in range(Bb):
        knproj_scr[b] = (jnp.dot(know_ref[b], W(_W_K),
                                 preferred_element_type=f32) + V(_B_CAT))

    control = question                                  # random_control_init=False
    memory = jnp.broadcast_to(V(_MEM0), (Bb, H))

    for step in range(L):
        # ---- ControlUnit -------------------------------------------------
        pos_q = pos_all[:, step, :]
        cq = (jnp.dot(control.astype(bf16), W(_W_CQ_C),
                      preferred_element_type=f32)
              + jnp.dot(pos_q.astype(bf16), W(_W_CQ_P),
                        preferred_element_type=f32)
              + V(_B_CQ))                               # (Bb, H)
        qc = (cq * V(_A_CTRL))[:, None, :]              # (Bb, 1, H)
        logits = jnp.sum(words_ref[...] * qc, axis=2, keepdims=True)  # (Bb,T,1)
        m = jnp.max(logits, axis=1, keepdims=True)
        e = jnp.exp(logits - m)
        attn = e / jnp.sum(e, axis=1, keepdims=True)
        control = jnp.sum(attn * words_ref[...], axis=1)               # (Bb, H)

        # ---- ReadUnit (mk = proj_mem*knowledge formed in VMEM only) ------
        proj_mem = (jnp.dot(memory.astype(bf16), W(_W_RM),
                            preferred_element_type=f32)
                    + V(_B_RM)).astype(bf16)            # (Bb, H)
        q_read = control * V(_A_READ)                   # (Bb, H) f32
        reads = []
        for b in range(Bb):
            kb = know_ref[b]                            # (N, H) bf16
            mk = kb * proj_mem[b:b + 1, :]              # (N, H) bf16
            ckn = (jnp.dot(mk, W(_W_MK), preferred_element_type=f32)
                   + knproj_scr[b])                     # (N, H) f32
            lg = jnp.sum(ckn * q_read[b:b + 1, :], axis=1, keepdims=True)
            lg = lg - jnp.max(lg, axis=0, keepdims=True)
            ee = jnp.exp(lg)
            wr = ee / jnp.sum(ee, axis=0, keepdims=True)
            reads.append(jnp.sum(wr * kb, axis=0, keepdims=True))       # (1, H)
        read = jnp.concatenate(reads, axis=0)           # (Bb, H)

        # ---- WriteUnit + memory gate -------------------------------------
        new_mem = (jnp.dot(read.astype(bf16), W(_W_WR_R),
                           preferred_element_type=f32)
                   + jnp.dot(memory.astype(bf16), W(_W_WR_M),
                             preferred_element_type=f32)
                   + V(_B_WR))                          # (Bb, H)
        glog = jnp.sum(control * V(_W_GATE), axis=1, keepdims=True) + g_bias
        g = jax.nn.sigmoid(glog)
        memory = g * memory + (1.0 - g) * new_mem

    mem_ref[...] = memory


def mac_forward(params, words, question, knowledge, memory_gate_bias=1.0):
    """MAC recurrence (control/read/write + memory gate) fused into one kernel
    followed by the OutputUnit classifier."""
    B, T, H = words.shape
    N = knowledge.shape[1]
    L = params["ctrl_pos_b"].shape[0] // H

    # batched position-aware control projections for all steps (one matmul)
    pos_all = pallas_linear(question, params["ctrl_pos_w"], params["ctrl_pos_b"])
    pos_all = pos_all.reshape(B, L, H)

    # pack the MAC-cell weights so they stay resident in VMEM across all steps
    wstack = jnp.concatenate([
        params["ctrl_cq_w"],            # rows [0:2H)
        params["read_mem_w"],           # rows [2H:3H)
        params["read_cat_w"],           # rows [3H:5H) = [W_mk ; W_k]
        params["write_w"],              # rows [5H:7H)
    ], axis=0).astype(jnp.bfloat16)
    vstack = jnp.stack([
        params["ctrl_cq_b"],
        params["ctrl_attn_w"].reshape(-1),
        params["read_mem_b"],
        params["read_cat_b"],
        params["read_attn_w"].reshape(-1),
        params["write_b"],
        params["gate_w"].reshape(-1),
        params["mem_0"].reshape(-1),
    ], axis=0).astype(jnp.float32)
    gate_b = params["gate_b"].reshape(1, 1).astype(jnp.float32)

    Bb = _pick_block(B)
    memory = pl.pallas_call(
        functools.partial(_mac_loop_kernel, gate_bias=float(memory_gate_bias)),
        out_shape=jax.ShapeDtypeStruct((B, H), jnp.float32),
        grid_spec=pltpu.PrefetchScalarGridSpec(
            num_scalar_prefetch=0,
            grid=(B // Bb,),
            in_specs=[
                pl.BlockSpec((Bb, T, H), lambda i: (i, 0, 0)),
                pl.BlockSpec((Bb, H), lambda i: (i, 0)),
                pl.BlockSpec((Bb, L, H), lambda i: (i, 0, 0)),
                pl.BlockSpec((Bb, N, H), lambda i: (i, 0, 0)),
                pl.BlockSpec((7 * H, H), lambda i: (0, 0)),
                pl.BlockSpec((8, H), lambda i: (0, 0)),
                pl.BlockSpec((1, 1), lambda i: (0, 0)),
            ],
            out_specs=pl.BlockSpec((Bb, H), lambda i: (i, 0)),
            scratch_shapes=[pltpu.VMEM((Bb, N, H), jnp.float32)],
        ),
        compiler_params=pltpu.CompilerParams(
            dimension_semantics=("parallel",),
            vmem_limit_bytes=48 * 1024 * 1024),
    )(words.astype(jnp.bfloat16), question.astype(jnp.float32), pos_all,
      knowledge.astype(jnp.bfloat16), wstack, vstack, gate_b)

    # OutputUnit: cat(memory, question) -> Linear -> ELU -> Linear
    out = pallas_linear2(memory, params["cls1_w"][:H],
                         question, params["cls1_w"][H:],
                         params["cls1_b"], activation="elu")
    out = pallas_linear(out, params["cls2_w"], params["cls2_b"])
    return out


# --------------------------------------------------------------------------
# Full forward pass (eval mode)
# --------------------------------------------------------------------------
def original_mac_forward(params, image, question_tokens, question_lengths):
    B = question_tokens.shape[0]

    # CNN stem -> knowledge (B, H*W, hidden) bf16
    knowledge = conv_stem(image, params)

    # Embedding (XLA gather), laid out (T, B, E) for the LSTM kernel
    emb_tbe = params["embed_w"][question_tokens.T]
    T, _, E = emb_tbe.shape
    hid = params["lstm_w_hh_f"].shape[1]

    # BiLSTM with pack_padded_sequence semantics.
    # TODO(synk): assumes max(question_lengths) == T (pad_packed_sequence would
    # otherwise shrink the time dimension to the batch max length).
    def run_dir(wih, whh, bih, bhh, reverse):
        xproj = pallas_linear(emb_tbe.reshape(T * B, E), wih.T, bih + bhh)
        xproj = xproj.reshape(T, B, 4 * hid)
        return lstm_recurrence(xproj, whh.T, question_lengths, reverse=reverse)

    outs_f, h_f = run_dir(params["lstm_w_ih_f"], params["lstm_w_hh_f"],
                          params["lstm_b_ih_f"], params["lstm_b_hh_f"], False)
    outs_b, h_b = run_dir(params["lstm_w_ih_b"], params["lstm_w_hh_b"],
                          params["lstm_b_ih_b"], params["lstm_b_hh_b"], True)
    words = jnp.concatenate([outs_f, outs_b], axis=-1).transpose(1, 0, 2)  # (B,T,H)
    question = jnp.concatenate([h_f, h_b], axis=-1)                         # (B,H)
    # question_dropout: identity in eval

    return mac_forward(params, words, question, knowledge)


# --------------------------------------------------------------------------
# Deterministic parameter initialisation (synthetic weights)
# --------------------------------------------------------------------------
def init_params(key, hidden_dim, length, vocab, embed_dim, c_in, num_answers):
    H = hidden_dim
    hid = H // 2
    keys = iter(jax.random.split(key, 64))

    def xavier(shape, fan_in, fan_out):
        bnd = (6.0 / (fan_in + fan_out)) ** 0.5
        return jax.random.uniform(next(keys), shape, jnp.float32, -bnd, bnd)

    def lin(d_in, d_out):
        return xavier((d_in, d_out), d_in, d_out), jnp.zeros((d_out,), jnp.float32)

    p = {}
    p["embed_w"] = xavier((vocab, embed_dim), embed_dim, vocab)
    p["conv1_w"] = xavier((H, c_in, 3, 3), c_in * 9, H * 9)
    p["conv1_b"] = jnp.zeros((H,), jnp.float32)
    p["conv2_w"] = xavier((H, H, 3, 3), H * 9, H * 9)
    p["conv2_b"] = jnp.zeros((H,), jnp.float32)

    s = 1.0 / (hid ** 0.5)

    def uni(shape):
        return jax.random.uniform(next(keys), shape, jnp.float32, -s, s)

    for d in ("f", "b"):
        p[f"lstm_w_ih_{d}"] = uni((4 * hid, embed_dim))
        p[f"lstm_w_hh_{d}"] = uni((4 * hid, hid))
        p[f"lstm_b_ih_{d}"] = uni((4 * hid,))
        p[f"lstm_b_hh_{d}"] = uni((4 * hid,))

    # MAC cell (canonical units; sub-unit source not provided in the module)
    p["mem_0"] = jnp.zeros((1, H), jnp.float32)
    pos_w, pos_b = [], []
    for _ in range(length):
        w, bb = lin(H, H)
        pos_w.append(w)
        pos_b.append(bb)
    p["ctrl_pos_w"] = jnp.concatenate(pos_w, axis=1)           # (H, length*H)
    p["ctrl_pos_b"] = jnp.concatenate(pos_b, axis=0)           # (length*H,)
    p["ctrl_cq_w"], p["ctrl_cq_b"] = lin(2 * H, H)
    p["ctrl_attn_w"], p["ctrl_attn_b"] = lin(H, 1)
    p["read_mem_w"], p["read_mem_b"] = lin(H, H)
    p["read_cat_w"], p["read_cat_b"] = lin(2 * H, H)
    p["read_attn_w"], p["read_attn_b"] = lin(H, 1)
    p["write_w"], p["write_b"] = lin(2 * H, H)
    p["gate_w"], p["gate_b"] = lin(H, 1)
    p["cls1_w"], p["cls1_b"] = lin(2 * H, H)
    p["cls2_w"], p["cls2_b"] = lin(H, num_answers)
    return p


# --------------------------------------------------------------------------
# Pure-JAX f32 reference (for a loose numerical sanity check)
# --------------------------------------------------------------------------
def _ref_conv3x3_elu(x_nhwc, w_oihw, b):
    Bc, Hh, Ww, _ = x_nhwc.shape
    xp = jnp.pad(x_nhwc, ((0, 0), (1, 1), (1, 1), (0, 0)))
    wt = jnp.transpose(w_oihw, (2, 3, 1, 0))                  # (3,3,C,O)
    out = b.astype(jnp.float32)
    for ky in range(3):
        for kx in range(3):
            out = out + jnp.einsum('bhwc,co->bhwo',
                                   xp[:, ky:ky + Hh, kx:kx + Ww, :], wt[ky, kx])
    return jnp.where(out > 0, out, jnp.exp(jnp.minimum(out, 0.0)) - 1.0)


def _ref_lstm_dir(emb_bte, lengths, w_ih, w_hh, b_ih, b_hh, reverse):
    Bq, T, _ = emb_bte.shape
    hid = w_hh.shape[1]
    xproj = jnp.einsum('bte,ge->btg', emb_bte, w_ih) + b_ih + b_hh
    h = jnp.zeros((Bq, hid), jnp.float32)
    c = jnp.zeros((Bq, hid), jnp.float32)
    outs = [None] * T
    order = range(T - 1, -1, -1) if reverse else range(T)
    for t in order:
        gates = xproj[:, t, :] + h @ w_hh.T
        i = jax.nn.sigmoid(gates[:, :hid])
        f = jax.nn.sigmoid(gates[:, hid:2 * hid])
        g = jnp.tanh(gates[:, 2 * hid:3 * hid])
        o = jax.nn.sigmoid(gates[:, 3 * hid:])
        c_new = f * c + i * g
        h_new = o * jnp.tanh(c_new)
        valid = (t < lengths)[:, None]
        h = jnp.where(valid, h_new, h)
        c = jnp.where(valid, c_new, c)
        outs[t] = jnp.where(valid, h_new, 0.0)
    return jnp.stack(outs, axis=1), h


def _ref_mac(params, words, question, knowledge, gate_bias=1.0):
    Bq, _, H = words.shape
    L = params["ctrl_pos_b"].shape[0] // H
    control = question
    memory = jnp.broadcast_to(params["mem_0"], (Bq, H))
    pos_all = question @ params["ctrl_pos_w"] + params["ctrl_pos_b"]
    w_mk, w_k = params["read_cat_w"][:H], params["read_cat_w"][H:]
    kn_proj = jnp.einsum('bnh,hk->bnk', knowledge, w_k) + params["read_cat_b"]
    for step in range(L):
        pos_q = pos_all[:, step * H:(step + 1) * H]
        cq = (control @ params["ctrl_cq_w"][:H] + pos_q @ params["ctrl_cq_w"][H:]
              + params["ctrl_cq_b"])
        q = cq * params["ctrl_attn_w"].reshape(1, H)
        attn = jax.nn.softmax(jnp.einsum('bth,bh->bt', words, q), axis=1)
        control = jnp.einsum('bt,bth->bh', attn, words)

        proj_mem = memory @ params["read_mem_w"] + params["read_mem_b"]
        mk = proj_mem[:, None, :] * knowledge
        ckn = jnp.einsum('bnh,hk->bnk', mk, w_mk) + kn_proj
        qr = control * params["read_attn_w"].reshape(1, H)
        ra = jax.nn.softmax(jnp.einsum('bnh,bh->bn', ckn, qr), axis=1)
        read = jnp.einsum('bn,bnh->bh', ra, knowledge)

        new_mem = (read @ params["write_w"][:H] + memory @ params["write_w"][H:]
                   + params["write_b"])
        g = jax.nn.sigmoid(control @ params["gate_w"] + params["gate_b"] + gate_bias)
        memory = g * memory + (1.0 - g) * new_mem
    out = (jnp.concatenate([memory, question], -1) @ params["cls1_w"]
           + params["cls1_b"])
    out = jnp.where(out > 0, out, jnp.exp(jnp.minimum(out, 0.0)) - 1.0)
    return out @ params["cls2_w"] + params["cls2_b"]


def forward_reference(params, image, question_tokens, question_lengths):
    B = question_tokens.shape[0]
    x = jnp.transpose(image, (0, 2, 3, 1))
    x = _ref_conv3x3_elu(x, params["conv1_w"], params["conv1_b"])
    x = _ref_conv3x3_elu(x, params["conv2_w"], params["conv2_b"])
    _, Hs, Ws, Hd = x.shape
    knowledge = x.reshape(B, Hs * Ws, Hd)
    emb = params["embed_w"][question_tokens]
    out_f, h_f = _ref_lstm_dir(emb, question_lengths,
                               params["lstm_w_ih_f"], params["lstm_w_hh_f"],
                               params["lstm_b_ih_f"], params["lstm_b_hh_f"], False)
    out_b, h_b = _ref_lstm_dir(emb, question_lengths,
                               params["lstm_w_ih_b"], params["lstm_w_hh_b"],
                               params["lstm_b_ih_b"], params["lstm_b_hh_b"], True)
    words = jnp.concatenate([out_f, out_b], -1)
    question = jnp.concatenate([h_f, h_b], -1)
    return _ref_mac(params, words, question, knowledge)


# --------------------------------------------------------------------------
if __name__ == "__main__":
    B = 2
    HIDDEN = 32          # small stand-in for hidden_dim=512 (must be even)
    LENGTH = 3           # small stand-in for length=12
    VOCAB = 30
    EMBED = 16
    C_IN = 1024          # fixed by nn.Conv2d(1024, hidden_dim, 3, padding=1)
    SPATIAL = 4
    T = 8
    NUM_ANSWERS = 28

    root = jax.random.PRNGKey(0)
    k_param, k_img, k_q = jax.random.split(root, 3)

    params = init_params(k_param, HIDDEN, LENGTH, VOCAB, EMBED, C_IN, NUM_ANSWERS)

    image = jax.random.normal(k_img, (B, C_IN, SPATIAL, SPATIAL), jnp.float32)
    question = jax.random.randint(k_q, (B, T), 0, VOCAB)
    question_lengths = jnp.array([T, 6], dtype=jnp.int32)   # sorted descending

    fwd = jax.jit(original_mac_forward)
    out = jax.block_until_ready(fwd(params, image, question, question_lengths))

    assert out.shape == (B, NUM_ANSWERS), out.shape
    assert bool(jnp.all(jnp.isfinite(out)))

    # loose sanity check against a pure-JAX f32 reference (Pallas path uses
    # bf16 MXU operands, so only gross structural errors should trip this)
    ref = forward_reference(params, image, question, question_lengths)
    max_diff = float(jnp.max(jnp.abs(out - ref)))
    assert max_diff < 0.5, f"max abs diff vs reference too large: {max_diff}"

    print("KERNEL_OK")
</pallas_src>

<mosaic_0001>
module attributes {stable_mosaic.version = 11 : i64} {
  func.func @_matmul_small_kernel(%arg0: memref<16x128xbf16, #tpu.memory_space<vmem>>, %arg1: memref<128x128xbf16, #tpu.memory_space<vmem>>, %arg2: memref<1x128xf32, #tpu.memory_space<vmem>>, %arg3: memref<16x128xf32, #tpu.memory_space<vmem>>) attributes {dimension_semantics = [], scalar_prefetch = 0 : i64, scratch_operands = 0 : i64, tpu.core_type = #tpu.core_type<tc>} {
    %c0 = arith.constant 0 : index
    %c0_0 = arith.constant 0 : index
    %0 = vector.load %arg0[%c0, %c0_0] : memref<16x128xbf16, #tpu.memory_space<vmem>>, vector<16x128xbf16>
    %c0_1 = arith.constant 0 : index
    %c0_2 = arith.constant 0 : index
    %1 = vector.load %arg1[%c0_1, %c0_2] : memref<128x128xbf16, #tpu.memory_space<vmem>>, vector<128x128xbf16>
    %cst = arith.constant dense<0.000000e+00> : vector<16x128xf32>
    %2 = tpu.matmul %0, %1, %cst {dimension_numbers = #tpu.dot_dimension_numbers<[1], [0], [0], [1], [0, 0, 1, 1], [], []>} : vector<16x128xbf16>, vector<128x128xbf16>, vector<16x128xf32> -> vector<16x128xf32>
    %c0_3 = arith.constant 0 : index
    %c0_4 = arith.constant 0 : index
    %3 = vector.load %arg2[%c0_3, %c0_4] : memref<1x128xf32, #tpu.memory_space<vmem>>, vector<1x128xf32>
    %4 = vector.broadcast %3 : vector<1x128xf32> to vector<16x128xf32>
    %5 = arith.addf %2, %4 : vector<16x128xf32>
    %c0_5 = arith.constant 0 : index
    %c0_6 = arith.constant 0 : index
    %6 = vector.load %arg3[%c0_5, %c0_6] : memref<16x128xf32, #tpu.memory_space<vmem>>, vector<16x128xf32>
    tpu.vector_store %arg3[%c0_5, %c0_6], %5 {strides = array<i32>} : memref<16x128xf32, #tpu.memory_space<vmem>>, vector<16x128xf32>,
    return
  }
}

module attributes {stable_mosaic.version = 11 : i64} {
  func.func @_lstm_kernel(%arg0: i32, %arg1: memref<8x2x64xf32, #tpu.memory_space<vmem>>, %arg2: memref<16x64xbf16, #tpu.memory_space<vmem>>, %arg3: memref<2x1xi32, #tpu.memory_space<vmem>>, %arg4: memref<8x2x16xbf16, #tpu.memory_space<vmem>>, %arg5: memref<2x16xf32, #tpu.memory_space<vmem>>) attributes {dimension_semantics = [#tpu.dimension_semantics<parallel>], iteration_bounds = array<i64: 1>, scalar_prefetch = 0 : i64, scratch_operands = 0 : i64, tpu.core_type = #tpu.core_type<tc>, window_params = [{transform_indices = @transform_0, window_bounds = array<i64: 8, 2, 64>}, {pipeline_mode = #tpu.pipeline_mode<synchronous>, transform_indices = @transform_1, window_bounds = array<i64: 16, 64>}, {transform_indices = @transform_2, window_bounds = array<i64: 2, 1>}, {transform_indices = @transform_3, window_bounds = array<i64: 8, 2, 16>}, {transform_indices = @transform_4, window_bounds = array<i64: 2, 16>}]} {
    %cst = arith.constant 0.000000e+00 : f32
    %0 = vector.broadcast %cst : f32 to vector<2x16xf32>
    %c0_i32 = arith.constant 0 : i32
    %c8_i32 = arith.constant 8 : i32
    %1 = arith.addi %c0_i32, %c8_i32 : i32
    %c1_i32 = arith.constant 1 : i32
    %2:2 = scf.for %arg6 = %c0_i32 to %1 step %c1_i32 iter_args(%arg7 = %0, %arg8 = %0) -> (vector<2x16xf32>, vector<2x16xf32>)  : i32 {
      %4 = arith.index_cast %arg6 : i32 to index
      %c0_2 = arith.constant 0 : index
      %c0_3 = arith.constant 0 : index
      %5 = vector.load %arg1[%4, %c0_2, %c0_3] : memref<8x2x64xf32, #tpu.memory_space<vmem>>, vector<1x2x64xf32>
      %6 = vector.shape_cast %5 : vector<1x2x64xf32> to vector<2x64xf32>
      %7 = arith.truncf %arg7 : vector<2x16xf32> to vector<2x16xbf16>
      %c0_4 = arith.constant 0 : index
      %c0_5 = arith.constant 0 : index
      %8 = vector.load %arg2[%c0_4, %c0_5] : memref<16x64xbf16, #tpu.memory_space<vmem>>, vector<16x64xbf16>
      %cst_6 = arith.constant dense<0.000000e+00> : vector<2x64xf32>
      %9 = tpu.matmul %7, %8, %cst_6 {dimension_numbers = #tpu.dot_dimension_numbers<[1], [0], [0], [1], [0, 0, 1, 1], [], []>} : vector<2x16xbf16>, vector<16x64xbf16>, vector<2x64xf32> -> vector<2x64xf32>
      %10 = arith.addf %6, %9 : vector<2x64xf32>
      %11 = vector.extract_strided_slice %10 {offsets = [0, 0], sizes = [2, 16], strides = [1, 1]} : vector<2x64xf32> to vector<2x16xf32>
      %12 = arith.negf %11 : vector<2x16xf32>
      %13 = math.exp %12 : vector<2x16xf32>
      %cst_7 = arith.constant 1.000000e+00 : f32
      %14 = vector.broadcast %cst_7 : f32 to vector<2x16xf32>
      %15 = arith.addf %14, %13 : vector<2x16xf32>
      %16 = arith.divf %14, %15 : vector<2x16xf32>
      %17 = vector.extract_strided_slice %10 {offsets = [0, 16], sizes = [2, 16], strides = [1, 1]} : vector<2x64xf32> to vector<2x16xf32>
      %18 = arith.negf %17 : vector<2x16xf32>
      %19 = math.exp %18 : vector<2x16xf32>
      %cst_8 = arith.constant 1.000000e+00 : f32
      %20 = vector.broadcast %cst_8 : f32 to vector<2x16xf32>
      %21 = arith.addf %20, %19 : vector<2x16xf32>
      %22 = arith.divf %20, %21 : vector<2x16xf32>
      %23 = vector.extract_strided_slice %10 {offsets = [0, 32], sizes = [2, 16], strides = [1, 1]} : vector<2x64xf32> to vector<2x16xf32>
      %24 = math.tanh %23 : vector<2x16xf32>
      %25 = vector.extract_strided_slice %10 {offsets = [0, 48], sizes = [2, 16], strides = [1, 1]} : vector<2x64xf32> to vector<2x16xf32>
      %26 = arith.negf %25 : vector<2x16xf32>
      %27 = math.exp %26 : vector<2x16xf32>
      %cst_9 = arith.constant 1.000000e+00 : f32
      %28 = vector.broadcast %cst_9 : f32 to vector<2x16xf32>
      %29 = arith.addf %28, %27 : vector<2x16xf32>
      %30 = arith.divf %28, %29 : vector<2x16xf32>
      %31 = arith.mulf %22, %arg8 : vector<2x16xf32>
      %32 = arith.mulf %16, %24 : vector<2x16xf32>
      %33 = arith.addf %31, %32 : vector<2x16xf32>
      %34 = math.tanh %33 : vector<2x16xf32>
      %35 = arith.mulf %30, %34 : vector<2x16xf32>
      %c0_10 = arith.constant 0 : index
      %c0_11 = arith.constant 0 : index
      %36 = vector.load %arg3[%c0_10, %c0_11] : memref<2x1xi32, #tpu.memory_space<vmem>>, vector<2x1xi32>
      %37 = vector.broadcast %arg6 : i32 to vector<2x1xi32>
      %38 = arith.cmpi slt, %37, %36 : vector<2x1xi32>
      %cst_12 = arith.constant 0.000000e+00 : f32
      %39 = vector.shape_cast %38 : vector<2x1xi1> to vector<2x1xi1>
      %40 = vector.broadcast %39 : vector<2x1xi1> to vector<2x16xi1>
      %41 = vector.broadcast %cst_12 : f32 to vector<2x16xf32>
      %42 = arith.select %40, %35, %41 : vector<2x16xi1>, vector<2x16xf32>
      %43 = arith.truncf %42 : vector<2x16xf32> to vector<2x16xbf16>
      %44 = arith.index_cast %arg6 : i32 to index
      %c0_13 = arith.constant 0 : index
      %c0_14 = arith.constant 0 : index
      %45 = vector.load %arg4[%44, %c0_13, %c0_14] : memref<8x2x16xbf16, #tpu.memory_space<vmem>>, vector<1x2x16xbf16>
      %46 = vector.shape_cast %45 : vector<1x2x16xbf16> to vector<2x16xbf16>
      %47 = vector.shape_cast %43 : vector<2x16xbf16> to vector<1x2x16xbf16>
      tpu.vector_store %arg4[%44, %c0_13, %c0_14], %47 {strides = array<i32>} : memref<8x2x16xbf16, #tpu.memory_space<vmem>>, vector<1x2x16xbf16>,
      %48 = vector.shape_cast %38 : vector<2x1xi1> to vector<2x1xi1>
      %49 = vector.broadcast %48 : vector<2x1xi1> to vector<2x16xi1>
      %50 = arith.select %49, %35, %arg7 : vector<2x16xi1>, vector<2x16xf32>
      %51 = vector.shape_cast %38 : vector<2x1xi1> to vector<2x1xi1>
      %52 = vector.broadcast %51 : vector<2x1xi1> to vector<2x16xi1>
      %53 = arith.select %52, %33, %arg8 : vector<2x16xi1>, vector<2x16xf32>
      scf.yield %50, %53 : vector<2x16xf32>, vector<2x16xf32>
    }
    %c8_i32_0 = arith.constant 8 : i32
    %c0 = arith.constant 0 : index
    %c0_1 = arith.constant 0 : index
    %3 = vector.load %arg5[%c0, %c0_1] : memref<2x16xf32, #tpu.memory_space<vmem>>, vector<2x16xf32>
    tpu.vector_store %arg5[%c0, %c0_1], %2#0 {strides = array<i32>} : memref<2x16xf32, #tpu.memory_space<vmem>>, vector<2x16xf32>,
    return
  }
  func.func @transform_0(%arg0: i32) -> (i32, i32, i32) {
    %c0_i32 = arith.constant 0 : i32
    %c0_i32_0 = arith.constant 0 : i32
    %c0_i32_1 = arith.constant 0 : i32
    return %c0_i32, %arg0, %c0_i32_0 : i32, i32, i32
  }
  func.func @transform_1(%arg0: i32) -> (i32, i32) {
    %c0_i32 = arith.constant 0 : i32
    %c0_i32_0 = arith.constant 0 : i32
    %c0_i32_1 = arith.constant 0 : i32
    return %c0_i32, %c0_i32_0 : i32, i32
  }
  func.func @transform_2(%arg0: i32) -> (i32, i32) {
    %c0_i32 = arith.constant 0 : i32
    %c0_i32_0 = arith.constant 0 : i32
    return %arg0, %c0_i32 : i32, i32
  }
  func.func @transform_3(%arg0: i32) -> (i32, i32, i32) {
    %c0_i32 = arith.constant 0 : i32
    %c0_i32_0 = arith.constant 0 : i32
    %c0_i32_1 = arith.constant 0 : i32
    return %c0_i32, %arg0, %c0_i32_0 : i32, i32, i32
  }
  func.func @transform_4(%arg0: i32) -> (i32, i32) {
    %c0_i32 = arith.constant 0 : i32
    %c0_i32_0 = arith.constant 0 : i32
    return %arg0, %c0_i32 : i32, i32
  }
}

module attributes {stable_mosaic.version = 11 : i64} {
  func.func @_lstm_kernel(%arg0: i32, %arg1: memref<8x2x64xf32, #tpu.memory_space<vmem>>, %arg2: memref<16x64xbf16, #tpu.memory_space<vmem>>, %arg3: memref<2x1xi32, #tpu.memory_space<vmem>>, %arg4: memref<8x2x16xbf16, #tpu.memory_space<vmem>>, %arg5: memref<2x16xf32, #tpu.memory_space<vmem>>) attributes {dimension_semantics = [#tpu.dimension_semantics<parallel>], iteration_bounds = array<i64: 1>, scalar_prefetch = 0 : i64, scratch_operands = 0 : i64, tpu.core_type = #tpu.core_type<tc>, window_params = [{transform_indices = @transform_0, window_bounds = array<i64: 8, 2, 64>}, {pipeline_mode = #tpu.pipeline_mode<synchronous>, transform_indices = @transform_1, window_bounds = array<i64: 16, 64>}, {transform_indices = @transform_2, window_bounds = array<i64: 2, 1>}, {transform_indices = @transform_3, window_bounds = array<i64: 8, 2, 16>}, {transform_indices = @transform_4, window_bounds = array<i64: 2, 16>}]} {
    %cst = arith.constant 0.000000e+00 : f32
    %0 = vector.broadcast %cst : f32 to vector<2x16xf32>
    %c0_i32 = arith.constant 0 : i32
    %c8_i32 = arith.constant 8 : i32
    %1 = arith.addi %c0_i32, %c8_i32 : i32
    %c1_i32 = arith.constant 1 : i32
    %2:2 = scf.for %arg6 = %c0_i32 to %1 step %c1_i32 iter_args(%arg7 = %0, %arg8 = %0) -> (vector<2x16xf32>, vector<2x16xf32>)  : i32 {
      %c7_i32 = arith.constant 7 : i32
      %4 = arith.subi %c7_i32, %arg6 : i32
      %5 = arith.index_cast %4 : i32 to index
      %c0_2 = arith.constant 0 : index
      %c0_3 = arith.constant 0 : index
      %6 = vector.load %arg1[%5, %c0_2, %c0_3] : memref<8x2x64xf32, #tpu.memory_space<vmem>>, vector<1x2x64xf32>
      %7 = vector.shape_cast %6 : vector<1x2x64xf32> to vector<2x64xf32>
      %8 = arith.truncf %arg7 : vector<2x16xf32> to vector<2x16xbf16>
      %c0_4 = arith.constant 0 : index
      %c0_5 = arith.constant 0 : index
      %9 = vector.load %arg2[%c0_4, %c0_5] : memref<16x64xbf16, #tpu.memory_space<vmem>>, vector<16x64xbf16>
      %cst_6 = arith.constant dense<0.000000e+00> : vector<2x64xf32>
      %10 = tpu.matmul %8, %9, %cst_6 {dimension_numbers = #tpu.dot_dimension_numbers<[1], [0], [0], [1], [0, 0, 1, 1], [], []>} : vector<2x16xbf16>, vector<16x64xbf16>, vector<2x64xf32> -> vector<2x64xf32>
      %11 = arith.addf %7, %10 : vector<2x64xf32>
      %12 = vector.extract_strided_slice %11 {offsets = [0, 0], sizes = [2, 16], strides = [1, 1]} : vector<2x64xf32> to vector<2x16xf32>
      %13 = arith.negf %12 : vector<2x16xf32>
      %14 = math.exp %13 : vector<2x16xf32>
      %cst_7 = arith.constant 1.000000e+00 : f32
      %15 = vector.broadcast %cst_7 : f32 to vector<2x16xf32>
      %16 = arith.addf %15, %14 : vector<2x16xf32>
      %17 = arith.divf %15, %16 : vector<2x16xf32>
      %18 = vector.extract_strided_slice %11 {offsets = [0, 16], sizes = [2, 16], strides = [1, 1]} : vector<2x64xf32> to vector<2x16xf32>
      %19 = arith.negf %18 : vector<2x16xf32>
      %20 = math.exp %19 : vector<2x16xf32>
      %cst_8 = arith.constant 1.000000e+00 : f32
      %21 = vector.broadcast %cst_8 : f32 to vector<2x16xf32>
      %22 = arith.addf %21, %20 : vector<2x16xf32>
      %23 = arith.divf %21, %22 : vector<2x16xf32>
      %24 = vector.extract_strided_slice %11 {offsets = [0, 32], sizes = [2, 16], strides = [1, 1]} : vector<2x64xf32> to vector<2x16xf32>
      %25 = math.tanh %24 : vector<2x16xf32>
      %26 = vector.extract_strided_slice %11 {offsets = [0, 48], sizes = [2, 16], strides = [1, 1]} : vector<2x64xf32> to vector<2x16xf32>
      %27 = arith.negf %26 : vector<2x16xf32>
      %28 = math.exp %27 : vector<2x16xf32>
      %cst_9 = arith.constant 1.000000e+00 : f32
      %29 = vector.broadcast %cst_9 : f32 to vector<2x16xf32>
      %30 = arith.addf %29, %28 : vector<2x16xf32>
      %31 = arith.divf %29, %30 : vector<2x16xf32>
      %32 = arith.mulf %23, %arg8 : vector<2x16xf32>
      %33 = arith.mulf %17, %25 : vector<2x16xf32>
      %34 = arith.addf %32, %33 : vector<2x16xf32>
      %35 = math.tanh %34 : vector<2x16xf32>
      %36 = arith.mulf %31, %35 : vector<2x16xf32>
      %c0_10 = arith.constant 0 : index
      %c0_11 = arith.constant 0 : index
      %37 = vector.load %arg3[%c0_10, %c0_11] : memref<2x1xi32, #tpu.memory_space<vmem>>, vector<2x1xi32>
      %38 = vector.broadcast %4 : i32 to vector<2x1xi32>
      %39 = arith.cmpi slt, %38, %37 : vector<2x1xi32>
      %cst_12 = arith.constant 0.000000e+00 : f32
      %40 = vector.shape_cast %39 : vector<2x1xi1> to vector<2x1xi1>
      %41 = vector.broadcast %40 : vector<2x1xi1> to vector<2x16xi1>
      %42 = vector.broadcast %cst_12 : f32 to vector<2x16xf32>
      %43 = arith.select %41, %36, %42 : vector<2x16xi1>, vector<2x16xf32>
      %44 = arith.truncf %43 : vector<2x16xf32> to vector<2x16xbf16>
      %45 = arith.index_cast %4 : i32 to index
      %c0_13 = arith.constant 0 : index
      %c0_14 = arith.constant 0 : index
      %46 = vector.load %arg4[%45, %c0_13, %c0_14] : memref<8x2x16xbf16, #tpu.memory_space<vmem>>, vector<1x2x16xbf16>
      %47 = vector.shape_cast %46 : vector<1x2x16xbf16> to vector<2x16xbf16>
      %48 = vector.shape_cast %44 : vector<2x16xbf16> to vector<1x2x16xbf16>
      tpu.vector_store %arg4[%45, %c0_13, %c0_14], %48 {strides = array<i32>} : memref<8x2x16xbf16, #tpu.memory_space<vmem>>, vector<1x2x16xbf16>,
      %49 = vector.shape_cast %39 : vector<2x1xi1> to vector<2x1xi1>
      %50 = vector.broadcast %49 : vector<2x1xi1> to vector<2x16xi1>
      %51 = arith.select %50, %36, %arg7 : vector<2x16xi1>, vector<2x16xf32>
      %52 = vector.shape_cast %39 : vector<2x1xi1> to vector<2x1xi1>
      %53 = vector.broadcast %52 : vector<2x1xi1> to vector<2x16xi1>
      %54 = arith.select %53, %34, %arg8 : vector<2x16xi1>, vector<2x16xf32>
      scf.yield %51, %54 : vector<2x16xf32>, vector<2x16xf32>
    }
    %c8_i32_0 = arith.constant 8 : i32
    %c0 = arith.constant 0 : index
    %c0_1 = arith.constant 0 : index
    %3 = vector.load %arg5[%c0, %c0_1] : memref<2x16xf32, #tpu.memory_space<vmem>>, vector<2x16xf32>
    tpu.vector_store %arg5[%c0, %c0_1], %2#0 {strides = array<i32>} : memref<2x16xf32, #tpu.memory_space<vmem>>, vector<2x16xf32>,
    return
  }
  func.func @transform_0(%arg0: i32) -> (i32, i32, i32) {
    %c0_i32 = arith.constant 0 : i32
    %c0_i32_0 = arith.constant 0 : i32
    %c0_i32_1 = arith.constant 0 : i32
    return %c0_i32, %arg0, %c0_i32_0 : i32, i32, i32
  }
  func.func @transform_1(%arg0: i32) -> (i32, i32) {
    %c0_i32 = arith.constant 0 : i32
    %c0_i32_0 = arith.constant 0 : i32
    %c0_i32_1 = arith.constant 0 : i32
    return %c0_i32, %c0_i32_0 : i32, i32
  }
  func.func @transform_2(%arg0: i32) -> (i32, i32) {
    %c0_i32 = arith.constant 0 : i32
    %c0_i32_0 = arith.constant 0 : i32
    return %arg0, %c0_i32 : i32, i32
  }
  func.func @transform_3(%arg0: i32) -> (i32, i32, i32) {
    %c0_i32 = arith.constant 0 : i32
    %c0_i32_0 = arith.constant 0 : i32
    %c0_i32_1 = arith.constant 0 : i32
    return %c0_i32, %arg0, %c0_i32_0 : i32, i32, i32
  }
  func.func @transform_4(%arg0: i32) -> (i32, i32) {
    %c0_i32 = arith.constant 0 : i32
    %c0_i32_0 = arith.constant 0 : i32
    return %arg0, %c0_i32 : i32, i32
  }
}

module attributes {stable_mosaic.version = 11 : i64} {
  func.func @_matmul_small_kernel(%arg0: memref<2x128xbf16, #tpu.memory_space<vmem>>, %arg1: memref<128x128xbf16, #tpu.memory_space<vmem>>, %arg2: memref<1x128xf32, #tpu.memory_space<vmem>>, %arg3: memref<2x128xf32, #tpu.memory_space<vmem>>) attributes {dimension_semantics = [], scalar_prefetch = 0 : i64, scratch_operands = 0 : i64, tpu.core_type = #tpu.core_type<tc>} {
    %c0 = arith.constant 0 : index
    %c0_0 = arith.constant 0 : index
    %0 = vector.load %arg0[%c0, %c0_0] : memref<2x128xbf16, #tpu.memory_space<vmem>>, vector<2x128xbf16>
    %c0_1 = arith.constant 0 : index
    %c0_2 = arith.constant 0 : index
    %1 = vector.load %arg1[%c0_1, %c0_2] : memref<128x128xbf16, #tpu.memory_space<vmem>>, vector<128x128xbf16>
    %cst = arith.constant dense<0.000000e+00> : vector<2x128xf32>
    %2 = tpu.matmul %0, %1, %cst {dimension_numbers = #tpu.dot_dimension_numbers<[1], [0], [0], [1], [0, 0, 1, 1], [], []>} : vector<2x128xbf16>, vector<128x128xbf16>, vector<2x128xf32> -> vector<2x128xf32>
    %c0_3 = arith.constant 0 : index
    %c0_4 = arith.constant 0 : index
    %3 = vector.load %arg2[%c0_3, %c0_4] : memref<1x128xf32, #tpu.memory_space<vmem>>, vector<1x128xf32>
    %4 = vector.broadcast %3 : vector<1x128xf32> to vector<2x128xf32>
    %5 = arith.addf %2, %4 : vector<2x128xf32>
    %c0_5 = arith.constant 0 : index
    %c0_6 = arith.constant 0 : index
    %6 = vector.load %arg3[%c0_5, %c0_6] : memref<2x128xf32, #tpu.memory_space<vmem>>, vector<2x128xf32>
    tpu.vector_store %arg3[%c0_5, %c0_6], %5 {strides = array<i32>} : memref<2x128xf32, #tpu.memory_space<vmem>>, vector<2x128xf32>,
    return
  }
}

module attributes {stable_mosaic.version = 11 : i64} {
  func.func @_conv3x3_kernel(%arg0: i32, %arg1: i32, %arg2: memref<1x80x1024xbf16, #tpu.memory_space<vmem>>, %arg3: memref<9x1024x128xbf16, #tpu.memory_space<vmem>>, %arg4: memref<1x128xf32, #tpu.memory_space<vmem>>, %arg5: memref<48x1xf32, #tpu.memory_space<vmem>>, %arg6: memref<1x80x128xbf16, #tpu.memory_space<vmem>>) attributes {dimension_semantics = [#tpu.dimension_semantics<parallel>, #tpu.dimension_semantics<parallel>], iteration_bounds = array<i64: 1, 2>, scalar_prefetch = 0 : i64, scratch_operands = 0 : i64, tpu.core_type = #tpu.core_type<tc>, window_params = [{transform_indices = @transform_0, window_bounds = array<i64: 1, 80, 1024>}, {transform_indices = @transform_1, window_bounds = array<i64: 9, 1024, 128>}, {transform_indices = @transform_2, window_bounds = array<i64: 1, 128>}, {pipeline_mode = #tpu.pipeline_mode<synchronous>, transform_indices = @transform_3, window_bounds = array<i64: 48, 1>}, {transform_indices = @transform_4, window_bounds = array<i64: 1, 80, 128>}]} {
    %cst = arith.constant 0.000000e+00 : f32
    %0 = vector.broadcast %cst : f32 to vector<48x128xf32>
    %c0 = arith.constant 0 : index
    %c7 = arith.constant 7 : index
    %c0_0 = arith.constant 0 : index
    %1 = vector.load %arg2[%c0, %c7, %c0_0] : memref<1x80x1024xbf16, #tpu.memory_space<vmem>>, vector<1x48x1024xbf16>
    %2 = vector.shape_cast %1 : vector<1x48x1024xbf16> to vector<48x1024xbf16>
    %c0_1 = arith.constant 0 : index
    %c0_2 = arith.constant 0 : index
    %c0_3 = arith.constant 0 : index
    %3 = vector.load %arg3[%c0_1, %c0_2, %c0_3] : memref<9x1024x128xbf16, #tpu.memory_space<vmem>>, vector<1x1024x128xbf16>
    %4 = vector.shape_cast %3 : vector<1x1024x128xbf16> to vector<1024x128xbf16>
    %cst_4 = arith.constant dense<0.000000e+00> : vector<48x128xf32>
    %5 = tpu.matmul %2, %4, %cst_4 {dimension_numbers = #tpu.dot_dimension_numbers<[1], [0], [0], [1], [0, 0, 1, 1], [], []>} : vector<48x1024xbf16>, vector<1024x128xbf16>, vector<48x128xf32> -> vector<48x128xf32>
    %6 = arith.addf %0, %5 : vector<48x128xf32>
    %c0_5 = arith.constant 0 : index
    %c8 = arith.constant 8 : index
    %c0_6 = arith.constant 0 : index
    %7 = vector.load %arg2[%c0_5, %c8, %c0_6] : memref<1x80x1024xbf16, #tpu.memory_space<vmem>>, vector<1x48x1024xbf16>
    %8 = vector.shape_cast %7 : vector<1x48x1024xbf16> to vector<48x1024xbf16>
    %c1 = arith.constant 1 : index
    %c0_7 = arith.constant 0 : index
    %c0_8 = arith.constant 0 : index
    %9 = vector.load %arg3[%c1, %c0_7, %c0_8] : memref<9x1024x128xbf16, #tpu.memory_space<vmem>>, vector<1x1024x128xbf16>
    %10 = vector.shape_cast %9 : vector<1x1024x128xbf16> to vector<1024x128xbf16>
    %cst_9 = arith.constant dense<0.000000e+00> : vector<48x128xf32>
    %11 = tpu.matmul %8, %10, %cst_9 {dimension_numbers = #tpu.dot_dimension_numbers<[1], [0], [0], [1], [0, 0, 1, 1], [], []>} : vector<48x1024xbf16>, vector<1024x128xbf16>, vector<48x128xf32> -> vector<48x128xf32>
    %12 = arith.addf %6, %11 : vector<48x128xf32>
    %c0_10 = arith.constant 0 : index
    %c9 = arith.constant 9 : index
    %c0_11 = arith.constant 0 : index
    %13 = vector.load %arg2[%c0_10, %c9, %c0_11] : memref<1x80x1024xbf16, #tpu.memory_space<vmem>>, vector<1x48x1024xbf16>
    %14 = vector.shape_cast %13 : vector<1x48x1024xbf16> to vector<48x1024xbf16>
    %c2 = arith.constant 2 : index
    %c0_12 = arith.constant 0 : index
    %c0_13 = arith.constant 0 : index
    %15 = vector.load %arg3[%c2, %c0_12, %c0_13] : memref<9x1024x128xbf16, #tpu.memory_space<vmem>>, vector<1x1024x128xbf16>
    %16 = vector.shape_cast %15 : vector<1x1024x128xbf16> to vector<1024x128xbf16>
    %cst_14 = arith.constant dense<0.000000e+00> : vector<48x128xf32>
    %17 = tpu.matmul %14, %16, %cst_14 {dimension_numbers = #tpu.dot_dimension_numbers<[1], [0], [0], [1], [0, 0, 1, 1], [], []>} : vector<48x1024xbf16>, vector<1024x128xbf16>, vector<48x128xf32> -> vector<48x128xf32>
    %18 = arith.addf %12, %17 : vector<48x128xf32>
    %c0_15 = arith.constant 0 : index
    %c15 = arith.constant 15 : index
    %c0_16 = arith.constant 0 : index
    %19 = vector.load %arg2[%c0_15, %c15, %c0_16] : memref<1x80x1024xbf16, #tpu.memory_space<vmem>>, vector<1x48x1024xbf16>
    %20 = vector.shape_cast %19 : vector<1x48x1024xbf16> to vector<48x1024xbf16>
    %c3 = arith.constant 3 : index
    %c0_17 = arith.constant 0 : index
    %c0_18 = arith.constant 0 : index
    %21 = vector.load %arg3[%c3, %c0_17, %c0_18] : memref<9x1024x128xbf16, #tpu.memory_space<vmem>>, vector<1x1024x128xbf16>
    %22 = vector.shape_cast %21 : vector<1x1024x128xbf16> to vector<1024x128xbf16>
    %cst_19 = arith.constant dense<0.000000e+00> : vector<48x128xf32>
    %23 = tpu.matmul %20, %22, %cst_19 {dimension_numbers = #tpu.dot_dimension_numbers<[1], [0], [0], [1], [0, 0, 1, 1], [], []>} : vector<48x1024xbf16>, vector<1024x128xbf16>, vector<48x128xf32> -> vector<48x128xf32>
    %24 = arith.addf %18, %23 : vector<48x128xf32>
    %c0_20 = arith.constant 0 : index
    %c16 = arith.constant 16 : index
    %c0_21 = arith.constant 0 : index
    %25 = vector.load %arg2[%c0_20, %c16, %c0_21] : memref<1x80x1024xbf16, #tpu.memory_space<vmem>>, vector<1x48x1024xbf16>
    %26 = vector.shape_cast %25 : vector<1x48x1024xbf16> to vector<48x1024xbf16>
    %c4 = arith.constant 4 : index
    %c0_22 = arith.constant 0 : index
    %c0_23 = arith.constant 0 : index
    %27 = vector.load %arg3[%c4, %c0_22, %c0_23] : memref<9x1024x128xbf16, #tpu.memory_space<vmem>>, vector<1x1024x128xbf16>
    %28 = vector.shape_cast %27 : vector<1x1024x128xbf16> to vector<1024x128xbf16>
    %cst_24 = arith.constant dense<0.000000e+00> : vector<48x128xf32>
    %29 = tpu.matmul %26, %28, %cst_24 {dimension_numbers = #tpu.dot_dimension_numbers<[1], [0], [0], [1], [0, 0, 1, 1], [], []>} : vector<48x1024xbf16>, vector<1024x128xbf16>, vector<48x128xf32> -> vector<48x128xf32>
    %30 = arith.addf %24, %29 : vector<48x128xf32>
    %c0_25 = arith.constant 0 : index
    %c17 = arith.constant 17 : index
    %c0_26 = arith.constant 0 : index
    %31 = vector.load %arg2[%c0_25, %c17, %c0_26] : memref<1x80x1024xbf16, #tpu.memory_space<vmem>>, vector<1x48x1024xbf16>
    %32 = vector.shape_cast %31 : vector<1x48x1024xbf16> to vector<48x1024xbf16>
    %c5 = arith.constant 5 : index
    %c0_27 = arith.constant 0 : index
    %c0_28 = arith.constant 0 : index
    %33 = vector.load %arg3[%c5, %c0_27, %c0_28] : memref<9x1024x128xbf16, #tpu.memory_space<vmem>>, vector<1x1024x128xbf16>
    %34 = vector.shape_cast %33 : vector<1x1024x128xbf16> to vector<1024x128xbf16>
    %cst_29 = arith.constant dense<0.000000e+00> : vector<48x128xf32>
    %35 = tpu.matmul %32, %34, %cst_29 {dimension_numbers = #tpu.dot_dimension_numbers<[1], [0], [0], [1], [0, 0, 1, 1], [], []>} : vector<48x1024xbf16>, vector<1024x128xbf16>, vector<48x128xf32> -> vector<48x128xf32>
    %36 = arith.addf %30, %35 : vector<48x128xf32>
    %c0_30 = arith.constant 0 : index
    %c23 = arith.constant 23 : index
    %c0_31 = arith.constant 0 : index
    %37 = vector.load %arg2[%c0_30, %c23, %c0_31] : memref<1x80x1024xbf16, #tpu.memory_space<vmem>>, vector<1x48x1024xbf16>
    %38 = vector.shape_cast %37 : vector<1x48x1024xbf16> to vector<48x1024xbf16>
    %c6 = arith.constant 6 : index
    %c0_32 = arith.constant 0 : index
    %c0_33 = arith.constant 0 : index
    %39 = vector.load %arg3[%c6, %c0_32, %c0_33] : memref<9x1024x128xbf16, #tpu.memory_space<vmem>>, vector<1x1024x128xbf16>
    %40 = vector.shape_cast %39 : vector<1x1024x128xbf16> to vector<1024x128xbf16>
    %cst_34 = arith.constant dense<0.000000e+00> : vector<48x128xf32>
    %41 = tpu.matmul %38, %40, %cst_34 {dimension_numbers = #tpu.dot_dimension_numbers<[1], [0], [0], [1], [0, 0, 1, 1], [], []>} : vector<48x1024xbf16>, vector<1024x128xbf16>, vector<48x128xf32> -> vector<48x128xf32>
    %42 = arith.addf %36, %41 : vector<48x128xf32>
    %c0_35 = arith.constant 0 : index
    %c24 = arith.constant 24 : index
    %c0_36 = arith.constant 0 : index
    %43 = vector.load %arg2[%c0_35, %c24, %c0_36] : memref<1x80x1024xbf16, #tpu.memory_space<vmem>>, vector<1x48x1024xbf16>
    %44 = vector.shape_cast %43 : vector<1x48x1024xbf16> to vector<48x1024xbf16>
    %c7_37 = arith.constant 7 : index
    %c0_38 = arith.constant 0 : index
    %c0_39 = arith.constant 0 : index
    %45 = vector.load %arg3[%c7_37, %c0_38, %c0_39] : memref<9x1024x128xbf16, #tpu.memory_space<vmem>>, vector<1x1024x128xbf16>
    %46 = vector.shape_cast %45 : vector<1x1024x128xbf16> to vector<1024x128xbf16>
    %cst_40 = arith.constant dense<0.000000e+00> : vector<48x128xf32>
    %47 = tpu.matmul %44, %46, %cst_40 {dimension_numbers = #tpu.dot_dimension_numbers<[1], [0], [0], [1], [0, 0, 1, 1], [], []>} : vector<48x1024xbf16>, vector<1024x128xbf16>, vector<48x128xf32> -> vector<48x128xf32>
    %48 = arith.addf %42, %47 : vector<48x128xf32>
    %c0_41 = arith.constant 0 : index
    %c25 = arith.constant 25 : index
    %c0_42 = arith.constant 0 : index
    %49 = vector.load %arg2[%c0_41, %c25, %c0_42] : memref<1x80x1024xbf16, #tpu.memory_space<vmem>>, vector<1x48x1024xbf16>
    %50 = vector.shape_cast %49 : vector<1x48x1024xbf16> to vector<48x1024xbf16>
    %c8_43 = arith.constant 8 : index
    %c0_44 = arith.constant 0 : index
    %c0_45 = arith.constant 0 : index
    %51 = vector.load %arg3[%c8_43, %c0_44, %c0_45] : memref<9x1024x128xbf16, #tpu.memory_space<vmem>>, vector<1x1024x128xbf16>
    %52 = vector.shape_cast %51 : vector<1x1024x128xbf16> to vector<1024x128xbf16>
    %cst_46 = arith.constant dense<0.000000e+00> : vector<48x128xf32>
    %53 = tpu.matmul %50, %52, %cst_46 {dimension_numbers = #tpu.dot_dimension_numbers<[1], [0], [0], [1], [0, 0, 1, 1], [], []>} : vector<48x1024xbf16>, vector<1024x128xbf16>, vector<48x128xf32> -> vector<48x128xf32>
    %54 = arith.addf %48, %53 : vector<48x128xf32>
    %c0_47 = arith.constant 0 : index
    %c0_48 = arith.constant 0 : index
    %55 = vector.load %arg4[%c0_47, %c0_48] : memref<1x128xf32, #tpu.memory_space<vmem>>, vector<1x128xf32>
    %56 = vector.broadcast %55 : vector<1x128xf32> to vector<48x128xf32>
    %57 = arith.addf %54, %56 : vector<48x128xf32>
    %cst_49 = arith.constant 0.000000e+00 : f32
    %58 = vector.broadcast %cst_49 : f32 to vector<48x128xf32>
    %59 = arith.cmpf ogt, %57, %58 : vector<48x128xf32>
    %cst_50 = arith.constant 0.000000e+00 : f32
    %60 = vector.broadcast %cst_50 : f32 to vector<48x128xf32>
    %61 = arith.minimumf %57, %60 : vector<48x128xf32>
    %62 = math.exp %61 : vector<48x128xf32>
    %cst_51 = arith.constant 1.000000e+00 : f32
    %63 = vector.broadcast %cst_51 : f32 to vector<48x128xf32>
    %64 = arith.subf %62, %63 : vector<48x128xf32>
    %65 = arith.select %59, %57, %64 : vector<48x128xi1>, vector<48x128xf32>
    %c0_52 = arith.constant 0 : index
    %c0_53 = arith.constant 0 : index
    %66 = vector.load %arg5[%c0_52, %c0_53] : memref<48x1xf32, #tpu.memory_space<vmem>>, vector<48x1xf32>
    %67 = vector.broadcast %66 : vector<48x1xf32> to vector<48x128xf32>
    %68 = arith.mulf %65, %67 : vector<48x128xf32>
    %cst_54 = arith.constant 0.000000e+00 : bf16
    %69 = vector.broadcast %cst_54 : bf16 to vector<16x128xbf16>
    %c0_55 = arith.constant 0 : index
    %c0_56 = arith.constant 0 : index
    %c0_57 = arith.constant 0 : index
    %70 = vector.load %arg6[%c0_55, %c0_56, %c0_57] : memref<1x80x128xbf16, #tpu.memory_space<vmem>>, vector<1x16x128xbf16>
    %71 = vector.shape_cast %70 : vector<1x16x128xbf16> to vector<16x128xbf16>
    %72 = vector.shape_cast %69 : vector<16x128xbf16> to vector<1x16x128xbf16>
    tpu.vector_store %arg6[%c0_55, %c0_56, %c0_57], %72 {strides = array<i32>} : memref<1x80x128xbf16, #tpu.memory_space<vmem>>, vector<1x16x128xbf16>,
    %73 = arith.truncf %68 : vector<48x128xf32> to vector<48x128xbf16>
    %c0_58 = arith.constant 0 : index
    %c16_59 = arith.constant 16 : index
    %c0_60 = arith.constant 0 : index
    %74 = vector.load %arg6[%c0_58, %c16_59, %c0_60] : memref<1x80x128xbf16, #tpu.memory_space<vmem>>, vector<1x48x128xbf16>
    %75 = vector.shape_cast %74 : vector<1x48x128xbf16> to vector<48x128xbf16>
    %76 = vector.shape_cast %73 : vector<48x128xbf16> to vector<1x48x128xbf16>
    tpu.vector_store %arg6[%c0_58, %c16_59, %c0_60], %76 {strides = array<i32>} : memref<1x80x128xbf16, #tpu.memory_space<vmem>>, vector<1x48x128xbf16>,
    %c0_61 = arith.constant 0 : index
    %c64 = arith.constant 64 : index
    %c0_62 = arith.constant 0 : index
    %77 = vector.load %arg6[%c0_61, %c64, %c0_62] : memref<1x80x128xbf16, #tpu.memory_space<vmem>>, vector<1x16x128xbf16>
    %78 = vector.shape_cast %77 : vector<1x16x128xbf16> to vector<16x128xbf16>
    %79 = vector.shape_cast %69 : vector<16x128xbf16> to vector<1x16x128xbf16>
    tpu.vector_store %arg6[%c0_61, %c64, %c0_62], %79 {strides = array<i32>} : memref<1x80x128xbf16, #tpu.memory_space<vmem>>, vector<1x16x128xbf16>,
    return
  }
  func.func @transform_0(%arg0: i32, %arg1: i32) -> (i32, i32, i32) {
    %c0_i32 = arith.constant 0 : i32
    %c0_i32_0 = arith.constant 0 : i32
    %c0_i32_1 = arith.constant 0 : i32
    return %arg1, %c0_i32, %c0_i32_0 : i32, i32, i32
  }
  func.func @transform_1(%arg0: i32, %arg1: i32) -> (i32, i32, i32) {
    %c0_i32 = arith.constant 0 : i32
    %c0_i32_0 = arith.constant 0 : i32
    %c0_i32_1 = arith.constant 0 : i32
    return %c0_i32, %c0_i32_0, %arg0 : i32, i32, i32
  }
  func.func @transform_2(%arg0: i32, %arg1: i32) -> (i32, i32) {
    %c0_i32 = arith.constant 0 : i32
    %c0_i32_0 = arith.constant 0 : i32
    return %c0_i32, %arg0 : i32, i32
  }
  func.func @transform_3(%arg0: i32, %arg1: i32) -> (i32, i32) {
    %c0_i32 = arith.constant 0 : i32
    %c0_i32_0 = arith.constant 0 : i32
    %c0_i32_1 = arith.constant 0 : i32
    return %c0_i32, %c0_i32_0 : i32, i32
  }
  func.func @transform_4(%arg0: i32, %arg1: i32) -> (i32, i32, i32) {
    %c0_i32 = arith.constant 0 : i32
    %c0_i32_0 = arith.constant 0 : i32
    return %arg1, %c0_i32, %arg0 : i32, i32, i32
  }
}

module attributes {stable_mosaic.version = 11 : i64} {
  func.func @_conv3x3_kernel(%arg0: i32, %arg1: i32, %arg2: memref<1x80x128xbf16, #tpu.memory_space<vmem>>, %arg3: memref<9x128x128xbf16, #tpu.memory_space<vmem>>, %arg4: memref<1x128xf32, #tpu.memory_space<vmem>>, %arg5: memref<48x1xf32, #tpu.memory_space<vmem>>, %arg6: memref<1x80x128xbf16, #tpu.memory_space<vmem>>) attributes {dimension_semantics = [#tpu.dimension_semantics<parallel>, #tpu.dimension_semantics<parallel>], iteration_bounds = array<i64: 1, 2>, scalar_prefetch = 0 : i64, scratch_operands = 0 : i64, tpu.core_type = #tpu.core_type<tc>, window_params = [{transform_indices = @transform_0, window_bounds = array<i64: 1, 80, 128>}, {transform_indices = @transform_1, window_bounds = array<i64: 9, 128, 128>}, {transform_indices = @transform_2, window_bounds = array<i64: 1, 128>}, {pipeline_mode = #tpu.pipeline_mode<synchronous>, transform_indices = @transform_3, window_bounds = array<i64: 48, 1>}, {transform_indices = @transform_4, window_bounds = array<i64: 1, 80, 128>}]} {
    %cst = arith.constant 0.000000e+00 : f32
    %0 = vector.broadcast %cst : f32 to vector<48x128xf32>
    %c0 = arith.constant 0 : index
    %c7 = arith.constant 7 : index
    %c0_0 = arith.constant 0 : index
    %1 = vector.load %arg2[%c0, %c7, %c0_0] : memref<1x80x128xbf16, #tpu.memory_space<vmem>>, vector<1x48x128xbf16>
    %2 = vector.shape_cast %1 : vector<1x48x128xbf16> to vector<48x128xbf16>
    %c0_1 = arith.constant 0 : index
    %c0_2 = arith.constant 0 : index
    %c0_3 = arith.constant 0 : index
    %3 = vector.load %arg3[%c0_1, %c0_2, %c0_3] : memref<9x128x128xbf16, #tpu.memory_space<vmem>>, vector<1x128x128xbf16>
    %4 = vector.shape_cast %3 : vector<1x128x128xbf16> to vector<128x128xbf16>
    %cst_4 = arith.constant dense<0.000000e+00> : vector<48x128xf32>
    %5 = tpu.matmul %2, %4, %cst_4 {dimension_numbers = #tpu.dot_dimension_numbers<[1], [0], [0], [1], [0, 0, 1, 1], [], []>} : vector<48x128xbf16>, vector<128x128xbf16>, vector<48x128xf32> -> vector<48x128xf32>
    %6 = arith.addf %0, %5 : vector<48x128xf32>
    %c0_5 = arith.constant 0 : index
    %c8 = arith.constant 8 : index
    %c0_6 = arith.constant 0 : index
    %7 = vector.load %arg2[%c0_5, %c8, %c0_6] : memref<1x80x128xbf16, #tpu.memory_space<vmem>>, vector<1x48x128xbf16>
    %8 = vector.shape_cast %7 : vector<1x48x128xbf16> to vector<48x128xbf16>
    %c1 = arith.constant 1 : index
    %c0_7 = arith.constant 0 : index
    %c0_8 = arith.constant 0 : index
    %9 = vector.load %arg3[%c1, %c0_7, %c0_8] : memref<9x128x128xbf16, #tpu.memory_space<vmem>>, vector<1x128x128xbf16>
    %10 = vector.shape_cast %9 : vector<1x128x128xbf16> to vector<128x128xbf16>
    %cst_9 = arith.constant dense<0.000000e+00> : vector<48x128xf32>
    %11 = tpu.matmul %8, %10, %cst_9 {dimension_numbers = #tpu.dot_dimension_numbers<[1], [0], [0], [1], [0, 0, 1, 1], [], []>} : vector<48x128xbf16>, vector<128x128xbf16>, vector<48x128xf32> -> vector<48x128xf32>
    %12 = arith.addf %6, %11 : vector<48x128xf32>
    %c0_10 = arith.constant 0 : index
    %c9 = arith.constant 9 : index
    %c0_11 = arith.constant 0 : index
    %13 = vector.load %arg2[%c0_10, %c9, %c0_11] : memref<1x80x128xbf16, #tpu.memory_space<vmem>>, vector<1x48x128xbf16>
    %14 = vector.shape_cast %13 : vector<1x48x128xbf16> to vector<48x128xbf16>
    %c2 = arith.constant 2 : index
    %c0_12 = arith.constant 0 : index
    %c0_13 = arith.constant 0 : index
    %15 = vector.load %arg3[%c2, %c0_12, %c0_13] : memref<9x128x128xbf16, #tpu.memory_space<vmem>>, vector<1x128x128xbf16>
    %16 = vector.shape_cast %15 : vector<1x128x128xbf16> to vector<128x128xbf16>
    %cst_14 = arith.constant dense<0.000000e+00> : vector<48x128xf32>
    %17 = tpu.matmul %14, %16, %cst_14 {dimension_numbers = #tpu.dot_dimension_numbers<[1], [0], [0], [1], [0, 0, 1, 1], [], []>} : vector<48x128xbf16>, vector<128x128xbf16>, vector<48x128xf32> -> vector<48x128xf32>
    %18 = arith.addf %12, %17 : vector<48x128xf32>
    %c0_15 = arith.constant 0 : index
    %c15 = arith.constant 15 : index
    %c0_16 = arith.constant 0 : index
    %19 = vector.load %arg2[%c0_15, %c15, %c0_16] : memref<1x80x128xbf16, #tpu.memory_space<vmem>>, vector<1x48x128xbf16>
    %20 = vector.shape_cast %19 : vector<1x48x128xbf16> to vector<48x128xbf16>
    %c3 = arith.constant 3 : index
    %c0_17 = arith.constant 0 : index
    %c0_18 = arith.constant 0 : index
    %21 = vector.load %arg3[%c3, %c0_17, %c0_18] : memref<9x128x128xbf16, #tpu.memory_space<vmem>>, vector<1x128x128xbf16>
    %22 = vector.shape_cast %21 : vector<1x128x128xbf16> to vector<128x128xbf16>
    %cst_19 = arith.constant dense<0.000000e+00> : vector<48x128xf32>
    %23 = tpu.matmul %20, %22, %cst_19 {dimension_numbers = #tpu.dot_dimension_numbers<[1], [0], [0], [1], [0, 0, 1, 1], [], []>} : vector<48x128xbf16>, vector<128x128xbf16>, vector<48x128xf32> -> vector<48x128xf32>
    %24 = arith.addf %18, %23 : vector<48x128xf32>
    %c0_20 = arith.constant 0 : index
    %c16 = arith.constant 16 : index
    %c0_21 = arith.constant 0 : index
    %25 = vector.load %arg2[%c0_20, %c16, %c0_21] : memref<1x80x128xbf16, #tpu.memory_space<vmem>>, vector<1x48x128xbf16>
    %26 = vector.shape_cast %25 : vector<1x48x128xbf16> to vector<48x128xbf16>
    %c4 = arith.constant 4 : index
    %c0_22 = arith.constant 0 : index
    %c0_23 = arith.constant 0 : index
    %27 = vector.load %arg3[%c4, %c0_22, %c0_23] : memref<9x128x128xbf16, #tpu.memory_space<vmem>>, vector<1x128x128xbf16>
    %28 = vector.shape_cast %27 : vector<1x128x128xbf16> to vector<128x128xbf16>
    %cst_24 = arith.constant dense<0.000000e+00> : vector<48x128xf32>
    %29 = tpu.matmul %26, %28, %cst_24 {dimension_numbers = #tpu.dot_dimension_numbers<[1], [0], [0], [1], [0, 0, 1, 1], [], []>} : vector<48x128xbf16>, vector<128x128xbf16>, vector<48x128xf32> -> vector<48x128xf32>
    %30 = arith.addf %24, %29 : vector<48x128xf32>
    %c0_25 = arith.constant 0 : index
    %c17 = arith.constant 17 : index
    %c0_26 = arith.constant 0 : index
    %31 = vector.load %arg2[%c0_25, %c17, %c0_26] : memref<1x80x128xbf16, #tpu.memory_space<vmem>>, vector<1x48x128xbf16>
    %32 = vector.shape_cast %31 : vector<1x48x128xbf16> to vector<48x128xbf16>
    %c5 = arith.constant 5 : index
    %c0_27 = arith.constant 0 : index
    %c0_28 = arith.constant 0 : index
    %33 = vector.load %arg3[%c5, %c0_27, %c0_28] : memref<9x128x128xbf16, #tpu.memory_space<vmem>>, vector<1x128x128xbf16>
    %34 = vector.shape_cast %33 : vector<1x128x128xbf16> to vector<128x128xbf16>
    %cst_29 = arith.constant dense<0.000000e+00> : vector<48x128xf32>
    %35 = tpu.matmul %32, %34, %cst_29 {dimension_numbers = #tpu.dot_dimension_numbers<[1], [0], [0], [1], [0, 0, 1, 1], [], []>} : vector<48x128xbf16>, vector<128x128xbf16>, vector<48x128xf32> -> vector<48x128xf32>
    %36 = arith.addf %30, %35 : vector<48x128xf32>
    %c0_30 = arith.constant 0 : index
    %c23 = arith.constant 23 : index
    %c0_31 = arith.constant 0 : index
    %37 = vector.load %arg2[%c0_30, %c23, %c0_31] : memref<1x80x128xbf16, #tpu.memory_space<vmem>>, vector<1x48x128xbf16>
    %38 = vector.shape_cast %37 : vector<1x48x128xbf16> to vector<48x128xbf16>
    %c6 = arith.constant 6 : index
    %c0_32 = arith.constant 0 : index
    %c0_33 = arith.constant 0 : index
    %39 = vector.load %arg3[%c6, %c0_32, %c0_33] : memref<9x128x128xbf16, #tpu.memory_space<vmem>>, vector<1x128x128xbf16>
    %40 = vector.shape_cast %39 : vector<1x128x128xbf16> to vector<128x128xbf16>
    %cst_34 = arith.constant dense<0.000000e+00> : vector<48x128xf32>
    %41 = tpu.matmul %38, %40, %cst_34 {dimension_numbers = #tpu.dot_dimension_numbers<[1], [0], [0], [1], [0, 0, 1, 1], [], []>} : vector<48x128xbf16>, vector<128x128xbf16>, vector<48x128xf32> -> vector<48x128xf32>
    %42 = arith.addf %36, %41 : vector<48x128xf32>
    %c0_35 = arith.constant 0 : index
    %c24 = arith.constant 24 : index
    %c0_36 = arith.constant 0 : index
    %43 = vector.load %arg2[%c0_35, %c24, %c0_36] : memref<1x80x128xbf16, #tpu.memory_space<vmem>>, vector<1x48x128xbf16>
    %44 = vector.shape_cast %43 : vector<1x48x128xbf16> to vector<48x128xbf16>
    %c7_37 = arith.constant 7 : index
    %c0_38 = arith.constant 0 : index
    %c0_39 = arith.constant 0 : index
    %45 = vector.load %arg3[%c7_37, %c0_38, %c0_39] : memref<9x128x128xbf16, #tpu.memory_space<vmem>>, vector<1x128x128xbf16>
    %46 = vector.shape_cast %45 : vector<1x128x128xbf16> to vector<128x128xbf16>
    %cst_40 = arith.constant dense<0.000000e+00> : vector<48x128xf32>
    %47 = tpu.matmul %44, %46, %cst_40 {dimension_numbers = #tpu.dot_dimension_numbers<[1], [0], [0], [1], [0, 0, 1, 1], [], []>} : vector<48x128xbf16>, vector<128x128xbf16>, vector<48x128xf32> -> vector<48x128xf32>
    %48 = arith.addf %42, %47 : vector<48x128xf32>
    %c0_41 = arith.constant 0 : index
    %c25 = arith.constant 25 : index
    %c0_42 = arith.constant 0 : index
    %49 = vector.load %arg2[%c0_41, %c25, %c0_42] : memref<1x80x128xbf16, #tpu.memory_space<vmem>>, vector<1x48x128xbf16>
    %50 = vector.shape_cast %49 : vector<1x48x128xbf16> to vector<48x128xbf16>
    %c8_43 = arith.constant 8 : index
    %c0_44 = arith.constant 0 : index
    %c0_45 = arith.constant 0 : index
    %51 = vector.load %arg3[%c8_43, %c0_44, %c0_45] : memref<9x128x128xbf16, #tpu.memory_space<vmem>>, vector<1x128x128xbf16>
    %52 = vector.shape_cast %51 : vector<1x128x128xbf16> to vector<128x128xbf16>
    %cst_46 = arith.constant dense<0.000000e+00> : vector<48x128xf32>
    %53 = tpu.matmul %50, %52, %cst_46 {dimension_numbers = #tpu.dot_dimension_numbers<[1], [0], [0], [1], [0, 0, 1, 1], [], []>} : vector<48x128xbf16>, vector<128x128xbf16>, vector<48x128xf32> -> vector<48x128xf32>
    %54 = arith.addf %48, %53 : vector<48x128xf32>
    %c0_47 = arith.constant 0 : index
    %c0_48 = arith.constant 0 : index
    %55 = vector.load %arg4[%c0_47, %c0_48] : memref<1x128xf32, #tpu.memory_space<vmem>>, vector<1x128xf32>
    %56 = vector.broadcast %55 : vector<1x128xf32> to vector<48x128xf32>
    %57 = arith.addf %54, %56 : vector<48x128xf32>
    %cst_49 = arith.constant 0.000000e+00 : f32
    %58 = vector.broadcast %cst_49 : f32 to vector<48x128xf32>
    %59 = arith.cmpf ogt, %57, %58 : vector<48x128xf32>
    %cst_50 = arith.constant 0.000000e+00 : f32
    %60 = vector.broadcast %cst_50 : f32 to vector<48x128xf32>
    %61 = arith.minimumf %57, %60 : vector<48x128xf32>
    %62 = math.exp %61 : vector<48x128xf32>
    %cst_51 = arith.constant 1.000000e+00 : f32
    %63 = vector.broadcast %cst_51 : f32 to vector<48x128xf32>
    %64 = arith.subf %62, %63 : vector<48x128xf32>
    %65 = arith.select %59, %57, %64 : vector<48x128xi1>, vector<48x128xf32>
    %c0_52 = arith.constant 0 : index
    %c0_53 = arith.constant 0 : index
    %66 = vector.load %arg5[%c0_52, %c0_53] : memref<48x1xf32, #tpu.memory_space<vmem>>, vector<48x1xf32>
    %67 = vector.broadcast %66 : vector<48x1xf32> to vector<48x128xf32>
    %68 = arith.mulf %65, %67 : vector<48x128xf32>
    %cst_54 = arith.constant 0.000000e+00 : bf16
    %69 = vector.broadcast %cst_54 : bf16 to vector<16x128xbf16>
    %c0_55 = arith.constant 0 : index
    %c0_56 = arith.constant 0 : index
    %c0_57 = arith.constant 0 : index
    %70 = vector.load %arg6[%c0_55, %c0_56, %c0_57] : memref<1x80x128xbf16, #tpu.memory_space<vmem>>, vector<1x16x128xbf16>
    %71 = vector.shape_cast %70 : vector<1x16x128xbf16> to vector<16x128xbf16>
    %72 = vector.shape_cast %69 : vector<16x128xbf16> to vector<1x16x128xbf16>
    tpu.vector_store %arg6[%c0_55, %c0_56, %c0_57], %72 {strides = array<i32>} : memref<1x80x128xbf16, #tpu.memory_space<vmem>>, vector<1x16x128xbf16>,
    %73 = arith.truncf %68 : vector<48x128xf32> to vector<48x128xbf16>
    %c0_58 = arith.constant 0 : index
    %c16_59 = arith.constant 16 : index
    %c0_60 = arith.constant 0 : index
    %74 = vector.load %arg6[%c0_58, %c16_59, %c0_60] : memref<1x80x128xbf16, #tpu.memory_space<vmem>>, vector<1x48x128xbf16>
    %75 = vector.shape_cast %74 : vector<1x48x128xbf16> to vector<48x128xbf16>
    %76 = vector.shape_cast %73 : vector<48x128xbf16> to vector<1x48x128xbf16>
    tpu.vector_store %arg6[%c0_58, %c16_59, %c0_60], %76 {strides = array<i32>} : memref<1x80x128xbf16, #tpu.memory_space<vmem>>, vector<1x48x128xbf16>,
    %c0_61 = arith.constant 0 : index
    %c64 = arith.constant 64 : index
    %c0_62 = arith.constant 0 : index
    %77 = vector.load %arg6[%c0_61, %c64, %c0_62] : memref<1x80x128xbf16, #tpu.memory_space<vmem>>, vector<1x16x128xbf16>
    %78 = vector.shape_cast %77 : vector<1x16x128xbf16> to vector<16x128xbf16>
    %79 = vector.shape_cast %69 : vector<16x128xbf16> to vector<1x16x128xbf16>
    tpu.vector_store %arg6[%c0_61, %c64, %c0_62], %79 {strides = array<i32>} : memref<1x80x128xbf16, #tpu.memory_space<vmem>>, vector<1x16x128xbf16>,
    return
  }
  func.func @transform_0(%arg0: i32, %arg1: i32) -> (i32, i32, i32) {
    %c0_i32 = arith.constant 0 : i32
    %c0_i32_0 = arith.constant 0 : i32
    %c0_i32_1 = arith.constant 0 : i32
    return %arg1, %c0_i32, %c0_i32_0 : i32, i32, i32
  }
  func.func @transform_1(%arg0: i32, %arg1: i32) -> (i32, i32, i32) {
    %c0_i32 = arith.constant 0 : i32
    %c0_i32_0 = arith.constant 0 : i32
    %c0_i32_1 = arith.constant 0 : i32
    return %c0_i32, %c0_i32_0, %arg0 : i32, i32, i32
  }
  func.func @transform_2(%arg0: i32, %arg1: i32) -> (i32, i32) {
    %c0_i32 = arith.constant 0 : i32
    %c0_i32_0 = arith.constant 0 : i32
    return %c0_i32, %arg0 : i32, i32
  }
  func.func @transform_3(%arg0: i32, %arg1: i32) -> (i32, i32) {
    %c0_i32 = arith.constant 0 : i32
    %c0_i32_0 = arith.constant 0 : i32
    %c0_i32_1 = arith.constant 0 : i32
    return %c0_i32, %c0_i32_0 : i32, i32
  }
  func.func @transform_4(%arg0: i32, %arg1: i32) -> (i32, i32, i32) {
    %c0_i32 = arith.constant 0 : i32
    %c0_i32_0 = arith.constant 0 : i32
    return %arg1, %c0_i32, %arg0 : i32, i32, i32
  }
}

module attributes {stable_mosaic.version = 11 : i64} {
  func.func @_mac_loop_kernel(%arg0: i32, %arg1: memref<2x8x32xbf16, #tpu.memory_space<vmem>>, %arg2: memref<2x32xf32, #tpu.memory_space<vmem>>, %arg3: memref<2x3x32xf32, #tpu.memory_space<vmem>>, %arg4: memref<2x16x32xbf16, #tpu.memory_space<vmem>>, %arg5: memref<224x32xbf16, #tpu.memory_space<vmem>>, %arg6: memref<8x32xf32, #tpu.memory_space<vmem>>, %arg7: memref<1x1xf32, #tpu.memory_space<vmem>>, %arg8: memref<2x32xf32, #tpu.memory_space<vmem>>, %arg9: memref<2x16x32xf32, #tpu.memory_space<vmem>>) attributes {dimension_semantics = [#tpu.dimension_semantics<parallel>], iteration_bounds = array<i64: 1>, scalar_prefetch = 0 : i64, scratch_operands = 1 : i64, tpu.core_type = #tpu.core_type<tc>, window_params = [{transform_indices = @transform_0, window_bounds = array<i64: 2, 8, 32>}, {transform_indices = @transform_1, window_bounds = array<i64: 2, 32>}, {transform_indices = @transform_2, window_bounds = array<i64: 2, 3, 32>}, {transform_indices = @transform_3, window_bounds = array<i64: 2, 16, 32>}, {pipeline_mode = #tpu.pipeline_mode<synchronous>, transform_indices = @transform_4, window_bounds = array<i64: 224, 32>}, {pipeline_mode = #tpu.pipeline_mode<synchronous>, transform_indices = @transform_5, window_bounds = array<i64: 8, 32>}, {pipeline_mode = #tpu.pipeline_mode<synchronous>, transform_indices = @transform_6, window_bounds = array<i64: 1, 1>}, {transform_indices = @transform_7, window_bounds = array<i64: 2, 32>}]} {
    %c0 = arith.constant 0 : index
    %c0_0 = arith.constant 0 : index
    %0 = vector.load %arg6[%c0, %c0_0] : memref<8x32xf32, #tpu.memory_space<vmem>>, vector<8x32xf32>
    %c0_1 = arith.constant 0 : index
    %c0_2 = arith.constant 0 : index
    %1 = vector.load %arg2[%c0_1, %c0_2] : memref<2x32xf32, #tpu.memory_space<vmem>>, vector<2x32xf32>
    %c0_3 = arith.constant 0 : index
    %c0_4 = arith.constant 0 : index
    %2 = vector.load %arg7[%c0_3, %c0_4] : memref<1x1xf32, #tpu.memory_space<vmem>>, vector<1x1xf32>
    %cst = arith.constant 1.000000e+00 : f32
    %3 = vector.broadcast %cst : f32 to vector<1x1xf32>
    %4 = arith.addf %2, %3 : vector<1x1xf32>
    %c0_5 = arith.constant 0 : index
    %c0_6 = arith.constant 0 : index
    %c0_7 = arith.constant 0 : index
    %5 = vector.load %arg3[%c0_5, %c0_6, %c0_7] : memref<2x3x32xf32, #tpu.memory_space<vmem>>, vector<2x3x32xf32>
    %c0_8 = arith.constant 0 : index
    %c0_9 = arith.constant 0 : index
    %c0_10 = arith.constant 0 : index
    %6 = vector.load %arg4[%c0_8, %c0_9, %c0_10] : memref<2x16x32xbf16, #tpu.memory_space<vmem>>, vector<1x16x32xbf16>
    %7 = vector.shape_cast %6 : vector<1x16x32xbf16> to vector<16x32xbf16>
    %c128 = arith.constant 128 : index
    %c0_11 = arith.constant 0 : index
    %8 = vector.load %arg5[%c128, %c0_11] : memref<224x32xbf16, #tpu.memory_space<vmem>>, vector<32x32xbf16>
    %cst_12 = arith.constant dense<0.000000e+00> : vector<16x32xf32>
    %9 = tpu.matmul %7, %8, %cst_12 {dimension_numbers = #tpu.dot_dimension_numbers<[1], [0], [0], [1], [0, 0, 1, 1], [], []>} : vector<16x32xbf16>, vector<32x32xbf16>, vector<16x32xf32> -> vector<16x32xf32>
    %10 = vector.extract_strided_slice %0 {offsets = [3, 0], sizes = [1, 32], strides = [1, 1]} : vector<8x32xf32> to vector<1x32xf32>
    %11 = vector.broadcast %10 : vector<1x32xf32> to vector<16x32xf32>
    %12 = arith.addf %9, %11 : vector<16x32xf32>
    %c0_13 = arith.constant 0 : index
    %c0_14 = arith.constant 0 : index
    %c0_15 = arith.constant 0 : index
    %13 = vector.load %arg9[%c0_13, %c0_14, %c0_15] : memref<2x16x32xf32, #tpu.memory_space<vmem>>, vector<1x16x32xf32>
    %14 = vector.shape_cast %13 : vector<1x16x32xf32> to vector<16x32xf32>
    %15 = vector.shape_cast %12 : vector<16x32xf32> to vector<1x16x32xf32>
    tpu.vector_store %arg9[%c0_13, %c0_14, %c0_15], %15 {strides = array<i32>} : memref<2x16x32xf32, #tpu.memory_space<vmem>>, vector<1x16x32xf32>,
    %c1 = arith.constant 1 : index
    %c0_16 = arith.constant 0 : index
    %c0_17 = arith.constant 0 : index
    %16 = vector.load %arg4[%c1, %c0_16, %c0_17] : memref<2x16x32xbf16, #tpu.memory_space<vmem>>, vector<1x16x32xbf16>
    %17 = vector.shape_cast %16 : vector<1x16x32xbf16> to vector<16x32xbf16>
    %c128_18 = arith.constant 128 : index
    %c0_19 = arith.constant 0 : index
    %18 = vector.load %arg5[%c128_18, %c0_19] : memref<224x32xbf16, #tpu.memory_space<vmem>>, vector<32x32xbf16>
    %cst_20 = arith.constant dense<0.000000e+00> : vector<16x32xf32>
    %19 = tpu.matmul %17, %18, %cst_20 {dimension_numbers = #tpu.dot_dimension_numbers<[1], [0], [0], [1], [0, 0, 1, 1], [], []>} : vector<16x32xbf16>, vector<32x32xbf16>, vector<16x32xf32> -> vector<16x32xf32>
    %20 = vector.extract_strided_slice %0 {offsets = [3, 0], sizes = [1, 32], strides = [1, 1]} : vector<8x32xf32> to vector<1x32xf32>
    %21 = vector.broadcast %20 : vector<1x32xf32> to vector<16x32xf32>
    %22 = arith.addf %19, %21 : vector<16x32xf32>
    %c1_21 = arith.constant 1 : index
    %c0_22 = arith.constant 0 : index
    %c0_23 = arith.constant 0 : index
    %23 = vector.load %arg9[%c1_21, %c0_22, %c0_23] : memref<2x16x32xf32, #tpu.memory_space<vmem>>, vector<1x16x32xf32>
    %24 = vector.shape_cast %23 : vector<1x16x32xf32> to vector<16x32xf32>
    %25 = vector.shape_cast %22 : vector<16x32xf32> to vector<1x16x32xf32>
    tpu.vector_store %arg9[%c1_21, %c0_22, %c0_23], %25 {strides = array<i32>} : memref<2x16x32xf32, #tpu.memory_space<vmem>>, vector<1x16x32xf32>,
    %26 = vector.extract_strided_slice %0 {offsets = [7, 0], sizes = [1, 32], strides = [1, 1]} : vector<8x32xf32> to vector<1x32xf32>
    %27 = vector.shape_cast %26 : vector<1x32xf32> to vector<1x32xf32>
    %28 = vector.broadcast %27 : vector<1x32xf32> to vector<2x32xf32>
    %29 = vector.extract_strided_slice %5 {offsets = [0, 0, 0], sizes = [2, 1, 32], strides = [1, 1, 1]} : vector<2x3x32xf32> to vector<2x1x32xf32>
    %30 = vector.shape_cast %29 : vector<2x1x32xf32> to vector<2x32xf32>
    %31 = arith.truncf %1 : vector<2x32xf32> to vector<2x32xbf16>
    %c0_24 = arith.constant 0 : index
    %c0_25 = arith.constant 0 : index
    %32 = vector.load %arg5[%c0_24, %c0_25] : memref<224x32xbf16, #tpu.memory_space<vmem>>, vector<32x32xbf16>
    %cst_26 = arith.constant dense<0.000000e+00> : vector<2x32xf32>
    %33 = tpu.matmul %31, %32, %cst_26 {dimension_numbers = #tpu.dot_dimension_numbers<[1], [0], [0], [1], [0, 0, 1, 1], [], []>} : vector<2x32xbf16>, vector<32x32xbf16>, vector<2x32xf32> -> vector<2x32xf32>
    %34 = arith.truncf %30 : vector<2x32xf32> to vector<2x32xbf16>
    %c32 = arith.constant 32 : index
    %c0_27 = arith.constant 0 : index
    %35 = vector.load %arg5[%c32, %c0_27] : memref<224x32xbf16, #tpu.memory_space<vmem>>, vector<32x32xbf16>
    %cst_28 = arith.constant dense<0.000000e+00> : vector<2x32xf32>
    %36 = tpu.matmul %34, %35, %cst_28 {dimension_numbers = #tpu.dot_dimension_numbers<[1], [0], [0], [1], [0, 0, 1, 1], [], []>} : vector<2x32xbf16>, vector<32x32xbf16>, vector<2x32xf32> -> vector<2x32xf32>
    %37 = arith.addf %33, %36 : vector<2x32xf32>
    %38 = vector.extract_strided_slice %0 {offsets = [0, 0], sizes = [1, 32], strides = [1, 1]} : vector<8x32xf32> to vector<1x32xf32>
    %39 = vector.broadcast %38 : vector<1x32xf32> to vector<2x32xf32>
    %40 = arith.addf %37, %39 : vector<2x32xf32>
    %41 = vector.extract_strided_slice %0 {offsets = [1, 0], sizes = [1, 32], strides = [1, 1]} : vector<8x32xf32> to vector<1x32xf32>
    %42 = vector.broadcast %41 : vector<1x32xf32> to vector<2x32xf32>
    %43 = arith.mulf %40, %42 : vector<2x32xf32>
    %44 = vector.shape_cast %43 : vector<2x32xf32> to vector<2x1x32xf32>
    %c0_29 = arith.constant 0 : index
    %c0_30 = arith.constant 0 : index
    %c0_31 = arith.constant 0 : index
    %45 = vector.load %arg1[%c0_29, %c0_30, %c0_31] : memref<2x8x32xbf16, #tpu.memory_space<vmem>>, vector<2x8x32xbf16>
    %46 = arith.extf %45 : vector<2x8x32xbf16> to vector<2x8x32xf32>
    %47 = vector.broadcast %44 : vector<2x1x32xf32> to vector<2x8x32xf32>
    %48 = arith.mulf %46, %47 : vector<2x8x32xf32>
    %cst_32 = arith.constant dense<0.000000e+00> : vector<2x8xf32>
    %49 = vector.multi_reduction <add>, %48, %cst_32 [2] : vector<2x8x32xf32> to vector<2x8xf32>
    %50 = vector.shape_cast %49 : vector<2x8xf32> to vector<2x8x1xf32>
    %cst_33 = arith.constant dense<0xFF800000> : vector<2x1xf32>
    %51 = vector.multi_reduction <maximumf>, %50, %cst_33 [1] : vector<2x8x1xf32> to vector<2x1xf32>
    %52 = vector.shape_cast %51 : vector<2x1xf32> to vector<2x1x1xf32>
    %53 = vector.broadcast %52 : vector<2x1x1xf32> to vector<2x8x1xf32>
    %54 = arith.subf %50, %53 : vector<2x8x1xf32>
    %55 = math.exp %54 : vector<2x8x1xf32>
    %cst_34 = arith.constant dense<0.000000e+00> : vector<2x1xf32>
    %56 = vector.multi_reduction <add>, %55, %cst_34 [1] : vector<2x8x1xf32> to vector<2x1xf32>
    %57 = vector.shape_cast %56 : vector<2x1xf32> to vector<2x1x1xf32>
    %58 = vector.broadcast %57 : vector<2x1x1xf32> to vector<2x8x1xf32>
    %59 = arith.divf %55, %58 : vector<2x8x1xf32>
    %c0_35 = arith.constant 0 : index
    %c0_36 = arith.constant 0 : index
    %c0_37 = arith.constant 0 : index
    %60 = vector.load %arg1[%c0_35, %c0_36, %c0_37] : memref<2x8x32xbf16, #tpu.memory_space<vmem>>, vector<2x8x32xbf16>
    %61 = arith.extf %60 : vector<2x8x32xbf16> to vector<2x8x32xf32>
    %62 = vector.broadcast %59 : vector<2x8x1xf32> to vector<2x8x32xf32>
    %63 = arith.mulf %62, %61 : vector<2x8x32xf32>
    %cst_38 = arith.constant dense<0.000000e+00> : vector<2x32xf32>
    %64 = vector.multi_reduction <add>, %63, %cst_38 [1] : vector<2x8x32xf32> to vector<2x32xf32>
    %65 = arith.truncf %28 : vector<2x32xf32> to vector<2x32xbf16>
    %c64 = arith.constant 64 : index
    %c0_39 = arith.constant 0 : index
    %66 = vector.load %arg5[%c64, %c0_39] : memref<224x32xbf16, #tpu.memory_space<vmem>>, vector<32x32xbf16>
    %cst_40 = arith.constant dense<0.000000e+00> : vector<2x32xf32>
    %67 = tpu.matmul %65, %66, %cst_40 {dimension_numbers = #tpu.dot_dimension_numbers<[1], [0], [0], [1], [0, 0, 1, 1], [], []>} : vector<2x32xbf16>, vector<32x32xbf16>, vector<2x32xf32> -> vector<2x32xf32>
    %68 = vector.extract_strided_slice %0 {offsets = [2, 0], sizes = [1, 32], strides = [1, 1]} : vector<8x32xf32> to vector<1x32xf32>
    %69 = vector.broadcast %68 : vector<1x32xf32> to vector<2x32xf32>
    %70 = arith.addf %67, %69 : vector<2x32xf32>
    %71 = arith.truncf %70 : vector<2x32xf32> to vector<2x32xbf16>
    %72 = vector.extract_strided_slice %0 {offsets = [4, 0], sizes = [1, 32], strides = [1, 1]} : vector<8x32xf32> to vector<1x32xf32>
    %73 = vector.broadcast %72 : vector<1x32xf32> to vector<2x32xf32>
    %74 = arith.mulf %64, %73 : vector<2x32xf32>
    %c0_41 = arith.constant 0 : index
    %c0_42 = arith.constant 0 : index
    %c0_43 = arith.constant 0 : index
    %75 = vector.load %arg4[%c0_41, %c0_42, %c0_43] : memref<2x16x32xbf16, #tpu.memory_space<vmem>>, vector<1x16x32xbf16>
    %76 = vector.shape_cast %75 : vector<1x16x32xbf16> to vector<16x32xbf16>
    %77 = vector.extract_strided_slice %71 {offsets = [0, 0], sizes = [1, 32], strides = [1, 1]} : vector<2x32xbf16> to vector<1x32xbf16>
    %78 = vector.broadcast %77 : vector<1x32xbf16> to vector<16x32xbf16>
    %79 = arith.mulf %76, %78 : vector<16x32xbf16>
    %c96 = arith.constant 96 : index
    %c0_44 = arith.constant 0 : index
    %80 = vector.load %arg5[%c96, %c0_44] : memref<224x32xbf16, #tpu.memory_space<vmem>>, vector<32x32xbf16>
    %cst_45 = arith.constant dense<0.000000e+00> : vector<16x32xf32>
    %81 = tpu.matmul %79, %80, %cst_45 {dimension_numbers = #tpu.dot_dimension_numbers<[1], [0], [0], [1], [0, 0, 1, 1], [], []>} : vector<16x32xbf16>, vector<32x32xbf16>, vector<16x32xf32> -> vector<16x32xf32>
    %c0_46 = arith.constant 0 : index
    %c0_47 = arith.constant 0 : index
    %c0_48 = arith.constant 0 : index
    %82 = vector.load %arg9[%c0_46, %c0_47, %c0_48] : memref<2x16x32xf32, #tpu.memory_space<vmem>>, vector<1x16x32xf32>
    %83 = vector.shape_cast %82 : vector<1x16x32xf32> to vector<16x32xf32>
    %84 = arith.addf %81, %83 : vector<16x32xf32>
    %85 = vector.extract_strided_slice %74 {offsets = [0, 0], sizes = [1, 32], strides = [1, 1]} : vector<2x32xf32> to vector<1x32xf32>
    %86 = vector.broadcast %85 : vector<1x32xf32> to vector<16x32xf32>
    %87 = arith.mulf %84, %86 : vector<16x32xf32>
    %cst_49 = arith.constant dense<0.000000e+00> : vector<16xf32>
    %88 = vector.multi_reduction <add>, %87, %cst_49 [1] : vector<16x32xf32> to vector<16xf32>
    %89 = vector.shape_cast %88 : vector<16xf32> to vector<16x1xf32>
    %cst_50 = arith.constant dense<0xFF800000> : vector<1xf32>
    %90 = vector.multi_reduction <maximumf>, %89, %cst_50 [0] : vector<16x1xf32> to vector<1xf32>
    %91 = vector.shape_cast %90 : vector<1xf32> to vector<1x1xf32>
    %92 = vector.broadcast %91 : vector<1x1xf32> to vector<16x1xf32>
    %93 = arith.subf %89, %92 : vector<16x1xf32>
    %94 = math.exp %93 : vector<16x1xf32>
    %cst_51 = arith.constant dense<0.000000e+00> : vector<1xf32>
    %95 = vector.multi_reduction <add>, %94, %cst_51 [0] : vector<16x1xf32> to vector<1xf32>
    %96 = vector.shape_cast %95 : vector<1xf32> to vector<1x1xf32>
    %97 = vector.broadcast %96 : vector<1x1xf32> to vector<16x1xf32>
    %98 = arith.divf %94, %97 : vector<16x1xf32>
    %99 = arith.extf %76 : vector<16x32xbf16> to vector<16x32xf32>
    %100 = vector.broadcast %98 : vector<16x1xf32> to vector<16x32xf32>
    %101 = arith.mulf %100, %99 : vector<16x32xf32>
    %cst_52 = arith.constant dense<0.000000e+00> : vector<32xf32>
    %102 = vector.multi_reduction <add>, %101, %cst_52 [0] : vector<16x32xf32> to vector<32xf32>
    %103 = vector.shape_cast %102 : vector<32xf32> to vector<1x32xf32>
    %c1_53 = arith.constant 1 : index
    %c0_54 = arith.constant 0 : index
    %c0_55 = arith.constant 0 : index
    %104 = vector.load %arg4[%c1_53, %c0_54, %c0_55] : memref<2x16x32xbf16, #tpu.memory_space<vmem>>, vector<1x16x32xbf16>
    %105 = vector.shape_cast %104 : vector<1x16x32xbf16> to vector<16x32xbf16>
    %106 = vector.extract_strided_slice %71 {offsets = [1, 0], sizes = [1, 32], strides = [1, 1]} : vector<2x32xbf16> to vector<1x32xbf16>
    %107 = vector.broadcast %106 : vector<1x32xbf16> to vector<16x32xbf16>
    %108 = arith.mulf %105, %107 : vector<16x32xbf16>
    %c96_56 = arith.constant 96 : index
    %c0_57 = arith.constant 0 : index
    %109 = vector.load %arg5[%c96_56, %c0_57] : memref<224x32xbf16, #tpu.memory_space<vmem>>, vector<32x32xbf16>
    %cst_58 = arith.constant dense<0.000000e+00> : vector<16x32xf32>
    %110 = tpu.matmul %108, %109, %cst_58 {dimension_numbers = #tpu.dot_dimension_numbers<[1], [0], [0], [1], [0, 0, 1, 1], [], []>} : vector<16x32xbf16>, vector<32x32xbf16>, vector<16x32xf32> -> vector<16x32xf32>
    %c1_59 = arith.constant 1 : index
    %c0_60 = arith.constant 0 : index
    %c0_61 = arith.constant 0 : index
    %111 = vector.load %arg9[%c1_59, %c0_60, %c0_61] : memref<2x16x32xf32, #tpu.memory_space<vmem>>, vector<1x16x32xf32>
    %112 = vector.shape_cast %111 : vector<1x16x32xf32> to vector<16x32xf32>
    %113 = arith.addf %110, %112 : vector<16x32xf32>
    %114 = vector.extract_strided_slice %74 {offsets = [1, 0], sizes = [1, 32], strides = [1, 1]} : vector<2x32xf32> to vector<1x32xf32>
    %115 = vector.broadcast %114 : vector<1x32xf32> to vector<16x32xf32>
    %116 = arith.mulf %113, %115 : vector<16x32xf32>
    %cst_62 = arith.constant dense<0.000000e+00> : vector<16xf32>
    %117 = vector.multi_reduction <add>, %116, %cst_62 [1] : vector<16x32xf32> to vector<16xf32>
    %118 = vector.shape_cast %117 : vector<16xf32> to vector<16x1xf32>
    %cst_63 = arith.constant dense<0xFF800000> : vector<1xf32>
    %119 = vector.multi_reduction <maximumf>, %118, %cst_63 [0] : vector<16x1xf32> to vector<1xf32>
    %120 = vector.shape_cast %119 : vector<1xf32> to vector<1x1xf32>
    %121 = vector.broadcast %120 : vector<1x1xf32> to vector<16x1xf32>
    %122 = arith.subf %118, %121 : vector<16x1xf32>
    %123 = math.exp %122 : vector<16x1xf32>
    %cst_64 = arith.constant dense<0.000000e+00> : vector<1xf32>
    %124 = vector.multi_reduction <add>, %123, %cst_64 [0] : vector<16x1xf32> to vector<1xf32>
    %125 = vector.shape_cast %124 : vector<1xf32> to vector<1x1xf32>
    %126 = vector.broadcast %125 : vector<1x1xf32> to vector<16x1xf32>
    %127 = arith.divf %123, %126 : vector<16x1xf32>
    %128 = arith.extf %105 : vector<16x32xbf16> to vector<16x32xf32>
    %129 = vector.broadcast %127 : vector<16x1xf32> to vector<16x32xf32>
    %130 = arith.mulf %129, %128 : vector<16x32xf32>
    %cst_65 = arith.constant dense<0.000000e+00> : vector<32xf32>
    %131 = vector.multi_reduction <add>, %130, %cst_65 [0] : vector<16x32xf32> to vector<32xf32>
    %132 = vector.shape_cast %131 : vector<32xf32> to vector<1x32xf32>
    %133 = tpu.concatenate %103, %132 in 0 : vector<1x32xf32>, vector<1x32xf32> -> vector<2x32xf32>
    %134 = arith.truncf %133 : vector<2x32xf32> to vector<2x32xbf16>
    %c160 = arith.constant 160 : index
    %c0_66 = arith.constant 0 : index
    %135 = vector.load %arg5[%c160, %c0_66] : memref<224x32xbf16, #tpu.memory_space<vmem>>, vector<32x32xbf16>
    %cst_67 = arith.constant dense<0.000000e+00> : vector<2x32xf32>
    %136 = tpu.matmul %134, %135, %cst_67 {dimension_numbers = #tpu.dot_dimension_numbers<[1], [0], [0], [1], [0, 0, 1, 1], [], []>} : vector<2x32xbf16>, vector<32x32xbf16>, vector<2x32xf32> -> vector<2x32xf32>
    %137 = arith.truncf %28 : vector<2x32xf32> to vector<2x32xbf16>
    %c192 = arith.constant 192 : index
    %c0_68 = arith.constant 0 : index
    %138 = vector.load %arg5[%c192, %c0_68] : memref<224x32xbf16, #tpu.memory_space<vmem>>, vector<32x32xbf16>
    %cst_69 = arith.constant dense<0.000000e+00> : vector<2x32xf32>
    %139 = tpu.matmul %137, %138, %cst_69 {dimension_numbers = #tpu.dot_dimension_numbers<[1], [0], [0], [1], [0, 0, 1, 1], [], []>} : vector<2x32xbf16>, vector<32x32xbf16>, vector<2x32xf32> -> vector<2x32xf32>
    %140 = arith.addf %136, %139 : vector<2x32xf32>
    %141 = vector.extract_strided_slice %0 {offsets = [5, 0], sizes = [1, 32], strides = [1, 1]} : vector<8x32xf32> to vector<1x32xf32>
    %142 = vector.broadcast %141 : vector<1x32xf32> to vector<2x32xf32>
    %143 = arith.addf %140, %142 : vector<2x32xf32>
    %144 = vector.extract_strided_slice %0 {offsets = [6, 0], sizes = [1, 32], strides = [1, 1]} : vector<8x32xf32> to vector<1x32xf32>
    %145 = vector.broadcast %144 : vector<1x32xf32> to vector<2x32xf32>
    %146 = arith.mulf %64, %145 : vector<2x32xf32>
    %cst_70 = arith.constant dense<0.000000e+00> : vector<2xf32>
    %147 = vector.multi_reduction <add>, %146, %cst_70 [1] : vector<2x32xf32> to vector<2xf32>
    %148 = vector.shape_cast %147 : vector<2xf32> to vector<2x1xf32>
    %149 = vector.broadcast %4 : vector<1x1xf32> to vector<2x1xf32>
    %150 = arith.addf %148, %149 : vector<2x1xf32>
    %151 = arith.negf %150 : vector<2x1xf32>
    %152 = math.exp %151 : vector<2x1xf32>
    %cst_71 = arith.constant 1.000000e+00 : f32
    %153 = vector.broadcast %cst_71 : f32 to vector<2x1xf32>
    %154 = arith.addf %153, %152 : vector<2x1xf32>
    %155 = arith.divf %153, %154 : vector<2x1xf32>
    %156 = vector.broadcast %155 : vector<2x1xf32> to vector<2x32xf32>
    %157 = arith.mulf %156, %28 : vector<2x32xf32>
    %cst_72 = arith.constant 1.000000e+00 : f32
    %158 = vector.broadcast %cst_72 : f32 to vector<2x1xf32>
    %159 = arith.subf %158, %155 : vector<2x1xf32>
    %160 = vector.broadcast %159 : vector<2x1xf32> to vector<2x32xf32>
    %161 = arith.mulf %160, %143 : vector<2x32xf32>
    %162 = arith.addf %157, %161 : vector<2x32xf32>
    %163 = vector.extract_strided_slice %5 {offsets = [0, 1, 0], sizes = [2, 1, 32], strides = [1, 1, 1]} : vector<2x3x32xf32> to vector<2x1x32xf32>
    %164 = vector.shape_cast %163 : vector<2x1x32xf32> to vector<2x32xf32>
    %165 = arith.truncf %64 : vector<2x32xf32> to vector<2x32xbf16>
    %c0_73 = arith.constant 0 : index
    %c0_74 = arith.constant 0 : index
    %166 = vector.load %arg5[%c0_73, %c0_74] : memref<224x32xbf16, #tpu.memory_space<vmem>>, vector<32x32xbf16>
    %cst_75 = arith.constant dense<0.000000e+00> : vector<2x32xf32>
    %167 = tpu.matmul %165, %166, %cst_75 {dimension_numbers = #tpu.dot_dimension_numbers<[1], [0], [0], [1], [0, 0, 1, 1], [], []>} : vector<2x32xbf16>, vector<32x32xbf16>, vector<2x32xf32> -> vector<2x32xf32>
    %168 = arith.truncf %164 : vector<2x32xf32> to vector<2x32xbf16>
    %c32_76 = arith.constant 32 : index
    %c0_77 = arith.constant 0 : index
    %169 = vector.load %arg5[%c32_76, %c0_77] : memref<224x32xbf16, #tpu.memory_space<vmem>>, vector<32x32xbf16>
    %cst_78 = arith.constant dense<0.000000e+00> : vector<2x32xf32>
    %170 = tpu.matmul %168, %169, %cst_78 {dimension_numbers = #tpu.dot_dimension_numbers<[1], [0], [0], [1], [0, 0, 1, 1], [], []>} : vector<2x32xbf16>, vector<32x32xbf16>, vector<2x32xf32> -> vector<2x32xf32>
    %171 = arith.addf %167, %170 : vector<2x32xf32>
    %172 = vector.extract_strided_slice %0 {offsets = [0, 0], sizes = [1, 32], strides = [1, 1]} : vector<8x32xf32> to vector<1x32xf32>
    %173 = vector.broadcast %172 : vector<1x32xf32> to vector<2x32xf32>
    %174 = arith.addf %171, %173 : vector<2x32xf32>
    %175 = vector.extract_strided_slice %0 {offsets = [1, 0], sizes = [1, 32], strides = [1, 1]} : vector<8x32xf32> to vector<1x32xf32>
    %176 = vector.broadcast %175 : vector<1x32xf32> to vector<2x32xf32>
    %177 = arith.mulf %174, %176 : vector<2x32xf32>
    %178 = vector.shape_cast %177 : vector<2x32xf32> to vector<2x1x32xf32>
    %c0_79 = arith.constant 0 : index
    %c0_80 = arith.constant 0 : index
    %c0_81 = arith.constant 0 : index
    %179 = vector.load %arg1[%c0_79, %c0_80, %c0_81] : memref<2x8x32xbf16, #tpu.memory_space<vmem>>, vector<2x8x32xbf16>
    %180 = arith.extf %179 : vector<2x8x32xbf16> to vector<2x8x32xf32>
    %181 = vector.broadcast %178 : vector<2x1x32xf32> to vector<2x8x32xf32>
    %182 = arith.mulf %180, %181 : vector<2x8x32xf32>
    %cst_82 = arith.constant dense<0.000000e+00> : vector<2x8xf32>
    %183 = vector.multi_reduction <add>, %182, %cst_82 [2] : vector<2x8x32xf32> to vector<2x8xf32>
    %184 = vector.shape_cast %183 : vector<2x8xf32> to vector<2x8x1xf32>
    %cst_83 = arith.constant dense<0xFF800000> : vector<2x1xf32>
    %185 = vector.multi_reduction <maximumf>, %184, %cst_83 [1] : vector<2x8x1xf32> to vector<2x1xf32>
    %186 = vector.shape_cast %185 : vector<2x1xf32> to vector<2x1x1xf32>
    %187 = vector.broadcast %186 : vector<2x1x1xf32> to vector<2x8x1xf32>
    %188 = arith.subf %184, %187 : vector<2x8x1xf32>
    %189 = math.exp %188 : vector<2x8x1xf32>
    %cst_84 = arith.constant dense<0.000000e+00> : vector<2x1xf32>
    %190 = vector.multi_reduction <add>, %189, %cst_84 [1] : vector<2x8x1xf32> to vector<2x1xf32>
    %191 = vector.shape_cast %190 : vector<2x1xf32> to vector<2x1x1xf32>
    %192 = vector.broadcast %191 : vector<2x1x1xf32> to vector<2x8x1xf32>
    %193 = arith.divf %189, %192 : vector<2x8x1xf32>
    %c0_85 = arith.constant 0 : index
    %c0_86 = arith.constant 0 : index
    %c0_87 = arith.constant 0 : index
    %194 = vector.load %arg1[%c0_85, %c0_86, %c0_87] : memref<2x8x32xbf16, #tpu.memory_space<vmem>>, vector<2x8x32xbf16>
    %195 = arith.extf %194 : vector<2x8x32xbf16> to vector<2x8x32xf32>
    %196 = vector.broadcast %193 : vector<2x8x1xf32> to vector<2x8x32xf32>
    %197 = arith.mulf %196, %195 : vector<2x8x32xf32>
    %cst_88 = arith.constant dense<0.000000e+00> : vector<2x32xf32>
    %198 = vector.multi_reduction <add>, %197, %cst_88 [1] : vector<2x8x32xf32> to vector<2x32xf32>
    %199 = arith.truncf %162 : vector<2x32xf32> to vector<2x32xbf16>
    %c64_89 = arith.constant 64 : index
    %c0_90 = arith.constant 0 : index
    %200 = vector.load %arg5[%c64_89, %c0_90] : memref<224x32xbf16, #tpu.memory_space<vmem>>, vector<32x32xbf16>
    %cst_91 = arith.constant dense<0.000000e+00> : vector<2x32xf32>
    %201 = tpu.matmul %199, %200, %cst_91 {dimension_numbers = #tpu.dot_dimension_numbers<[1], [0], [0], [1], [0, 0, 1, 1], [], []>} : vector<2x32xbf16>, vector<32x32xbf16>, vector<2x32xf32> -> vector<2x32xf32>
    %202 = vector.extract_strided_slice %0 {offsets = [2, 0], sizes = [1, 32], strides = [1, 1]} : vector<8x32xf32> to vector<1x32xf32>
    %203 = vector.broadcast %202 : vector<1x32xf32> to vector<2x32xf32>
    %204 = arith.addf %201, %203 : vector<2x32xf32>
    %205 = arith.truncf %204 : vector<2x32xf32> to vector<2x32xbf16>
    %206 = vector.extract_strided_slice %0 {offsets = [4, 0], sizes = [1, 32], strides = [1, 1]} : vector<8x32xf32> to vector<1x32xf32>
    %207 = vector.broadcast %206 : vector<1x32xf32> to vector<2x32xf32>
    %208 = arith.mulf %198, %207 : vector<2x32xf32>
    %c0_92 = arith.constant 0 : index
    %c0_93 = arith.constant 0 : index
    %c0_94 = arith.constant 0 : index
    %209 = vector.load %arg4[%c0_92, %c0_93, %c0_94] : memref<2x16x32xbf16, #tpu.memory_space<vmem>>, vector<1x16x32xbf16>
    %210 = vector.shape_cast %209 : vector<1x16x32xbf16> to vector<16x32xbf16>
    %211 = vector.extract_strided_slice %205 {offsets = [0, 0], sizes = [1, 32], strides = [1, 1]} : vector<2x32xbf16> to vector<1x32xbf16>
    %212 = vector.broadcast %211 : vector<1x32xbf16> to vector<16x32xbf16>
    %213 = arith.mulf %210, %212 : vector<16x32xbf16>
    %c96_95 = arith.constant 96 : index
    %c0_96 = arith.constant 0 : index
    %214 = vector.load %arg5[%c96_95, %c0_96] : memref<224x32xbf16, #tpu.memory_space<vmem>>, vector<32x32xbf16>
    %cst_97 = arith.constant dense<0.000000e+00> : vector<16x32xf32>
    %215 = tpu.matmul %213, %214, %cst_97 {dimension_numbers = #tpu.dot_dimension_numbers<[1], [0], [0], [1], [0, 0, 1, 1], [], []>} : vector<16x32xbf16>, vector<32x32xbf16>, vector<16x32xf32> -> vector<16x32xf32>
    %c0_98 = arith.constant 0 : index
    %c0_99 = arith.constant 0 : index
    %c0_100 = arith.constant 0 : index
    %216 = vector.load %arg9[%c0_98, %c0_99, %c0_100] : memref<2x16x32xf32, #tpu.memory_space<vmem>>, vector<1x16x32xf32>
    %217 = vector.shape_cast %216 : vector<1x16x32xf32> to vector<16x32xf32>
    %218 = arith.addf %215, %217 : vector<16x32xf32>
    %219 = vector.extract_strided_slice %208 {offsets = [0, 0], sizes = [1, 32], strides = [1, 1]} : vector<2x32xf32> to vector<1x32xf32>
    %220 = vector.broadcast %219 : vector<1x32xf32> to vector<16x32xf32>
    %221 = arith.mulf %218, %220 : vector<16x32xf32>
    %cst_101 = arith.constant dense<0.000000e+00> : vector<16xf32>
    %222 = vector.multi_reduction <add>, %221, %cst_101 [1] : vector<16x32xf32> to vector<16xf32>
    %223 = vector.shape_cast %222 : vector<16xf32> to vector<16x1xf32>
    %cst_102 = arith.constant dense<0xFF800000> : vector<1xf32>
    %224 = vector.multi_reduction <maximumf>, %223, %cst_102 [0] : vector<16x1xf32> to vector<1xf32>
    %225 = vector.shape_cast %224 : vector<1xf32> to vector<1x1xf32>
    %226 = vector.broadcast %225 : vector<1x1xf32> to vector<16x1xf32>
    %227 = arith.subf %223, %226 : vector<16x1xf32>
    %228 = math.exp %227 : vector<16x1xf32>
    %cst_103 = arith.constant dense<0.000000e+00> : vector<1xf32>
    %229 = vector.multi_reduction <add>, %228, %cst_103 [0] : vector<16x1xf32> to vector<1xf32>
    %230 = vector.shape_cast %229 : vector<1xf32> to vector<1x1xf32>
    %231 = vector.broadcast %230 : vector<1x1xf32> to vector<16x1xf32>
    %232 = arith.divf %228, %231 : vector<16x1xf32>
    %233 = arith.extf %210 : vector<16x32xbf16> to vector<16x32xf32>
    %234 = vector.broadcast %232 : vector<16x1xf32> to vector<16x32xf32>
    %235 = arith.mulf %234, %233 : vector<16x32xf32>
    %cst_104 = arith.constant dense<0.000000e+00> : vector<32xf32>
    %236 = vector.multi_reduction <add>, %235, %cst_104 [0] : vector<16x32xf32> to vector<32xf32>
    %237 = vector.shape_cast %236 : vector<32xf32> to vector<1x32xf32>
    %c1_105 = arith.constant 1 : index
    %c0_106 = arith.constant 0 : index
    %c0_107 = arith.constant 0 : index
    %238 = vector.load %arg4[%c1_105, %c0_106, %c0_107] : memref<2x16x32xbf16, #tpu.memory_space<vmem>>, vector<1x16x32xbf16>
    %239 = vector.shape_cast %238 : vector<1x16x32xbf16> to vector<16x32xbf16>
    %240 = vector.extract_strided_slice %205 {offsets = [1, 0], sizes = [1, 32], strides = [1, 1]} : vector<2x32xbf16> to vector<1x32xbf16>
    %241 = vector.broadcast %240 : vector<1x32xbf16> to vector<16x32xbf16>
    %242 = arith.mulf %239, %241 : vector<16x32xbf16>
    %c96_108 = arith.constant 96 : index
    %c0_109 = arith.constant 0 : index
    %243 = vector.load %arg5[%c96_108, %c0_109] : memref<224x32xbf16, #tpu.memory_space<vmem>>, vector<32x32xbf16>
    %cst_110 = arith.constant dense<0.000000e+00> : vector<16x32xf32>
    %244 = tpu.matmul %242, %243, %cst_110 {dimension_numbers = #tpu.dot_dimension_numbers<[1], [0], [0], [1], [0, 0, 1, 1], [], []>} : vector<16x32xbf16>, vector<32x32xbf16>, vector<16x32xf32> -> vector<16x32xf32>
    %c1_111 = arith.constant 1 : index
    %c0_112 = arith.constant 0 : index
    %c0_113 = arith.constant 0 : index
    %245 = vector.load %arg9[%c1_111, %c0_112, %c0_113] : memref<2x16x32xf32, #tpu.memory_space<vmem>>, vector<1x16x32xf32>
    %246 = vector.shape_cast %245 : vector<1x16x32xf32> to vector<16x32xf32>
    %247 = arith.addf %244, %246 : vector<16x32xf32>
    %248 = vector.extract_strided_slice %208 {offsets = [1, 0], sizes = [1, 32], strides = [1, 1]} : vector<2x32xf32> to vector<1x32xf32>
    %249 = vector.broadcast %248 : vector<1x32xf32> to vector<16x32xf32>
    %250 = arith.mulf %247, %249 : vector<16x32xf32>
    %cst_114 = arith.constant dense<0.000000e+00> : vector<16xf32>
    %251 = vector.multi_reduction <add>, %250, %cst_114 [1] : vector<16x32xf32> to vector<16xf32>
    %252 = vector.shape_cast %251 : vector<16xf32> to vector<16x1xf32>
    %cst_115 = arith.constant dense<0xFF800000> : vector<1xf32>
    %253 = vector.multi_reduction <maximumf>, %252, %cst_115 [0] : vector<16x1xf32> to vector<1xf32>
    %254 = vector.shape_cast %253 : vector<1xf32> to vector<1x1xf32>
    %255 = vector.broadcast %254 : vector<1x1xf32> to vector<16x1xf32>
    %256 = arith.subf %252, %255 : vector<16x1xf32>
    %257 = math.exp %256 : vector<16x1xf32>
    %cst_116 = arith.constant dense<0.000000e+00> : vector<1xf32>
    %258 = vector.multi_reduction <add>, %257, %cst_116 [0] : vector<16x1xf32> to vector<1xf32>
    %259 = vector.shape_cast %258 : vector<1xf32> to vector<1x1xf32>
    %260 = vector.broadcast %259 : vector<1x1xf32> to vector<16x1xf32>
    %261 = arith.divf %257, %260 : vector<16x1xf32>
    %262 = arith.extf %239 : vector<16x32xbf16> to vector<16x32xf32>
    %263 = vector.broadcast %261 : vector<16x1xf32> to vector<16x32xf32>
    %264 = arith.mulf %263, %262 : vector<16x32xf32>
    %cst_117 = arith.constant dense<0.000000e+00> : vector<32xf32>
    %265 = vector.multi_reduction <add>, %264, %cst_117 [0] : vector<16x32xf32> to vector<32xf32>
    %266 = vector.shape_cast %265 : vector<32xf32> to vector<1x32xf32>
    %267 = tpu.concatenate %237, %266 in 0 : vector<1x32xf32>, vector<1x32xf32> -> vector<2x32xf32>
    %268 = arith.truncf %267 : vector<2x32xf32> to vector<2x32xbf16>
    %c160_118 = arith.constant 160 : index
    %c0_119 = arith.constant 0 : index
    %269 = vector.load %arg5[%c160_118, %c0_119] : memref<224x32xbf16, #tpu.memory_space<vmem>>, vector<32x32xbf16>
    %cst_120 = arith.constant dense<0.000000e+00> : vector<2x32xf32>
    %270 = tpu.matmul %268, %269, %cst_120 {dimension_numbers = #tpu.dot_dimension_numbers<[1], [0], [0], [1], [0, 0, 1, 1], [], []>} : vector<2x32xbf16>, vector<32x32xbf16>, vector<2x32xf32> -> vector<2x32xf32>
    %271 = arith.truncf %162 : vector<2x32xf32> to vector<2x32xbf16>
    %c192_121 = arith.constant 192 : index
    %c0_122 = arith.constant 0 : index
    %272 = vector.load %arg5[%c192_121, %c0_122] : memref<224x32xbf16, #tpu.memory_space<vmem>>, vector<32x32xbf16>
    %cst_123 = arith.constant dense<0.000000e+00> : vector<2x32xf32>
    %273 = tpu.matmul %271, %272, %cst_123 {dimension_numbers = #tpu.dot_dimension_numbers<[1], [0], [0], [1], [0, 0, 1, 1], [], []>} : vector<2x32xbf16>, vector<32x32xbf16>, vector<2x32xf32> -> vector<2x32xf32>
    %274 = arith.addf %270, %273 : vector<2x32xf32>
    %275 = vector.extract_strided_slice %0 {offsets = [5, 0], sizes = [1, 32], strides = [1, 1]} : vector<8x32xf32> to vector<1x32xf32>
    %276 = vector.broadcast %275 : vector<1x32xf32> to vector<2x32xf32>
    %277 = arith.addf %274, %276 : vector<2x32xf32>
    %278 = vector.extract_strided_slice %0 {offsets = [6, 0], sizes = [1, 32], strides = [1, 1]} : vector<8x32xf32> to vector<1x32xf32>
    %279 = vector.broadcast %278 : vector<1x32xf32> to vector<2x32xf32>
    %280 = arith.mulf %198, %279 : vector<2x32xf32>
    %cst_124 = arith.constant dense<0.000000e+00> : vector<2xf32>
    %281 = vector.multi_reduction <add>, %280, %cst_124 [1] : vector<2x32xf32> to vector<2xf32>
    %282 = vector.shape_cast %281 : vector<2xf32> to vector<2x1xf32>
    %283 = vector.broadcast %4 : vector<1x1xf32> to vector<2x1xf32>
    %284 = arith.addf %282, %283 : vector<2x1xf32>
    %285 = arith.negf %284 : vector<2x1xf32>
    %286 = math.exp %285 : vector<2x1xf32>
    %cst_125 = arith.constant 1.000000e+00 : f32
    %287 = vector.broadcast %cst_125 : f32 to vector<2x1xf32>
    %288 = arith.addf %287, %286 : vector<2x1xf32>
    %289 = arith.divf %287, %288 : vector<2x1xf32>
    %290 = vector.broadcast %289 : vector<2x1xf32> to vector<2x32xf32>
    %291 = arith.mulf %290, %162 : vector<2x32xf32>
    %cst_126 = arith.constant 1.000000e+00 : f32
    %292 = vector.broadcast %cst_126 : f32 to vector<2x1xf32>
    %293 = arith.subf %292, %289 : vector<2x1xf32>
    %294 = vector.broadcast %293 : vector<2x1xf32> to vector<2x32xf32>
    %295 = arith.mulf %294, %277 : vector<2x32xf32>
    %296 = arith.addf %291, %295 : vector<2x32xf32>
    %297 = vector.extract_strided_slice %5 {offsets = [0, 2, 0], sizes = [2, 1, 32], strides = [1, 1, 1]} : vector<2x3x32xf32> to vector<2x1x32xf32>
    %298 = vector.shape_cast %297 : vector<2x1x32xf32> to vector<2x32xf32>
    %299 = arith.truncf %198 : vector<2x32xf32> to vector<2x32xbf16>
    %c0_127 = arith.constant 0 : index
    %c0_128 = arith.constant 0 : index
    %300 = vector.load %arg5[%c0_127, %c0_128] : memref<224x32xbf16, #tpu.memory_space<vmem>>, vector<32x32xbf16>
    %cst_129 = arith.constant dense<0.000000e+00> : vector<2x32xf32>
    %301 = tpu.matmul %299, %300, %cst_129 {dimension_numbers = #tpu.dot_dimension_numbers<[1], [0], [0], [1], [0, 0, 1, 1], [], []>} : vector<2x32xbf16>, vector<32x32xbf16>, vector<2x32xf32> -> vector<2x32xf32>
    %302 = arith.truncf %298 : vector<2x32xf32> to vector<2x32xbf16>
    %c32_130 = arith.constant 32 : index
    %c0_131 = arith.constant 0 : index
    %303 = vector.load %arg5[%c32_130, %c0_131] : memref<224x32xbf16, #tpu.memory_space<vmem>>, vector<32x32xbf16>
    %cst_132 = arith.constant dense<0.000000e+00> : vector<2x32xf32>
    %304 = tpu.matmul %302, %303, %cst_132 {dimension_numbers = #tpu.dot_dimension_numbers<[1], [0], [0], [1], [0, 0, 1, 1], [], []>} : vector<2x32xbf16>, vector<32x32xbf16>, vector<2x32xf32> -> vector<2x32xf32>
    %305 = arith.addf %301, %304 : vector<2x32xf32>
    %306 = vector.extract_strided_slice %0 {offsets = [0, 0], sizes = [1, 32], strides = [1, 1]} : vector<8x32xf32> to vector<1x32xf32>
    %307 = vector.broadcast %306 : vector<1x32xf32> to vector<2x32xf32>
    %308 = arith.addf %305, %307 : vector<2x32xf32>
    %309 = vector.extract_strided_slice %0 {offsets = [1, 0], sizes = [1, 32], strides = [1, 1]} : vector<8x32xf32> to vector<1x32xf32>
    %310 = vector.broadcast %309 : vector<1x32xf32> to vector<2x32xf32>
    %311 = arith.mulf %308, %310 : vector<2x32xf32>
    %312 = vector.shape_cast %311 : vector<2x32xf32> to vector<2x1x32xf32>
    %c0_133 = arith.constant 0 : index
    %c0_134 = arith.constant 0 : index
    %c0_135 = arith.constant 0 : index
    %313 = vector.load %arg1[%c0_133, %c0_134, %c0_135] : memref<2x8x32xbf16, #tpu.memory_space<vmem>>, vector<2x8x32xbf16>
    %314 = arith.extf %313 : vector<2x8x32xbf16> to vector<2x8x32xf32>
    %315 = vector.broadcast %312 : vector<2x1x32xf32> to vector<2x8x32xf32>
    %316 = arith.mulf %314, %315 : vector<2x8x32xf32>
    %cst_136 = arith.constant dense<0.000000e+00> : vector<2x8xf32>
    %317 = vector.multi_reduction <add>, %316, %cst_136 [2] : vector<2x8x32xf32> to vector<2x8xf32>
    %318 = vector.shape_cast %317 : vector<2x8xf32> to vector<2x8x1xf32>
    %cst_137 = arith.constant dense<0xFF800000> : vector<2x1xf32>
    %319 = vector.multi_reduction <maximumf>, %318, %cst_137 [1] : vector<2x8x1xf32> to vector<2x1xf32>
    %320 = vector.shape_cast %319 : vector<2x1xf32> to vector<2x1x1xf32>
    %321 = vector.broadcast %320 : vector<2x1x1xf32> to vector<2x8x1xf32>
    %322 = arith.subf %318, %321 : vector<2x8x1xf32>
    %323 = math.exp %322 : vector<2x8x1xf32>
    %cst_138 = arith.constant dense<0.000000e+00> : vector<2x1xf32>
    %324 = vector.multi_reduction <add>, %323, %cst_138 [1] : vector<2x8x1xf32> to vector<2x1xf32>
    %325 = vector.shape_cast %324 : vector<2x1xf32> to vector<2x1x1xf32>
    %326 = vector.broadcast %325 : vector<2x1x1xf32> to vector<2x8x1xf32>
    %327 = arith.divf %323, %326 : vector<2x8x1xf32>
    %c0_139 = arith.constant 0 : index
    %c0_140 = arith.constant 0 : index
    %c0_141 = arith.constant 0 : index
    %328 = vector.load %arg1[%c0_139, %c0_140, %c0_141] : memref<2x8x32xbf16, #tpu.memory_space<vmem>>, vector<2x8x32xbf16>
    %329 = arith.extf %328 : vector<2x8x32xbf16> to vector<2x8x32xf32>
    %330 = vector.broadcast %327 : vector<2x8x1xf32> to vector<2x8x32xf32>
    %331 = arith.mulf %330, %329 : vector<2x8x32xf32>
    %cst_142 = arith.constant dense<0.000000e+00> : vector<2x32xf32>
    %332 = vector.multi_reduction <add>, %331, %cst_142 [1] : vector<2x8x32xf32> to vector<2x32xf32>
    %333 = arith.truncf %296 : vector<2x32xf32> to vector<2x32xbf16>
    %c64_143 = arith.constant 64 : index
    %c0_144 = arith.constant 0 : index
    %334 = vector.load %arg5[%c64_143, %c0_144] : memref<224x32xbf16, #tpu.memory_space<vmem>>, vector<32x32xbf16>
    %cst_145 = arith.constant dense<0.000000e+00> : vector<2x32xf32>
    %335 = tpu.matmul %333, %334, %cst_145 {dimension_numbers = #tpu.dot_dimension_numbers<[1], [0], [0], [1], [0, 0, 1, 1], [], []>} : vector<2x32xbf16>, vector<32x32xbf16>, vector<2x32xf32> -> vector<2x32xf32>
    %336 = vector.extract_strided_slice %0 {offsets = [2, 0], sizes = [1, 32], strides = [1, 1]} : vector<8x32xf32> to vector<1x32xf32>
    %337 = vector.broadcast %336 : vector<1x32xf32> to vector<2x32xf32>
    %338 = arith.addf %335, %337 : vector<2x32xf32>
    %339 = arith.truncf %338 : vector<2x32xf32> to vector<2x32xbf16>
    %340 = vector.extract_strided_slice %0 {offsets = [4, 0], sizes = [1, 32], strides = [1, 1]} : vector<8x32xf32> to vector<1x32xf32>
    %341 = vector.broadcast %340 : vector<1x32xf32> to vector<2x32xf32>
    %342 = arith.mulf %332, %341 : vector<2x32xf32>
    %c0_146 = arith.constant 0 : index
    %c0_147 = arith.constant 0 : index
    %c0_148 = arith.constant 0 : index
    %343 = vector.load %arg4[%c0_146, %c0_147, %c0_148] : memref<2x16x32xbf16, #tpu.memory_space<vmem>>, vector<1x16x32xbf16>
    %344 = vector.shape_cast %343 : vector<1x16x32xbf16> to vector<16x32xbf16>
    %345 = vector.extract_strided_slice %339 {offsets = [0, 0], sizes = [1, 32], strides = [1, 1]} : vector<2x32xbf16> to vector<1x32xbf16>
    %346 = vector.broadcast %345 : vector<1x32xbf16> to vector<16x32xbf16>
    %347 = arith.mulf %344, %346 : vector<16x32xbf16>
    %c96_149 = arith.constant 96 : index
    %c0_150 = arith.constant 0 : index
    %348 = vector.load %arg5[%c96_149, %c0_150] : memref<224x32xbf16, #tpu.memory_space<vmem>>, vector<32x32xbf16>
    %cst_151 = arith.constant dense<0.000000e+00> : vector<16x32xf32>
    %349 = tpu.matmul %347, %348, %cst_151 {dimension_numbers = #tpu.dot_dimension_numbers<[1], [0], [0], [1], [0, 0, 1, 1], [], []>} : vector<16x32xbf16>, vector<32x32xbf16>, vector<16x32xf32> -> vector<16x32xf32>
    %c0_152 = arith.constant 0 : index
    %c0_153 = arith.constant 0 : index
    %c0_154 = arith.constant 0 : index
    %350 = vector.load %arg9[%c0_152, %c0_153, %c0_154] : memref<2x16x32xf32, #tpu.memory_space<vmem>>, vector<1x16x32xf32>
    %351 = vector.shape_cast %350 : vector<1x16x32xf32> to vector<16x32xf32>
    %352 = arith.addf %349, %351 : vector<16x32xf32>
    %353 = vector.extract_strided_slice %342 {offsets = [0, 0], sizes = [1, 32], strides = [1, 1]} : vector<2x32xf32> to vector<1x32xf32>
    %354 = vector.broadcast %353 : vector<1x32xf32> to vector<16x32xf32>
    %355 = arith.mulf %352, %354 : vector<16x32xf32>
    %cst_155 = arith.constant dense<0.000000e+00> : vector<16xf32>
    %356 = vector.multi_reduction <add>, %355, %cst_155 [1] : vector<16x32xf32> to vector<16xf32>
    %357 = vector.shape_cast %356 : vector<16xf32> to vector<16x1xf32>
    %cst_156 = arith.constant dense<0xFF800000> : vector<1xf32>
    %358 = vector.multi_reduction <maximumf>, %357, %cst_156 [0] : vector<16x1xf32> to vector<1xf32>
    %359 = vector.shape_cast %358 : vector<1xf32> to vector<1x1xf32>
    %360 = vector.broadcast %359 : vector<1x1xf32> to vector<16x1xf32>
    %361 = arith.subf %357, %360 : vector<16x1xf32>
    %362 = math.exp %361 : vector<16x1xf32>
    %cst_157 = arith.constant dense<0.000000e+00> : vector<1xf32>
    %363 = vector.multi_reduction <add>, %362, %cst_157 [0] : vector<16x1xf32> to vector<1xf32>
    %364 = vector.shape_cast %363 : vector<1xf32> to vector<1x1xf32>
    %365 = vector.broadcast %364 : vector<1x1xf32> to vector<16x1xf32>
    %366 = arith.divf %362, %365 : vector<16x1xf32>
    %367 = arith.extf %344 : vector<16x32xbf16> to vector<16x32xf32>
    %368 = vector.broadcast %366 : vector<16x1xf32> to vector<16x32xf32>
    %369 = arith.mulf %368, %367 : vector<16x32xf32>
    %cst_158 = arith.constant dense<0.000000e+00> : vector<32xf32>
    %370 = vector.multi_reduction <add>, %369, %cst_158 [0] : vector<16x32xf32> to vector<32xf32>
    %371 = vector.shape_cast %370 : vector<32xf32> to vector<1x32xf32>
    %c1_159 = arith.constant 1 : index
    %c0_160 = arith.constant 0 : index
    %c0_161 = arith.constant 0 : index
    %372 = vector.load %arg4[%c1_159, %c0_160, %c0_161] : memref<2x16x32xbf16, #tpu.memory_space<vmem>>, vector<1x16x32xbf16>
    %373 = vector.shape_cast %372 : vector<1x16x32xbf16> to vector<16x32xbf16>
    %374 = vector.extract_strided_slice %339 {offsets = [1, 0], sizes = [1, 32], strides = [1, 1]} : vector<2x32xbf16> to vector<1x32xbf16>
    %375 = vector.broadcast %374 : vector<1x32xbf16> to vector<16x32xbf16>
    %376 = arith.mulf %373, %375 : vector<16x32xbf16>
    %c96_162 = arith.constant 96 : index
    %c0_163 = arith.constant 0 : index
    %377 = vector.load %arg5[%c96_162, %c0_163] : memref<224x32xbf16, #tpu.memory_space<vmem>>, vector<32x32xbf16>
    %cst_164 = arith.constant dense<0.000000e+00> : vector<16x32xf32>
    %378 = tpu.matmul %376, %377, %cst_164 {dimension_numbers = #tpu.dot_dimension_numbers<[1], [0], [0], [1], [0, 0, 1, 1], [], []>} : vector<16x32xbf16>, vector<32x32xbf16>, vector<16x32xf32> -> vector<16x32xf32>
    %c1_165 = arith.constant 1 : index
    %c0_166 = arith.constant 0 : index
    %c0_167 = arith.constant 0 : index
    %379 = vector.load %arg9[%c1_165, %c0_166, %c0_167] : memref<2x16x32xf32, #tpu.memory_space<vmem>>, vector<1x16x32xf32>
    %380 = vector.shape_cast %379 : vector<1x16x32xf32> to vector<16x32xf32>
    %381 = arith.addf %378, %380 : vector<16x32xf32>
    %382 = vector.extract_strided_slice %342 {offsets = [1, 0], sizes = [1, 32], strides = [1, 1]} : vector<2x32xf32> to vector<1x32xf32>
    %383 = vector.broadcast %382 : vector<1x32xf32> to vector<16x32xf32>
    %384 = arith.mulf %381, %383 : vector<16x32xf32>
    %cst_168 = arith.constant dense<0.000000e+00> : vector<16xf32>
    %385 = vector.multi_reduction <add>, %384, %cst_168 [1] : vector<16x32xf32> to vector<16xf32>
    %386 = vector.shape_cast %385 : vector<16xf32> to vector<16x1xf32>
    %cst_169 = arith.constant dense<0xFF800000> : vector<1xf32>
    %387 = vector.multi_reduction <maximumf>, %386, %cst_169 [0] : vector<16x1xf32> to vector<1xf32>
    %388 = vector.shape_cast %387 : vector<1xf32> to vector<1x1xf32>
    %389 = vector.broadcast %388 : vector<1x1xf32> to vector<16x1xf32>
    %390 = arith.subf %386, %389 : vector<16x1xf32>
    %391 = math.exp %390 : vector<16x1xf32>
    %cst_170 = arith.constant dense<0.000000e+00> : vector<1xf32>
    %392 = vector.multi_reduction <add>, %391, %cst_170 [0] : vector<16x1xf32> to vector<1xf32>
    %393 = vector.shape_cast %392 : vector<1xf32> to vector<1x1xf32>
    %394 = vector.broadcast %393 : vector<1x1xf32> to vector<16x1xf32>
    %395 = arith.divf %391, %394 : vector<16x1xf32>
    %396 = arith.extf %373 : vector<16x32xbf16> to vector<16x32xf32>
    %397 = vector.broadcast %395 : vector<16x1xf32> to vector<16x32xf32>
    %398 = arith.mulf %397, %396 : vector<16x32xf32>
    %cst_171 = arith.constant dense<0.000000e+00> : vector<32xf32>
    %399 = vector.multi_reduction <add>, %398, %cst_171 [0] : vector<16x32xf32> to vector<32xf32>
    %400 = vector.shape_cast %399 : vector<32xf32> to vector<1x32xf32>
    %401 = tpu.concatenate %371, %400 in 0 : vector<1x32xf32>, vector<1x32xf32> -> vector<2x32xf32>
    %402 = arith.truncf %401 : vector<2x32xf32> to vector<2x32xbf16>
    %c160_172 = arith.constant 160 : index
    %c0_173 = arith.constant 0 : index
    %403 = vector.load %arg5[%c160_172, %c0_173] : memref<224x32xbf16, #tpu.memory_space<vmem>>, vector<32x32xbf16>
    %cst_174 = arith.constant dense<0.000000e+00> : vector<2x32xf32>
    %404 = tpu.matmul %402, %403, %cst_174 {dimension_numbers = #tpu.dot_dimension_numbers<[1], [0], [0], [1], [0, 0, 1, 1], [], []>} : vector<2x32xbf16>, vector<32x32xbf16>, vector<2x32xf32> -> vector<2x32xf32>
    %405 = arith.truncf %296 : vector<2x32xf32> to vector<2x32xbf16>
    %c192_175 = arith.constant 192 : index
    %c0_176 = arith.constant 0 : index
    %406 = vector.load %arg5[%c192_175, %c0_176] : memref<224x32xbf16, #tpu.memory_space<vmem>>, vector<32x32xbf16>
    %cst_177 = arith.constant dense<0.000000e+00> : vector<2x32xf32>
    %407 = tpu.matmul %405, %406, %cst_177 {dimension_numbers = #tpu.dot_dimension_numbers<[1], [0], [0], [1], [0, 0, 1, 1], [], []>} : vector<2x32xbf16>, vector<32x32xbf16>, vector<2x32xf32> -> vector<2x32xf32>
    %408 = arith.addf %404, %407 : vector<2x32xf32>
    %409 = vector.extract_strided_slice %0 {offsets = [5, 0], sizes = [1, 32], strides = [1, 1]} : vector<8x32xf32> to vector<1x32xf32>
    %410 = vector.broadcast %409 : vector<1x32xf32> to vector<2x32xf32>
    %411 = arith.addf %408, %410 : vector<2x32xf32>
    %412 = vector.extract_strided_slice %0 {offsets = [6, 0], sizes = [1, 32], strides = [1, 1]} : vector<8x32xf32> to vector<1x32xf32>
    %413 = vector.broadcast %412 : vector<1x32xf32> to vector<2x32xf32>
    %414 = arith.mulf %332, %413 : vector<2x32xf32>
    %cst_178 = arith.constant dense<0.000000e+00> : vector<2xf32>
    %415 = vector.multi_reduction <add>, %414, %cst_178 [1] : vector<2x32xf32> to vector<2xf32>
    %416 = vector.shape_cast %415 : vector<2xf32> to vector<2x1xf32>
    %417 = vector.broadcast %4 : vector<1x1xf32> to vector<2x1xf32>
    %418 = arith.addf %416, %417 : vector<2x1xf32>
    %419 = arith.negf %418 : vector<2x1xf32>
    %420 = math.exp %419 : vector<2x1xf32>
    %cst_179 = arith.constant 1.000000e+00 : f32
    %421 = vector.broadcast %cst_179 : f32 to vector<2x1xf32>
    %422 = arith.addf %421, %420 : vector<2x1xf32>
    %423 = arith.divf %421, %422 : vector<2x1xf32>
    %424 = vector.broadcast %423 : vector<2x1xf32> to vector<2x32xf32>
    %425 = arith.mulf %424, %296 : vector<2x32xf32>
    %cst_180 = arith.constant 1.000000e+00 : f32
    %426 = vector.broadcast %cst_180 : f32 to vector<2x1xf32>
    %427 = arith.subf %426, %423 : vector<2x1xf32>
    %428 = vector.broadcast %427 : vector<2x1xf32> to vector<2x32xf32>
    %429 = arith.mulf %428, %411 : vector<2x32xf32>
    %430 = arith.addf %425, %429 : vector<2x32xf32>
    %c0_181 = arith.constant 0 : index
    %c0_182 = arith.constant 0 : index
    %431 = vector.load %arg8[%c0_181, %c0_182] : memref<2x32xf32, #tpu.memory_space<vmem>>, vector<2x32xf32>
    tpu.vector_store %arg8[%c0_181, %c0_182], %430 {strides = array<i32>} : memref<2x32xf32, #tpu.memory_space<vmem>>, vector<2x32xf32>,
    return
  }
  func.func @transform_0(%arg0: i32) -> (i32, i32, i32) {
    %c0_i32 = arith.constant 0 : i32
    %c0_i32_0 = arith.constant 0 : i32
    %c0_i32_1 = arith.constant 0 : i32
    return %arg0, %c0_i32, %c0_i32_0 : i32, i32, i32
  }
  func.func @transform_1(%arg0: i32) -> (i32, i32) {
    %c0_i32 = arith.constant 0 : i32
    %c0_i32_0 = arith.constant 0 : i32
    return %arg0, %c0_i32 : i32, i32
  }
  func.func @transform_2(%arg0: i32) -> (i32, i32, i32) {
    %c0_i32 = arith.constant 0 : i32
    %c0_i32_0 = arith.constant 0 : i32
    %c0_i32_1 = arith.constant 0 : i32
    return %arg0, %c0_i32, %c0_i32_0 : i32, i32, i32
  }
  func.func @transform_3(%arg0: i32) -> (i32, i32, i32) {
    %c0_i32 = arith.constant 0 : i32
    %c0_i32_0 = arith.constant 0 : i32
    %c0_i32_1 = arith.constant 0 : i32
    return %arg0, %c0_i32, %c0_i32_0 : i32, i32, i32
  }
  func.func @transform_4(%arg0: i32) -> (i32, i32) {
    %c0_i32 = arith.constant 0 : i32
    %c0_i32_0 = arith.constant 0 : i32
    %c0_i32_1 = arith.constant 0 : i32
    return %c0_i32, %c0_i32_0 : i32, i32
  }
  func.func @transform_5(%arg0: i32) -> (i32, i32) {
    %c0_i32 = arith.constant 0 : i32
    %c0_i32_0 = arith.constant 0 : i32
    %c0_i32_1 = arith.constant 0 : i32
    return %c0_i32, %c0_i32_0 : i32, i32
  }
  func.func @transform_6(%arg0: i32) -> (i32, i32) {
    %c0_i32 = arith.constant 0 : i32
    %c0_i32_0 = arith.constant 0 : i32
    %c0_i32_1 = arith.constant 0 : i32
    return %c0_i32, %c0_i32_0 : i32, i32
  }
  func.func @transform_7(%arg0: i32) -> (i32, i32) {
    %c0_i32 = arith.constant 0 : i32
    %c0_i32_0 = arith.constant 0 : i32
    return %arg0, %c0_i32 : i32, i32
  }
}

module attributes {stable_mosaic.version = 11 : i64} {
  func.func @_matmul2_small_kernel(%arg0: memref<2x128xbf16, #tpu.memory_space<vmem>>, %arg1: memref<128x128xbf16, #tpu.memory_space<vmem>>, %arg2: memref<2x128xbf16, #tpu.memory_space<vmem>>, %arg3: memref<128x128xbf16, #tpu.memory_space<vmem>>, %arg4: memref<1x128xf32, #tpu.memory_space<vmem>>, %arg5: memref<2x128xf32, #tpu.memory_space<vmem>>) attributes {dimension_semantics = [], scalar_prefetch = 0 : i64, scratch_operands = 0 : i64, tpu.core_type = #tpu.core_type<tc>} {
    %c0 = arith.constant 0 : index
    %c0_0 = arith.constant 0 : index
    %0 = vector.load %arg0[%c0, %c0_0] : memref<2x128xbf16, #tpu.memory_space<vmem>>, vector<2x128xbf16>
    %c0_1 = arith.constant 0 : index
    %c0_2 = arith.constant 0 : index
    %1 = vector.load %arg1[%c0_1, %c0_2] : memref<128x128xbf16, #tpu.memory_space<vmem>>, vector<128x128xbf16>
    %cst = arith.constant dense<0.000000e+00> : vector<2x128xf32>
    %2 = tpu.matmul %0, %1, %cst {dimension_numbers = #tpu.dot_dimension_numbers<[1], [0], [0], [1], [0, 0, 1, 1], [], []>} : vector<2x128xbf16>, vector<128x128xbf16>, vector<2x128xf32> -> vector<2x128xf32>
    %c0_3 = arith.constant 0 : index
    %c0_4 = arith.constant 0 : index
    %3 = vector.load %arg2[%c0_3, %c0_4] : memref<2x128xbf16, #tpu.memory_space<vmem>>, vector<2x128xbf16>
    %c0_5 = arith.constant 0 : index
    %c0_6 = arith.constant 0 : index
    %4 = vector.load %arg3[%c0_5, %c0_6] : memref<128x128xbf16, #tpu.memory_space<vmem>>, vector<128x128xbf16>
    %cst_7 = arith.constant dense<0.000000e+00> : vector<2x128xf32>
    %5 = tpu.matmul %3, %4, %cst_7 {dimension_numbers = #tpu.dot_dimension_numbers<[1], [0], [0], [1], [0, 0, 1, 1], [], []>} : vector<2x128xbf16>, vector<128x128xbf16>, vector<2x128xf32> -> vector<2x128xf32>
    %6 = arith.addf %2, %5 : vector<2x128xf32>
    %c0_8 = arith.constant 0 : index
    %c0_9 = arith.constant 0 : index
    %7 = vector.load %arg4[%c0_8, %c0_9] : memref<1x128xf32, #tpu.memory_space<vmem>>, vector<1x128xf32>
    %8 = vector.broadcast %7 : vector<1x128xf32> to vector<2x128xf32>
    %9 = arith.addf %6, %8 : vector<2x128xf32>
    %cst_10 = arith.constant 0.000000e+00 : f32
    %10 = vector.broadcast %cst_10 : f32 to vector<2x128xf32>
    %11 = arith.cmpf ogt, %9, %10 : vector<2x128xf32>
    %cst_11 = arith.constant 0.000000e+00 : f32
    %12 = vector.broadcast %cst_11 : f32 to vector<2x128xf32>
    %13 = arith.minimumf %9, %12 : vector<2x128xf32>
    %14 = math.exp %13 : vector<2x128xf32>
    %cst_12 = arith.constant 1.000000e+00 : f32
    %15 = vector.broadcast %cst_12 : f32 to vector<2x128xf32>
    %16 = arith.subf %14, %15 : vector<2x128xf32>
    %17 = arith.select %11, %9, %16 : vector<2x128xi1>, vector<2x128xf32>
    %c0_13 = arith.constant 0 : index
    %c0_14 = arith.constant 0 : index
    %18 = vector.load %arg5[%c0_13, %c0_14] : memref<2x128xf32, #tpu.memory_space<vmem>>, vector<2x128xf32>
    tpu.vector_store %arg5[%c0_13, %c0_14], %17 {strides = array<i32>} : memref<2x128xf32, #tpu.memory_space<vmem>>, vector<2x128xf32>,
    return
  }
}

module attributes {stable_mosaic.version = 11 : i64} {
  func.func @_matmul_small_kernel(%arg0: memref<2x128xbf16, #tpu.memory_space<vmem>>, %arg1: memref<128x128xbf16, #tpu.memory_space<vmem>>, %arg2: memref<1x128xf32, #tpu.memory_space<vmem>>, %arg3: memref<2x128xf32, #tpu.memory_space<vmem>>) attributes {dimension_semantics = [], scalar_prefetch = 0 : i64, scratch_operands = 0 : i64, tpu.core_type = #tpu.core_type<tc>} {
    %c0 = arith.constant 0 : index
    %c0_0 = arith.constant 0 : index
    %0 = vector.load %arg0[%c0, %c0_0] : memref<2x128xbf16, #tpu.memory_space<vmem>>, vector<2x128xbf16>
    %c0_1 = arith.constant 0 : index
    %c0_2 = arith.constant 0 : index
    %1 = vector.load %arg1[%c0_1, %c0_2] : memref<128x128xbf16, #tpu.memory_space<vmem>>, vector<128x128xbf16>
    %cst = arith.constant dense<0.000000e+00> : vector<2x128xf32>
    %2 = tpu.matmul %0, %1, %cst {dimension_numbers = #tpu.dot_dimension_numbers<[1], [0], [0], [1], [0, 0, 1, 1], [], []>} : vector<2x128xbf16>, vector<128x128xbf16>, vector<2x128xf32> -> vector<2x128xf32>
    %c0_3 = arith.constant 0 : index
    %c0_4 = arith.constant 0 : index
    %3 = vector.load %arg2[%c0_3, %c0_4] : memref<1x128xf32, #tpu.memory_space<vmem>>, vector<1x128xf32>
    %4 = vector.broadcast %3 : vector<1x128xf32> to vector<2x128xf32>
    %5 = arith.addf %2, %4 : vector<2x128xf32>
    %c0_5 = arith.constant 0 : index
    %c0_6 = arith.constant 0 : index
    %6 = vector.load %arg3[%c0_5, %c0_6] : memref<2x128xf32, #tpu.memory_space<vmem>>, vector<2x128xf32>
    tpu.vector_store %arg3[%c0_5, %c0_6], %5 {strides = array<i32>} : memref<2x128xf32, #tpu.memory_space<vmem>>, vector<2x128xf32>,
    return
  }
}

</mosaic_0001>

<bundles_post_ra>
// kernel: original_mac_forward.12
= control target key start
LH: loop header
LB: loop body
LE: loop exit
PB: predicated region body
PF: predicated region fallthrough
CT: control target
= control target key end

     0   :  { %v191_v0 = vmov 0.0   ;;  %vm192_vm0 = vmmov 0   ;;  %s249_s1 = inlined_call_operand.vmem [shape: bf16[128,128], index: 1, kind: input, shape index: {}]   ;;  %s250_s0 = inlined_call_operand.vmem [shape: bf16[16,128], index: 0, kind: input, shape index: {}]   ;;  %s251_s2 = inlined_call_operand.vmem [shape: f32[1,128], index: 2, kind: input, shape index: {}]   ;;  %s252_s3 = inlined_call_operand.vmem [shape: f32[16,128], index: 3, kind: output, shape index: {}]  }
   0x1   :  { %160 = vmatprep.subr.bf16.mxu0 %v191_v0  ;;  %v182_v1 = vld [vmem:[%s249_s1] sm:$0xff]   ;;  %176 = vmatprep.mubr.msk.bf16.mxu0 %vm192_vm0, %v191_v0  ;;  %v183_v2 = vld [vmem:[%s249_s1 + $0x8] sm:$0xff]   ;;  %v184_v3 = vld [vmem:[%s249_s1 + $0x10] sm:$0xff]  }
   0x2   :  { %161 = vmatpush3.bf16.msra.mxu0 %v182_v1  ;;  %v185_v4 = vld [vmem:[%s249_s1 + $0x18] sm:$0xff]   ;;  %v186_v5 = vld [vmem:[%s249_s1 + $0x20] sm:$0xff]   ;;  %v187_v6 = vld [vmem:[%s249_s1 + $0x28] sm:$0xff]  }
   0x3   :  { %162 = vmatprep.subr.bf16.mxu0 %v191_v0  ;;  %v188_v7 = vld [vmem:[%s249_s1 + $0x30] sm:$0xff]   ;;  %v189_v8 = vld [vmem:[%s249_s1 + $0x38] sm:$0xff]   ;;  %v190_v9 = vld [vmem:[%s250_s0] sm:$0xff]  }
   0x4   :  { %v141_v10 = vld [vmem:[%s251_s2] ss:$0 sm:$0xff] }
   0x6   :  { %163 = vmatpush3.bf16.msra.mxu0 %v183_v2 }
   0x7   :  { %164 = vmatprep.subr.bf16.mxu0 %v191_v0 }
   0xa   :  { %165 = vmatpush3.bf16.msra.mxu0 %v184_v3 }
   0xb   :  { %166 = vmatprep.subr.bf16.mxu0 %v191_v0 }
   0xe   :  { %167 = vmatpush3.bf16.msra.mxu0 %v185_v4 }
   0xf   :  { %168 = vmatprep.subr.bf16.mxu0 %v191_v0 }
  0x12   :  { %169 = vmatpush3.bf16.msra.mxu0 %v186_v5 }
  0x13   :  { %170 = vmatprep.subr.bf16.mxu0 %v191_v0 }
  0x16   :  { %171 = vmatpush3.bf16.msra.mxu0 %v187_v6 }
  0x17   :  { %172 = vmatprep.subr.bf16.mxu0 %v191_v0 }
  0x1a   :  { %173 = vmatpush3.bf16.msra.mxu0 %v188_v7 }
  0x1b   :  { %174 = vmatprep.subr.bf16.mxu0 %v191_v0 }
  0x1e   :  { %175 = vmatpush3.bf16.msra.mxu0 %v189_v8 }
  0x21   :  { %177 = vmatmul.mubr.bf16.vlgmr.msra.gmra.mrb[0].mxu0 %v190_v9 }
  0xf4   :  { %v128_v11 = vpop.f32.mrb[0].mxu0 }
  0xf5   :  { %v129_v12 = vadd.f32 %v141_v10, %v128_v11  ;;  %v178_v13 = vpop.f32.mrb[1].mxu0 }
  0xf6   :  { %v131_v14 = vpop.f32.mrb[2].mxu0 }
  0xf7   :  { %135 = vst [vmem:[%s252_s3] sm:$0xff] %v129_v12  ;;  %v132_v15 = vadd.f32 %v141_v10, %v131_v14  ;;  %v179_v16 = vpop.f32.mrb[3].mxu0 }
  0xf9   :  { %136 = vst [vmem:[%s252_s3 + $0x8] sm:$0xff] %v132_v15 }

// kernel: original_mac_forward.15
= control target key start
LH: loop header
LB: loop body
LE: loop exit
PB: predicated region body
PF: predicated region fallthrough
CT: control target
= control target key end

     0   :  { %v285_v0 = vmov 0.0   ;;  %v287_v1 = vmov 0.0   ;;  %s289_s15 = smov 0   ;;  %s331_s0 = inlined_call_operand.vmem [shape: f32[8,2,64], index: 0, kind: input, shape index: {}]   ;;  %s332_s1 = inlined_call_operand.vmem [shape: bf16[16,64], index: 1, kind: input, shape index: {}]   ;;  %s333_s2 = inlined_call_operand.vmem [shape: s32[2,1], index: 2, kind: input, shape index: {}]   ;;  %s334_s3 = inlined_call_operand.vmem [shape: bf16[8,2,16], index: 3, kind: output, shape index: {0}]   ;;  %s335_s4 = inlined_call_operand.vmem [shape: f32[2,16], index: 4, kind: output, shape index: {1}]  }
   0x1 LB: > { %v251_v2 = vmov 0.0   ;;  %v218_v3 = vld [vmem:[%s332_s1] sm:$0xff]   ;;  %v29_v4 = vpack.c.bf16 %v245_v1, %v245_v1  ;;  %vm252_vm0 = vmmov 0   ;;  %s253_s18 = smov 80   ;;  %vm41_vm1 = vcmask 130048   ;;  %s305_s19 = ssub.s32 7, %s249_s15  ;;  %s249_s15 = sphi %s289_s15, %s22_s15   ;;  %v245_v1 = vphi %v287_v1, %v336_v1   ;;  %v241_v0 = vphi %v285_v0, %v142_v0  }
   0x2   : > { %177 = vmatprep.subr.bf16.mxu0 %v251_v2  ;;  %179 = vmatprep.mubr.msk.bf16.mxu0 %vm252_vm0, %v251_v2  ;;  %s171_s20 = sshll.u32 %s305_s19, 1  ;;  %v254_v12 = vmov 0   ;;  %s255_s24 = smov 96   ;;  %v110_v17 = vld [vmem:[%s333_s2] sm:$0x3]  ;;  %v111_v18 = vstv %s305_s19  ;;  %v124_v30 = vlaneseq  ;;  %vm139_vm4 = vcmask 122880  }
   0x3   : > { %178 = vmatpush3.bf16.msra.mxu0 %v218_v3  ;;  %33 = vrot.lane.b32.xlu0 %v29_v4, %s253_s18  ;;  %s27_s23 = scalar_lea.vmem %s331_s0, %s171_s20  ;;  %vm112_vm2 = vcmp.lt.s32.totalorder %v111_v18, %v110_v17  ;;  %s256_s27 = smov 16   ;;  %v258_v28 = vmov 1966171168  }
   0x4   : > { %v28_v6 = vld [vmem:[%s27_s23] sm:$0x3]  ;;  %216 = vset.pattern.permute.xlu1 %v254_v12  ;;  %217 = vset.pattern.permute.xlu0 %v254_v12  ;;  %v113_v22 = vsel %vm112_vm2, 1, %v254_v12  ;;  %s257_s28 = smov 32   ;;  %v122_v29 = vunpack.c.l.s4 %v258_v28  ;;  %v125_v32 = vshrl.u32 %v124_v30, 7  ;;  %s138_s5 = scalar_lea.vmem %s334_s3, %s305_s19 }
   0x5   : > { %s22_s15 = sadd.s32 1, %s249_s15  }
   0x6   : > { %v123_v31 = vunpack.c.0.s8 %v122_v29  ;;  %p19_p0 = scmp.ge.s32.totalorder %s22_s15, 8  }
   0x7   :  { %s259_s6 = smov (%p19_p0), 80   ;;  %vm147_vm5 = vcmask (%p19_p0), 123904  }
   0x8   : > { %v126_v35 = vsub.s32 %v123_v31, %v125_v32 }
  0x75   : > { %v34_v5 = vpop.permute.xlu0 %33 }
  0x76   : > { %180 = vmatmul.mubr.msk.bf16.vlgmr.msra.gmra.mrb[0].mxu0 %vm41_vm1, %v34_v5 }
 0x149   : > { %v79_v7 = vpop.f32.mrb[0].mxu0 }
 0x14a   : > { %v85_v8 = vadd.f32 %v79_v7, %v28_v6  ;;  %v181_v9 = vpop.f32.mrb[1].mxu0 }
 0x14b   : > { %v82_v10 = vpop.f32.mrb[2].mxu0 }
 0x14c   : > { %219 = vtanh.f32 %v85_v8  ;;  %v182_v11 = vpop.f32.mrb[3].mxu0  ;;  %v174_v14 = vmul.f32 -1.442695, %v85_v8 }
 0x14e   : > { %221 = vpow2.f32 %v174_v14 }
 0x156   : > { %v220_v13 = vpop.eup %219 }
 0x157   : > { %95 = vrot.lane.b32.xlu0 %v220_v13, %s255_s24 }
 0x158   : > { %v222_v15 = vpop.eup %221 }
 0x159   : > { %v89_v16 = vadd.f32 1.0, %v222_v15 }
 0x15b   : > { %223 = vrcp.f32 %v89_v16 }
 0x165   : > { %v224_v19 = vpop.eup %223 }
 0x166   : > { %v93_v23 = vmul.f32 %v241_v0, %v224_v19 }
 0x1c9   : > { %v96_v20 = vpop.permute.xlu0 %95 }
 0x1ca   : > { %v98_v21 = vmul.f32 %v224_v19, %v96_v20 }
 0x1cc   : > { %100 = vrot.lane.b32.xlu1 %v98_v21, %s256_s27 }
 0x1d0   : > { %115 = vperm.xlu1 %216, %v113_v22  }
 0x23e   : > { %v101_v24 = vpop.permute.xlu1 %100 }
 0x23f   : > { %v103_v25 = vadd.f32 %v101_v24, %v93_v23 }
 0x241   : > { %225 = vtanh.f32 %v103_v25 }
 0x24b   : > { %v226_v26 = vpop.eup %225 }
 0x24c   : > { %106 = vrot.lane.b32.xlu0 %v226_v26, %s257_s28 }
 0x24f   : > { %v116_v27 = vpop.permute.xlu1 %115 }
 0x250   : > { %vm117_vm3 = vcmp.eq.s32.totalorder %v116_v27, 1 }
 0x251   : > { %v142_v0 = vsel %vm117_vm3, %v103_v25, %v241_v0  }
 0x2be   : > { %v107_v33 = vpop.permute.xlu0 %106 }
 0x2bf   : > { %v109_v34 = vmul.f32 %v224_v19, %v107_v33 }
 0x2c1   : > { %v118_v36 = vsel %vm117_vm3, %v109_v34, 0.0  ;;  %v141_v37 = vsel %vm117_vm3, %v109_v34, %v245_v1  }
 0x2c2   : > { %v119_v38 = vpack.c.bf16 %v118_v36, %v118_v36  ;;  %v336_v1 = vmov %v141_v37  ;;  %144 = vrot.lane.b32.xlu0 (%p19_p0), %v141_v37, %s259_s6 }
 0x2c4   : > { %v127_v39 = vrot.slane %v119_v38, %v126_v35 }
 0x2c6   : > { %v134_v40 = vrot.slane %v127_v39, %v126_v35 }
 0x2c8   : > { %135 = vrot.lane.b32.xlu1 %v134_v40, %s253_s18 }
 0x334   :  { %v145_v42 = vpop.permute.xlu0 (%p19_p0), %144 }
 0x335   :  { %21 = sbr.rel (!%p19_p0) target bundleno = 1 (0x1), region = 49  ;;  %148 = vst.msk [vmem:[%s335_s4] sm:$0x3] (%p19_p0), %vm147_vm5, %v145_v42 }
 0x33a   : > { %v136_v41 = vpop.permute.xlu1 %135 }
 0x33b   : > { %140 = vst.msk [vmem:[%s138_s5] sm:$0x1] %vm139_vm4, %v136_v41 }

// kernel: original_mac_forward.13
= control target key start
LH: loop header
LB: loop body
LE: loop exit
PB: predicated region body
PF: predicated region fallthrough
CT: control target
= control target key end

     0   :  { %v284_v0 = vmov 0.0   ;;  %v286_v1 = vmov 0.0   ;;  %s288_s15 = smov 0   ;;  %s327_s0 = inlined_call_operand.vmem [shape: f32[8,2,64], index: 0, kind: input, shape index: {}]   ;;  %s328_s1 = inlined_call_operand.vmem [shape: bf16[16,64], index: 1, kind: input, shape index: {}]   ;;  %s329_s2 = inlined_call_operand.vmem [shape: s32[2,1], index: 2, kind: input, shape index: {}]   ;;  %s330_s3 = inlined_call_operand.vmem [shape: bf16[8,2,16], index: 3, kind: output, shape index: {0}]   ;;  %s331_s4 = inlined_call_operand.vmem [shape: f32[2,16], index: 4, kind: output, shape index: {1}]  }
   0x1 LB: > { %v250_v2 = vmov 0.0   ;;  %v217_v3 = vld [vmem:[%s328_s1] sm:$0xff]   ;;  %v28_v4 = vpack.c.bf16 %v244_v1, %v244_v1  ;;  %vm251_vm0 = vmmov 0   ;;  %s252_s18 = smov 80   ;;  %vm40_vm1 = vcmask 130048   ;;  %s170_s19 = sshll.u32 %s248_s15, 1  ;;  %s248_s15 = sphi %s288_s15, %s22_s15   ;;  %v244_v1 = vphi %v286_v1, %v332_v1   ;;  %v240_v0 = vphi %v284_v0, %v141_v0  }
   0x2   : > { %176 = vmatprep.subr.bf16.mxu0 %v250_v2  ;;  %178 = vmatprep.mubr.msk.bf16.mxu0 %vm251_vm0, %v250_v2  ;;  %s26_s22 = scalar_lea.vmem %s327_s0, %s170_s19  ;;  %v253_v12 = vmov 0   ;;  %s254_s23 = smov 96   ;;  %v109_v17 = vld [vmem:[%s329_s2] sm:$0x3]  ;;  %v110_v18 = vstv %s248_s15  ;;  %v257_v28 = vmov 1966171168   ;;  %v123_v30 = vlaneseq }
   0x3   : > { %177 = vmatpush3.bf16.msra.mxu0 %v217_v3  ;;  %32 = vrot.lane.b32.xlu0 %v28_v4, %s252_s18  ;;  %v27_v6 = vld [vmem:[%s26_s22] sm:$0x3]  ;;  %vm111_vm2 = vcmp.lt.s32.totalorder %v110_v18, %v109_v17  ;;  %s255_s26 = smov 16   ;;  %s256_s27 = smov 32   ;;  %v121_v29 = vunpack.c.l.s4 %v257_v28  ;;  %vm138_vm4 = vcmask 122880  }
   0x4   : > { %215 = vset.pattern.permute.xlu1 %v253_v12  ;;  %216 = vset.pattern.permute.xlu0 %v253_v12  ;;  %v112_v22 = vsel %vm111_vm2, 1, %v253_v12  ;;  %v124_v32 = vshrl.u32 %v123_v30, 7  ;;  %s137_s30 = scalar_lea.vmem %s330_s3, %s248_s15  ;;  %s22_s15 = sadd.s32 1, %s248_s15  }
   0x5   : > { %v122_v31 = vunpack.c.0.s8 %v121_v29  ;;  %p19_p0 = scmp.ge.s32.totalorder %s22_s15, 8  }
   0x6   :  { %s258_s5 = smov (%p19_p0), 80   ;;  %vm146_vm5 = vcmask (%p19_p0), 123904  }
   0x7   : > { %v125_v35 = vsub.s32 %v122_v31, %v124_v32 }
  0x75   : > { %v33_v5 = vpop.permute.xlu0 %32 }
  0x76   : > { %179 = vmatmul.mubr.msk.bf16.vlgmr.msra.gmra.mrb[0].mxu0 %vm40_vm1, %v33_v5 }
 0x149   : > { %v78_v7 = vpop.f32.mrb[0].mxu0 }
 0x14a   : > { %v84_v8 = vadd.f32 %v78_v7, %v27_v6  ;;  %v180_v9 = vpop.f32.mrb[1].mxu0 }
 0x14b   : > { %v81_v10 = vpop.f32.mrb[2].mxu0 }
 0x14c   : > { %218 = vtanh.f32 %v84_v8  ;;  %v181_v11 = vpop.f32.mrb[3].mxu0  ;;  %v173_v14 = vmul.f32 -1.442695, %v84_v8 }
 0x14e   : > { %220 = vpow2.f32 %v173_v14 }
 0x156   : > { %v219_v13 = vpop.eup %218 }
 0x157   : > { %94 = vrot.lane.b32.xlu0 %v219_v13, %s254_s23 }
 0x158   : > { %v221_v15 = vpop.eup %220 }
 0x159   : > { %v88_v16 = vadd.f32 1.0, %v221_v15 }
 0x15b   : > { %222 = vrcp.f32 %v88_v16 }
 0x165   : > { %v223_v19 = vpop.eup %222 }
 0x166   : > { %v92_v23 = vmul.f32 %v240_v0, %v223_v19 }
 0x1c9   : > { %v95_v20 = vpop.permute.xlu0 %94 }
 0x1ca   : > { %v97_v21 = vmul.f32 %v223_v19, %v95_v20 }
 0x1cc   : > { %99 = vrot.lane.b32.xlu1 %v97_v21, %s255_s26 }
 0x1d0   : > { %114 = vperm.xlu1 %215, %v112_v22  }
 0x23e   : > { %v100_v24 = vpop.permute.xlu1 %99 }
 0x23f   : > { %v102_v25 = vadd.f32 %v100_v24, %v92_v23 }
 0x241   : > { %224 = vtanh.f32 %v102_v25 }
 0x24b   : > { %v225_v26 = vpop.eup %224 }
 0x24c   : > { %105 = vrot.lane.b32.xlu0 %v225_v26, %s256_s27 }
 0x24f   : > { %v115_v27 = vpop.permute.xlu1 %114 }
 0x250   : > { %vm116_vm3 = vcmp.eq.s32.totalorder %v115_v27, 1 }
 0x251   : > { %v141_v0 = vsel %vm116_vm3, %v102_v25, %v240_v0  }
 0x2be   : > { %v106_v33 = vpop.permute.xlu0 %105 }
 0x2bf   : > { %v108_v34 = vmul.f32 %v223_v19, %v106_v33 }
 0x2c1   : > { %v117_v36 = vsel %vm116_vm3, %v108_v34, 0.0  ;;  %v140_v37 = vsel %vm116_vm3, %v108_v34, %v244_v1  }
 0x2c2   : > { %v118_v38 = vpack.c.bf16 %v117_v36, %v117_v36  ;;  %v332_v1 = vmov %v140_v37  ;;  %143 = vrot.lane.b32.xlu0 (%p19_p0), %v140_v37, %s258_s5 }
 0x2c4   : > { %v126_v39 = vrot.slane %v118_v38, %v125_v35 }
 0x2c6   : > { %v133_v40 = vrot.slane %v126_v39, %v125_v35 }
 0x2c8   : > { %134 = vrot.lane.b32.xlu1 %v133_v40, %s252_s18 }
 0x334   :  { %v144_v42 = vpop.permute.xlu0 (%p19_p0), %143 }
 0x335   :  { %21 = sbr.rel (!%p19_p0) target bundleno = 1 (0x1), region = 49  ;;  %147 = vst.msk [vmem:[%s331_s4] sm:$0x3] (%p19_p0), %vm146_vm5, %v144_v42 }
 0x33a   : > { %v135_v41 = vpop.permute.xlu1 %134 }
 0x33b   : > { %139 = vst.msk [vmem:[%s137_s30] sm:$0x1] %vm138_vm4, %v135_v41 }

// kernel: original_mac_forward.16
= control target key start
LH: loop header
LB: loop body
LE: loop exit
PB: predicated region body
PF: predicated region fallthrough
CT: control target
= control target key end

     0   :  { %v180_v0 = vmov 0.0   ;;  %vm181_vm0 = vmmov 0   ;;  %s235_s1 = inlined_call_operand.vmem [shape: bf16[128,128], index: 1, kind: input, shape index: {}]   ;;  %s236_s0 = inlined_call_operand.vmem [shape: bf16[2,128], index: 0, kind: input, shape index: {}]   ;;  %s237_s2 = inlined_call_operand.vmem [shape: f32[1,128], index: 2, kind: input, shape index: {}]   ;;  %s238_s3 = inlined_call_operand.vmem [shape: f32[2,128], index: 3, kind: output, shape index: {}]  }
   0x1   :  { %150 = vmatprep.subr.bf16.mxu0 %v180_v0  ;;  %v172_v1 = vld [vmem:[%s235_s1] sm:$0xff]   ;;  %166 = vmatprep.mubr.msk.bf16.mxu0 %vm181_vm0, %v180_v0  ;;  %v173_v2 = vld [vmem:[%s235_s1 + $0x8] sm:$0xff]   ;;  %v174_v3 = vld [vmem:[%s235_s1 + $0x10] sm:$0xff]  }
   0x2   :  { %151 = vmatpush3.bf16.msra.mxu0 %v172_v1  ;;  %v175_v4 = vld [vmem:[%s235_s1 + $0x18] sm:$0xff]   ;;  %v176_v5 = vld [vmem:[%s235_s1 + $0x20] sm:$0xff]   ;;  %v177_v6 = vld [vmem:[%s235_s1 + $0x28] sm:$0xff]  }
   0x3   :  { %152 = vmatprep.subr.bf16.mxu0 %v180_v0  ;;  %v178_v7 = vld [vmem:[%s235_s1 + $0x30] sm:$0xff]   ;;  %v179_v8 = vld [vmem:[%s235_s1 + $0x38] sm:$0xff]   ;;  %v15_v9 = vld [vmem:[%s236_s0] sm:$0x1] }
   0x4   :  { %v132_v10 = vld [vmem:[%s237_s2] ss:$0 sm:$0xff] }
   0x6   :  { %153 = vmatpush3.bf16.msra.mxu0 %v173_v2 }
   0x7   :  { %154 = vmatprep.subr.bf16.mxu0 %v180_v0 }
   0xa   :  { %155 = vmatpush3.bf16.msra.mxu0 %v174_v3 }
   0xb   :  { %156 = vmatprep.subr.bf16.mxu0 %v180_v0 }
   0xe   :  { %157 = vmatpush3.bf16.msra.mxu0 %v175_v4 }
   0xf   :  { %158 = vmatprep.subr.bf16.mxu0 %v180_v0 }
  0x12   :  { %159 = vmatpush3.bf16.msra.mxu0 %v176_v5 }
  0x13   :  { %160 = vmatprep.subr.bf16.mxu0 %v180_v0 }
  0x16   :  { %161 = vmatpush3.bf16.msra.mxu0 %v177_v6 }
  0x17   :  { %162 = vmatprep.subr.bf16.mxu0 %v180_v0 }
  0x1a   :  { %163 = vmatpush3.bf16.msra.mxu0 %v178_v7 }
  0x1b   :  { %164 = vmatprep.subr.bf16.mxu0 %v180_v0 }
  0x1e   :  { %165 = vmatpush3.bf16.msra.mxu0 %v179_v8 }
  0x21   :  { %167 = vmatmul.mubr.bf16.vlgmr.msra.gmra.mrb[0].mxu0 %v15_v9 }
  0xf4   :  { %v121_v11 = vpop.f32.mrb[0].mxu0 }
  0xf5   :  { %v122_v12 = vadd.f32 %v132_v10, %v121_v11  ;;  %v168_v13 = vpop.f32.mrb[1].mxu0 }
  0xf6   :  { %v124_v14 = vpop.f32.mrb[2].mxu0 }
  0xf7   :  { %127 = vst [vmem:[%s238_s3] sm:$0x3] %v122_v12  ;;  %v169_v15 = vpop.f32.mrb[3].mxu0 }

// kernel: original_mac_forward.11
= control target key start
LH: loop header
LB: loop body
LE: loop exit
PB: predicated region body
PF: predicated region fallthrough
CT: control target
= control target key end

     0   :  { %s2781_s15 = smov 0   ;;  %s2783_s16 = smov 0   ;;  %s3336_s0 = inlined_call_operand.vmem [shape: bf16[2,80,128], index: 0, kind: input, shape index: {}]   ;;  %s3337_s1 = inlined_call_operand.vmem [shape: bf16[9,128,128], index: 1, kind: input, shape index: {}]   ;;  %s3338_s2 = inlined_call_operand.vmem [shape: f32[1,128], index: 2, kind: input, shape index: {}]   ;;  %s3339_s3 = inlined_call_operand.vmem [shape: f32[48,1], index: 3, kind: input, shape index: {}]   ;;  %s3340_s4 = inlined_call_operand.vmem [shape: bf16[2,80,128], index: 4, kind: output, shape index: {}]  }
   0x1   :  { %s2785_s17 = smov 0  }
   0x2 LB: > { %s23_s18 = sadd.s32 1, %s2747_s16  ;;  %p1948_p0 = scmp.ge.s32.totalorder %s2751_s17, 1  ;;  %s2751_s17 = sphi %s2785_s17, %s14_s17   ;;  %s2747_s16 = sphi %s2783_s16, %s3342_s16   ;;  %s2743_s15 = sphi %s2781_s15, %s3341_s15  }
   0x3   : > { %p24_p1 = scmp.ge.s32.totalorder %s23_s18, 2  ;;  %p193_p2 = scmp.lt.s32.totalorder %s2751_s17, 3 }
   0x5   : > { %s3344_s18 = smov (%p24_p1, %s23_s18), 0  ;;  %p194_p3 = pnand %p1948_p0, %p193_p2 }
   0x6   : > { %v2616_v0 = vld [vmem:[%s3337_s1 + $0x40] sm:$0xff] (!%p194_p3)   ;;  %v2753_v1 = vmov (!%p194_p3), 0.0   ;;  %v2618_v3 = vld [vmem:[%s3337_s1 + $0x48] sm:$0xff] (!%p194_p3)   ;;  %vm2754_vm0 = vmmov (!%p194_p3), 0   ;;  %p229_p4 = scmp.lt.s32.totalorder (!%p194_p3), %s2743_s15, 1  ;;  %v2620_v5 = vld [vmem:[%s3337_s1 + $0x50] sm:$0xff] (!%p194_p3)  }
   0x7   : > { %197 = sbr.rel (%p194_p3) target bundleno = 417 (0x1a1), region = 36  ;;  %2318 = vmatprep.subr.bf16.mxu0 (!%p194_p3), %v2753_v1  ;;  %2346 = vmatprep.subr.bf16.mxu1 (!%p194_p3), %v2753_v1  ;;  %v2617_v2 = vld [vmem:[%s3337_s1] sm:$0xff] (!%p194_p3)   ;;  %v2619_v4 = vld [vmem:[%s3337_s1 + $0x8] sm:$0xff] (!%p194_p3)   ;;  %v2621_v6 = vld [vmem:[%s3337_s1 + $0x10] sm:$0xff] (!%p194_p3)   ;;  %vm419_vm1 = vsmask.f32 (!%p194_p3), 4352 }
   0x8   : > { %2319 = vmatpush3.bf16.msra.mxu0 (!%p194_p3), %v2616_v0  ;;  %2334 = vmatprep.mubr.msk.bf16.mxu0 (!%p194_p3), %vm2754_vm0, %v2753_v1  ;;  %v2622_v7 = vld [vmem:[%s3337_s1 + $0x58] sm:$0xff] (!%p194_p3)   ;;  %v2624_v9 = vld [vmem:[%s3337_s1 + $0x60] sm:$0xff] (!%p194_p3)   ;;  %v2626_v16 = vld [vmem:[%s3337_s1 + $0x68] sm:$0xff] (!%p194_p3)   ;;  %vm605_vm2 = vsmask.f32 (!%p194_p3), 7424 }
   0x9   : > { %2347 = vmatpush3.bf16.msra.mxu1 (!%p194_p3), %v2617_v2  ;;  %2320 = vmatprep.subr.bf16.mxu0 (!%p194_p3), %v2753_v1  ;;  %v2623_v8 = vld [vmem:[%s3337_s1 + $0x18] sm:$0xff] (!%p194_p3)   ;;  %v2625_v10 = vld [vmem:[%s3337_s1 + $0x20] sm:$0xff] (!%p194_p3)   ;;  %v2627_v18 = vld [vmem:[%s3337_s1 + $0x28] sm:$0xff] (!%p194_p3)  }
   0xa   : > { %2348 = vmatprep.subr.bf16.mxu1 (!%p194_p3), %v2753_v1  ;;  %2362 = vmatprep.mubr.msk.bf16.mxu1 (!%p194_p3), %vm2754_vm0, %v2753_v1  ;;  %v2628_v21 = vld [vmem:[%s3337_s1 + $0x70] sm:$0xff] (!%p194_p3)   ;;  %v2630_v29 = vld [vmem:[%s3337_s1 + $0x78] sm:$0xff] (!%p194_p3)   ;;  %v2635_v39 = vld [vmem:[%s3337_s1 + $0x80] sm:$0xff] (!%p194_p3)  }
   0xb   : > { %v2629_v24 = vld [vmem:[%s3337_s1 + $0x30] sm:$0xff] (!%p194_p3)   ;;  %v2631_v32 = vld [vmem:[%s3337_s1 + $0x38] sm:$0xff] (!%p194_p3)   ;;  %v2636_v41 = vld [vmem:[%s3337_s1 + $0xc0] sm:$0xff] (!%p194_p3)  }
   0xc   : > { %2321 = vmatpush3.bf16.msra.mxu0 (!%p194_p3), %v2618_v3  ;;  %v2637_v46 = vld [vmem:[%s3337_s1 + $0x88] sm:$0xff] (!%p194_p3)   ;;  %v2639_v51 = vld [vmem:[%s3337_s1 + $0x90] sm:$0xff] (!%p194_p3)   ;;  %v2641_v57 = vld [vmem:[%s3337_s1 + $0x98] sm:$0xff] (!%p194_p3)  }
   0xd   : > { %2349 = vmatpush3.bf16.msra.mxu1 (!%p194_p3), %v2619_v4  ;;  %2322 = vmatprep.subr.bf16.mxu0 (!%p194_p3), %v2753_v1  ;;  %v2638_v47 = vld [vmem:[%s3337_s1 + $0xc8] sm:$0xff] (!%p194_p3)   ;;  %v2640_v53 = vld [vmem:[%s3337_s1 + $0xd0] sm:$0xff] (!%p194_p3)   ;;  %v2642_v62 = vld [vmem:[%s3337_s1 + $0xd8] sm:$0xff] (!%p194_p3)  }
   0xe   : > { %s3346_s15 = smov (!%p229_p4, %s2743_s15), 1  ;;  %2350 = vmatprep.subr.bf16.mxu1 %v2753_v1 }
   0xf   : > { %s2586_s5 = smul.u32 40, %s3346_s15 }
  0x10   : > { %2323 = vmatpush3.bf16.msra.mxu0 %v2620_v5  ;;  %v2645_v5 = vld [vmem:[%s3337_s1 + $0xa0] sm:$0xff]  }
  0x11   : > { %2351 = vmatpush3.bf16.msra.mxu1 %v2621_v6  ;;  %2324 = vmatprep.subr.bf16.mxu0 %v2753_v1  ;;  %s2843_s12 = scalar_lea.vmem %s3336_s0, %s2586_s5  ;;  %s3311_s14 = scalar_lea.vmem %s3340_s4, %s2586_s5 }
  0x12   : > { %2352 = vmatprep.subr.bf16.mxu1 %v2753_v1  ;;  %v250_v11 = vld [vmem:[%s2843_s12] sm:$0x8]  ;;  %v251_v12 = vld [vmem:[%s2843_s12 + $0x4] sm:$0xf]  ;;  %v252_v13 = vld [vmem:[%s2843_s12 + $0x8] sm:$0xf] }
  0x13   : > { %v2857_v14 = vld [vmem:[%s2843_s12 + $0xc] sm:$0xf]  ;;  %v1978_v15 = vcombine.low %v250_v11, %v251_v12  ;;  %v254_v30 = vld [vmem:[%s2843_s12 + $0x10] sm:$0xf]  ;;  %v2881_v31 = vld [vmem:[%s2843_s12 + $0x14] sm:$0xf]  ;;  %v1967_v36 = vcombine.low %v251_v12, %v252_v13 }
  0x14   : > { %2325 = vmatpush3.bf16.msra.mxu0 %v2622_v7  ;;  %v1979_v17 = vcombine.low %v252_v13, %v2857_v14  ;;  %v1980_v35 = vcombine.low %v254_v30, %v2881_v31  ;;  %v256_v44 = vld [vmem:[%s2843_s12 + $0x18] sm:$0xf]  ;;  %v1968_v52 = vcombine.low %v2857_v14, %v254_v30  ;;  %v563_v58 = vld [vmem:[%s2843_s12 + $0x4] sm:$0xf]  ;;  %v2926_v59 = vld [vmem:[%s2843_s12 + $0x8] sm:$0xf] }
  0x15   : > { %2353 = vmatpush3.bf16.msra.mxu1 %v2623_v8  ;;  %2326 = vmatprep.subr.bf16.mxu0 %v2753_v1  ;;  %v421_v19 = vshrl.u32 %v1978_v15, 16  ;;  %v424_v20 = vshll.u32 %v1978_v15, 16  ;;  %v1981_v45 = vcombine.low %v256_v44, %v256_v44  ;;  %v2929_v60 = vld [vmem:[%s2843_s12 + $0xc] sm:$0xf]  ;;  %v2932_v61 = vld [vmem:[%s2843_s12 + $0x10] sm:$0xf]  ;;  %v1969_v2 = vcombine.low %v2881_v31, %v256_v44 }
  0x16   : > { %2354 = vmatprep.subr.bf16.mxu1 %v2753_v1  ;;  %v429_v22 = vshrl.u32 %v1979_v17, 16  ;;  %v432_v23 = vshll.u32 %v1979_v17, 16  ;;  %v438_v37 = vshrl.u32 %v1980_v35, 16  ;;  %v441_v38 = vshll.u32 %v1980_v35, 16  ;;  %v748_v0 = vld [vmem:[%s2843_s12 + $0x4] sm:$0x8] }
  0x17   : > { %v423_v25 = vrot.slane %v421_v19, 3  ;;  %v426_v26 = vrot.slane %v424_v20, 4  ;;  %v447_v49 = vshrl.u32 %v1981_v45, 16  ;;  %v450_v50 = vshll.u32 %v1981_v45, 16  ;;  %v2646_v7 = vld [vmem:[%s3337_s1 + $0xe0] sm:$0xff]   ;;  %v2651_v17 = vld [vmem:[%s3337_s1 + $0xb0] sm:$0xff]  }
  0x18   : > { %2327 = vmatpush3.bf16.msra.mxu0 %v2624_v9  ;;  %v431_v27 = vrot.slane %v429_v22, 3  ;;  %v434_v28 = vrot.slane %v432_v23, 4  ;;  %v440_v42 = vrot.slane %v438_v37, 3  ;;  %v443_v43 = vrot.slane %v441_v38, 4  ;;  %v2647_v9 = vld [vmem:[%s3337_s1 + $0xa8] sm:$0xff]   ;;  %v2652_v19 = vld [vmem:[%s3337_s1 + $0xf0] sm:$0xff]  }
  0x19   : > { %2355 = vmatpush3.bf16.msra.mxu1 %v2625_v10  ;;  %2328 = vmatprep.subr.bf16.mxu0 %v2753_v1  ;;  %v427_v33 = vor.u32 %v426_v26, %v423_v25  ;;  %v449_v55 = vrot.slane %v447_v49, 3  ;;  %v452_v56 = vrot.slane %v450_v50, 4  ;;  %v2006_v3 = vcombine.low %v563_v58, %v2926_v59  ;;  %v2648_v10 = vld [vmem:[%s3337_s1 + $0xe8] sm:$0xff]   ;;  %v2999_v35 = vld [vmem:[%s2843_s12 + $0x1c] sm:$0xf] }
  0x1a   : > { %2356 = vmatprep.subr.bf16.mxu1 %v2753_v1  ;;  %v435_v34 = vor.u32 %v434_v28, %v431_v27  ;;  %v444_v48 = vor.u32 %v443_v43, %v440_v42  ;;  %v2948_v4 = vcombine.low %v2929_v60, %v2932_v61  ;;  %v2034_v6 = vcombine.low %v748_v0, %v2926_v59  ;;  %v2653_v27 = vld [vmem:[%s3337_s1 + $0xb8] sm:$0xff]   ;;  %v2660_v43 = vld [vmem:[%s3337_s1 + $0x108] sm:$0xff]  }
  0x1b   : > { %v453_v63 = vor.u32 %v452_v56, %v449_v55  ;;  %v609_v11 = vshll.u32 %v2006_v3, 16  ;;  %v607_v20 = vshrl.u32 %v2006_v3, 16  ;;  %v2654_v28 = vld [vmem:[%s3337_s1 + $0xf8] sm:$0xff]   ;;  %v2035_v42 = vcombine.low %v2999_v35, %v2999_v35  ;;  %v2661_v45 = vld [vmem:[%s3337_s1 + $0x148] sm:$0xff]  }
  0x1c   : > { %2329 = vmatpush3.bf16.msra.mxu0 %v2626_v16  ;;  %v436_v40 = vsel %vm419_vm1, %v427_v33, %v435_v34  ;;  %v445_v54 = vsel %vm419_vm1, %v435_v34, %v444_v48  ;;  %v614_v12 = vshll.u32 %v2948_v4, 16  ;;  %v618_v13 = vshrl.u32 %v2948_v4, 16  ;;  %v2970_v16 = vld [vmem:[%s2843_s12 + $0x14] sm:$0xf]  ;;  %v2665_v58 = vld [vmem:[%s3337_s1 + $0x118] sm:$0xff]  }
  0x1d   : > { %2357 = vmatpush3.bf16.msra.mxu1 %v2627_v18  ;;  %2330 = vmatprep.subr.bf16.mxu0 %v2753_v1  ;;  %v454_v8 = vsel %vm419_vm1, %v444_v48, %v453_v63  ;;  %v774_v14 = vshrl.u32 %v2034_v6, 16  ;;  %v777_v15 = vshll.u32 %v2034_v6, 16  ;;  %v2979_v18 = vld [vmem:[%s2843_s12 + $0x18] sm:$0xf]  ;;  %v790_v49 = vshrl.u32 %v2035_v42, 16  ;;  %v2668_v6 = vld [vmem:[%s3337_s1 + $0x120] sm:$0xff]  }
  0x1e   : > { %2358 = vmatprep.subr.bf16.mxu1 %v2753_v1  ;;  %v782_v25 = vrot.slane %v614_v12, 4  ;;  %v2008_v26 = vcombine.low %v2970_v16, %v2979_v18  ;;  %v616_v30 = vrot.slane %v614_v12, 1  ;;  %v2667_v44 = vld [vmem:[%s2843_s12 + $0x1c] ss:$0 sps:$4 sm:$0x11]   ;;  %v793_v50 = vshll.u32 %v2035_v42, 16 }
  0x1f   : > { %v776_v22 = vrot.slane %v774_v14, 3  ;;  %v779_v23 = vrot.slane %v777_v15, 4  ;;  %v792_v56 = vrot.slane %v790_v49, 3  ;;  %v3045_v4 = vld [vmem:[%s2843_s12 + $0xc] sm:$0xf]  ;;  %v2686_v42 = vld [vmem:[%s3337_s1 + $0x1d0] sm:$0xff]   ;;  %v2062_v49 = vcombine.low %v2979_v18, %v2999_v35 }
  0x20   : > { %2331 = vmatpush3.bf16.msra.mxu0 %v2628_v21  ;;  %v611_v21 = vrot.slane %v609_v11, 1  ;;  %v622_v33 = vshll.u32 %v2008_v26, 16  ;;  %v626_v34 = vshrl.u32 %v2008_v26, 16  ;;  %v3067_v11 = vld [vmem:[%s2843_s12 + $0x14] sm:$0xf]  ;;  %v2671_v12 = vld [vmem:[%s3337_s1 + $0x128] sm:$0xff]  }
  0x21   : > { %2359 = vmatpush3.bf16.msra.mxu1 %v2629_v24  ;;  %2332 = vmatprep.subr.bf16.mxu0 %v2753_v1  ;;  %v781_v24 = vrot.slane %v618_v13, 3  ;;  %v780_v31 = vor.u32 %v779_v23, %v776_v22  ;;  %v3094_v23 = vld [vmem:[%s2843_s12 + $0x18] sm:$0xf]  ;;  %v2694_v18 = vld [vmem:[%s3337_s1 + $0x1a8] sm:$0xff]  }
  0x22   : > { %2360 = vmatprep.subr.bf16.mxu1 %v2753_v1  ;;  %v2676_v26 = vld [vmem:[%s3337_s1 + $0x178] sm:$0xff]  }
  0x24   : > { %2333 = vmatpush3.bf16.msra.mxu0 %v2630_v29  ;;  %v612_v29 = vor.u32 %v611_v21, %v607_v20 }
  0x25   : > { %2361 = vmatpush3.bf16.msra.mxu1 %v2631_v32  ;;  %2374 = vmatprep.subr.bf16.mxu0 %v2753_v1  ;;  %v783_v32 = vor.u32 %v782_v25, %v781_v24  ;;  %v3098_v24 = vld [vmem:[%s2843_s12 + $0x1c] sm:$0xf] }
  0x26   : > { %2402 = vmatprep.subr.bf16.mxu1 %v2753_v1  ;;  %v617_v37 = vsel %vm605_vm2, %v612_v29, %v616_v30  ;;  %v2675_v25 = vld [vmem:[%s3337_s1 + $0x138] sm:$0xff]   ;;  %v3111_v29 = vcombine.low %v3094_v23, %v3098_v24 }
  0x27   : > { %2335 = vmatmul.mubr.bf16.vlgmr.msra.gmra.mrb[0].mxu0 %v1967_v36  ;;  %v2658_v36 = vld [vmem:[%s3337_s1 + $0x100] sm:$0xff]   ;;  %v784_v38 = vsel %vm419_vm1, %v780_v31, %v783_v32 }
  0x28   : > { %2363 = vmatmul.mubr.bf16.vlgmr.msra.gmra.mrb[0].mxu1 %v436_v40  ;;  %2375 = vmatpush3.bf16.msra.mxu0 %v2635_v39  ;;  %v2659_v39 = vld [vmem:[%s3337_s1 + $0x140] sm:$0xff]   ;;  %v785_v40 = vrot.slane %v626_v34, 3 }
  0x29   : > { %2403 = vmatpush3.bf16.msra.mxu1 %v2636_v41  ;;  %2376 = vmatprep.subr.bf16.mxu0 %v2753_v1  ;;  %v786_v41 = vrot.slane %v622_v33, 4  ;;  %v2680_v31 = vld [vmem:[%s3337_s1 + $0x180] sm:$0xff]  }
  0x2a   : > { %2404 = vmatprep.subr.bf16.mxu1 %v2753_v1  ;;  %2366 = vmatprep.mubr.msk.bf16.mxu1 %vm2754_vm0, %v2753_v1 }
  0x2b   : > { %2338 = vmatprep.mubr.msk.bf16.mxu0 %vm2754_vm0, %v2753_v1  ;;  %v787_v48 = vor.u32 %v786_v41, %v785_v40  ;;  %v2061_v40 = vcombine.low %v2932_v61, %v2970_v16  ;;  %v2685_v41 = vld [vmem:[%s3337_s1 + $0x190] sm:$0xff]   ;;  %v1108_v61 = vshrl.u32 %v3111_v29, 16 }
  0x2c   : > { %2377 = vmatpush3.bf16.msra.mxu0 %v2637_v46  ;;  %v620_v46 = vor.u32 %v618_v13, %v616_v30  ;;  %v2672_v13 = vld [vmem:[%s3337_s1 + $0x168] sm:$0xff]   ;;  %v2060_v30 = vcombine.low %v2926_v59, %v2929_v60 }
  0x2d   : > { %2405 = vmatpush3.bf16.msra.mxu1 %v2638_v47  ;;  %2378 = vmatprep.subr.bf16.mxu0 %v2753_v1  ;;  %v624_v47 = vrot.slane %v622_v33, 1  ;;  %v788_v55 = vsel %vm419_vm1, %v783_v32, %v787_v48  ;;  %v2681_v33 = vld [vmem:[%s3337_s1 + $0x1c0] sm:$0xff]   ;;  %v2682_v59 = vld [vmem:[%s3337_s1 + $0x188] sm:$0xff]  }
  0x2e   : > { %2406 = vmatprep.subr.bf16.mxu1 %v2753_v1  ;;  %v2683_v60 = vld [vmem:[%s3337_s1 + $0x1c8] sm:$0xff]  }
  0x2f   : > { %2339 = vmatmul.mubr.bf16.gmra.mrb[4].mxu0 %v1968_v52  ;;  %v625_v52 = vsel %vm605_vm2, %v620_v46, %v624_v47  ;;  %v628_v0 = vor.u32 %v626_v34, %v624_v47 }
  0x30   : > { %2379 = vmatpush3.bf16.msra.mxu0 %v2639_v51  ;;  %2367 = vmatmul.mubr.bf16.gmra.mrb[4].mxu1 %v445_v54  ;;  %v630_v51 = vshll.u32 %v2667_v44, 16  ;;  %v2664_v54 = vld [vmem:[%s3337_s1 + $0x150] sm:$0xff]   ;;  %v2688_v44 = vld [vmem:[%s3337_s1 + $0x198] sm:$0xff]  }
  0x31   : > { %2407 = vmatpush3.bf16.msra.mxu1 %v2640_v53  ;;  %2380 = vmatprep.subr.bf16.mxu0 %v2753_v1  ;;  %v2663_v53 = vld [vmem:[%s3337_s1 + $0x110] sm:$0xff]  }
  0x32   : > { %2408 = vmatprep.subr.bf16.mxu1 %v2753_v1  ;;  %2370 = vmatprep.mubr.msk.bf16.mxu1 %vm2754_vm0, %v2753_v1  ;;  %v632_v63 = vrot.slane %v630_v51, 1 }
  0x33   : > { %2342 = vmatprep.mubr.msk.bf16.mxu0 %vm2754_vm0, %v2753_v1 }
  0x34   : > { %2381 = vmatpush3.bf16.msra.mxu0 %v2641_v57  ;;  %v795_v57 = vrot.slane %v793_v50, 4  ;;  %v2691_v50 = vld [vmem:[%s3337_s1 + $0x1a0] sm:$0xff]  }
  0x35   : > { %2409 = vmatpush3.bf16.msra.mxu1 %v2642_v62  ;;  %2382 = vmatprep.subr.bf16.mxu0 %v2753_v1  ;;  %v2666_v62 = vld [vmem:[%s3337_s1 + $0x158] sm:$0xff]  }
  0x36   : > { %2410 = vmatprep.subr.bf16.mxu1 %v2753_v1  ;;  %v796_v3 = vor.u32 %v795_v57, %v792_v56  ;;  %v2696_v57 = vld [vmem:[%s3337_s1 + $0x1b0] sm:$0xff]  }
  0x37   : > { %2343 = vmatmul.mubr.bf16.gmra.mrb[8].mxu0 %v1969_v2  ;;  %v1046_v2 = vld [vmem:[%s2843_s12 + $0x8] sm:$0xf] }
  0x38   : > { %2383 = vmatpush3.bf16.msra.mxu0 %v2645_v5  ;;  %2371 = vmatmul.mubr.bf16.gmra.mrb[8].mxu1 %v454_v8  ;;  %v633_v5 = vsel %vm605_vm2, %v628_v0, %v632_v63  ;;  %v2669_v8 = vld [vmem:[%s3337_s1 + $0x160] sm:$0xff]   ;;  %v2697_v0 = vld [vmem:[%s3337_s1 + $0x1f0] sm:$0xff]  }
  0x39   : > { %2411 = vmatpush3.bf16.msra.mxu1 %v2646_v7  ;;  %2384 = vmatprep.subr.bf16.mxu0 %v2753_v1  ;;  %v2087_v7 = vcombine.low %v1046_v2, %v3045_v4  ;;  %v2698_v2 = vld [vmem:[%s3337_s1 + $0x1b8] sm:$0xff]  }
  0x3a   : > { %2412 = vmatprep.subr.bf16.mxu1 %v2753_v1  ;;  %2390 = vmatprep.mubr.msk.bf16.mxu0 %vm2754_vm0, %v2753_v1 }
  0x3b   : > { %2418 = vmatprep.mubr.msk.bf16.mxu1 %vm2754_vm0, %v2753_v1  ;;  %v1091_v14 = vshll.u32 %v2087_v7, 16  ;;  %v1089_v20 = vshrl.u32 %v2087_v7, 16  ;;  %v3209_v7 = vld [vmem:[%s2843_s12 + $0x20] sm:$0xf] }
  0x3c   : > { %2385 = vmatpush3.bf16.msra.mxu0 %v2647_v9  ;;  %v797_v9 = vsel %vm419_vm1, %v787_v48, %v796_v3  ;;  %v1230_v48 = vld [vmem:[%s2843_s12 + $0x8] sm:$0x8] }
  0x3d   : > { %2413 = vmatpush3.bf16.msra.mxu1 %v2648_v10  ;;  %2386 = vmatprep.subr.bf16.mxu0 %v2753_v1  ;;  %v3064_v10 = vld [vmem:[%s2843_s12 + $0x10] sm:$0xf]  ;;  %v1093_v21 = vrot.slane %v1091_v14, 1  ;;  %v2115_v51 = vcombine.low %v1230_v48, %v3045_v4 }
  0x3e   : > { %2414 = vmatprep.subr.bf16.mxu1 %v2753_v1  ;;  %v3078_v15 = vcombine.low %v3064_v10, %v3067_v11 }
  0x3f   : > { %v1256_v35 = vshrl.u32 %v2115_v51, 16 }
  0x40   : > { %2387 = vmatpush3.bf16.msra.mxu0 %v2651_v17  ;;  %v2673_v17 = vld [vmem:[%s3337_s1 + $0x130] sm:$0xff]   ;;  %v1096_v22 = vshll.u32 %v3078_v15, 16  ;;  %v1100_v34 = vshrl.u32 %v3078_v15, 16  ;;  %v2116_v15 = vcombine.low %v3209_v7, %v3209_v7 }
  0x41   : > { %2415 = vmatpush3.bf16.msra.mxu1 %v2652_v19  ;;  %2388 = vmatprep.subr.bf16.mxu0 %v2753_v1  ;;  %v2674_v19 = vld [vmem:[%s3337_s1 + $0x170] sm:$0xff]  }
  0x42   : > { %2416 = vmatprep.subr.bf16.mxu1 %v2753_v1  ;;  %v1263_v56 = vrot.slane %v1100_v34, 3  ;;  %v1264_v63 = vrot.slane %v1096_v22, 4 }
  0x44   : > { %2389 = vmatpush3.bf16.msra.mxu0 %v2653_v27  ;;  %v1094_v27 = vor.u32 %v1093_v21, %v1089_v20  ;;  %v1275_v20 = vshll.u32 %v2116_v15, 16  ;;  %v1763_v21 = vld [vmem:[%s3339_s3 + $0x10] sm:$0xff] }
  0x45   : > { %2417 = vmatpush3.bf16.msra.mxu1 %v2654_v28  ;;  %2430 = vmatprep.subr.bf16.mxu0 %v2753_v1  ;;  %v1098_v28 = vrot.slane %v1096_v22, 1  ;;  %v1761_v22 = vld [vmem:[%s3339_s3] sm:$0xff] }
  0x46   : > { %2458 = vmatprep.subr.bf16.mxu1 %v2753_v1 }
  0x47   : > { %2391 = vmatmul.mubr.bf16.vlgmr.msra.gmra.mrb[12].mxu0 %v617_v37  ;;  %v1099_v32 = vsel %vm605_vm2, %v1094_v27, %v1098_v28  ;;  %v1102_v37 = vor.u32 %v1100_v34, %v1098_v28  ;;  %v2142_v27 = vcombine.low %v3067_v11, %v3094_v23  ;;  %v2706_v11 = vld [vmem:[%s3337_s1 + $0x218] sm:$0xff]   ;;  %v2708_v34 = vld [vmem:[%s3337_s1 + $0x220] sm:$0xff]  }
  0x48   : > { %2419 = vmatmul.mubr.bf16.vlgmr.msra.gmra.mrb[12].mxu1 %v784_v38  ;;  %2431 = vmatpush3.bf16.msra.mxu0 %v2658_v36  ;;  %v1104_v36 = vshll.u32 %v3111_v29, 16  ;;  %v1277_v29 = vrot.slane %v1275_v20, 4 }
  0x49   : > { %2459 = vmatpush3.bf16.msra.mxu1 %v2659_v39  ;;  %2432 = vmatprep.subr.bf16.mxu0 %v2753_v1  ;;  %v2693_v39 = vld [vmem:[%s2843_s12 + $0x20] ss:$0 sps:$4 sm:$0x11]  }
  0x4a   : > { %2460 = vmatprep.subr.bf16.mxu1 %v2753_v1  ;;  %2394 = vmatprep.mubr.msk.bf16.mxu0 %vm2754_vm0, %v2753_v1  ;;  %v1106_v38 = vrot.slane %v1104_v36, 1  ;;  %v1112_v16 = vshll.u32 %v2693_v39, 16  ;;  %v1268_v14 = vrot.slane %v1104_v36, 4  ;;  %v2143_v36 = vcombine.low %v3098_v24, %v3209_v7  ;;  %v2710_v24 = vld [vmem:[%s3337_s1 + $0x228] sm:$0xff]  }
  0x4b   : > { %2422 = vmatprep.mubr.msk.bf16.mxu1 %vm2754_vm0, %v2753_v1 }
  0x4c   : > { %2433 = vmatpush3.bf16.msra.mxu0 %v2660_v43  ;;  %v1107_v43 = vsel %vm605_vm2, %v1102_v37, %v1106_v38  ;;  %v1110_v46 = vor.u32 %v1108_v61, %v1106_v38  ;;  %v1114_v47 = vrot.slane %v1112_v16, 1  ;;  %v2714_v37 = vld [vmem:[%s2843_s12 + $0x14] sm:$0xff]  }
  0x4d   : > { %2461 = vmatpush3.bf16.msra.mxu1 %v2661_v45  ;;  %2434 = vmatprep.subr.bf16.mxu0 %v2753_v1  ;;  %v2689_v45 = vld [vmem:[%s3337_s1 + $0x1d8] sm:$0xff]   ;;  %v1578_v39 = vshll.u32 %v2714_v37, 16  ;;  %v1582_v16 = vshrl.u32 %v2714_v37, 16 }
  0x4e   : > { %2462 = vmatprep.subr.bf16.mxu1 %v2753_v1 }
  0x4f   : > { %2395 = vmatmul.mubr.bf16.gmra.mrb[16].mxu0 %v625_v52  ;;  %v2692_v52 = vld [vmem:[%s3337_s1 + $0x1e0] sm:$0xff]  }
  0x50   : > { %2435 = vmatpush3.bf16.msra.mxu0 %v2663_v53  ;;  %2423 = vmatmul.mubr.bf16.gmra.mrb[16].mxu1 %v788_v55  ;;  %v1115_v53 = vsel %vm605_vm2, %v1110_v46, %v1114_v47  ;;  %v2695_v55 = vld [vmem:[%s3337_s1 + $0x1e8] sm:$0xff]  }
  0x51   : > { %2463 = vmatpush3.bf16.msra.mxu1 %v2664_v54  ;;  %2436 = vmatprep.subr.bf16.mxu0 %v2753_v1  ;;  %v1259_v54 = vshll.u32 %v2115_v51, 16 }
  0x52   : > { %2464 = vmatprep.subr.bf16.mxu1 %v2753_v1  ;;  %2398 = vmatprep.mubr.msk.bf16.mxu0 %vm2754_vm0, %v2753_v1 }
  0x53   : > { %2426 = vmatprep.mubr.msk.bf16.mxu1 %vm2754_vm0, %v2753_v1 }
  0x54   : > { %2437 = vmatpush3.bf16.msra.mxu0 %v2665_v58  ;;  %v1258_v58 = vrot.slane %v1256_v35, 3 }
  0x55   : > { %2465 = vmatpush3.bf16.msra.mxu1 %v2666_v62  ;;  %2438 = vmatprep.subr.bf16.mxu0 %v2753_v1  ;;  %v1261_v62 = vrot.slane %v1259_v54, 4 }
  0x56   : > { %2466 = vmatprep.subr.bf16.mxu1 %v2753_v1 }
  0x57   : > { %2399 = vmatmul.mubr.bf16.gmra.mrb[20].mxu0 %v633_v5  ;;  %v1262_v3 = vor.u32 %v1261_v62, %v1258_v58  ;;  %v1265_v5 = vor.u32 %v1264_v63, %v1263_v56 }
  0x58   : > { %2439 = vmatpush3.bf16.msra.mxu0 %v2668_v6  ;;  %2427 = vmatmul.mubr.bf16.gmra.mrb[20].mxu1 %v797_v9  ;;  %v2699_v6 = vld [vmem:[%s3337_s1 + $0x1f8] sm:$0xff]   ;;  %v1267_v9 = vrot.slane %v1108_v61, 3  ;;  %v1580_v61 = vrot.slane %v1578_v39, 1 }
  0x59   : > { %2467 = vmatpush3.bf16.msra.mxu1 %v2669_v8  ;;  %2440 = vmatprep.subr.bf16.mxu0 %v2753_v1  ;;  %v2141_v8 = vcombine.low %v3045_v4, %v3064_v10  ;;  %v2755_v4 = vmov 0   ;;  %v2703_v10 = vld [vmem:[%s3337_s1 + $0x208] sm:$0xff]  }
  0x5a   : > { %2468 = vmatprep.subr.bf16.mxu1 %v2753_v1  ;;  %2446 = vmatprep.mubr.msk.bf16.mxu0 %vm2754_vm0, %v2753_v1  ;;  %v1584_v47 = vor.u32 %v1582_v16, %v1580_v61  ;;  %1803 = vst [vmem:[%s3311_s14] sm:$0xf] %v2755_v4  ;;  %1804 = vst [vmem:[%s3311_s14 + $0x4] sm:$0xf] %v2755_v4 }
  0x5b   : > { %2474 = vmatprep.mubr.msk.bf16.mxu1 %vm2754_vm0, %v2753_v1  ;;  %2615 = vset.pattern.permute.xlu1 %v2755_v4  ;;  %1835 = vst [vmem:[%s3311_s14 + $0x20] sm:$0xf] %v2755_v4  ;;  %1836 = vst [vmem:[%s3311_s14 + $0x24] sm:$0xf] %v2755_v4 }
  0x5c   : > { %2441 = vmatpush3.bf16.msra.mxu0 %v2671_v12  ;;  %v1266_v12 = vsel %vm419_vm1, %v1262_v3, %v1265_v5  ;;  %2614 = vset.pattern.permute.xlu0 %v2755_v4 }
  0x5d   : > { %2469 = vmatpush3.bf16.msra.mxu1 %v2672_v13  ;;  %2442 = vmatprep.subr.bf16.mxu0 %v2753_v1  ;;  %v2702_v13 = vld [vmem:[%s3337_s1 + $0x200] sm:$0xff]  }
  0x5e   : > { %2470 = vmatprep.subr.bf16.mxu1 %v2753_v1  ;;  %1779 = vperm.xlu1 %2615, %v1763_v21  }
  0x5f   : > { %1769 = vperm.xlu0 %2614, %v1761_v22  }
  0x60   : > { %2443 = vmatpush3.bf16.msra.mxu0 %v2673_v17  ;;  %v1269_v17 = vor.u32 %v1268_v14, %v1267_v9 }
  0x61   : > { %2471 = vmatpush3.bf16.msra.mxu1 %v2674_v19  ;;  %2444 = vmatprep.subr.bf16.mxu0 %v2753_v1  ;;  %v1272_v19 = vshrl.u32 %v2116_v15, 16 }
  0x62   : > { %2472 = vmatprep.subr.bf16.mxu1 %v2753_v1 }
  0x63   : > { %v1274_v28 = vrot.slane %v1272_v19, 3 }
  0x64   : > { %2445 = vmatpush3.bf16.msra.mxu0 %v2675_v25  ;;  %v1270_v25 = vsel %vm419_vm1, %v1265_v5, %v1269_v17 }
  0x65   : > { %2473 = vmatpush3.bf16.msra.mxu1 %v2676_v26  ;;  %2486 = vmatprep.subr.bf16.mxu0 %v2753_v1  ;;  %v2704_v26 = vld [vmem:[%s3337_s1 + $0x210] sm:$0xff]   ;;  %v1278_v23 = vor.u32 %v1277_v29, %v1274_v28 }
  0x66   : > { %2514 = vmatprep.subr.bf16.mxu1 %v2753_v1 }
  0x67   : > { %2447 = vmatmul.mubr.bf16.vlgmr.msra.gmra.mrb[24].mxu0 %v2060_v30  ;;  %v1764_v30 = vld [vmem:[%s3339_s3 + $0x18] sm:$0xff] }
  0x68   : > { %2475 = vmatmul.mubr.bf16.vlgmr.msra.gmra.mrb[24].mxu1 %v1099_v32  ;;  %2487 = vmatpush3.bf16.msra.mxu0 %v2680_v31  ;;  %v1762_v31 = vld [vmem:[%s3339_s3 + $0x8] sm:$0xff] }
  0x69   : > { %2515 = vmatpush3.bf16.msra.mxu1 %v2681_v33  ;;  %2488 = vmatprep.subr.bf16.mxu0 %v2753_v1  ;;  %v1766_v32 = vld [vmem:[%s3339_s3 + $0x28] sm:$0xff]  ;;  %v1279_v33 = vsel %vm419_vm1, %v1269_v17, %v1278_v23 }
  0x6a   : > { %2516 = vmatprep.subr.bf16.mxu1 %v2753_v1  ;;  %2450 = vmatprep.mubr.msk.bf16.mxu0 %vm2754_vm0, %v2753_v1 }
  0x6b   : > { %2478 = vmatprep.mubr.msk.bf16.mxu1 %vm2754_vm0, %v2753_v1  ;;  %1784 = vperm.xlu1 %2615, %v1764_v30  }
  0x6c   : > { %2489 = vmatpush3.bf16.msra.mxu0 %v2682_v59  ;;  %1774 = vperm.xlu0 %2614, %v1762_v31   ;;  %v2713_v59 = vld [vmem:[%s2843_s12 + $0xc] sm:$0xff]  }
  0x6d   : > { %2517 = vmatpush3.bf16.msra.mxu1 %v2683_v60  ;;  %2490 = vmatprep.subr.bf16.mxu0 %v2753_v1  ;;  %v1765_v60 = vld [vmem:[%s3339_s3 + $0x20] sm:$0xff]  ;;  %v1573_v38 = vshll.u32 %v2713_v59, 16 }
  0x6e   : > { %2518 = vmatprep.subr.bf16.mxu1 %v2753_v1 }
  0x6f   : > { %2451 = vmatmul.mubr.bf16.gmra.mrb[28].mxu0 %v2061_v40  ;;  %1794 = vperm.xlu1 %2615, %v1766_v32   ;;  %v2715_v40 = vld [vmem:[%s2843_s12 + $0x1c] sm:$0xff]  }
  0x70   : > { %2491 = vmatpush3.bf16.msra.mxu0 %v2685_v41  ;;  %2479 = vmatmul.mubr.bf16.gmra.mrb[28].mxu1 %v1107_v43  ;;  %v2711_v41 = vld [vmem:[%s3337_s1 + $0x230] sm:$0xff]   ;;  %v1575_v43 = vrot.slane %v1573_v38, 1 }
  0x71   : > { %2519 = vmatpush3.bf16.msra.mxu1 %v2686_v42  ;;  %2492 = vmatprep.subr.bf16.mxu0 %v2753_v1  ;;  %v1571_v42 = vshrl.u32 %v2713_v59, 16 }
  0x72   : > { %2520 = vmatprep.subr.bf16.mxu1 %v2753_v1  ;;  %2454 = vmatprep.mubr.msk.bf16.mxu0 %vm2754_vm0, %v2753_v1 }
  0x73   : > { %2482 = vmatprep.mubr.msk.bf16.mxu1 %vm2754_vm0, %v2753_v1  ;;  %1789 = vperm.xlu0 %2614, %v1765_v60   ;;  %v1576_v46 = vor.u32 %v1575_v43, %v1571_v42 }
  0x74   : > { %2493 = vmatpush3.bf16.msra.mxu0 %v2688_v44  ;;  %v1586_v44 = vshll.u32 %v2715_v40, 16 }
  0x75   : > { %2521 = vmatpush3.bf16.msra.mxu1 %v2689_v45  ;;  %2494 = vmatprep.subr.bf16.mxu0 %v2753_v1  ;;  %v2712_v45 = vld [vmem:[%s3337_s1 + $0x238] sm:$0xff]  }
  0x76   : > { %2522 = vmatprep.subr.bf16.mxu1 %v2753_v1  ;;  %v1588_v48 = vrot.slane %v1586_v44, 1 }
  0x77   : > { %2455 = vmatmul.mubr.bf16.gmra.mrb[32].mxu0 %v2062_v49  ;;  %v2716_v49 = vld [vmem:[%s2843_s12 + $0x24] ss:$0 sps:$4 sm:$0x11]  }
  0x78   : > { %2495 = vmatpush3.bf16.msra.mxu0 %v2691_v50  ;;  %2483 = vmatmul.mubr.bf16.gmra.mrb[32].mxu1 %v1115_v53  ;;  %v1581_v50 = vsel %vm605_vm2, %v1576_v46, %v1580_v61  ;;  %v1589_v51 = vsel %vm605_vm2, %v1584_v47, %v1588_v48  ;;  %v1594_v53 = vshll.u32 %v2716_v49, 16 }
  0x79   : > { %2523 = vmatpush3.bf16.msra.mxu1 %v2692_v52  ;;  %2496 = vmatprep.subr.bf16.mxu0 %v2753_v1  ;;  %v1590_v52 = vshrl.u32 %v2715_v40, 16 }
  0x7a   : > { %2524 = vmatprep.subr.bf16.mxu1 %v2753_v1  ;;  %2502 = vmatprep.mubr.msk.bf16.mxu0 %vm2754_vm0, %v2753_v1  ;;  %v1596_v35 = vrot.slane %v1594_v53, 1 }
  0x7b   : > { %2530 = vmatprep.mubr.msk.bf16.mxu1 %vm2754_vm0, %v2753_v1 }
  0x7c   : > { %2497 = vmatpush3.bf16.msra.mxu0 %v2694_v18  ;;  %v1592_v18 = vor.u32 %v1590_v52, %v1588_v48 }
  0x7d   : > { %2525 = vmatpush3.bf16.msra.mxu1 %v2695_v55  ;;  %2498 = vmatprep.subr.bf16.mxu0 %v2753_v1 }
  0x7e   : > { %2526 = vmatprep.subr.bf16.mxu1 %v2753_v1  ;;  %v1597_v54 = vsel %vm605_vm2, %v1592_v18, %v1596_v35 }
  0x80   : > { %2499 = vmatpush3.bf16.msra.mxu0 %v2696_v57 }
  0x81   : > { %2527 = vmatpush3.bf16.msra.mxu1 %v2697_v0  ;;  %2500 = vmatprep.subr.bf16.mxu0 %v2753_v1 }
  0x82   : > { %2528 = vmatprep.subr.bf16.mxu1 %v2753_v1 }
  0x84   : > { %2501 = vmatpush3.bf16.msra.mxu0 %v2698_v2 }
  0x85   : > { %2529 = vmatpush3.bf16.msra.mxu1 %v2699_v6  ;;  %2542 = vmatprep.subr.bf16.mxu0 %v2753_v1 }
  0x86   : > { %2570 = vmatprep.subr.bf16.mxu1 %v2753_v1 }
  0x87   : > { %2503 = vmatmul.mubr.bf16.vlgmr.msra.gmra.mrb[36].mxu0 %v1266_v12 }
  0x88   : > { %2531 = vmatmul.mubr.bf16.vlgmr.msra.gmra.mrb[36].mxu1 %v2141_v8  ;;  %2543 = vmatpush3.bf16.msra.mxu0 %v2702_v13 }
  0x89   : > { %2578 = vmatpush3.bf16.msra.mxu1 %v2702_v13  ;;  %2544 = vmatprep.subr.bf16.mxu0 %v2753_v1 }
  0x8a   : > { %2571 = vmatprep.subr.bf16.mxu1 %v2753_v1  ;;  %2506 = vmatprep.mubr.msk.bf16.mxu0 %vm2754_vm0, %v2753_v1 }
  0x8b   : > { %2534 = vmatprep.mubr.msk.bf16.mxu1 %vm2754_vm0, %v2753_v1 }
  0x8c   : > { %2545 = vmatpush3.bf16.msra.mxu0 %v2703_v10 }
  0x8d   : > { %2579 = vmatpush3.bf16.msra.mxu1 %v2703_v10  ;;  %2546 = vmatprep.subr.bf16.mxu0 %v2753_v1 }
  0x8e   : > { %2572 = vmatprep.subr.bf16.mxu1 %v2753_v1 }
  0x8f   : > { %2507 = vmatmul.mubr.bf16.gmra.mrb[40].mxu0 %v1270_v25 }
  0x90   : > { %2547 = vmatpush3.bf16.msra.mxu0 %v2704_v26  ;;  %2535 = vmatmul.mubr.bf16.gmra.mrb[40].mxu1 %v2142_v27 }
  0x91   : > { %2580 = vmatpush3.bf16.msra.mxu1 %v2704_v26  ;;  %2548 = vmatprep.subr.bf16.mxu0 %v2753_v1 }
  0x92   : > { %2573 = vmatprep.subr.bf16.mxu1 %v2753_v1  ;;  %2510 = vmatprep.mubr.msk.bf16.mxu0 %vm2754_vm0, %v2753_v1 }
  0x93   : > { %2538 = vmatprep.mubr.msk.bf16.mxu1 %vm2754_vm0, %v2753_v1 }
  0x94   : > { %2549 = vmatpush3.bf16.msra.mxu0 %v2706_v11 }
  0x95   : > { %2581 = vmatpush3.bf16.msra.mxu1 %v2706_v11  ;;  %2550 = vmatprep.subr.bf16.mxu0 %v2753_v1 }
  0x96   : > { %2574 = vmatprep.subr.bf16.mxu1 %v2753_v1 }
  0x97   : > { %2511 = vmatmul.mubr.bf16.gmra.mrb[44].mxu0 %v1279_v33 }
  0x98   : > { %2551 = vmatpush3.bf16.msra.mxu0 %v2708_v34  ;;  %2539 = vmatmul.mubr.bf16.gmra.mrb[44].mxu1 %v2143_v36 }
  0x99   : > { %2582 = vmatpush3.bf16.msra.mxu1 %v2708_v34  ;;  %2552 = vmatprep.subr.bf16.mxu0 %v2753_v1 }
  0x9a   : > { %2575 = vmatprep.subr.bf16.mxu1 %v2753_v1  ;;  %2558 = vmatprep.mubr.msk.bf16.mxu0 %vm2754_vm0, %v2753_v1 }
  0x9b   : > { %2562 = vmatprep.mubr.msk.bf16.mxu1 %vm2754_vm0, %v2753_v1 }
  0x9c   : > { %2553 = vmatpush3.bf16.msra.mxu0 %v2710_v24 }
  0x9d   : > { %2583 = vmatpush3.bf16.msra.mxu1 %v2710_v24  ;;  %2554 = vmatprep.subr.bf16.mxu0 %v2753_v1 }
  0x9e   : > { %2576 = vmatprep.subr.bf16.mxu1 %v2753_v1 }
  0xa0   : > { %2555 = vmatpush3.bf16.msra.mxu0 %v2711_v41 }
  0xa1   : > { %2584 = vmatpush3.bf16.msra.mxu1 %v2711_v41  ;;  %2556 = vmatprep.subr.bf16.mxu0 %v2753_v1 }
  0xa2   : > { %2577 = vmatprep.subr.bf16.mxu1 %v2753_v1 }
  0xa4   : > { %2557 = vmatpush3.bf16.msra.mxu0 %v2712_v45 }
  0xa5   : > { %2585 = vmatpush3.bf16.msra.mxu1 %v2712_v45 }
  0xa7   : > { %2559 = vmatmul.mubr.bf16.vlgmr.msra.gmra.mrb[48].mxu0 %v1581_v50 }
  0xa8   : > { %2563 = vmatmul.mubr.bf16.vlgmr.msra.gmra.mrb[48].mxu1 %v1589_v51 }
  0xa9   : > { %2566 = vmatprep.mubr.msk.bf16.mxu1 %vm2754_vm0, %v2753_v1 }
  0xb0   : > { %2567 = vmatmul.mubr.bf16.gmra.mrb[52].mxu1 %v1597_v54 }
  0xfa   : > { %v390_v55 = vpop.f32.mrb[0].mxu0 }
  0xfb   : > { %v540_v56 = vpop.f32.mrb[0].mxu1  ;;  %v2336_v57 = vpop.f32.mrb[1].mxu0 }
  0xfc   : > { %v541_v58 = vadd.f32 %v540_v56, %v390_v55  ;;  %v2364_v62 = vpop.f32.mrb[1].mxu1  ;;  %v393_v63 = vpop.f32.mrb[2].mxu0 }
  0xfd   : > { %v543_v0 = vpop.f32.mrb[2].mxu1  ;;  %v2337_v2 = vpop.f32.mrb[3].mxu0 }
  0xfe   : > { %v544_v3 = vadd.f32 %v543_v0, %v393_v63  ;;  %v2365_v5 = vpop.f32.mrb[3].mxu1 }
 0x102   : > { %v398_v6 = vpop.f32.mrb[4].mxu0 }
 0x103   : > { %v548_v7 = vpop.f32.mrb[4].mxu1  ;;  %v2340_v8 = vpop.f32.mrb[5].mxu0 }
 0x104   : > { %v549_v9 = vadd.f32 %v548_v7, %v398_v6  ;;  %v2368_v1 = vpop.f32.mrb[5].mxu1  ;;  %v401_v12 = vpop.f32.mrb[6].mxu0 }
 0x105   : > { %v551_v13 = vpop.f32.mrb[6].mxu1  ;;  %v2341_v14 = vpop.f32.mrb[7].mxu0 }
 0x106   : > { %v552_v15 = vadd.f32 %v551_v13, %v401_v12  ;;  %v2369_v10 = vpop.f32.mrb[7].mxu1 }
 0x10a   : > { %v406_v17 = vpop.f32.mrb[8].mxu0 }
 0x10b   : > { %v556_v19 = vpop.f32.mrb[8].mxu1  ;;  %v2344_v20 = vpop.f32.mrb[9].mxu0 }
 0x10c   : > { %v557_v21 = vadd.f32 %v556_v19, %v406_v17  ;;  %v2372_v22 = vpop.f32.mrb[9].mxu1  ;;  %v409_v25 = vpop.f32.mrb[10].mxu0 }
 0x10d   : > { %v559_v26 = vpop.f32.mrb[10].mxu1  ;;  %v2345_v27 = vpop.f32.mrb[11].mxu0 }
 0x10e   : > { %v560_v28 = vadd.f32 %v559_v26, %v409_v25  ;;  %v2373_v29 = vpop.f32.mrb[11].mxu1 }
 0x11a   : > { %v719_v30 = vpop.f32.mrb[12].mxu0 }
 0x11b   : > { %v742_v11 = vadd.f32 %v719_v30, %v541_v58  ;;  %v883_v23 = vpop.f32.mrb[12].mxu1  ;;  %v2392_v31 = vpop.f32.mrb[13].mxu0 }
 0x11c   : > { %v2420_v32 = vpop.f32.mrb[13].mxu1  ;;  %v722_v33 = vpop.f32.mrb[14].mxu0 }
 0x11d   : > { %v906_v34 = vadd.f32 %v883_v23, %v742_v11  ;;  %v743_v36 = vadd.f32 %v722_v33, %v544_v3  ;;  %v886_v59 = vpop.f32.mrb[14].mxu1  ;;  %v2393_v60 = vpop.f32.mrb[15].mxu0 }
 0x11e   : > { %v2421_v37 = vpop.f32.mrb[15].mxu1 }
 0x11f   : > { %v907_v24 = vadd.f32 %v886_v59, %v743_v36 }
 0x122   : > { %v727_v38 = vpop.f32.mrb[16].mxu0 }
 0x123   : > { %v744_v39 = vadd.f32 %v727_v38, %v549_v9  ;;  %v2396_v40 = vpop.f32.mrb[17].mxu0  ;;  %v891_v41 = vpop.f32.mrb[16].mxu1 }
 0x124   : > { %v730_v42 = vpop.f32.mrb[18].mxu0  ;;  %v2424_v43 = vpop.f32.mrb[17].mxu1 }
 0x125   : > { %v745_v61 = vadd.f32 %v730_v42, %v552_v15  ;;  %v908_v4 = vadd.f32 %v891_v41, %v744_v39  ;;  %v894_v16 = vpop.f32.mrb[18].mxu1  ;;  %v2397_v44 = vpop.f32.mrb[19].mxu0 }
 0x126   : > { %v2425_v45 = vpop.f32.mrb[19].mxu1 }
 0x127   : > { %v909_v46 = vadd.f32 %v894_v16, %v745_v61 }
 0x12a   : > { %v735_v47 = vpop.f32.mrb[20].mxu0 }
 0x12b   : > { %v746_v48 = vadd.f32 %v735_v47, %v557_v21  ;;  %v2400_v49 = vpop.f32.mrb[21].mxu0  ;;  %v899_v50 = vpop.f32.mrb[20].mxu1 }
 0x12c   : > { %v738_v51 = vpop.f32.mrb[22].mxu0  ;;  %v2428_v52 = vpop.f32.mrb[21].mxu1 }
 0x12d   : > { %v747_v53 = vadd.f32 %v738_v51, %v560_v28  ;;  %v910_v18 = vadd.f32 %v899_v50, %v746_v48  ;;  %v902_v35 = vpop.f32.mrb[22].mxu1  ;;  %v2401_v54 = vpop.f32.mrb[23].mxu0 }
 0x12e   : > { %v2429_v55 = vpop.f32.mrb[23].mxu1 }
 0x12f   : > { %v911_v56 = vadd.f32 %v902_v35, %v747_v53 }
 0x13a   : > { %v1017_v57 = vpop.f32.mrb[24].mxu0 }
 0x13b   : > { %v1040_v58 = vadd.f32 %v1017_v57, %v906_v34  ;;  %v1201_v62 = vpop.f32.mrb[24].mxu1  ;;  %v2448_v63 = vpop.f32.mrb[25].mxu0 }
 0x13c   : > { %v2476_v0 = vpop.f32.mrb[25].mxu1  ;;  %v1020_v2 = vpop.f32.mrb[26].mxu0 }
 0x13d   : > { %v1224_v3 = vadd.f32 %v1201_v62, %v1040_v58  ;;  %v1041_v5 = vadd.f32 %v1020_v2, %v907_v24  ;;  %v1204_v6 = vpop.f32.mrb[26].mxu1  ;;  %v2449_v7 = vpop.f32.mrb[27].mxu0 }
 0x13e   : > { %v2477_v8 = vpop.f32.mrb[27].mxu1  ;;  %v2180_v7 = vld [vmem:[%s3338_s2] ss:$0 sm:$0xff] }
 0x13f   : > { %v1225_v9 = vadd.f32 %v1204_v6, %v1041_v5 }
 0x142   : > { %v1025_v1 = vpop.f32.mrb[28].mxu0 }
 0x143   : > { %v1042_v12 = vadd.f32 %v1025_v1, %v908_v4  ;;  %v2452_v13 = vpop.f32.mrb[29].mxu0  ;;  %v1209_v14 = vpop.f32.mrb[28].mxu1 }
 0x144   : > { %v1028_v15 = vpop.f32.mrb[30].mxu0  ;;  %v2480_v10 = vpop.f32.mrb[29].mxu1 }
 0x145   : > { %v1043_v17 = vadd.f32 %v1028_v15, %v909_v46  ;;  %v1226_v19 = vadd.f32 %v1209_v14, %v1042_v12  ;;  %v1212_v20 = vpop.f32.mrb[30].mxu1  ;;  %v2453_v21 = vpop.f32.mrb[31].mxu0 }
 0x146   : > { %v2481_v22 = vpop.f32.mrb[31].mxu1 }
 0x147   : > { %v1227_v25 = vadd.f32 %v1212_v20, %v1043_v17 }
 0x14a   : > { %v1033_v26 = vpop.f32.mrb[32].mxu0 }
 0x14b   : > { %v1044_v27 = vadd.f32 %v1033_v26, %v910_v18  ;;  %v2456_v28 = vpop.f32.mrb[33].mxu0  ;;  %v1217_v29 = vpop.f32.mrb[32].mxu1 }
 0x14c   : > { %v1036_v30 = vpop.f32.mrb[34].mxu0  ;;  %v2484_v11 = vpop.f32.mrb[33].mxu1 }
 0x14d   : > { %v1045_v23 = vadd.f32 %v1036_v30, %v911_v56  ;;  %v1228_v31 = vadd.f32 %v1217_v29, %v1044_v27  ;;  %v1220_v32 = vpop.f32.mrb[34].mxu1  ;;  %v2457_v33 = vpop.f32.mrb[35].mxu0 }
 0x14e   : > { %v2485_v34 = vpop.f32.mrb[35].mxu1 }
 0x14f   : > { %v1229_v36 = vadd.f32 %v1220_v32, %v1045_v23 }
 0x15a   : > { %v1365_v59 = vpop.f32.mrb[36].mxu0 }
 0x15b   : > { %v1388_v60 = vadd.f32 %v1365_v59, %v1224_v3  ;;  %v1499_v37 = vpop.f32.mrb[36].mxu1  ;;  %v2504_v24 = vpop.f32.mrb[37].mxu0 }
 0x15c   : > { %v2532_v38 = vpop.f32.mrb[37].mxu1  ;;  %v1368_v39 = vpop.f32.mrb[38].mxu0 }
 0x15d   : > { %v1522_v40 = vadd.f32 %v1499_v37, %v1388_v60  ;;  %v1389_v41 = vadd.f32 %v1368_v39, %v1225_v9  ;;  %v1502_v42 = vpop.f32.mrb[38].mxu1  ;;  %v2505_v43 = vpop.f32.mrb[39].mxu0 }
 0x15e   : > { %v2533_v61 = vpop.f32.mrb[39].mxu1  ;;  %v1770_v43 = vpop.permute.xlu0 %1769 }
 0x15f   : > { %v1523_v4 = vadd.f32 %v1502_v42, %v1389_v41 }
 0x162   : > { %v1373_v16 = vpop.f32.mrb[40].mxu0 }
 0x163   : > { %v1390_v44 = vadd.f32 %v1373_v16, %v1226_v19  ;;  %v2508_v45 = vpop.f32.mrb[41].mxu0  ;;  %v1507_v46 = vpop.f32.mrb[40].mxu1 }
 0x164   : > { %v1376_v47 = vpop.f32.mrb[42].mxu0  ;;  %v2536_v48 = vpop.f32.mrb[41].mxu1 }
 0x165   : > { %v1391_v49 = vadd.f32 %v1376_v47, %v1227_v25  ;;  %v1524_v50 = vadd.f32 %v1507_v46, %v1390_v44  ;;  %v1510_v51 = vpop.f32.mrb[42].mxu1  ;;  %v2509_v52 = vpop.f32.mrb[43].mxu0 }
 0x166   : > { %v2537_v53 = vpop.f32.mrb[43].mxu1  ;;  %v1775_v52 = vpop.permute.xlu0 %1774 }
 0x167   : > { %v1525_v18 = vadd.f32 %v1510_v51, %v1391_v49 }
 0x16a   : > { %v1381_v35 = vpop.f32.mrb[44].mxu0 }
 0x16b   : > { %v1392_v54 = vadd.f32 %v1381_v35, %v1228_v31  ;;  %v2512_v55 = vpop.f32.mrb[45].mxu0  ;;  %v1515_v56 = vpop.f32.mrb[44].mxu1 }
 0x16c   : > { %v1384_v57 = vpop.f32.mrb[46].mxu0  ;;  %v2540_v58 = vpop.f32.mrb[45].mxu1 }
 0x16d   : > { %v1393_v62 = vadd.f32 %v1384_v57, %v1229_v36  ;;  %v1526_v63 = vadd.f32 %v1515_v56, %v1392_v54  ;;  %v1518_v0 = vpop.f32.mrb[46].mxu1  ;;  %v2513_v2 = vpop.f32.mrb[47].mxu0 }
 0x16e   : > { %v2541_v3 = vpop.f32.mrb[47].mxu1 }
 0x16f   : > { %v1527_v5 = vadd.f32 %v1518_v0, %v1393_v62 }
 0x17a   : > { %v1683_v6 = vpop.f32.mrb[48].mxu0 }
 0x17b   : > { %v1706_v8 = vadd.f32 %v1683_v6, %v1522_v40  ;;  %v1691_v9 = vpop.f32.mrb[48].mxu1  ;;  %v2560_v1 = vpop.f32.mrb[49].mxu0 }
 0x17c   : > { %v1708_v12 = vadd.f32 %v1691_v9, %v1524_v50  ;;  %v2564_v13 = vpop.f32.mrb[49].mxu1  ;;  %v1686_v14 = vpop.f32.mrb[50].mxu0 }
 0x17d   : > { %v1719_v15 = vadd.f32 %v2180_v7, %v1706_v8  ;;  %v1707_v10 = vadd.f32 %v1686_v14, %v1523_v4  ;;  %v1694_v17 = vpop.f32.mrb[50].mxu1  ;;  %v2561_v19 = vpop.f32.mrb[51].mxu0 }
 0x17e   : > { %v1721_v20 = vadd.f32 %v2180_v7, %v1708_v12  ;;  %v1709_v21 = vadd.f32 %v1694_v17, %v1525_v18  ;;  %v2565_v22 = vpop.f32.mrb[51].mxu1  ;;  %v1780_v4 = vpop.permute.xlu1 %1779 }
 0x17f   : > { %v1731_v25 = vmin.f32 %v1719_v15, 0.0  ;;  %v1720_v26 = vadd.f32 %v2180_v7, %v1707_v10  ;;  %vm1725_vm3 = vcmp.gt.f32.partialorder %v1719_v15, 0.0  ;;  %v1790_v8 = vpop.permute.xlu0 %1789 }
 0x180   : > { %v1733_v27 = vmin.f32 %v1721_v20, 0.0  ;;  %v1722_v28 = vadd.f32 %v2180_v7, %v1709_v21  ;;  %vm1727_vm4 = vcmp.gt.f32.partialorder %v1721_v20, 0.0 }
 0x181   : > { %v1737_v29 = vmul.f32 1.442695, %v1731_v25  ;;  %v1732_v30 = vmin.f32 %v1720_v26, 0.0  ;;  %vm1726_vm5 = vcmp.gt.f32.partialorder %v1720_v26, 0.0 }
 0x182   : > { %v1741_v11 = vmul.f32 1.442695, %v1733_v27  ;;  %v1734_v23 = vmin.f32 %v1722_v28, 0.0  ;;  %vm1728_vm6 = vcmp.gt.f32.partialorder %v1722_v28, 0.0  ;;  %v1785_v35 = vpop.permute.xlu1 %1784 }
 0x183   : > { %2717 = vpow2.f32 %v1737_v29  ;;  %v1739_v31 = vmul.f32 1.442695, %v1732_v30  ;;  %v1699_v32 = vpop.f32.mrb[52].mxu1 }
 0x184   : > { %2719 = vpow2.f32 %v1741_v11  ;;  %v1743_v33 = vmul.f32 1.442695, %v1734_v23  ;;  %v1710_v34 = vadd.f32 %v1699_v32, %v1526_v63  ;;  %v2568_v36 = vpop.f32.mrb[53].mxu1 }
 0x185   : > { %2721 = vpow2.f32 %v1739_v31  ;;  %v1702_v59 = vpop.f32.mrb[54].mxu1 }
 0x186   : > { %2723 = vpow2.f32 %v1743_v33  ;;  %v1723_v60 = vadd.f32 %v2180_v7, %v1710_v34  ;;  %v1711_v37 = vadd.f32 %v1702_v59, %v1527_v5  ;;  %v2569_v24 = vpop.f32.mrb[55].mxu1  ;;  %v1795_v6 = vpop.permute.xlu1 %1794 }
 0x188   : > { %v1735_v38 = vmin.f32 %v1723_v60, 0.0  ;;  %v1724_v39 = vadd.f32 %v2180_v7, %v1711_v37  ;;  %vm1729_vm7 = vcmp.gt.f32.partialorder %v1723_v60, 0.0 }
 0x18a   : > { %v1745_v40 = vmul.f32 1.442695, %v1735_v38  ;;  %v1736_v41 = vmin.f32 %v1724_v39, 0.0  ;;  %vm1730_vm8 = vcmp.gt.f32.partialorder %v1724_v39, 0.0 }
 0x18c   : > { %2725 = vpow2.f32 %v1745_v40  ;;  %v1747_v42 = vmul.f32 1.442695, %v1736_v41 }
 0x18d   : > { %v2718_v61 = vpop.eup %2717 }
 0x18e   : > { %v2720_v16 = vpop.eup %2719  ;;  %2727 = vpow2.f32 %v1747_v42  ;;  %v2181_v44 = vadd.f32 -1.0, %v2718_v61 }
 0x18f   : > { %v2722_v45 = vpop.eup %2721  ;;  %v2183_v46 = vadd.f32 -1.0, %v2720_v16 }
 0x190   : > { %v2724_v47 = vpop.eup %2723  ;;  %v1755_v48 = vsel %vm1725_vm3, %v1719_v15, %v2181_v44  ;;  %v2182_v49 = vadd.f32 -1.0, %v2722_v45 }
 0x191   : > { %v1757_v50 = vsel %vm1727_vm4, %v1721_v20, %v2183_v46  ;;  %v2184_v51 = vadd.f32 -1.0, %v2724_v47  ;;  %v1797_v18 = vmul.f32 %v1770_v43, %v1755_v48 }
 0x192   : > { %v1756_v53 = vsel %vm1726_vm5, %v1720_v26, %v2182_v49  ;;  %v1799_v56 = vmul.f32 %v1780_v4, %v1757_v50 }
 0x193   : > { %v1758_v54 = vsel %vm1728_vm6, %v1722_v28, %v2184_v51  ;;  %v1798_v55 = vmul.f32 %v1775_v52, %v1756_v53 }
 0x194   : > { %v1800_v57 = vmul.f32 %v1785_v35, %v1758_v54 }
 0x195   : > { %v2204_v58 = vpack.c.bf16 %v1798_v55, %v1797_v18 }
 0x196   : > { %v2726_v62 = vpop.eup %2725  ;;  %v2209_v63 = vpack.c.bf16 %v1800_v57, %v1799_v56 }
 0x197   : > { %2216 = vst [vmem:[%s3311_s14 + $0x8] sm:$0xff] %v2204_v58   ;;  %v2185_v0 = vadd.f32 -1.0, %v2726_v62 }
 0x198   : > { %v2728_v2 = vpop.eup %2727  ;;  %2217 = vst [vmem:[%s3311_s14 + $0x10] sm:$0xff] %v2209_v63  }
 0x199   : > { %v2186_v3 = vadd.f32 -1.0, %v2728_v2  ;;  %v1759_v5 = vsel %vm1729_vm7, %v1723_v60, %v2185_v0 }
 0x19a   : > { %v1801_v1 = vmul.f32 %v1790_v8, %v1759_v5 }
 0x19b   : > { %v1760_v7 = vsel %vm1730_vm8, %v1724_v39, %v2186_v3 }
 0x19c   : > { %v1802_v9 = vmul.f32 %v1795_v6, %v1760_v7 }
 0x19e   : > { %v2214_v12 = vpack.c.bf16 %v1802_v9, %v1801_v1 }
 0x1a0   : > { %2218 = vst [vmem:[%s3311_s14 + $0x18] sm:$0xff] %v2214_v12  }
 0x1a1 PF: > { %s14_s17 = sadd.s32 1, %s2751_s17   ;;  %s3341_s15 = smov %s2747_s16 }
 0x1a2   : > { %p11_p5 = scmp.ge.s32.totalorder %s14_s17, 4   ;;  %s3342_s16 = smov %s3344_s18 }
 0x1a4   :  { %13 = sbr.rel (!%p11_p5) target bundleno = 2 (0x2), region = 80 }

// kernel: original_mac_forward.18
= control target key start
LH: loop header
LB: loop body
LE: loop exit
PB: predicated region body
PF: predicated region fallthrough
CT: control target
= control target key end

     0   :  { %v346_v0 = vmov 0.0   ;;  %vm347_vm0 = vmmov 0   ;;  %s438_s3 = inlined_call_operand.vmem [shape: bf16[128,128], index: 3, kind: input, shape index: {}]   ;;  %s439_s1 = inlined_call_operand.vmem [shape: bf16[128,128], index: 1, kind: input, shape index: {}]   ;;  %s440_s2 = inlined_call_operand.vmem [shape: bf16[2,128], index: 2, kind: input, shape index: {}]   ;;  %s441_s0 = inlined_call_operand.vmem [shape: bf16[2,128], index: 0, kind: input, shape index: {}]   ;;  %s442_s4 = inlined_call_operand.vmem [shape: f32[1,128], index: 4, kind: input, shape index: {}]   ;;  %s443_s5 = inlined_call_operand.vmem [shape: f32[2,128], index: 5, kind: output, shape index: {}]  }
   0x1   :  { %286 = vmatprep.subr.bf16.mxu0 %v346_v0  ;;  %306 = vmatprep.subr.bf16.mxu1 %v346_v0  ;;  %v328_v1 = vld [vmem:[%s438_s3] sm:$0xff]   ;;  %v330_v3 = vld [vmem:[%s438_s3 + $0x8] sm:$0xff]   ;;  %v332_v5 = vld [vmem:[%s438_s3 + $0x10] sm:$0xff]  }
   0x2   :  { %v329_v2 = vld [vmem:[%s439_s1] sm:$0xff]   ;;  %302 = vmatprep.mubr.msk.bf16.mxu0 %vm347_vm0, %v346_v0  ;;  %322 = vmatprep.mubr.msk.bf16.mxu1 %vm347_vm0, %v346_v0  ;;  %v331_v4 = vld [vmem:[%s439_s1 + $0x8] sm:$0xff]   ;;  %v333_v6 = vld [vmem:[%s439_s1 + $0x10] sm:$0xff]  }
   0x3   :  { %287 = vmatpush3.bf16.msra.mxu0 %v328_v1  ;;  %307 = vmatpush3.bf16.msra.mxu1 %v329_v2  ;;  %v334_v7 = vld [vmem:[%s438_s3 + $0x18] sm:$0xff]   ;;  %v336_v9 = vld [vmem:[%s438_s3 + $0x20] sm:$0xff]   ;;  %v338_v11 = vld [vmem:[%s438_s3 + $0x28] sm:$0xff]  }
   0x4   :  { %288 = vmatprep.subr.bf16.mxu0 %v346_v0  ;;  %308 = vmatprep.subr.bf16.mxu1 %v346_v0  ;;  %v335_v8 = vld [vmem:[%s439_s1 + $0x18] sm:$0xff]   ;;  %v337_v10 = vld [vmem:[%s439_s1 + $0x20] sm:$0xff]   ;;  %v339_v12 = vld [vmem:[%s439_s1 + $0x28] sm:$0xff]  }
   0x5   :  { %v340_v13 = vld [vmem:[%s438_s3 + $0x30] sm:$0xff]   ;;  %v342_v15 = vld [vmem:[%s438_s3 + $0x38] sm:$0xff]   ;;  %v38_v17 = vld [vmem:[%s440_s2] sm:$0x1] }
   0x6   :  { %v341_v14 = vld [vmem:[%s439_s1 + $0x30] sm:$0xff]   ;;  %v343_v16 = vld [vmem:[%s439_s1 + $0x38] sm:$0xff]   ;;  %v21_v18 = vld [vmem:[%s441_s0] sm:$0x1] }
   0x7   :  { %289 = vmatpush3.bf16.msra.mxu0 %v330_v3  ;;  %309 = vmatpush3.bf16.msra.mxu1 %v331_v4  ;;  %v266_v21 = vld [vmem:[%s442_s4] ss:$0 sm:$0xff] }
   0x8   :  { %290 = vmatprep.subr.bf16.mxu0 %v346_v0  ;;  %310 = vmatprep.subr.bf16.mxu1 %v346_v0 }
   0xb   :  { %291 = vmatpush3.bf16.msra.mxu0 %v332_v5  ;;  %311 = vmatpush3.bf16.msra.mxu1 %v333_v6 }
   0xc   :  { %292 = vmatprep.subr.bf16.mxu0 %v346_v0  ;;  %312 = vmatprep.subr.bf16.mxu1 %v346_v0 }
   0xf   :  { %293 = vmatpush3.bf16.msra.mxu0 %v334_v7  ;;  %313 = vmatpush3.bf16.msra.mxu1 %v335_v8 }
  0x10   :  { %294 = vmatprep.subr.bf16.mxu0 %v346_v0  ;;  %314 = vmatprep.subr.bf16.mxu1 %v346_v0 }
  0x13   :  { %295 = vmatpush3.bf16.msra.mxu0 %v336_v9  ;;  %315 = vmatpush3.bf16.msra.mxu1 %v337_v10 }
  0x14   :  { %296 = vmatprep.subr.bf16.mxu0 %v346_v0  ;;  %316 = vmatprep.subr.bf16.mxu1 %v346_v0 }
  0x17   :  { %297 = vmatpush3.bf16.msra.mxu0 %v338_v11  ;;  %317 = vmatpush3.bf16.msra.mxu1 %v339_v12 }
  0x18   :  { %298 = vmatprep.subr.bf16.mxu0 %v346_v0  ;;  %318 = vmatprep.subr.bf16.mxu1 %v346_v0 }
  0x1b   :  { %299 = vmatpush3.bf16.msra.mxu0 %v340_v13  ;;  %319 = vmatpush3.bf16.msra.mxu1 %v341_v14 }
  0x1c   :  { %300 = vmatprep.subr.bf16.mxu0 %v346_v0  ;;  %320 = vmatprep.subr.bf16.mxu1 %v346_v0 }
  0x1f   :  { %301 = vmatpush3.bf16.msra.mxu0 %v342_v15  ;;  %321 = vmatpush3.bf16.msra.mxu1 %v343_v16 }
  0x22   :  { %303 = vmatmul.mubr.bf16.vlgmr.msra.gmra.mrb[0].mxu0 %v38_v17  ;;  %323 = vmatmul.mubr.bf16.vlgmr.msra.gmra.mrb[0].mxu1 %v21_v18 }
  0xf5   :  { %v137_v19 = vpop.f32.mrb[0].mxu0  ;;  %v225_v20 = vpop.f32.mrb[0].mxu1 }
  0xf6   :  { %v304_v22 = vpop.f32.mrb[1].mxu0  ;;  %v226_v23 = vadd.f32 %v225_v20, %v137_v19  ;;  %v324_v24 = vpop.f32.mrb[1].mxu1 }
  0xf7   :  { %v140_v25 = vpop.f32.mrb[2].mxu0  ;;  %v228_v26 = vpop.f32.mrb[2].mxu1 }
  0xf8   :  { %v305_v27 = vpop.f32.mrb[3].mxu0  ;;  %v238_v28 = vadd.f32 %v266_v21, %v226_v23  ;;  %v325_v29 = vpop.f32.mrb[3].mxu1 }
  0xfa   :  { %v240_v30 = vmin.f32 %v238_v28, 0.0  ;;  %vm239_vm1 = vcmp.gt.f32.partialorder %v238_v28, 0.0 }
  0xfc   :  { %v241_v31 = vmul.f32 1.442695, %v240_v30 }
  0xfe   :  { %344 = vpow2.f32 %v241_v31 }
 0x108   :  { %v345_v32 = vpop.eup %344 }
 0x109   :  { %v267_v33 = vadd.f32 -1.0, %v345_v32 }
 0x10b   :  { %v244_v34 = vsel %vm239_vm1, %v238_v28, %v267_v33 }
 0x10c   :  { %245 = vst [vmem:[%s443_s5] sm:$0x3] %v244_v34 }

// kernel: original_mac_forward.17
= control target key start
LH: loop header
LB: loop body
LE: loop exit
PB: predicated region body
PF: predicated region fallthrough
CT: control target
= control target key end

     0   :  { %v2473_v0 = vmov 0.0   ;;  %vm2474_vm0 = vmmov 0   ;;  %v41_v7 = vlaneseq  ;;  %vm62_vm1 = vcmask 261120   ;;  %s3086_s4 = inlined_call_operand.vmem [shape: bf16[224,32], index: 4, kind: input, shape index: {}]   ;;  %s3087_s3 = inlined_call_operand.vmem [shape: bf16[2,16,32], index: 3, kind: input, shape index: {}]   ;;  %s3088_s2 = inlined_call_operand.vmem [shape: f32[2,3,32], index: 2, kind: input, shape index: {}]   ;;  %s3089_s1 = inlined_call_operand.vmem [shape: f32[2,32], index: 1, kind: input, shape index: {}]   ;;  %s3090_s5 = inlined_call_operand.vmem [shape: f32[8,32], index: 5, kind: input, shape index: {}]   ;;  %s3091_s0 = inlined_call_operand.vmem [shape: bf16[2,8,32], index: 0, kind: input, shape index: {}]   ;;  %s3092_s6 = inlined_call_operand.<no memory space> [shape: f32[1,1], index: 6, kind: input, shape index: {}]   ;;  %s3093_s7 = inlined_call_operand.vmem [shape: f32[2,32], index: 7, kind: output, shape index: {}]  }
   0x1   :  { %2177 = vmatprep.subr.bf16.mxu0 %v2473_v0  ;;  %2185 = vmatprep.subr.bf16.mxu1 %v2473_v0  ;;  %v2367_v1 = vld [vmem:[%s3086_s4 + $0x40] sm:$0xff]   ;;  %v2369_v3 = vld [vmem:[%s3086_s4 + $0x48] sm:$0xff]   ;;  %v2546_v8 = vld [vmem:[%s3086_s4 + $0x10] sm:$0xff]   ;;  %vm200_vm2 = vcmask 1041409   ;;  %v2475_v47 = vmov 1966171168  }
   0x2   :  { %v2368_v2 = vld [vmem:[%s3086_s4 + $0x40] sm:$0xff]   ;;  %2181 = vmatprep.mubr.msk.bf16.mxu0 %vm2474_vm0, %v2473_v0  ;;  %2189 = vmatprep.mubr.msk.bf16.mxu1 %vm2474_vm0, %v2473_v0  ;;  %v2370_v4 = vld [vmem:[%s3086_s4 + $0x48] sm:$0xff]   ;;  %v2559_v10 = vld [vmem:[%s3086_s4 + $0x18] sm:$0xff]   ;;  %v2561_v11 = vshrl.u32 %v41_v7, 7  ;;  %v325_v48 = vunpack.c.l.s4 %v2475_v47  ;;  %vm867_vm3 = vcmask 254976   ;;  %vm733_vm4 = vcmask 1040384  }
   0x3   :  { %2178 = vmatpush3.bf16.msra.mxu0 %v2367_v1  ;;  %2186 = vmatpush3.bf16.msra.mxu1 %v2368_v2  ;;  %v2371_v5 = vld [vmem:[%s3087_s3] sm:$0xff]   ;;  %v2372_v6 = vld [vmem:[%s3087_s3 + $0x8] sm:$0xff]   ;;  %v2637_v30 = vld [vmem:[%s3086_s4 + $0x30] sm:$0xff]  }
   0x4   :  { %2179 = vmatprep.subr.bf16.mxu0 %v2473_v0  ;;  %2187 = vmatprep.subr.bf16.mxu1 %v2473_v0  ;;  %v2552_v9 = vld [vmem:[%s3086_s4] sm:$0xff]   ;;  %v2568_v12 = vld [vmem:[%s3086_s4 + $0x8] sm:$0xff]   ;;  %v182_v20 = vsub.s32 7, %v2561_v11  ;;  %v2646_v31 = vld [vmem:[%s3086_s4 + $0x38] sm:$0xff]   ;;  %v43_v32 = vsub.s32 3, %v2561_v11  ;;  %v2658_v46 = vsub.s32 0, %v2561_v11  ;;  %v326_v52 = vunpack.c.0.s8 %v325_v48 }
   0x5   :  { %v33_v13 = vld [vmem:[%s3088_s2] sm:$0x7]  ;;  %v34_v14 = vld [vmem:[%s3088_s2 + $0x4] sm:$0x7]  ;;  %v2619_v28 = vld [vmem:[%s3086_s4 + $0x28] sm:$0xff]   ;;  %v320_v49 = vsub.s32 1, %v2561_v11 }
   0x6   :  { %v189_v15 = vpack.c.bf16 %v33_v13, %v33_v13  ;;  %v190_v16 = vpack.c.bf16 %v34_v14, %v34_v14  ;;  %v30_v17 = vld [vmem:[%s3089_s1] sm:$0x3]  ;;  %v425_v59 = vsub.s32 2, %v2561_v11  ;;  %v2672_v63 = vsub.s32 %v326_v52, %v2561_v11 }
   0x7   :  { %2180 = vmatpush3.bf16.msra.mxu0 %v2369_v3  ;;  %2188 = vmatpush3.bf16.msra.mxu1 %v2370_v4  ;;  %v184_v21 = vpack.c.bf16 %v30_v17, %v30_v17  ;;  %v2598_v23 = vld [vmem:[%s3086_s4 + $0x20] sm:$0xff]  }
   0x8   :  { %2193 = vmatprep.subr.bf16.mxu0 %v2473_v0  ;;  %2201 = vmatprep.subr.bf16.mxu1 %v2473_v0  ;;  %v2586_v18 = vunpack.c.l.b16 %v189_v15  ;;  %v2588_v19 = vunpack.c.l.b16 %v190_v16  ;;  %v2606_v25 = vld [vmem:[%s3090_s5] sm:$0xff] }
   0x9   :  { %v2613_v27 = vrot.slane %v2606_v25, %v182_v20  ;;  %v44_v33 = vrot.slane %v2606_v25, %v43_v32  ;;  %v2664_v51 = vrot.slane %v2606_v25, %v2658_v46  ;;  %v2667_v57 = vrot.slane %v2606_v25, %v320_v49  ;;  %v2105_v4 = vld [vmem:[%s3091_s0] sm:$0xff]  }
   0xa   :  { %2182 = vmatmul.mubr.msk.bf16.vlgmr.msra.gmra.mrb[0].mxu0 %vm62_vm1, %v2371_v5  ;;  %2190 = vmatmul.mubr.msk.bf16.vlgmr.msra.gmra.mrb[0].mxu1 %vm62_vm1, %v2372_v6  ;;  %v199_v22 = vrot.slane %v2588_v19, 7  ;;  %v2676_v3 = vrot.slane %v2606_v25, %v425_v59  ;;  %v2684_v15 = vunpack.c.l.bf16 %v2105_v4 }
   0xb   :  { %2194 = vmatpush3.bf16.msra.mxu0 %v2546_v8  ;;  %2202 = vmatpush3.bf16.msra.mxu1 %v2552_v9  ;;  %v2626_v29 = vpack.c.bf16 %v2613_v27, %v2613_v27 }
   0xc   :  { %2195 = vmatprep.subr.bf16.mxu0 %v2473_v0  ;;  %2203 = vmatprep.subr.bf16.mxu1 %v2473_v0  ;;  %v201_v24 = vsel %vm200_vm2, %v199_v22, %v2586_v18 }
   0xd   :  { %2197 = vmatprep.mubr.msk.bf16.mxu0 %vm2474_vm0, %v2473_v0  ;;  %2205 = vmatprep.mubr.msk.bf16.mxu1 %vm2474_vm0, %v2473_v0  ;;  %v202_v26 = vpack.c.b16 %v201_v24, %v201_v24 }
   0xf   :  { %2196 = vmatpush3.bf16.msra.mxu0 %v2559_v10  ;;  %2204 = vmatpush3.bf16.msra.mxu1 %v2568_v12 }
  0x10   :  { %2209 = vmatprep.subr.bf16.mxu0 %v2473_v0  ;;  %2217 = vmatprep.subr.bf16.mxu1 %v2473_v0 }
  0x12   :  { %2206 = vmatmul.mubr.msk.bf16.vlgmr.msra.gmra.mrb[4].mxu1 %vm62_vm1, %v184_v21  ;;  %2198 = vmatmul.mubr.msk.bf16.vlgmr.msra.gmra.mrb[4].mxu0 %vm62_vm1, %v202_v26  ;;  %v2688_v26 = vunpack.c.h.bf16 %v2105_v4 }
  0x13   :  { %2221 = vmatprep.mubr.msk.bf16.mxu1 %vm2474_vm0, %v2473_v0  ;;  %2210 = vmatpush3.bf16.msra.mxu0 %v2598_v23 }
  0x14   :  { %2213 = vmatprep.mubr.msk.bf16.mxu0 %vm2474_vm0, %v2473_v0  ;;  %2211 = vmatprep.subr.bf16.mxu0 %v2473_v0 }
  0x15   :  { %2218 = vmatpush3.bf16.msra.mxu1 %v2637_v30 }
  0x16   :  { %2219 = vmatprep.subr.bf16.mxu1 %v2473_v0 }
  0x17   :  { %2212 = vmatpush3.bf16.msra.mxu0 %v2619_v28 }
  0x18   :  { %2225 = vmatprep.subr.bf16.mxu0 %v2473_v0 }
  0x19   :  { %2220 = vmatpush3.bf16.msra.mxu1 %v2646_v31 }
  0x1a   :  { %2214 = vmatmul.mubr.msk.bf16.vlgmr.msra.gmra.mrb[8].mxu0 %vm62_vm1, %v2626_v29  ;;  %2233 = vmatprep.subr.bf16.mxu1 %v2473_v0 }
  0x1b   :  { %2229 = vmatprep.mubr.msk.bf16.mxu0 %vm2474_vm0, %v2473_v0  ;;  %2226 = vmatpush3.bf16.msra.mxu0 %v2637_v30 }
  0x1c   :  { %2227 = vmatprep.subr.bf16.mxu0 %v2473_v0 }
  0x1f   :  { %2228 = vmatpush3.bf16.msra.mxu0 %v2646_v31 }
  0x20   :  { %2241 = vmatprep.subr.bf16.mxu0 %v2473_v0 }
  0xdd   :  { %v100_v34 = vpop.f32.mrb[0].mxu0  ;;  %v170_v37 = vpop.f32.mrb[0].mxu1 }
  0xde   :  { %v101_v35 = vadd.f32 %v100_v34, %v44_v33  ;;  %v2183_v36 = vpop.f32.mrb[1].mxu0  ;;  %v171_v39 = vadd.f32 %v170_v37, %v44_v33  ;;  %v2191_v40 = vpop.f32.mrb[1].mxu1 }
  0xdf   :  { %v103_v38 = vpop.f32.mrb[2].mxu0  ;;  %v173_v43 = vpop.f32.mrb[2].mxu1  ;;  %v2698_v40 = vld [vmem:[%s3087_s3] sm:$0xf] }
  0xe0   :  { %107 = vst.msk [vmem:[#allocation2] sm:$0xff] %vm62_vm1, %v101_v35  ;;  %v104_v41 = vadd.f32 %v103_v38, %v44_v33  ;;  %v2184_v42 = vpop.f32.mrb[3].mxu0  ;;  %178 = vst.msk [vmem:[#allocation2 + $0x10] sm:$0xff] %vm62_vm1, %v171_v39  ;;  %v174_v44 = vadd.f32 %v173_v43, %v44_v33  ;;  %v2192_v45 = vpop.f32.mrb[3].mxu1 }
  0xe1   :  { %v2714_v45 = vld [vmem:[%s3087_s3 + $0xc] sm:$0xf] }
  0xe2   :  { %108 = vst.msk [vmem:[#allocation2 + $0x8] sm:$0xff] %vm62_vm1, %v104_v41  ;;  %179 = vst.msk [vmem:[#allocation2 + $0x18] sm:$0xff] %vm62_vm1, %v174_v44  ;;  %v2703_v41 = vld [vmem:[%s3087_s3 + $0x4] sm:$0xf]  ;;  %v2709_v44 = vld [vmem:[%s3087_s3 + $0x8] sm:$0xf] }
  0xe5   :  { %v307_v50 = vpop.f32.mrb[4].mxu1  ;;  %v252_v54 = vpop.f32.mrb[4].mxu0 }
  0xe6   :  { %v2207_v53 = vpop.f32.mrb[5].mxu1  ;;  %v308_v56 = vadd.f32 %v307_v50, %v252_v54  ;;  %v2199_v58 = vpop.f32.mrb[5].mxu0 }
  0xe7   :  { %v310_v55 = vpop.f32.mrb[6].mxu1  ;;  %v255_v61 = vpop.f32.mrb[6].mxu0 }
  0xe8   :  { %v2208_v60 = vpop.f32.mrb[7].mxu1  ;;  %v317_v62 = vadd.f32 %v2664_v51, %v308_v56  ;;  %v2200_v1 = vpop.f32.mrb[7].mxu0 }
  0xea   :  { %v322_v2 = vmul.f32 %v2667_v57, %v317_v62 }
  0xec   :  { %v330_v5 = vrot.slane %v322_v2, %v2672_v63 }
  0xed   :  { %v476_v6 = vpop.f32.mrb[8].mxu0 }
  0xee   :  { %v477_v7 = vadd.f32 %v476_v6, %v2676_v3  ;;  %v2215_v13 = vpop.f32.mrb[9].mxu0  ;;  %v338_v14 = vrot.slane %v330_v5, %v2672_v63  ;;  %v331_v16 = vcombine.high %v330_v5, %v330_v5 }
  0xef   :  { %v479_v17 = vpop.f32.mrb[10].mxu0 }
  0xf0   :  { %v482_v20 = vpack.c.bf16 %v477_v7, %v477_v7  ;;  %v2216_v21 = vpop.f32.mrb[11].mxu0  ;;  %v353_v22 = vrot.slane %v338_v14, %v2658_v46  ;;  %v345_v24 = vrot.slane %v331_v16, %v2672_v63 }
  0xf2   :  { %v492_v32 = vpack.i.b16 %v482_v20, %v482_v20  ;;  %v621_v33 = vshrl.u32 %v482_v20, 16  ;;  %v360_v34 = vmul.f32 %v2684_v15, %v353_v22  ;;  %v357_v35 = vrot.slane %v345_v24, %v2658_v46 }
  0xf4   :  { %v497_v36 = vrot.slane %v492_v32, %v2658_v46  ;;  %v622_v37 = vpack.i.b16 %v621_v33, %v621_v33  ;;  %v362_v38 = vsel %vm62_vm1, %v360_v34, 0.0  ;;  %v361_v39 = vmul.f32 %v2688_v26, %v357_v35 }
  0xf5   :  { %363 = vadd.xlane.f32.xlu0 %v362_v38 }
  0xf6   :  { %v2063_v42 = vcombine.low %v497_v36, %v497_v36  ;;  %v627_v43 = vrot.slane %v622_v37, %v2658_v46  ;;  %v365_v50 = vsel %vm62_vm1, %v361_v39, 0.0 }
  0xf8   :  { %v502_v47 = vmul.bf16 %v2063_v42, %v2698_v40  ;;  %v503_v48 = vmul.bf16 %v2063_v42, %v2703_v41  ;;  %v2070_v49 = vcombine.low %v627_v43, %v627_v43 }
  0xf9   :  { %366 = vadd.xlane.f32.xlu0 %v365_v50 }
  0xfa   :  { %v2064_v52 = vcombine.low %v502_v47, %v503_v48  ;;  %v632_v53 = vmul.bf16 %v2070_v49, %v2709_v44  ;;  %v633_v54 = vmul.bf16 %v2070_v49, %v2714_v45 }
  0xfc   :  { %v2071_v55 = vcombine.low %v632_v53, %v633_v54  ;;  %2222 = vmatmul.mubr.msk.bf16.vlgmr.msra.gmra.mrb[8].mxu1 %vm62_vm1, %v2064_v52 }
  0xfd   :  { %2237 = vmatprep.mubr.msk.bf16.mxu1 %vm2474_vm0, %v2473_v0 }
  0xfe   :  { %2230 = vmatmul.mubr.msk.bf16.vlgmr.msra.gmra.mrb[12].mxu0 %vm62_vm1, %v2071_v55 }
  0xff   :  { %2245 = vmatprep.mubr.msk.bf16.mxu0 %vm2474_vm0, %v2473_v0 }
 0x182   :  { %v364_v56 = vpop.xlane.xlu0 %363 }
 0x183   :  { %v368_v58 = vrot.slane %v364_v56, 4 }
 0x185   :  { %v369_v59 = vmax.f32 %v364_v56, %v368_v58 }
 0x186   :  { %v367_v60 = vpop.xlane.xlu0 %366 }
 0x187   :  { %v370_v61 = vrot.slane %v369_v59, 2  ;;  %v374_v62 = vrot.slane %v367_v60, 4 }
 0x189   :  { %v371_v1 = vmax.f32 %v369_v59, %v370_v61  ;;  %v375_v2 = vmax.f32 %v367_v60, %v374_v62 }
 0x18b   :  { %v372_v4 = vrot.slane %v371_v1, 1  ;;  %v376_v5 = vrot.slane %v375_v2, 2 }
 0x18d   :  { %v373_v6 = vmax.f32 %v371_v1, %v372_v4  ;;  %v377_v7 = vmax.f32 %v375_v2, %v376_v5 }
 0x18f   :  { %v380_v13 = vsub.f32 %v364_v56, %v373_v6  ;;  %v378_v14 = vrot.slane %v377_v7, 1 }
 0x191   :  { %v382_v16 = vmul.f32 1.442695, %v380_v13  ;;  %v379_v17 = vmax.f32 %v377_v7, %v378_v14  ;;  %v485_v7 = vsub.s32 4, %v2561_v11 }
 0x193   :  { %2385 = vpow2.f32 %v382_v16  ;;  %v381_v20 = vsub.f32 %v367_v60, %v379_v17  ;;  %v2733_v16 = vrot.slane %v2606_v25, %v485_v7 }
 0x195   :  { %v384_v21 = vmul.f32 1.442695, %v381_v20 }
 0x197   :  { %2387 = vpow2.f32 %v384_v21  ;;  %v858_v21 = vsub.s32 6, %v2561_v11 }
 0x19d   :  { %v2386_v22 = vpop.eup %2385 }
 0x19e   :  { %v386_v24 = vrot.slane %v2386_v22, 4 }
 0x1a0   :  { %v387_v32 = vadd.f32 %v2386_v22, %v386_v24 }
 0x1a1   :  { %v2388_v33 = vpop.eup %2387 }
 0x1a2   :  { %v388_v34 = vrot.slane %v387_v32, 2  ;;  %v392_v35 = vrot.slane %v2388_v33, 4 }
 0x1a4   :  { %v389_v36 = vadd.f32 %v388_v34, %v387_v32  ;;  %v393_v37 = vadd.f32 %v2388_v33, %v392_v35  ;;  %v2738_v34 = vrot.slane %v2606_v25, %v858_v21 }
 0x1a6   :  { %v394_v38 = vrot.slane %v393_v37, 2  ;;  %v390_v39 = vrot.slane %v389_v36, 1 }
 0x1a8   :  { %v395_v42 = vadd.f32 %v394_v38, %v393_v37  ;;  %v391_v43 = vadd.f32 %v390_v39, %v389_v36  ;;  %v2744_v37 = vld [vmem:[#allocation2] sm:$0xff] }
 0x1aa   :  { %v396_v47 = vrot.slane %v395_v42, 1  ;;  %2389 = vrcp.f32 %v391_v43 }
 0x1ac   :  { %v397_v48 = vadd.f32 %v396_v47, %v395_v42 }
 0x1ae   :  { %2391 = vrcp.f32 %v397_v48  ;;  %v2749_v48 = vld [vmem:[#allocation2 + $0x8] sm:$0xff] }
 0x1b4   :  { %v2390_v49 = vpop.eup %2389 }
 0x1b5   :  { %v399_v50 = vmul.f32 %v2390_v49, %v2386_v22 }
 0x1b7   :  { %v402_v52 = vmul.f32 %v2684_v15, %v399_v50  ;;  %v2751_v50 = vld [vmem:[#allocation2 + $0x10] sm:$0xff] }
 0x1b8   :  { %v2392_v53 = vpop.eup %2391 }
 0x1b9   :  { %v404_v54 = vsel %vm62_vm1, %v402_v52, 0.0  ;;  %v401_v55 = vmul.f32 %v2392_v53, %v2388_v33 }
 0x1ba   :  { %v405_v56 = vrot.slane %v404_v54, 4 }
 0x1bb   :  { %v403_v58 = vmul.f32 %v2688_v26, %v401_v55 }
 0x1bc   :  { %v406_v59 = vadd.f32 %v405_v56, %v404_v54 }
 0x1bd   :  { %v411_v60 = vsel %vm62_vm1, %v403_v58, 0.0 }
 0x1be   :  { %v407_v61 = vrot.slane %v406_v59, 2  ;;  %v412_v62 = vrot.slane %v411_v60, 4 }
 0x1c0   :  { %v408_v1 = vadd.f32 %v407_v61, %v406_v59  ;;  %v413_v2 = vadd.f32 %v412_v62, %v411_v60  ;;  %v2756_v60 = vld [vmem:[#allocation2 + $0x18] sm:$0xff] }
 0x1c2   :  { %v409_v4 = vrot.slane %v408_v1, 1  ;;  %v414_v5 = vrot.slane %v413_v2, 2 }
 0x1c4   :  { %v410_v6 = vadd.f32 %v409_v4, %v408_v1  ;;  %v415_v13 = vadd.f32 %v414_v5, %v413_v2 }
 0x1c6   :  { %v416_v14 = vrot.slane %v415_v13, 1  ;;  %v898_v17 = vpack.c.bf16 %v410_v6, %v410_v6  ;;  %v487_v24 = vmul.f32 %v2733_v16, %v410_v6 }
 0x1c8   :  { %v417_v20 = vadd.f32 %v416_v14, %v415_v13  ;;  %v948_v32 = vunpack.c.l.b16 %v898_v17  ;;  %v574_v47 = vrot.slane %v487_v24, %v2658_v46  ;;  %v860_v13 = vmul.f32 %v2738_v34, %v410_v6 }
 0x1c9   :  { %v12_v6 = vstv %s3092_s6 }
 0x1ca   :  { %v899_v22 = vpack.c.bf16 %v417_v20, %v417_v20  ;;  %v488_v35 = vmul.f32 %v2733_v16, %v417_v20  ;;  %v861_v39 = vmul.f32 %v2738_v34, %v417_v20  ;;  %13 = vst [vmem:[#allocation3] sm:$0x1] %v12_v6 }
 0x1cc   :  { %v949_v33 = vunpack.c.l.b16 %v899_v22  ;;  %v688_v59 = vrot.slane %v488_v35, %v2658_v46  ;;  %v864_v62 = vrot.slane %v861_v39, 7  ;;  %v2777_v35 = vld [vmem:[%s3086_s4 + $0x50] sm:$0xff]   ;;  %v2789_v39 = vld [vmem:[%s3086_s4 + $0x58] sm:$0xff]  }
 0x1cd   :  { %2242 = vmatpush3.bf16.msra.mxu0 %v2777_v35 }
 0x1ce   :  { %v2742_v36 = vsel %vm200_vm2, %v949_v33, %v948_v32  ;;  %v865_v17 = vsel %vm200_vm2, %v864_v62, %v860_v13  ;;  %v2476_v32 = vmov 0   ;;  %v2772_v33 = vld [vmem:[%s3086_s4 + $0x60] sm:$0xff]   ;;  %2243 = vmatprep.subr.bf16.mxu0 %v2473_v0 }
 0x1cf   :  { %v564_v38 = vpop.f32.mrb[8].mxu1  ;;  %v868_v22 = vsel %vm867_vm3, %v865_v17, 0.0  ;;  %2365 = vset.pattern.permute.xlu1 %v2476_v32  ;;  %2366 = vset.pattern.permute.xlu0 %v2476_v32 }
 0x1d0   :  { %v565_v42 = vadd.f32 %v564_v38, %v2744_v37  ;;  %v2223_v43 = vpop.f32.mrb[9].mxu1  ;;  %2234 = vmatpush3.bf16.msra.mxu1 %v2772_v33  ;;  %v2784_v38 = vld [vmem:[%s3086_s4 + $0x68] sm:$0xff]  }
 0x1d1   :  { %v567_v49 = vpop.f32.mrb[10].mxu1  ;;  %v678_v52 = vpop.f32.mrb[12].mxu0  ;;  %2235 = vmatprep.subr.bf16.mxu1 %v2473_v0  ;;  %2244 = vmatpush3.bf16.msra.mxu0 %v2789_v39 }
 0x1d2   :  { %v568_v53 = vadd.f32 %v567_v49, %v2749_v48  ;;  %v679_v54 = vadd.f32 %v678_v52, %v2751_v50  ;;  %v2224_v55 = vpop.f32.mrb[11].mxu1  ;;  %v2231_v56 = vpop.f32.mrb[13].mxu0  ;;  %v575_v58 = vmul.f32 %v574_v47, %v565_v42  ;;  %2257 = vmatprep.subr.bf16.mxu0 %v2473_v0  ;;  %v900_v42 = vrot.slane %v2586_v18, 1 }
 0x1d3   :  { %v681_v61 = vpop.f32.mrb[14].mxu0 }
 0x1d4   :  { %v682_v1 = vadd.f32 %v681_v61, %v2756_v60  ;;  %v2232_v2 = vpop.f32.mrb[15].mxu0  ;;  %v577_v4 = vsel %vm62_vm1, %v575_v58, 0.0  ;;  %v689_v5 = vmul.f32 %v688_v59, %v679_v54  ;;  %v576_v7 = vmul.f32 %v574_v47, %v568_v53  ;;  %2236 = vmatpush3.bf16.msra.mxu1 %v2784_v38 }
 0x1d5   :  { %578 = vadd.xlane.f32.xlu1 %v577_v4  ;;  %2249 = vmatprep.subr.bf16.mxu1 %v2473_v0  ;;  %v901_v43 = vsel %vm200_vm2, %v2588_v19, %v900_v42 }
 0x1d6   :  { %v691_v14 = vsel %vm62_vm1, %v689_v5, 0.0  ;;  %v580_v20 = vsel %vm62_vm1, %v576_v7, 0.0  ;;  %v690_v21 = vmul.f32 %v688_v59, %v682_v1  ;;  %v902_v47 = vpack.c.b16 %v901_v43, %v901_v43 }
 0x1d7   :  { %692 = vadd.xlane.f32.xlu0 %v691_v14  ;;  %2238 = vmatmul.mubr.msk.bf16.vlgmr.msra.gmra.mrb[12].mxu1 %vm62_vm1, %v2626_v29 }
 0x1d8   :  { %v694_v24 = vsel %vm62_vm1, %v690_v21, 0.0  ;;  %2250 = vmatpush3.bf16.msra.mxu1 %v2546_v8  ;;  %2253 = vmatprep.mubr.msk.bf16.mxu1 %vm2474_vm0, %v2473_v0  ;;  %v31_v8 = vld [vmem:[#allocation3] sm:$0x1] }
 0x1d9   :  { %581 = vadd.xlane.f32.xlu1 %v580_v20  ;;  %2251 = vmatprep.subr.bf16.mxu1 %v2473_v0 }
 0x1db   :  { %869 = vadd.xlane.f32.xlu0 %v868_v22 }
 0x1dc   :  { %2252 = vmatpush3.bf16.msra.mxu1 %v2559_v10  ;;  %v32_v10 = vadd.f32 1.0, %v31_v8 }
 0x1dd   :  { %695 = vadd.xlane.f32.xlu1 %v694_v24  ;;  %2265 = vmatprep.subr.bf16.mxu1 %v2473_v0 }
 0x1de   :  { %v2816_v52 = vrot.slane %v32_v10, %v2658_v46 }
 0x1df   :  { %2254 = vmatmul.mubr.msk.bf16.vlgmr.msra.gmra.mrb[16].mxu1 %vm62_vm1, %v902_v47 }
 0x1e0   :  { %2266 = vmatpush3.bf16.msra.mxu1 %v2598_v23  ;;  %2269 = vmatprep.mubr.msk.bf16.mxu1 %vm2474_vm0, %v2473_v0 }
 0x1e1   :  { %2267 = vmatprep.subr.bf16.mxu1 %v2473_v0 }
 0x1e4   :  { %2268 = vmatpush3.bf16.msra.mxu1 %v2619_v28 }
 0x1e5   :  { %2281 = vmatprep.subr.bf16.mxu1 %v2473_v0 }
 0x262   :  { %v579_v29 = vpop.xlane.xlu1 %578 }
 0x264   :  { %v693_v49 = vpop.xlane.xlu0 %692 }
 0x266   :  { %v582_v53 = vpop.xlane.xlu1 %581 }
 0x267   :  { %v583_v54 = vmax.f32 %v579_v29, %v582_v53 }
 0x268   :  { %v870_v55 = vpop.xlane.xlu0 %869 }
 0x269   :  { %v584_v23 = vrot.slane %v583_v54, 4  ;;  %v877_v56 = vadd.f32 %v2816_v52, %v870_v55 }
 0x26a   :  { %v696_v58 = vpop.xlane.xlu1 %695 }
 0x26b   :  { %v585_v59 = vmax.f32 %v583_v54, %v584_v23  ;;  %v2079_v61 = vmul.f32 -1.442695, %v877_v56  ;;  %v697_v62 = vmax.f32 %v693_v49, %v696_v58 }
 0x26d   :  { %v586_v28 = vrot.slane %v585_v59, 2  ;;  %2393 = vpow2.f32 %v2079_v61  ;;  %v698_v1 = vrot.slane %v697_v62, 4 }
 0x26f   :  { %v587_v2 = vmax.f32 %v585_v59, %v586_v28  ;;  %v699_v4 = vmax.f32 %v697_v62, %v698_v1 }
 0x271   :  { %v588_v5 = vrot.slane %v587_v2, 1  ;;  %v700_v7 = vrot.slane %v699_v4, 2 }
 0x273   :  { %v589_v13 = vmax.f32 %v587_v2, %v588_v5  ;;  %v701_v14 = vmax.f32 %v699_v4, %v700_v7 }
 0x275   :  { %v590_v17 = vsub.f32 %v579_v29, %v589_v13  ;;  %v591_v20 = vsub.f32 %v582_v53, %v589_v13  ;;  %v702_v21 = vrot.slane %v701_v14, 1 }
 0x277   :  { %v2394_v22 = vpop.eup %2393  ;;  %v592_v24 = vmul.f32 1.442695, %v590_v17  ;;  %v594_v6 = vmul.f32 1.442695, %v591_v20  ;;  %v703_v32 = vmax.f32 %v701_v14, %v702_v21  ;;  %v2820_v20 = vunpack.c.l.bf16 %v2698_v40 }
 0x278   :  { %v881_v42 = vadd.f32 1.0, %v2394_v22  ;;  %v2823_v21 = vunpack.c.l.bf16 %v2703_v41 }
 0x279   :  { %2395 = vpow2.f32 %v592_v24  ;;  %v704_v43 = vsub.f32 %v693_v49, %v703_v32  ;;  %v705_v47 = vsub.f32 %v696_v58, %v703_v32  ;;  %v2826_v32 = vunpack.c.l.bf16 %v2709_v44 }
 0x27a   :  { %2397 = vpow2.f32 %v594_v6 }
 0x27b   :  { %2399 = vrcp.f32 %v881_v42  ;;  %v706_v8 = vmul.f32 1.442695, %v704_v43  ;;  %v708_v10 = vmul.f32 1.442695, %v705_v47  ;;  %v2829_v42 = vunpack.c.l.bf16 %v2714_v45 }
 0x27d   :  { %2401 = vpow2.f32 %v706_v8 }
 0x27e   :  { %2403 = vpow2.f32 %v708_v10 }
 0x283   :  { %v2396_v54 = vpop.eup %2395 }
 0x284   :  { %v2398_v55 = vpop.eup %2397 }
 0x285   :  { %v2400_v23 = vpop.eup %2399  ;;  %v596_v29 = vadd.f32 %v2398_v55, %v2396_v54 }
 0x286   :  { %886 = vperm.xlu1 %2365, %v2400_v23   ;;  %v890_v53 = vsub.f32 1.0, %v2400_v23 }
 0x287   :  { %v2402_v56 = vpop.eup %2401  ;;  %v597_v59 = vrot.slane %v596_v29, 4 }
 0x288   :  { %v2404_v61 = vpop.eup %2403  ;;  %893 = vperm.xlu0 %2366, %v890_v53  }
 0x289   :  { %v598_v62 = vadd.f32 %v597_v59, %v596_v29  ;;  %v710_v28 = vadd.f32 %v2404_v61, %v2402_v56 }
 0x28b   :  { %v599_v49 = vrot.slane %v598_v62, 2  ;;  %v711_v58 = vrot.slane %v710_v28, 4 }
 0x28d   :  { %v600_v1 = vadd.f32 %v599_v49, %v598_v62  ;;  %v712_v2 = vadd.f32 %v711_v58, %v710_v28 }
 0x28f   :  { %v601_v4 = vrot.slane %v600_v1, 1  ;;  %v713_v5 = vrot.slane %v712_v2, 2 }
 0x291   :  { %v602_v7 = vadd.f32 %v601_v4, %v600_v1  ;;  %v714_v13 = vadd.f32 %v713_v5, %v712_v2 }
 0x293   :  { %2405 = vrcp.f32 %v602_v7  ;;  %v715_v14 = vrot.slane %v714_v13, 1 }
 0x295   :  { %v716_v17 = vadd.f32 %v715_v14, %v714_v13 }
 0x297   :  { %2407 = vrcp.f32 %v716_v17 }
 0x29d   :  { %v2406_v22 = vpop.eup %2405 }
 0x29e   :  { %v604_v24 = vmul.f32 %v2406_v22, %v2396_v54  ;;  %v605_v6 = vmul.f32 %v2406_v22, %v2398_v55 }
 0x2a0   :  { %v608_v43 = vmul.f32 %v2820_v20, %v604_v24  ;;  %v609_v47 = vmul.f32 %v2823_v21, %v605_v6 }
 0x2a1   :  { %v2408_v8 = vpop.eup %2407 }
 0x2a2   :  { %v610_v10 = vsel %vm62_vm1, %v608_v43, 0.0  ;;  %v611_v23 = vsel %vm62_vm1, %v609_v47, 0.0  ;;  %v718_v29 = vmul.f32 %v2408_v8, %v2402_v56  ;;  %v719_v53 = vmul.f32 %v2408_v8, %v2404_v61 }
 0x2a3   :  { %v612_v59 = vadd.f32 %v611_v23, %v610_v10  ;;  %v951_v43 = vpack.c.b16 %v2742_v36, %v2742_v36 }
 0x2a4   :  { %v722_v54 = vmul.f32 %v2826_v32, %v718_v29  ;;  %v723_v55 = vmul.f32 %v2829_v42, %v719_v53  ;;  %v853_v53 = vsub.s32 5, %v2561_v11 }
 0x2a5   :  { %v613_v62 = vrot.slane %v612_v59, 4 }
 0x2a6   :  { %v724_v28 = vsel %vm62_vm1, %v722_v54, 0.0  ;;  %v725_v49 = vsel %vm62_vm1, %v723_v55, 0.0 }
 0x2a7   :  { %v726_v58 = vadd.f32 %v725_v49, %v724_v28  ;;  %v614_v1 = vadd.f32 %v613_v62, %v612_v59  ;;  %v2858_v59 = vrot.slane %v2606_v25, %v853_v53 }
 0x2a9   :  { %v727_v2 = vrot.slane %v726_v58, 4  ;;  %v615_v4 = vrot.slane %v614_v1, 2 }
 0x2ab   :  { %v616_v5 = vadd.f32 %v615_v4, %v614_v1  ;;  %v728_v7 = vadd.f32 %v727_v2, %v726_v58 }
 0x2ad   :  { %v729_v13 = vrot.slane %v728_v7, 2  ;;  %v617_v14 = vrot.slane %v616_v5, 1 }
 0x2af   :  { %v730_v56 = vadd.f32 %v729_v13, %v728_v7  ;;  %v618_v17 = vadd.f32 %v617_v14, %v616_v5 }
 0x2b1   :  { %v731_v61 = vrot.slane %v730_v56, 1 }
 0x2b3   :  { %v732_v22 = vadd.f32 %v731_v61, %v730_v56 }
 0x2b5   :  { %v734_v24 = vsel %vm733_vm4, %v618_v17, %v732_v22 }
 0x2b6   :  { %v735_v6 = vpack.c.bf16 %v734_v24, %v734_v24 }
 0x2b8   :  { %2246 = vmatmul.mubr.msk.bf16.vlgmr.msra.gmra.mrb[16].mxu0 %vm62_vm1, %v735_v6 }
 0x2b9   :  { %2258 = vmatpush3.bf16.msra.mxu0 %v2552_v9  ;;  %2261 = vmatprep.mubr.msk.bf16.mxu0 %vm2474_vm0, %v2473_v0  ;;  %v790_v9 = vpop.f32.mrb[12].mxu1 }
 0x2ba   :  { %2259 = vmatprep.subr.bf16.mxu0 %v2473_v0 }
 0x2bd   :  { %2260 = vmatpush3.bf16.msra.mxu0 %v2568_v12  ;;  %v2239_v12 = vpop.f32.mrb[13].mxu1 }
 0x2be   :  { %2273 = vmatprep.subr.bf16.mxu0 %v2473_v0  ;;  %v793_v47 = vpop.f32.mrb[14].mxu1 }
 0x2bf   :  { %v2240_v8 = vpop.f32.mrb[15].mxu1 }
 0x2c0   :  { %2262 = vmatmul.mubr.msk.bf16.vlgmr.msra.gmra.mrb[20].mxu0 %vm62_vm1, %v951_v43  ;;  %v940_v36 = vpop.f32.mrb[16].mxu1 }
 0x2c1   :  { %2274 = vmatpush3.bf16.msra.mxu0 %v2637_v30  ;;  %2277 = vmatprep.mubr.msk.bf16.mxu0 %vm2474_vm0, %v2473_v0  ;;  %v2255_v10 = vpop.f32.mrb[17].mxu1 }
 0x2c2   :  { %2275 = vmatprep.subr.bf16.mxu0 %v2473_v0  ;;  %v943_v23 = vpop.f32.mrb[18].mxu1 }
 0x2c3   :  { %v2256_v29 = vpop.f32.mrb[19].mxu1 }
 0x2c5   :  { %2276 = vmatpush3.bf16.msra.mxu0 %v2646_v31 }
 0x2c6   :  { %2289 = vmatprep.subr.bf16.mxu0 %v2473_v0 }
 0x305   :  { %v887_v28 = vpop.permute.xlu1 %886 }
 0x306   :  { %v889_v4 = vmul.f32 %v887_v28, %v2613_v27 }
 0x307   :  { %v894_v2 = vpop.permute.xlu0 %893 }
 0x38b   :  { %v845_v54 = vpop.f32.mrb[16].mxu0 }
 0x38c   :  { %v846_v55 = vadd.f32 %v845_v54, %v790_v9  ;;  %v2247_v62 = vpop.f32.mrb[17].mxu0 }
 0x38d   :  { %v848_v49 = vpop.f32.mrb[18].mxu0 }
 0x38e   :  { %v855_v58 = vadd.f32 %v2858_v59, %v846_v55  ;;  %v2248_v1 = vpop.f32.mrb[19].mxu0 }
 0x390   :  { %v896_v5 = vmul.f32 %v894_v2, %v855_v58 }
 0x392   :  { %v2862_v7 = vadd.f32 %v896_v5, %v889_v4 }
 0x393   :  { %v989_v13 = vpop.f32.mrb[20].mxu0 }
 0x394   :  { %v2866_v11 = vpack.c.bf16 %v2862_v7, %v2862_v7  ;;  %v990_v25 = vadd.f32 %v989_v13, %v940_v36  ;;  %v2263_v14 = vpop.f32.mrb[21].mxu0 }
 0x395   :  { %v992_v56 = vpop.f32.mrb[22].mxu0 }
 0x396   :  { %v995_v61 = vadd.f32 %v990_v25, %v2664_v51  ;;  %v2264_v17 = vpop.f32.mrb[23].mxu0  ;;  %2270 = vmatmul.mubr.msk.bf16.vlgmr.msra.gmra.mrb[20].mxu1 %vm62_vm1, %v2866_v11 }
 0x397   :  { %2282 = vmatpush3.bf16.msra.mxu1 %v2637_v30  ;;  %2285 = vmatprep.mubr.msk.bf16.mxu1 %vm2474_vm0, %v2473_v0 }
 0x398   :  { %v996_v27 = vmul.f32 %v995_v61, %v2667_v57  ;;  %2283 = vmatprep.subr.bf16.mxu1 %v2473_v0 }
 0x39a   :  { %v1004_v22 = vrot.slane %v996_v27, %v2672_v63 }
 0x39b   :  { %2284 = vmatpush3.bf16.msra.mxu1 %v2646_v31 }
 0x39c   :  { %v1012_v24 = vrot.slane %v1004_v22, %v2672_v63  ;;  %v1005_v6 = vcombine.high %v1004_v22, %v1004_v22  ;;  %2297 = vmatprep.subr.bf16.mxu1 %v2473_v0 }
 0x39e   :  { %v1023_v43 = vrot.slane %v1012_v24, %v2658_v46  ;;  %v1019_v30 = vrot.slane %v1005_v6, %v2672_v63 }
 0x3a0   :  { %v1030_v9 = vmul.f32 %v2684_v15, %v1023_v43  ;;  %v1027_v12 = vrot.slane %v1019_v30, %v2658_v46 }
 0x3a2   :  { %v1032_v47 = vsel %vm62_vm1, %v1030_v9, 0.0  ;;  %v1031_v8 = vmul.f32 %v2688_v26, %v1027_v12 }
 0x3a3   :  { %1033 = vadd.xlane.f32.xlu1 %v1032_v47 }
 0x3a4   :  { %v1035_v31 = vsel %vm62_vm1, %v1031_v8, 0.0 }
 0x3a5   :  { %1036 = vadd.xlane.f32.xlu0 %v1035_v31 }
 0x430   :  { %v1034_v36 = vpop.xlane.xlu1 %1033 }
 0x431   :  { %v1038_v10 = vrot.slane %v1034_v36, 4 }
 0x432   :  { %v1037_v23 = vpop.xlane.xlu0 %1036 }
 0x433   :  { %v1039_v29 = vmax.f32 %v1034_v36, %v1038_v10  ;;  %v1044_v53 = vrot.slane %v1037_v23, 4 }
 0x435   :  { %v1040_v54 = vrot.slane %v1039_v29, 2  ;;  %v1045_v55 = vmax.f32 %v1037_v23, %v1044_v53 }
 0x437   :  { %v1041_v62 = vmax.f32 %v1039_v29, %v1040_v54  ;;  %v1046_v28 = vrot.slane %v1045_v55, 2 }
 0x439   :  { %v1042_v49 = vrot.slane %v1041_v62, 1  ;;  %v1047_v58 = vmax.f32 %v1045_v55, %v1046_v28 }
 0x43b   :  { %v1043_v1 = vmax.f32 %v1041_v62, %v1042_v49  ;;  %v1048_v2 = vrot.slane %v1047_v58, 1 }
 0x43d   :  { %v1050_v4 = vsub.f32 %v1034_v36, %v1043_v1  ;;  %v1049_v5 = vmax.f32 %v1047_v58, %v1048_v2 }
 0x43f   :  { %v1052_v13 = vmul.f32 1.442695, %v1050_v4  ;;  %v1051_v25 = vsub.f32 %v1037_v23, %v1049_v5 }
 0x441   :  { %2409 = vpow2.f32 %v1052_v13  ;;  %v1054_v14 = vmul.f32 1.442695, %v1051_v25 }
 0x443   :  { %2411 = vpow2.f32 %v1054_v14 }
 0x44b   :  { %v2410_v56 = vpop.eup %2409 }
 0x44c   :  { %v1056_v61 = vrot.slane %v2410_v56, 4 }
 0x44d   :  { %v2412_v17 = vpop.eup %2411 }
 0x44e   :  { %v1057_v27 = vadd.f32 %v2410_v56, %v1056_v61  ;;  %v1062_v22 = vrot.slane %v2412_v17, 4 }
 0x450   :  { %v1058_v24 = vrot.slane %v1057_v27, 2  ;;  %v1063_v6 = vadd.f32 %v2412_v17, %v1062_v22 }
 0x452   :  { %v1059_v43 = vadd.f32 %v1058_v24, %v1057_v27  ;;  %v1064_v30 = vrot.slane %v1063_v6, 2 }
 0x454   :  { %v1060_v9 = vrot.slane %v1059_v43, 1  ;;  %v1065_v12 = vadd.f32 %v1064_v30, %v1063_v6 }
 0x456   :  { %v1066_v47 = vrot.slane %v1065_v12, 1  ;;  %v1061_v8 = vadd.f32 %v1060_v9, %v1059_v43 }
 0x458   :  { %2413 = vrcp.f32 %v1061_v8  ;;  %v1067_v31 = vadd.f32 %v1066_v47, %v1065_v12 }
 0x45a   :  { %2415 = vrcp.f32 %v1067_v31 }
 0x462   :  { %v2414_v36 = vpop.eup %2413 }
 0x463   :  { %v1069_v10 = vmul.f32 %v2414_v36, %v2410_v56 }
 0x464   :  { %v2416_v23 = vpop.eup %2415 }
 0x465   :  { %v1072_v29 = vmul.f32 %v2684_v15, %v1069_v10  ;;  %v1071_v53 = vmul.f32 %v2416_v23, %v2412_v17 }
 0x467   :  { %v1074_v54 = vsel %vm62_vm1, %v1072_v29, 0.0  ;;  %v1073_v55 = vmul.f32 %v2688_v26, %v1071_v53 }
 0x468   :  { %v1075_v62 = vrot.slane %v1074_v54, 4 }
 0x469   :  { %v1126_v28 = vpop.f32.mrb[20].mxu1  ;;  %v1081_v49 = vsel %vm62_vm1, %v1073_v55, 0.0 }
 0x46a   :  { %v1127_v58 = vadd.f32 %v1126_v28, %v2676_v3  ;;  %v2271_v1 = vpop.f32.mrb[21].mxu1  ;;  %v1076_v2 = vadd.f32 %v1075_v62, %v1074_v54  ;;  %v1082_v4 = vrot.slane %v1081_v49, 4 }
 0x46b   :  { %v1129_v5 = vpop.f32.mrb[22].mxu1 }
 0x46c   :  { %v1132_v13 = vpack.c.bf16 %v1127_v58, %v1127_v58  ;;  %v2272_v25 = vpop.f32.mrb[23].mxu1  ;;  %v1077_v14 = vrot.slane %v1076_v2, 2  ;;  %v1083_v56 = vadd.f32 %v1082_v4, %v1081_v49  ;;  %v2458_v49 = vld [vmem:[%s3086_s4 + $0x18] sm:$0xff]  }
 0x46e   :  { %v1136_v61 = vpack.i.b16 %v1132_v13, %v1132_v13  ;;  %v1243_v17 = vshrl.u32 %v1132_v13, 16  ;;  %v1078_v27 = vadd.f32 %v1077_v14, %v1076_v2  ;;  %v1084_v22 = vrot.slane %v1083_v56, 2 }
 0x470   :  { %v1141_v24 = vrot.slane %v1136_v61, %v2658_v46  ;;  %v1244_v6 = vpack.i.b16 %v1243_v17, %v1243_v17  ;;  %v1079_v43 = vrot.slane %v1078_v27, 1  ;;  %v1085_v30 = vadd.f32 %v1084_v22, %v1083_v56 }
 0x472   :  { %v2083_v9 = vcombine.low %v1141_v24, %v1141_v24  ;;  %v1249_v12 = vrot.slane %v1244_v6, %v2658_v46  ;;  %v2894_v47 = vadd.f32 %v1079_v43, %v1078_v27  ;;  %v1086_v8 = vrot.slane %v1085_v30, 1 }
 0x474   :  { %v1146_v31 = vmul.bf16 %v2083_v9, %v2698_v40  ;;  %v1147_v36 = vmul.bf16 %v2083_v9, %v2703_v41  ;;  %v2086_v10 = vcombine.low %v1249_v12, %v1249_v12  ;;  %v1468_v23 = vpack.c.bf16 %v2894_v47, %v2894_v47 }
 0x475   :  { %v1087_v29 = vadd.f32 %v1086_v8, %v1085_v30 }
 0x476   :  { %v2084_v53 = vcombine.low %v1146_v31, %v1147_v36  ;;  %v1254_v54 = vmul.bf16 %v2086_v10, %v2709_v44  ;;  %v1255_v55 = vmul.bf16 %v2086_v10, %v2714_v45  ;;  %v1519_v40 = vunpack.c.l.b16 %v1468_v23  ;;  %v2457_v45 = vld [vmem:[%s3086_s4 + $0x10] sm:$0xff]  }
 0x477   :  { %v1469_v62 = vpack.c.bf16 %v1087_v29, %v1087_v29  ;;  %v1134_v17 = vmul.f32 %v1087_v29, %v2733_v16  ;;  %v1438_v36 = vmul.f32 %v1087_v29, %v2738_v34  ;;  %v1471_v29 = vrot.slane %v2588_v19, 1 }
 0x478   :  { %v2087_v28 = vcombine.low %v1254_v54, %v1255_v55  ;;  %2278 = vmatmul.mubr.msk.bf16.vlgmr.msra.gmra.mrb[24].mxu0 %vm62_vm1, %v2084_v53  ;;  %v1437_v54 = vmul.f32 %v2894_v47, %v2738_v34 }
 0x479   :  { %2290 = vmatpush3.bf16.msra.mxu0 %v2772_v33  ;;  %2293 = vmatprep.mubr.msk.bf16.mxu0 %vm2474_vm0, %v2473_v0  ;;  %v1520_v41 = vunpack.c.l.b16 %v1469_v62  ;;  %v1441_v53 = vrot.slane %v1438_v36, 7 }
 0x47a   :  { %2286 = vmatmul.mubr.msk.bf16.vlgmr.msra.gmra.mrb[24].mxu1 %vm62_vm1, %v2087_v28  ;;  %2291 = vmatprep.subr.bf16.mxu0 %v2473_v0  ;;  %v1470_v28 = vrot.slane %v2586_v18, 2  ;;  %v2460_v18 = vld [vmem:[%s3086_s4 + $0x28] sm:$0xff]  }
 0x47b   :  { %2298 = vmatpush3.bf16.msra.mxu1 %v2777_v35  ;;  %2301 = vmatprep.mubr.msk.bf16.mxu1 %vm2474_vm0, %v2473_v0  ;;  %v2912_v44 = vsel %vm200_vm2, %v1520_v41, %v1519_v40 }
 0x47c   :  { %2299 = vmatprep.subr.bf16.mxu1 %v2473_v0  ;;  %v1472_v40 = vsel %vm200_vm2, %v1471_v29, %v1470_v28 }
 0x47d   :  { %2292 = vmatpush3.bf16.msra.mxu0 %v2784_v38  ;;  %v1473_v41 = vpack.c.b16 %v1472_v40, %v1472_v40 }
 0x47e   :  { %2305 = vmatprep.subr.bf16.mxu0 %v2473_v0 }
 0x47f   :  { %2300 = vmatpush3.bf16.msra.mxu1 %v2789_v39 }
 0x480   :  { %2294 = vmatmul.mubr.msk.bf16.vlgmr.msra.gmra.mrb[28].mxu0 %vm62_vm1, %v2866_v11  ;;  %2313 = vmatprep.subr.bf16.mxu1 %v2473_v0  ;;  %v1133_v11 = vmul.f32 %v2894_v47, %v2733_v16  ;;  %v2459_v47 = vld [vmem:[%s3086_s4 + $0x20] sm:$0xff]  }
 0x481   :  { %2306 = vmatpush3.bf16.msra.mxu0 %v2457_v45  ;;  %2309 = vmatprep.mubr.msk.bf16.mxu0 %vm2474_vm0, %v2473_v0 }
 0x482   :  { %2307 = vmatprep.subr.bf16.mxu0 %v2473_v0  ;;  %v1200_v4 = vrot.slane %v1133_v11, %v2658_v46 }
 0x485   :  { %2308 = vmatpush3.bf16.msra.mxu0 %v2458_v49 }
 0x486   :  { %2321 = vmatprep.subr.bf16.mxu0 %v2473_v0 }
 0x488   :  { %2310 = vmatmul.mubr.msk.bf16.vlgmr.msra.gmra.mrb[32].mxu0 %vm62_vm1, %v1473_v41 }
 0x489   :  { %2322 = vmatpush3.bf16.msra.mxu0 %v2459_v47  ;;  %2325 = vmatprep.mubr.msk.bf16.mxu0 %vm2474_vm0, %v2473_v0 }
 0x48a   :  { %2323 = vmatprep.subr.bf16.mxu0 %v2473_v0 }
 0x48d   :  { %2324 = vmatpush3.bf16.msra.mxu0 %v2460_v18 }
 0x48e   :  { %2337 = vmatprep.subr.bf16.mxu0 %v2473_v0 }
 0x54b   :  { %v1190_v58 = vpop.f32.mrb[24].mxu0 }
 0x54c   :  { %v1191_v1 = vadd.f32 %v1190_v58, %v2744_v37  ;;  %v2279_v2 = vpop.f32.mrb[25].mxu0  ;;  %v1308_v37 = vrot.slane %v1134_v17, %v2658_v46 }
 0x54d   :  { %v1193_v5 = vpop.f32.mrb[26].mxu0  ;;  %v1298_v13 = vpop.f32.mrb[24].mxu1 }
 0x54e   :  { %v1194_v25 = vadd.f32 %v1193_v5, %v2749_v48  ;;  %v2280_v14 = vpop.f32.mrb[27].mxu0  ;;  %v2287_v56 = vpop.f32.mrb[25].mxu1  ;;  %v1201_v61 = vmul.f32 %v1200_v4, %v1191_v1  ;;  %v1299_v22 = vadd.f32 %v1298_v13, %v2751_v50 }
 0x54f   :  { %v1301_v27 = vpop.f32.mrb[26].mxu1 }
 0x550   :  { %v2288_v24 = vpop.f32.mrb[27].mxu1  ;;  %v1203_v6 = vsel %vm62_vm1, %v1201_v61, 0.0  ;;  %v1202_v43 = vmul.f32 %v1200_v4, %v1194_v25  ;;  %v1302_v9 = vadd.f32 %v1301_v27, %v2756_v60  ;;  %v1309_v8 = vmul.f32 %v1308_v37, %v1299_v22 }
 0x551   :  { %1204 = vadd.xlane.f32.xlu1 %v1203_v6  ;;  %v1442_v60 = vsel %vm200_vm2, %v1441_v53, %v1437_v54 }
 0x552   :  { %v1206_v12 = vsel %vm62_vm1, %v1202_v43, 0.0  ;;  %v1311_v10 = vsel %vm62_vm1, %v1309_v8, 0.0  ;;  %v1310_v23 = vmul.f32 %v1308_v37, %v1302_v9  ;;  %v1444_v62 = vsel %vm867_vm3, %v1442_v60, 0.0 }
 0x553   :  { %v2940_v30 = vpop.f32.mrb[28].mxu0 }
 0x554   :  { %v2295_v48 = vpop.f32.mrb[29].mxu0  ;;  %v1314_v55 = vsel %vm62_vm1, %v1310_v23, 0.0 }
 0x555   :  { %1207 = vadd.xlane.f32.xlu1 %v1206_v12  ;;  %v1390_v31 = vpop.f32.mrb[30].mxu0 }
 0x556   :  { %v2296_v50 = vpop.f32.mrb[31].mxu0 }
 0x559   :  { %1312 = vadd.xlane.f32.xlu1 %v1311_v10 }
 0x55d   :  { %1315 = vadd.xlane.f32.xlu1 %v1314_v55 }
 0x561   :  { %1445 = vadd.xlane.f32.xlu1 %v1444_v62 }
 0x5de   :  { %v1205_v19 = vpop.xlane.xlu1 %1204 }
 0x5e2   :  { %v1208_v45 = vpop.xlane.xlu1 %1207 }
 0x5e3   :  { %v1209_v49 = vmax.f32 %v1205_v19, %v1208_v45 }
 0x5e5   :  { %v1210_v11 = vrot.slane %v1209_v49, 4 }
 0x5e6   :  { %v1313_v58 = vpop.xlane.xlu1 %1312 }
 0x5e7   :  { %v1211_v1 = vmax.f32 %v1209_v49, %v1210_v11 }
 0x5e9   :  { %v1212_v2 = vrot.slane %v1211_v1, 2 }
 0x5ea   :  { %v1316_v4 = vpop.xlane.xlu1 %1315 }
 0x5eb   :  { %v1213_v5 = vmax.f32 %v1211_v1, %v1212_v2  ;;  %v1317_v13 = vmax.f32 %v1313_v58, %v1316_v4 }
 0x5ed   :  { %v1214_v25 = vrot.slane %v1213_v5, 1  ;;  %v1318_v14 = vrot.slane %v1317_v13, 4 }
 0x5ee   :  { %v1446_v56 = vpop.xlane.xlu1 %1445 }
 0x5ef   :  { %v1215_v61 = vmax.f32 %v1213_v5, %v1214_v25  ;;  %v1319_v17 = vmax.f32 %v1317_v13, %v1318_v14  ;;  %v1447_v27 = vadd.f32 %v1446_v56, %v2816_v52 }
 0x5f1   :  { %v1216_v22 = vsub.f32 %v1205_v19, %v1215_v61  ;;  %v1217_v24 = vsub.f32 %v1208_v45, %v1215_v61  ;;  %v1320_v6 = vrot.slane %v1319_v17, 2  ;;  %v2091_v43 = vmul.f32 -1.442695, %v1447_v27 }
 0x5f3   :  { %v1218_v37 = vmul.f32 1.442695, %v1216_v22  ;;  %v1220_v9 = vmul.f32 1.442695, %v1217_v24  ;;  %v1321_v48 = vmax.f32 %v1319_v17, %v1320_v6  ;;  %2417 = vpow2.f32 %v2091_v43 }
 0x5f5   :  { %2419 = vpow2.f32 %v1218_v37  ;;  %v1322_v12 = vrot.slane %v1321_v48, 1 }
 0x5f6   :  { %2421 = vpow2.f32 %v1220_v9 }
 0x5f7   :  { %v1323_v8 = vmax.f32 %v1321_v48, %v1322_v12 }
 0x5f9   :  { %v1324_v31 = vsub.f32 %v1313_v58, %v1323_v8  ;;  %v1325_v36 = vsub.f32 %v1316_v4, %v1323_v8 }
 0x5fb   :  { %v1326_v50 = vmul.f32 1.442695, %v1324_v31  ;;  %v1328_v10 = vmul.f32 1.442695, %v1325_v36 }
 0x5fd   :  { %v2418_v23 = vpop.eup %2417  ;;  %2423 = vpow2.f32 %v1326_v50 }
 0x5fe   :  { %2425 = vpow2.f32 %v1328_v10  ;;  %v1451_v53 = vadd.f32 1.0, %v2418_v23 }
 0x5ff   :  { %v2420_v54 = vpop.eup %2419 }
 0x600   :  { %v2422_v55 = vpop.eup %2421  ;;  %2427 = vrcp.f32 %v1451_v53 }
 0x601   :  { %v1222_v60 = vadd.f32 %v2422_v55, %v2420_v54 }
 0x603   :  { %v1223_v62 = vrot.slane %v1222_v60, 4 }
 0x605   :  { %v1224_v28 = vadd.f32 %v1223_v62, %v1222_v60 }
 0x607   :  { %v2424_v29 = vpop.eup %2423  ;;  %v1225_v40 = vrot.slane %v1224_v28, 2 }
 0x608   :  { %v2426_v41 = vpop.eup %2425 }
 0x609   :  { %v1226_v47 = vadd.f32 %v1225_v40, %v1224_v28  ;;  %v1330_v18 = vadd.f32 %v2426_v41, %v2424_v29 }
 0x60a   :  { %v2428_v19 = vpop.eup %2427 }
 0x60b   :  { %v1227_v45 = vrot.slane %v1226_v47, 1  ;;  %v1331_v49 = vrot.slane %v1330_v18, 4  ;;  %1456 = vperm.xlu1 %2365, %v2428_v19   ;;  %v1460_v11 = vsub.f32 1.0, %v2428_v19  ;;  %v2462_v19 = vld [vmem:[%s3086_s4 + $0x8] sm:$0xff]  }
 0x60d   :  { %v1228_v58 = vadd.f32 %v1227_v45, %v1226_v47  ;;  %v1332_v1 = vadd.f32 %v1331_v49, %v1330_v18  ;;  %1463 = vperm.xlu0 %2366, %v1460_v11   ;;  %v2461_v18 = vld [vmem:[%s3086_s4] sm:$0xff]   ;;  %v1522_v45 = vpack.c.b16 %v2912_v44, %v2912_v44  ;;  %v2463_v49 = vld [vmem:[%s3086_s4 + $0x30] sm:$0xff]   ;;  %v2464_v11 = vld [vmem:[%s3086_s4 + $0x38] sm:$0xff]   ;;  %v1511_v44 = vpop.f32.mrb[32].mxu0 }
 0x60f   :  { %2429 = vrcp.f32 %v1228_v58  ;;  %v1333_v2 = vrot.slane %v1332_v1, 2  ;;  %v2311_v58 = vpop.f32.mrb[33].mxu0 }
 0x611   :  { %v1334_v4 = vadd.f32 %v1333_v2, %v1332_v1  ;;  %v1514_v1 = vpop.f32.mrb[34].mxu0 }
 0x612   :  { %v2312_v2 = vpop.f32.mrb[35].mxu0 }
 0x613   :  { %v1335_v5 = vrot.slane %v1334_v4, 1  ;;  %v2467_v2 = vld [vmem:[%s3087_s3 + $0x8] sm:$0xf] }
 0x615   :  { %v1336_v13 = vadd.f32 %v1335_v5, %v1334_v4 }
 0x617   :  { %2431 = vrcp.f32 %v1336_v13 }
 0x619   :  { %v2430_v25 = vpop.eup %2429 }
 0x61a   :  { %v1230_v14 = vmul.f32 %v2430_v25, %v2420_v54  ;;  %v1231_v56 = vmul.f32 %v2430_v25, %v2422_v55 }
 0x61c   :  { %v1232_v61 = vmul.f32 %v1230_v14, %v2820_v20  ;;  %v1233_v17 = vmul.f32 %v1231_v56, %v2823_v21 }
 0x61e   :  { %v1234_v27 = vsel %vm62_vm1, %v1232_v61, 0.0  ;;  %v1235_v22 = vsel %vm62_vm1, %v1233_v17, 0.0 }
 0x61f   :  { %v1236_v24 = vadd.f32 %v1235_v22, %v1234_v27 }
 0x621   :  { %v2432_v6 = vpop.eup %2431  ;;  %v1237_v43 = vrot.slane %v1236_v24, 4 }
 0x622   :  { %v1338_v37 = vmul.f32 %v2432_v6, %v2424_v29  ;;  %v1339_v9 = vmul.f32 %v2432_v6, %v2426_v41 }
 0x623   :  { %v1238_v48 = vadd.f32 %v1237_v43, %v1236_v24 }
 0x624   :  { %v1340_v12 = vmul.f32 %v1338_v37, %v2826_v32  ;;  %v1341_v8 = vmul.f32 %v1339_v9, %v2829_v42 }
 0x625   :  { %v1239_v10 = vrot.slane %v1238_v48, 2 }
 0x626   :  { %v1342_v31 = vsel %vm62_vm1, %v1340_v12, 0.0  ;;  %v1343_v36 = vsel %vm62_vm1, %v1341_v8, 0.0 }
 0x627   :  { %v1344_v50 = vadd.f32 %v1343_v36, %v1342_v31  ;;  %v1240_v53 = vadd.f32 %v1239_v10, %v1238_v48 }
 0x629   :  { %v1345_v23 = vrot.slane %v1344_v50, 4  ;;  %v1241_v60 = vrot.slane %v1240_v53, 1 }
 0x62b   :  { %v1346_v54 = vadd.f32 %v1345_v23, %v1344_v50  ;;  %v1242_v29 = vadd.f32 %v1241_v60, %v1240_v53 }
 0x62d   :  { %v1347_v55 = vrot.slane %v1346_v54, 2 }
 0x62f   :  { %v1348_v62 = vadd.f32 %v1347_v55, %v1346_v54 }
 0x631   :  { %v1349_v28 = vrot.slane %v1348_v62, 1 }
 0x633   :  { %v1350_v40 = vadd.f32 %v1349_v28, %v1348_v62 }
 0x635   :  { %v1351_v41 = vsel %vm733_vm4, %v1242_v29, %v1350_v40 }
 0x636   :  { %v1352_v47 = vpack.c.bf16 %v1351_v41, %v1351_v41 }
 0x638   :  { %2302 = vmatmul.mubr.msk.bf16.vlgmr.msra.gmra.mrb[28].mxu1 %vm62_vm1, %v1352_v47 }
 0x639   :  { %2314 = vmatpush3.bf16.msra.mxu1 %v2461_v18  ;;  %2317 = vmatprep.mubr.msk.bf16.mxu1 %vm2474_vm0, %v2473_v0 }
 0x63a   :  { %2315 = vmatprep.subr.bf16.mxu1 %v2473_v0 }
 0x63d   :  { %2316 = vmatpush3.bf16.msra.mxu1 %v2462_v19 }
 0x63e   :  { %2329 = vmatprep.subr.bf16.mxu1 %v2473_v0 }
 0x640   :  { %2318 = vmatmul.mubr.msk.bf16.vlgmr.msra.gmra.mrb[32].mxu1 %vm62_vm1, %v1522_v45 }
 0x641   :  { %2330 = vmatpush3.bf16.msra.mxu1 %v2463_v49  ;;  %2333 = vmatprep.mubr.msk.bf16.mxu1 %vm2474_vm0, %v2473_v0 }
 0x642   :  { %2331 = vmatprep.subr.bf16.mxu1 %v2473_v0 }
 0x645   :  { %2332 = vmatpush3.bf16.msra.mxu1 %v2464_v11 }
 0x646   :  { %2345 = vmatprep.subr.bf16.mxu1 %v2473_v0 }
 0x68a   :  { %v1457_v25 = vpop.permute.xlu1 %1456 }
 0x68b   :  { %v1459_v27 = vmul.f32 %v1457_v25, %v2862_v7 }
 0x68c   :  { %v1464_v17 = vpop.permute.xlu0 %1463 }
 0x70b   :  { %v1430_v4 = vpop.f32.mrb[28].mxu1 }
 0x70c   :  { %v1431_v5 = vadd.f32 %v1430_v4, %v2940_v30  ;;  %v2303_v13 = vpop.f32.mrb[29].mxu1 }
 0x70d   :  { %v1433_v14 = vpop.f32.mrb[30].mxu1 }
 0x70e   :  { %v1436_v56 = vadd.f32 %v1431_v5, %v2858_v59  ;;  %v2304_v61 = vpop.f32.mrb[31].mxu1  ;;  %v2468_v5 = vld [vmem:[%s3087_s3 + $0xc] sm:$0xf] }
 0x710   :  { %v1466_v22 = vmul.f32 %v1464_v17, %v1436_v56 }
 0x712   :  { %v3002_v24 = vadd.f32 %v1466_v22, %v1459_v27 }
 0x713   :  { %v1560_v6 = vpop.f32.mrb[32].mxu1 }
 0x714   :  { %v1659_v43 = vpack.c.bf16 %v3002_v24, %v3002_v24  ;;  %v1561_v37 = vadd.f32 %v1560_v6, %v1511_v44  ;;  %v2319_v9 = vpop.f32.mrb[33].mxu1 }
 0x715   :  { %v1563_v48 = vpop.f32.mrb[34].mxu1 }
 0x716   :  { %v1566_v30 = vadd.f32 %v1561_v37, %v2664_v51  ;;  %v2320_v12 = vpop.f32.mrb[35].mxu1  ;;  %2326 = vmatmul.mubr.msk.bf16.vlgmr.msra.gmra.mrb[36].mxu0 %vm62_vm1, %v1659_v43 }
 0x717   :  { %2338 = vmatpush3.bf16.msra.mxu0 %v2463_v49  ;;  %2341 = vmatprep.mubr.msk.bf16.mxu0 %vm2474_vm0, %v2473_v0  ;;  %v2465_v49 = vld [vmem:[%s3087_s3] sm:$0xf] }
 0x718   :  { %v1567_v7 = vmul.f32 %v1566_v30, %v2667_v57  ;;  %2339 = vmatprep.subr.bf16.mxu0 %v2473_v0 }
 0x71a   :  { %v1575_v8 = vrot.slane %v1567_v7, %v2672_v63 }
 0x71b   :  { %2340 = vmatpush3.bf16.msra.mxu0 %v2464_v11 }
 0x71c   :  { %v1583_v31 = vrot.slane %v1575_v8, %v2672_v63  ;;  %v1576_v36 = vcombine.high %v1575_v8, %v1575_v8  ;;  %2353 = vmatprep.subr.bf16.mxu0 %v2473_v0 }
 0x71e   :  { %v1594_v51 = vrot.slane %v1583_v31, %v2658_v46  ;;  %v1590_v50 = vrot.slane %v1576_v36, %v2672_v63 }
 0x720   :  { %v1601_v10 = vmul.f32 %v2684_v15, %v1594_v51  ;;  %v1598_v23 = vrot.slane %v1590_v50, %v2658_v46 }
 0x722   :  { %v1603_v57 = vsel %vm62_vm1, %v1601_v10, 0.0  ;;  %v1602_v53 = vmul.f32 %v2688_v26, %v1598_v23 }
 0x723   :  { %1604 = vadd.xlane.f32.xlu1 %v1603_v57 }
 0x724   :  { %v1606_v54 = vsel %vm62_vm1, %v1602_v53, 0.0 }
 0x725   :  { %1607 = vadd.xlane.f32.xlu0 %v1606_v54 }
 0x7b2   :  { %v1608_v14 = vpop.xlane.xlu0 %1607 }
 0x7b3   :  { %v1615_v61 = vrot.slane %v1608_v14, 4 }
 0x7b5   :  { %v1616_v27 = vmax.f32 %v1608_v14, %v1615_v61 }
 0x7b7   :  { %v1617_v6 = vrot.slane %v1616_v27, 2 }
 0x7b9   :  { %v1618_v37 = vmax.f32 %v1616_v27, %v1617_v6 }
 0x7bb   :  { %v1619_v48 = vrot.slane %v1618_v37, 1 }
 0x7e9   :  { %v1697_v55 = vpop.f32.mrb[36].mxu0 }
 0x7ea   :  { %v1698_v60 = vadd.f32 %v1697_v55, %v2676_v3  ;;  %v2327_v62 = vpop.f32.mrb[37].mxu0  ;;  %v2466_v3 = vld [vmem:[%s3087_s3 + $0x4] sm:$0xf] }
 0x7eb   :  { %v1700_v28 = vpop.f32.mrb[38].mxu0 }
 0x7ec   :  { %v1703_v29 = vpack.c.bf16 %v1698_v60, %v1698_v60  ;;  %v2328_v40 = vpop.f32.mrb[39].mxu0 }
 0x7ee   :  { %v1707_v63 = vpack.i.b16 %v1703_v29, %v1703_v29  ;;  %v1814_v41 = vshrl.u32 %v1703_v29, 16 }
 0x7f0   :  { %v1712_v47 = vrot.slane %v1707_v63, %v2658_v46  ;;  %v1815_v18 = vpack.i.b16 %v1814_v41, %v1814_v41 }
 0x7f2   :  { %v2095_v19 = vcombine.low %v1712_v47, %v1712_v47  ;;  %v1820_v45 = vrot.slane %v1815_v18, %v2658_v46 }
 0x7f4   :  { %v1717_v11 = vmul.bf16 %v2465_v49, %v2095_v19  ;;  %v1718_v44 = vmul.bf16 %v2466_v3, %v2095_v19  ;;  %v2098_v58 = vcombine.low %v1820_v45, %v1820_v45 }
 0x7f6   :  { %v2096_v1 = vcombine.low %v1717_v11, %v1718_v44  ;;  %v1825_v4 = vmul.bf16 %v2467_v2, %v2098_v58  ;;  %v1826_v13 = vmul.bf16 %v2468_v5, %v2098_v58 }
 0x7f8   :  { %v2099_v25 = vcombine.low %v1825_v4, %v1826_v13  ;;  %2334 = vmatmul.mubr.msk.bf16.vlgmr.msra.gmra.mrb[36].mxu1 %vm62_vm1, %v2096_v1 }
 0x7f9   :  { %2346 = vmatpush3.bf16.msra.mxu1 %v2772_v33  ;;  %2349 = vmatprep.mubr.msk.bf16.mxu1 %vm2474_vm0, %v2473_v0  ;;  %v1605_v33 = vpop.xlane.xlu1 %1604 }
 0x7fa   :  { %2342 = vmatmul.mubr.msk.bf16.vlgmr.msra.gmra.mrb[40].mxu0 %vm62_vm1, %v2099_v25  ;;  %2347 = vmatprep.subr.bf16.mxu1 %v2473_v0  ;;  %v1609_v56 = vrot.slane %v1605_v33, 4 }
 0x7fb   :  { %2354 = vmatpush3.bf16.msra.mxu0 %v2777_v35  ;;  %2357 = vmatprep.mubr.msk.bf16.mxu0 %vm2474_vm0, %v2473_v0 }
 0x7fc   :  { %2355 = vmatprep.subr.bf16.mxu0 %v2473_v0  ;;  %v1610_v17 = vmax.f32 %v1605_v33, %v1609_v56  ;;  %v1620_v0 = vmax.f32 %v1618_v37, %v1619_v48  ;;  %v2469_v56 = vld [vmem:[#allocation2] sm:$0xff] }
 0x7fd   :  { %2348 = vmatpush3.bf16.msra.mxu1 %v2784_v38 }
 0x7fe   :  { %v1611_v22 = vrot.slane %v1610_v17, 2  ;;  %v1622_v38 = vsub.f32 %v1608_v14, %v1620_v0 }
 0x7ff   :  { %2356 = vmatpush3.bf16.msra.mxu0 %v2789_v39 }
 0x800   :  { %2350 = vmatmul.mubr.msk.bf16.vlgmr.msra.gmra.mrb[40].mxu1 %vm62_vm1, %v1659_v43  ;;  %v1612_v35 = vmax.f32 %v1610_v17, %v1611_v22  ;;  %v1625_v39 = vmul.f32 1.442695, %v1622_v38 }
 0x802   :  { %v1613_v9 = vrot.slane %v1612_v35, 1 }
 0x804   :  { %v1614_v30 = vmax.f32 %v1612_v35, %v1613_v9  ;;  %v2470_v35 = vld [vmem:[#allocation2 + $0x8] sm:$0xff]  ;;  %v2471_v9 = vld [vmem:[#allocation2 + $0x10] sm:$0xff] }
 0x806   :  { %v1621_v12 = vsub.f32 %v1605_v33, %v1614_v30 }
 0x808   :  { %v1623_v7 = vmul.f32 1.442695, %v1621_v12 }
 0x80a   :  { %2433 = vpow2.f32 %v1623_v7 }
 0x80b   :  { %2435 = vpow2.f32 %v1625_v39  ;;  %v2472_v39 = vld [vmem:[#allocation2 + $0x18] sm:$0xff] }
 0x814   :  { %v2434_v43 = vpop.eup %2433 }
 0x815   :  { %v2436_v8 = vpop.eup %2435  ;;  %v1627_v31 = vrot.slane %v2434_v43, 4 }
 0x816   :  { %v1633_v36 = vrot.slane %v2436_v8, 4 }
 0x817   :  { %v1628_v51 = vadd.f32 %v2434_v43, %v1627_v31 }
 0x818   :  { %v1634_v50 = vadd.f32 %v2436_v8, %v1633_v36 }
 0x819   :  { %v1629_v10 = vrot.slane %v1628_v51, 2 }
 0x81a   :  { %v1635_v23 = vrot.slane %v1634_v50, 2 }
 0x81b   :  { %v1630_v57 = vadd.f32 %v1629_v10, %v1628_v51 }
 0x81c   :  { %v1636_v53 = vadd.f32 %v1635_v23, %v1634_v50 }
 0x81d   :  { %v1631_v54 = vrot.slane %v1630_v57, 1 }
 0x81e   :  { %v1637_v55 = vrot.slane %v1636_v53, 1 }
 0x81f   :  { %v1632_v60 = vadd.f32 %v1631_v54, %v1630_v57 }
 0x820   :  { %v1638_v62 = vadd.f32 %v1637_v55, %v1636_v53 }
 0x821   :  { %2437 = vrcp.f32 %v1632_v60 }
 0x822   :  { %2439 = vrcp.f32 %v1638_v62 }
 0x82b   :  { %v2438_v28 = vpop.eup %2437 }
 0x82c   :  { %v2440_v29 = vpop.eup %2439  ;;  %v1640_v40 = vmul.f32 %v2438_v28, %v2434_v43 }
 0x82d   :  { %v1642_v63 = vmul.f32 %v2440_v29, %v2436_v8 }
 0x82e   :  { %v1643_v41 = vmul.f32 %v2684_v15, %v1640_v40 }
 0x82f   :  { %v1644_v47 = vmul.f32 %v2688_v26, %v1642_v63 }
 0x830   :  { %v1645_v18 = vsel %vm62_vm1, %v1643_v41, 0.0 }
 0x831   :  { %v1652_v19 = vsel %vm62_vm1, %v1644_v47, 0.0  ;;  %v1646_v45 = vrot.slane %v1645_v18, 4 }
 0x832   :  { %v1653_v49 = vrot.slane %v1652_v19, 4 }
 0x833   :  { %v1647_v11 = vadd.f32 %v1646_v45, %v1645_v18 }
 0x834   :  { %v1654_v3 = vadd.f32 %v1653_v49, %v1652_v19 }
 0x835   :  { %v1648_v44 = vrot.slane %v1647_v11, 2 }
 0x836   :  { %v1655_v58 = vrot.slane %v1654_v3, 2 }
 0x837   :  { %v1649_v1 = vadd.f32 %v1648_v44, %v1647_v11 }
 0x838   :  { %v1656_v2 = vadd.f32 %v1655_v58, %v1654_v3 }
 0x839   :  { %v1650_v4 = vrot.slane %v1649_v1, 1 }
 0x83a   :  { %v1657_v5 = vrot.slane %v1656_v2, 1 }
 0x83b   :  { %v1651_v13 = vadd.f32 %v1650_v4, %v1649_v1 }
 0x83c   :  { %v1658_v25 = vadd.f32 %v1657_v5, %v1656_v2 }
 0x83d   :  { %v1704_v15 = vmul.f32 %v1651_v13, %v2733_v16  ;;  %v2008_v50 = vmul.f32 %v1651_v13, %v2738_v34 }
 0x83e   :  { %v1705_v26 = vmul.f32 %v1658_v25, %v2733_v16  ;;  %v2009_v14 = vmul.f32 %v1658_v25, %v2738_v34 }
 0x83f   :  { %v1771_v27 = vrot.slane %v1704_v15, %v2658_v46 }
 0x840   :  { %v1879_v38 = vrot.slane %v1705_v26, %v2658_v46  ;;  %v2012_v7 = vrot.slane %v2009_v14, 7 }
 0x842   :  { %v2013_v57 = vsel %vm200_vm2, %v2012_v7, %v2008_v50 }
 0x843   :  { %v2015_v62 = vsel %vm867_vm3, %v2013_v57, 0.0 }
 0x8cb   :  { %v1761_v33 = vpop.f32.mrb[36].mxu1 }
 0x8cc   :  { %v1762_v61 = vadd.f32 %v2469_v56, %v1761_v33  ;;  %v2335_v17 = vpop.f32.mrb[37].mxu1 }
 0x8cd   :  { %v1764_v22 = vpop.f32.mrb[38].mxu1  ;;  %v1869_v6 = vpop.f32.mrb[40].mxu0 }
 0x8ce   :  { %v1765_v37 = vadd.f32 %v2470_v35, %v1764_v22  ;;  %v1870_v48 = vadd.f32 %v2471_v9, %v1869_v6  ;;  %v2336_v30 = vpop.f32.mrb[39].mxu1  ;;  %v2343_v0 = vpop.f32.mrb[41].mxu0  ;;  %v1772_v12 = vmul.f32 %v1771_v27, %v1762_v61 }
 0x8cf   :  { %v1872_v16 = vpop.f32.mrb[42].mxu0 }
 0x8d0   :  { %v1873_v43 = vadd.f32 %v2472_v39, %v1872_v16  ;;  %v2344_v8 = vpop.f32.mrb[43].mxu0  ;;  %v1774_v31 = vsel %vm62_vm1, %v1772_v12, 0.0  ;;  %v1880_v36 = vmul.f32 %v1879_v38, %v1870_v48  ;;  %v1773_v51 = vmul.f32 %v1771_v27, %v1765_v37 }
 0x8d1   :  { %1775 = vadd.xlane.f32.xlu1 %v1774_v31 }
 0x8d2   :  { %v1882_v10 = vsel %vm62_vm1, %v1880_v36, 0.0  ;;  %v1777_v53 = vsel %vm62_vm1, %v1773_v51, 0.0  ;;  %v1881_v54 = vmul.f32 %v1879_v38, %v1873_v43 }
 0x8d3   :  { %v3062_v23 = vpop.f32.mrb[40].mxu1  ;;  %1883 = vadd.xlane.f32.xlu0 %v1882_v10 }
 0x8d4   :  { %v2351_v46 = vpop.f32.mrb[41].mxu1  ;;  %v1885_v28 = vsel %vm62_vm1, %v1881_v54, 0.0 }
 0x8d5   :  { %1778 = vadd.xlane.f32.xlu1 %v1777_v53  ;;  %v1961_v55 = vpop.f32.mrb[42].mxu1 }
 0x8d6   :  { %v2352_v60 = vpop.f32.mrb[43].mxu1 }
 0x8d7   :  { %2016 = vadd.xlane.f32.xlu0 %v2015_v62 }
 0x8d9   :  { %1886 = vadd.xlane.f32.xlu1 %v1885_v28 }
 0x95e   :  { %v1776_v34 = vpop.xlane.xlu1 %1775 }
 0x960   :  { %v1884_v29 = vpop.xlane.xlu0 %1883 }
 0x962   :  { %v1779_v40 = vpop.xlane.xlu1 %1778 }
 0x963   :  { %v1780_v63 = vmax.f32 %v1776_v34, %v1779_v40 }
 0x964   :  { %v2017_v41 = vpop.xlane.xlu0 %2016 }
 0x965   :  { %v1781_v47 = vrot.slane %v1780_v63, 4  ;;  %v2018_v18 = vadd.f32 %v2017_v41, %v2816_v52 }
 0x966   :  { %v1887_v19 = vpop.xlane.xlu1 %1886 }
 0x967   :  { %v1782_v45 = vmax.f32 %v1780_v63, %v1781_v47  ;;  %v2103_v49 = vmul.f32 -1.442695, %v2018_v18  ;;  %v1888_v11 = vmax.f32 %v1884_v29, %v1887_v19 }
 0x969   :  { %v1783_v3 = vrot.slane %v1782_v45, 2  ;;  %2441 = vpow2.f32 %v2103_v49  ;;  %v1889_v44 = vrot.slane %v1888_v11, 4 }
 0x96b   :  { %v1784_v58 = vmax.f32 %v1782_v45, %v1783_v3  ;;  %v1890_v1 = vmax.f32 %v1888_v11, %v1889_v44 }
 0x96d   :  { %v1785_v2 = vrot.slane %v1784_v58, 1  ;;  %v1891_v4 = vrot.slane %v1890_v1, 2 }
 0x96f   :  { %v1786_v5 = vmax.f32 %v1784_v58, %v1785_v2  ;;  %v1892_v13 = vmax.f32 %v1890_v1, %v1891_v4 }
 0x971   :  { %v1787_v25 = vsub.f32 %v1776_v34, %v1786_v5  ;;  %v1788_v15 = vsub.f32 %v1779_v40, %v1786_v5  ;;  %v1893_v26 = vrot.slane %v1892_v13, 1 }
 0x973   :  { %v2442_v33 = vpop.eup %2441  ;;  %v1789_v14 = vmul.f32 1.442695, %v1787_v25  ;;  %v1791_v56 = vmul.f32 1.442695, %v1788_v15  ;;  %v1894_v52 = vmax.f32 %v1892_v13, %v1893_v26 }
 0x974   :  { %v2022_v61 = vadd.f32 1.0, %v2442_v33 }
 0x975   :  { %2443 = vpow2.f32 %v1789_v14  ;;  %v1895_v17 = vsub.f32 %v1884_v29, %v1894_v52  ;;  %v1896_v27 = vsub.f32 %v1887_v19, %v1894_v52 }
 0x976   :  { %2445 = vpow2.f32 %v1791_v56 }
 0x977   :  { %2447 = vrcp.f32 %v2022_v61  ;;  %v1897_v22 = vmul.f32 1.442695, %v1895_v17  ;;  %v1899_v6 = vmul.f32 1.442695, %v1896_v27 }
 0x979   :  { %2449 = vpow2.f32 %v1897_v22 }
 0x97a   :  { %2451 = vpow2.f32 %v1899_v6 }
 0x97f   :  { %v2444_v35 = vpop.eup %2443 }
 0x980   :  { %v2446_v37 = vpop.eup %2445 }
 0x981   :  { %v2448_v9 = vpop.eup %2447  ;;  %v1793_v48 = vadd.f32 %v2446_v37, %v2444_v35 }
 0x982   :  { %2027 = vperm.xlu1 %2365, %v2448_v9   ;;  %v2031_v30 = vsub.f32 1.0, %v2448_v9 }
 0x983   :  { %v2450_v0 = vpop.eup %2449  ;;  %v1794_v12 = vrot.slane %v1793_v48, 4 }
 0x984   :  { %v2452_v38 = vpop.eup %2451  ;;  %2034 = vperm.xlu0 %2366, %v2031_v30  }
 0x985   :  { %v1795_v16 = vadd.f32 %v1794_v12, %v1793_v48  ;;  %v1901_v7 = vadd.f32 %v2452_v38, %v2450_v0 }
 0x987   :  { %v1796_v39 = vrot.slane %v1795_v16, 2  ;;  %v1902_v43 = vrot.slane %v1901_v7, 4 }
 0x989   :  { %v1797_v8 = vadd.f32 %v1796_v39, %v1795_v16  ;;  %v1903_v31 = vadd.f32 %v1902_v43, %v1901_v7 }
 0x98b   :  { %v1798_v36 = vrot.slane %v1797_v8, 1  ;;  %v1904_v51 = vrot.slane %v1903_v31, 2 }
 0x98d   :  { %v1799_v50 = vadd.f32 %v1798_v36, %v1797_v8  ;;  %v1905_v10 = vadd.f32 %v1904_v51, %v1903_v31 }
 0x98f   :  { %2453 = vrcp.f32 %v1799_v50  ;;  %v1906_v57 = vrot.slane %v1905_v10, 1 }
 0x991   :  { %v1907_v46 = vadd.f32 %v1906_v57, %v1905_v10 }
 0x993   :  { %2455 = vrcp.f32 %v1907_v46 }
 0x999   :  { %v2454_v53 = vpop.eup %2453 }
 0x99a   :  { %v1801_v54 = vmul.f32 %v2454_v53, %v2444_v35  ;;  %v1802_v55 = vmul.f32 %v2454_v53, %v2446_v37 }
 0x99c   :  { %v1803_v60 = vmul.f32 %v1801_v54, %v2820_v20  ;;  %v1804_v62 = vmul.f32 %v1802_v55, %v2823_v21 }
 0x99d   :  { %v2456_v28 = vpop.eup %2455 }
 0x99e   :  { %v1805_v34 = vsel %vm62_vm1, %v1803_v60, 0.0  ;;  %v1806_v29 = vsel %vm62_vm1, %v1804_v62, 0.0  ;;  %v1909_v40 = vmul.f32 %v2456_v28, %v2450_v0  ;;  %v1910_v63 = vmul.f32 %v2456_v28, %v2452_v38 }
 0x99f   :  { %v1807_v41 = vadd.f32 %v1806_v29, %v1805_v34 }
 0x9a0   :  { %v1911_v47 = vmul.f32 %v1909_v40, %v2826_v32  ;;  %v1912_v18 = vmul.f32 %v1910_v63, %v2829_v42 }
 0x9a1   :  { %v1808_v19 = vrot.slane %v1807_v41, 4 }
 0x9a2   :  { %v1913_v45 = vsel %vm62_vm1, %v1911_v47, 0.0  ;;  %v1914_v49 = vsel %vm62_vm1, %v1912_v18, 0.0 }
 0x9a3   :  { %v1915_v20 = vadd.f32 %v1914_v49, %v1913_v45  ;;  %v1809_v11 = vadd.f32 %v1808_v19, %v1807_v41 }
 0x9a5   :  { %v1916_v21 = vrot.slane %v1915_v20, 4  ;;  %v1810_v3 = vrot.slane %v1809_v11, 2 }
 0x9a7   :  { %v1811_v44 = vadd.f32 %v1810_v3, %v1809_v11  ;;  %v1917_v58 = vadd.f32 %v1916_v21, %v1915_v20 }
 0x9a9   :  { %v1918_v1 = vrot.slane %v1917_v58, 2  ;;  %v1812_v2 = vrot.slane %v1811_v44, 1 }
 0x9ab   :  { %v1919_v4 = vadd.f32 %v1918_v1, %v1917_v58  ;;  %v1813_v13 = vadd.f32 %v1812_v2, %v1811_v44 }
 0x9ad   :  { %v1920_v5 = vrot.slane %v1919_v4, 1 }
 0x9af   :  { %v1921_v25 = vadd.f32 %v1920_v5, %v1919_v4 }
 0x9b1   :  { %v1922_v32 = vsel %vm733_vm4, %v1813_v13, %v1921_v25 }
 0x9b2   :  { %v1923_v42 = vpack.c.bf16 %v1922_v32, %v1922_v32 }
 0x9b4   :  { %2358 = vmatmul.mubr.msk.bf16.vlgmr.msra.gmra.mrb[44].mxu0 %vm62_vm1, %v1923_v42 }
 0xa01   :  { %v2028_v14 = vpop.permute.xlu1 %2027 }
 0xa02   :  { %v2030_v27 = vmul.f32 %v2028_v14, %v3002_v24 }
 0xa03   :  { %v2035_v17 = vpop.permute.xlu0 %2034 }
 0xa87   :  { %v2001_v15 = vpop.f32.mrb[44].mxu0 }
 0xa88   :  { %v2002_v26 = vadd.f32 %v2001_v15, %v3062_v23  ;;  %v2359_v33 = vpop.f32.mrb[45].mxu0 }
 0xa89   :  { %v2004_v56 = vpop.f32.mrb[46].mxu0 }
 0xa8a   :  { %v2007_v52 = vadd.f32 %v2002_v26, %v2858_v59  ;;  %v2360_v61 = vpop.f32.mrb[47].mxu0 }
 0xa8c   :  { %v2037_v22 = vmul.f32 %v2035_v17, %v2007_v52 }
 0xa8e   :  { %v2038_v6 = vadd.f32 %v2037_v22, %v2030_v27 }
 0xa90   :  { %2039 = vst.msk [vmem:[%s3093_s7] sm:$0x3] %vm867_vm3, %v2038_v6 }

// kernel: original_mac_forward.19
= control target key start
LH: loop header
LB: loop body
LE: loop exit
PB: predicated region body
PF: predicated region fallthrough
CT: control target
= control target key end

     0   :  { %v216_v1 = vmov 0.0   ;;  %vm217_vm0 = vmmov 0   ;;  %s281_s0 = inlined_call_operand.vmem [shape: bf16[2,128], index: 0, kind: input, shape index: {}]   ;;  %s282_s1 = inlined_call_operand.vmem [shape: bf16[128,128], index: 1, kind: input, shape index: {}]   ;;  %s283_s2 = inlined_call_operand.vmem [shape: f32[1,128], index: 2, kind: input, shape index: {}]   ;;  %s284_s3 = inlined_call_operand.hbm [shape: f32[2,128], index: 3, kind: output, shape index: {}]  }
   0x1   :  { %v184_v0 = vld [vmem:[%s282_s1] sm:$0xff]   ;;  %161 = vmatprep.subr.bf16.mxu0 %v216_v1  ;;  %v185_v2 = vld [vmem:[%s282_s1 + $0x8] sm:$0xff]   ;;  %177 = vmatprep.mubr.msk.bf16.mxu0 %vm217_vm0, %v216_v1  ;;  %v186_v3 = vld [vmem:[%s282_s1 + $0x10] sm:$0xff]  }
   0x2   :  { %162 = vmatpush3.bf16.msra.mxu0 %v184_v0 }
   0x3   :  { %163 = vmatprep.subr.bf16.mxu0 %v216_v1 }
   0x6   :  { %164 = vmatpush3.bf16.msra.mxu0 %v185_v2 }
   0x7   :  { %165 = vmatprep.subr.bf16.mxu0 %v216_v1 }
   0x8   :  { %8 = vsyncpa [#allocation3], 0  ;;  %v187_v4 = vld [vmem:[%s282_s1 + $0x18] sm:$0xff]   ;;  %v188_v5 = vld [vmem:[%s282_s1 + $0x20] sm:$0xff]   ;;  %s218_s5 = smov [#allocation2]  }
   0x9   :  { %v189_v6 = vld [vmem:[%s282_s1 + $0x28] sm:$0xff]   ;;  %v190_v7 = vld [vmem:[%s282_s1 + $0x30] sm:$0xff]   ;;  %v191_v8 = vld [vmem:[%s282_s1 + $0x38] sm:$0xff]   ;;  %s135_s6 = sshll.u32 %s218_s5, 4  ;;  %s136_s6 = int_to_ptr.vmem [resolvable:$true] %s135_s6 }
   0xa   :  { %166 = vmatpush3.bf16.msra.mxu0 %v186_v3  ;;  %v16_v9 = vld [vmem:[%s281_s0] sm:$0x1]  ;;  %s192_s1 = scalar_lea.vmem %s136_s6, 32  ;;  %p197_p1 = scmp.lt.s32.totalorder %s136_s6, %s136_s6 }
   0xb   :  { %167 = vmatprep.subr.bf16.mxu0 %v216_v1  ;;  %v143_v10 = vld [vmem:[%s283_s2] ss:$0 sm:$0xff]  ;;  %p193_p0 = scmp.ne.s32.totalorder %s136_s6, %s192_s1  ;;  %p198_p2 = scmp.lt.s32.totalorder %s192_s1, %s192_s1 }
   0xd   :  { %p199_p3 = por %p198_p2, %p197_p1 }
   0xe   :  { %168 = vmatpush3.bf16.msra.mxu0 %v187_v4 }
   0xf   :  { %169 = vmatprep.subr.bf16.mxu0 %v216_v1  ;;  %p200_p4 = pnand %p199_p3, %p193_p0 }
  0x12   :  { %170 = vmatpush3.bf16.msra.mxu0 %v188_v5 }
  0x13   :  { %171 = vmatprep.subr.bf16.mxu0 %v216_v1 }
  0x16   :  { %172 = vmatpush3.bf16.msra.mxu0 %v189_v6 }
  0x17   :  { %173 = vmatprep.subr.bf16.mxu0 %v216_v1 }
  0x1a   :  { %174 = vmatpush3.bf16.msra.mxu0 %v190_v7 }
  0x1b   :  { %175 = vmatprep.subr.bf16.mxu0 %v216_v1 }
  0x1e   :  { %176 = vmatpush3.bf16.msra.mxu0 %v191_v8 }
  0x21   :  { %178 = vmatmul.mubr.bf16.vlgmr.msra.gmra.mrb[0].mxu0 %v16_v9 }
  0xf4   :  { %v122_v11 = vpop.f32.mrb[0].mxu0 }
  0xf5   :  { %v123_v12 = vadd.f32 %v143_v10, %v122_v11  ;;  %v179_v13 = vpop.f32.mrb[1].mxu0 }
  0xf6   :  { %v125_v14 = vpop.f32.mrb[2].mxu0 }
  0xf7   :  { %128 = vst [vmem:[#allocation2] sm:$0x3] %v123_v12  ;;  %v180_v15 = vpop.f32.mrb[3].mxu0 }
  0xf8   :  { %203 = shalt.err (!%p200_p4)
}
  0xf9   :  { %s204_s2 = scalar_lea.hbm %s284_s3, 32 }
  0xfa   :  { %p205_p5 = scmp.ne.s32.totalorder %s284_s3, %s204_s2  ;;  %p208_p6 = scmp.lt.u32.totalorder %s204_s2, %s284_s3 }
  0xfc   :  { %p210_p7 = pnand %p208_p6, %p205_p5 }
  0xfe   :  { %213 = shalt.err (!%p210_p7)
}
  0xff   :  { %138 = dma.vmem_to_hbm [thread:$0]  %s136_s6, 32, %s284_s3, [#allocation3]  }
 0x100   :  { %214 = dma.done.wait [#allocation3], 32  }
 0x101   :  { %215 = vsyncadd [#allocation3], 4294967264 }
 0x102   :  { %142 = vsyncpa [#allocation3], 1 }

// kernel: original_mac_forward.10
= control target key start
LH: loop header
LB: loop body
LE: loop exit
PB: predicated region body
PF: predicated region fallthrough
CT: control target
= control target key end

     0   :  { %s13351_s15 = smov 0   ;;  %s13353_s16 = smov 0   ;;  %s16947_s0 = inlined_call_operand.vmem [shape: bf16[2,80,1024], index: 0, kind: input, shape index: {}]   ;;  %s16948_s1 = inlined_call_operand.vmem [shape: bf16[9,1024,128], index: 1, kind: input, shape index: {}]   ;;  %s16949_s2 = inlined_call_operand.vmem [shape: f32[1,128], index: 2, kind: input, shape index: {}]   ;;  %s16950_s3 = inlined_call_operand.vmem [shape: f32[48,1], index: 3, kind: input, shape index: {}]   ;;  %s16951_s4 = inlined_call_operand.vmem [shape: bf16[2,80,128], index: 4, kind: output, shape index: {}]  }
   0x1   :  { %s13355_s17 = smov 0  }
   0x2 LB: > { %s23_s18 = sadd.s32 1, %s13319_s16  ;;  %p9510_p0 = scmp.ge.s32.totalorder %s13323_s17, 1  ;;  %s13323_s17 = sphi %s13355_s17, %s14_s17   ;;  %s13319_s16 = sphi %s13353_s16, %s17033_s16   ;;  %s13315_s15 = sphi %s13351_s15, %s17032_s15  }
   0x3   : > { %p24_p1 = scmp.ge.s32.totalorder %s23_s18, 2  ;;  %p193_p2 = scmp.lt.s32.totalorder %s13323_s17, 3 }
   0x5   : > { %s17035_s18 = smov (%p24_p1, %s23_s18), 0  ;;  %p194_p3 = pnand %p9510_p0, %p193_p2 }
   0x7   : > { %197 = sbr.rel (%p194_p3) target bundleno = 911 (0x38f), region = 36 }
   0xe   : > { %v12637_v0 = vld [vmem:[%s16948_s1 + $0x240] sm:$0xff]   ;;  %v12641_v4 = vld [vmem:[%s16948_s1 + $0x248] sm:$0xff]   ;;  %v12645_v8 = vld [vmem:[%s16948_s1 + $0x250] sm:$0xff]   ;;  %p229_p4 = scmp.lt.s32.totalorder %s13315_s15, 1  ;;  %vm1311_vm0 = vsmask.f32 4352 }
   0xf   : > { %v12638_v1 = vld [vmem:[%s16948_s1 + $0x2c0] sm:$0xff]   ;;  %11384 = vmatprep.subr.bf16.mxu0 %v12637_v0  ;;  %v12642_v5 = vld [vmem:[%s16948_s1 + $0x2c8] sm:$0xff]   ;;  %v12646_v9 = vld [vmem:[%s16948_s1 + $0x2d0] sm:$0xff]   ;;  %vm2501_vm1 = vsmask.f32 7424 }
  0x10   : > { %v12639_v2 = vld [vmem:[%s16948_s1 + $0x200] sm:$0xff]   ;;  %11418 = vmatprep.subr.bf16.mxu1 %v12638_v1  ;;  %v12643_v6 = vld [vmem:[%s16948_s1 + $0x208] sm:$0xff]   ;;  %v12647_v10 = vld [vmem:[%s16948_s1 + $0x210] sm:$0xff]   ;;  %s17037_s15 = smov (!%p229_p4, %s13315_s15), 1 }
  0x11   : > { %v12640_v3 = vld [vmem:[%s16948_s1 + $0x280] sm:$0xff]   ;;  %11385 = vmatpush3.bf16.msra.mxu0 %v12639_v2  ;;  %v12644_v7 = vld [vmem:[%s16948_s1 + $0x288] sm:$0xff]   ;;  %v12648_v11 = vld [vmem:[%s16948_s1 + $0x290] sm:$0xff]   ;;  %s12608_s27 = smul.u32 320, %s17037_s15 }
  0x12   : > { %11419 = vmatpush3.bf16.msra.mxu1 %v12640_v3  ;;  %11386 = vmatprep.subr.bf16.mxu0 %v12641_v4  ;;  %v12649_v12 = vld [vmem:[%s16948_s1 + $0x258] sm:$0xff]   ;;  %v12653_v16 = vld [vmem:[%s16948_s1 + $0x260] sm:$0xff]   ;;  %v12657_v20 = vld [vmem:[%s16948_s1 + $0x268] sm:$0xff]  }
  0x13   : > { %11420 = vmatprep.subr.bf16.mxu1 %v12642_v5  ;;  %v12650_v13 = vld [vmem:[%s16948_s1 + $0x2d8] sm:$0xff]   ;;  %v12654_v17 = vld [vmem:[%s16948_s1 + $0x2e0] sm:$0xff]   ;;  %v12658_v21 = vld [vmem:[%s16948_s1 + $0x2e8] sm:$0xff]   ;;  %s13469_s12 = scalar_lea.vmem %s16947_s0, %s12608_s27 }
  0x14   : > { %v12651_v14 = vld [vmem:[%s16948_s1 + $0x218] sm:$0xff]   ;;  %v12655_v18 = vld [vmem:[%s16948_s1 + $0x220] sm:$0xff]   ;;  %v12659_v22 = vld [vmem:[%s16948_s1 + $0x228] sm:$0xff]  }
  0x15   : > { %11387 = vmatpush3.bf16.msra.mxu0 %v12643_v6  ;;  %v12652_v15 = vld [vmem:[%s16948_s1 + $0x298] sm:$0xff]   ;;  %v12656_v19 = vld [vmem:[%s16948_s1 + $0x2a0] sm:$0xff]   ;;  %v12660_v23 = vld [vmem:[%s16948_s1 + $0x2a8] sm:$0xff]  }
  0x16   : > { %11421 = vmatpush3.bf16.msra.mxu1 %v12644_v7  ;;  %11388 = vmatprep.subr.bf16.mxu0 %v12645_v8  ;;  %v12661_v24 = vld [vmem:[%s16948_s1 + $0x270] sm:$0xff]   ;;  %v12665_v28 = vld [vmem:[%s16948_s1 + $0x278] sm:$0xff]   ;;  %v13478_v32 = vld [vmem:[%s13469_s12] sm:$0x88] }
  0x17   : > { %11422 = vmatprep.subr.bf16.mxu1 %v12646_v9  ;;  %v12662_v25 = vld [vmem:[%s16948_s1 + $0x2f0] sm:$0xff]   ;;  %v12666_v29 = vld [vmem:[%s16948_s1 + $0x2f8] sm:$0xff]   ;;  %v13481_v33 = vld [vmem:[%s13469_s12 + $0x20] sm:$0xff] }
  0x18   : > { %v12663_v26 = vld [vmem:[%s16948_s1 + $0x230] sm:$0xff]   ;;  %v12667_v30 = vld [vmem:[%s16948_s1 + $0x238] sm:$0xff]   ;;  %v13484_v34 = vld [vmem:[%s13469_s12 + $0x40] sm:$0xff]  ;;  %v9729_v37 = vcombine.low %v13478_v32, %v13481_v33 }
  0x19   : > { %11389 = vmatpush3.bf16.msra.mxu0 %v12647_v10  ;;  %v12664_v27 = vld [vmem:[%s16948_s1 + $0x2b0] sm:$0xff]   ;;  %v12668_v31 = vld [vmem:[%s16948_s1 + $0x2b8] sm:$0xff]   ;;  %v13487_v35 = vld [vmem:[%s13469_s12 + $0x60] sm:$0xff]  ;;  %v9642_v36 = vcombine.high %v13481_v33, %v13484_v34  ;;  %v9641_v40 = vcombine.low %v13481_v33, %v13484_v34 }
  0x1a   : > { %11423 = vmatpush3.bf16.msra.mxu1 %v12648_v11  ;;  %11390 = vmatprep.subr.bf16.mxu0 %v12649_v12  ;;  %v13494_v38 = vld [vmem:[%s13469_s12 + $0x8] sm:$0x88]  ;;  %v9737_v41 = vcombine.low %v13484_v34, %v13487_v35  ;;  %v1313_v45 = vshrl.u32 %v9729_v37, 16  ;;  %v1316_v46 = vshll.u32 %v9729_v37, 16  ;;  %v12669_v49 = vld [vmem:[%s16948_s1 + $0x340] sm:$0xff]  }
  0x1b   : > { %11424 = vmatprep.subr.bf16.mxu1 %v12650_v13  ;;  %v13497_v39 = vld [vmem:[%s13469_s12 + $0x28] sm:$0xff]  ;;  %1071 = vmatprep.mubr.bf16.mxu0 %v9642_v36  ;;  %v12670_v50 = vld [vmem:[%s16948_s1 + $0x3c0] sm:$0xff]  }
  0x1c   : > { %v13504_v42 = vld [vmem:[%s13469_s12 + $0x48] sm:$0xff]  ;;  %v9731_v44 = vcombine.low %v13494_v38, %v13497_v39  ;;  %v1321_v51 = vshrl.u32 %v9737_v41, 16  ;;  %v1324_v52 = vshll.u32 %v9737_v41, 16  ;;  %v12671_v54 = vld [vmem:[%s16948_s1 + $0x300] sm:$0xff]   ;;  %v1315_v55 = vrot.slane %v1313_v45, 3 }
  0x1d   : > { %11391 = vmatpush3.bf16.msra.mxu0 %v12651_v14  ;;  %v13507_v43 = vld [vmem:[%s13469_s12 + $0x68] sm:$0xff]  ;;  %v9644_v47 = vcombine.high %v13497_v39, %v13504_v42  ;;  %v1318_v56 = vrot.slane %v1316_v46, 4  ;;  %v9643_v1 = vcombine.low %v13497_v39, %v13504_v42  ;;  %v12672_v4 = vld [vmem:[%s16948_s1 + $0x380] sm:$0xff]   ;;  %v12677_v14 = vld [vmem:[%s16948_s1 + $0x350] sm:$0xff]   ;;  %v9732_v45 = vcombine.high %v13494_v38, %v13497_v39 }
  0x1e   : > { %11425 = vmatpush3.bf16.msra.mxu1 %v12652_v15  ;;  %11392 = vmatprep.subr.bf16.mxu0 %v12653_v16  ;;  %v9739_v48 = vcombine.low %v13504_v42, %v13507_v43  ;;  %v1347_v53 = vshrl.u32 %v9731_v44, 16  ;;  %v1350_v57 = vshll.u32 %v9731_v44, 16  ;;  %v1323_v59 = vrot.slane %v1321_v51, 3  ;;  %v12673_v6 = vld [vmem:[%s16948_s1 + $0x348] sm:$0xff]   ;;  %v12678_v15 = vld [vmem:[%s16948_s1 + $0x3d0] sm:$0xff]   ;;  %v13615_v41 = vld [vmem:[%s13469_s12 + $0xc0] sm:$0xff] }
  0x1f   : > { %11426 = vmatprep.subr.bf16.mxu1 %v12654_v17  ;;  %1128 = vmatprep.mubr.bf16.mxu1 %v9644_v47  ;;  %v1326_v60 = vrot.slane %v1324_v52, 4  ;;  %v1319_v2 = vor.u32 %v1318_v56, %v1315_v55  ;;  %v12674_v8 = vld [vmem:[%s16948_s1 + $0x3c8] sm:$0xff]   ;;  %v12679_v16 = vld [vmem:[%s16948_s1 + $0x310] sm:$0xff]  }
  0x20   : > { %v1355_v58 = vshrl.u32 %v9739_v48, 16  ;;  %v1349_v61 = vrot.slane %v1347_v53, 3  ;;  %v1358_v62 = vshll.u32 %v9739_v48, 16  ;;  %v1352_v63 = vrot.slane %v1350_v57, 4  ;;  %v12675_v11 = vld [vmem:[%s16948_s1 + $0x308] sm:$0xff]   ;;  %v12680_v17 = vld [vmem:[%s16948_s1 + $0x390] sm:$0xff]  }
  0x21   : > { %11393 = vmatpush3.bf16.msra.mxu0 %v12655_v18  ;;  %v13529_v5 = vor.u32 %v1326_v60, %v1323_v59  ;;  %v12676_v12 = vld [vmem:[%s16948_s1 + $0x388] sm:$0xff]   ;;  %v12681_v18 = vld [vmem:[%s16948_s1 + $0x358] sm:$0xff]   ;;  %v9740_v53 = vcombine.high %v13504_v42, %v13507_v43  ;;  %v12693_v56 = vld [vmem:[%s16948_s1 + $0x370] sm:$0xff]   ;;  %v1367_v59 = vshll.u32 %v9732_v45, 16 }
  0x22   : > { %11427 = vmatpush3.bf16.msra.mxu1 %v12656_v19  ;;  %11394 = vmatprep.subr.bf16.mxu0 %v12657_v20  ;;  %v1357_v0 = vrot.slane %v1355_v58, 3  ;;  %v1360_v3 = vrot.slane %v1358_v62, 4  ;;  %v1353_v7 = vor.u32 %v1352_v63, %v1349_v61  ;;  %v12682_v19 = vld [vmem:[%s16948_s1 + $0x3d8] sm:$0xff]   ;;  %v13572_v20 = vld [vmem:[%s13469_s12 + $0x80] sm:$0xff]  ;;  %v12689_v36 = vld [vmem:[%s16948_s1 + $0x368] sm:$0xff]  }
  0x23   : > { %11428 = vmatprep.subr.bf16.mxu1 %v12658_v21  ;;  %v13539_v9 = vsel %vm1311_vm0, %v1319_v2, %v13529_v5  ;;  %v9650_v21 = vcombine.high %v13487_v35, %v13572_v20  ;;  %v12690_v37 = vld [vmem:[%s16948_s1 + $0x3e8] sm:$0xff]   ;;  %v12694_v42 = vld [vmem:[%s16948_s1 + $0x3f0] sm:$0xff]   ;;  %v1372_v61 = vshrl.u32 %v9740_v53, 16  ;;  %v12697_v63 = vld [vmem:[%s16948_s1 + $0x378] sm:$0xff]  }
  0x24   : > { %v13541_v10 = vor.u32 %v1360_v3, %v1357_v0  ;;  %v13621_v47 = vld [vmem:[%s13469_s12 + $0xa8] sm:$0xff]  ;;  %v12695_v58 = vld [vmem:[%s16948_s1 + $0x330] sm:$0xff]   ;;  %v1375_v0 = vshll.u32 %v9740_v53, 16  ;;  %v12699_v3 = vld [vmem:[%s16948_s1 + $0x338] sm:$0xff]  }
  0x25   : > { %11395 = vmatpush3.bf16.msra.mxu0 %v12659_v22  ;;  %v13577_v22 = vld [vmem:[%s13469_s12 + $0x88] sm:$0xff]  ;;  %v12696_v60 = vld [vmem:[%s16948_s1 + $0x3b0] sm:$0xff]  }
  0x26   : > { %11429 = vmatpush3.bf16.msra.mxu1 %v12660_v23  ;;  %11396 = vmatprep.subr.bf16.mxu0 %v12661_v24  ;;  %v13551_v13 = vsel %vm1311_vm0, %v1353_v7, %v13541_v10  ;;  %v9649_v23 = vcombine.low %v13487_v35, %v13572_v20  ;;  %v9730_v24 = vcombine.high %v13478_v32, %v13481_v33  ;;  %v12687_v32 = vld [vmem:[%s16948_s1 + $0x320] sm:$0xff]   ;;  %v13624_v48 = vld [vmem:[%s13469_s12 + $0xc8] sm:$0xff]  ;;  %v12700_v7 = vld [vmem:[%s16948_s1 + $0x3b8] sm:$0xff]  }
  0x27   : > { %11430 = vmatprep.subr.bf16.mxu1 %v12662_v25  ;;  %v9652_v25 = vcombine.high %v13507_v43, %v13577_v22  ;;  %v9660_v51 = vcombine.high %v13621_v47, %v13624_v48  ;;  %v12691_v52 = vld [vmem:[%s16948_s1 + $0x328] sm:$0xff]   ;;  %v9659_v38 = vcombine.low %v13621_v47, %v13624_v48 }
  0x28   : > { %v1330_v33 = vshrl.u32 %v9730_v24, 16 }
  0x29   : > { %11397 = vmatpush3.bf16.msra.mxu0 %v12663_v26  ;;  %v12683_v26 = vld [vmem:[%s16948_s1 + $0x318] sm:$0xff]  }
  0x2a   : > { %11431 = vmatpush3.bf16.msra.mxu1 %v12664_v27  ;;  %11398 = vmatprep.subr.bf16.mxu0 %v12665_v28  ;;  %v9651_v27 = vcombine.low %v13507_v43, %v13577_v22  ;;  %v12684_v28 = vld [vmem:[%s16948_s1 + $0x398] sm:$0xff]   ;;  %v1364_v43 = vshrl.u32 %v9732_v45, 16  ;;  %v9754_v45 = vcombine.high %v13615_v41, %v13615_v41 }
  0x2b   : > { %11432 = vmatprep.subr.bf16.mxu1 %v12666_v29  ;;  %v12685_v29 = vld [vmem:[%s16948_s1 + $0x360] sm:$0xff]  }
  0x2d   : > { %11399 = vmatpush3.bf16.msra.mxu0 %v12667_v30  ;;  %v9738_v30 = vcombine.high %v13484_v34, %v13487_v35  ;;  %v12688_v34 = vld [vmem:[%s16948_s1 + $0x3a0] sm:$0xff]   ;;  %v1333_v35 = vshll.u32 %v9730_v24, 16 }
  0x2e   : > { %11433 = vmatpush3.bf16.msra.mxu1 %v12668_v31  ;;  %11452 = vmatprep.subr.bf16.mxu0 %v12669_v49  ;;  %v12686_v31 = vld [vmem:[%s16948_s1 + $0x3e0] sm:$0xff]  }
  0x2f   : > { %11486 = vmatprep.subr.bf16.mxu1 %v12670_v50  ;;  %v1338_v44 = vshrl.u32 %v9738_v30, 16  ;;  %v13627_v50 = vrot.slane %v1330_v33, 3  ;;  %v13636_v39 = vrot.slane %v1333_v35, 4  ;;  %v1341_v55 = vshll.u32 %v9738_v30, 16  ;;  %v12705_v33 = vld [vmem:[%s16948_s1 + $0x48] sm:$0xff]  }
  0x30   : > { %1072 = vmatmul.mubr.bf16.vlgmr.msra.gmra.mrb[0].mxu0 %v9641_v40  ;;  %v270_v40 = vld [vmem:[%s13469_s12 + $0xa0] sm:$0xff]  ;;  %v9748_v30 = vcombine.high %v13577_v22, %v13621_v47  ;;  %v9747_v35 = vcombine.low %v13577_v22, %v13621_v47  ;;  %v12708_v22 = vld [vmem:[%s16948_s1 + $0x88] sm:$0xff]   ;;  %v13738_v47 = vld [vmem:[%s13469_s12 + $0x70] sm:$0xff] }
  0x31   : > { %11453 = vmatpush3.bf16.msra.mxu0 %v12671_v54  ;;  %1129 = vmatmul.mubr.bf16.vlgmr.msra.gmra.mrb[0].mxu1 %v9643_v1  ;;  %v9658_v46 = vcombine.high %v270_v40, %v13615_v41  ;;  %v9657_v49 = vcombine.low %v270_v40, %v13615_v41  ;;  %v12692_v54 = vld [vmem:[%s16948_s1 + $0x3a8] sm:$0xff]   ;;  %v13646_v57 = vrot.slane %v1338_v44, 3  ;;  %v9746_v62 = vcombine.high %v13572_v20, %v270_v40  ;;  %v12698_v1 = vld [vmem:[%s16948_s1 + $0x3f8] sm:$0xff]  }
  0x32   : > { %11487 = vmatpush3.bf16.msra.mxu1 %v12672_v4  ;;  %11454 = vmatprep.subr.bf16.mxu0 %v12673_v6  ;;  %v13664_v2 = vrot.slane %v1341_v55, 4  ;;  %v13669_v4 = vrot.slane %v1364_v43, 3  ;;  %v9745_v6 = vcombine.low %v13572_v20, %v270_v40  ;;  %v12707_v40 = vld [vmem:[%s16948_s1 + $0x8] sm:$0xff]   ;;  %v1476_v44 = vshrl.u32 %v9748_v30, 16  ;;  %v13758_v43 = vld [vmem:[%s13469_s12 + $0x78] sm:$0xff] }
  0x33   : > { %11488 = vmatprep.subr.bf16.mxu1 %v12674_v8  ;;  %1079 = vmatprep.mubr.bf16.mxu0 %v9650_v21  ;;  %v13676_v8 = vld [vmem:[%s13469_s12 + $0x30] sm:$0xff]  ;;  %v1470_v55 = vshll.u32 %v9747_v35, 16 }
  0x34   : > { %1136 = vmatprep.mubr.bf16.mxu1 %v9652_v25  ;;  %v12701_v25 = vld [vmem:[%s16948_s1 + $0x40] sm:$0xff]  }
  0x35   : > { %11455 = vmatpush3.bf16.msra.mxu0 %v12675_v11  ;;  %v13678_v11 = vrot.slane %v1367_v59, 4  ;;  %v1530_v59 = vshrl.u32 %v9754_v45, 16 }
  0x36   : > { %11489 = vmatpush3.bf16.msra.mxu1 %v12676_v12  ;;  %11456 = vmatprep.subr.bf16.mxu0 %v12677_v14  ;;  %v1458_v12 = vshrl.u32 %v9746_v62, 16  ;;  %v13681_v14 = vld [vmem:[%s13469_s12 + $0x50] sm:$0xff] }
  0x37   : > { %11490 = vmatprep.subr.bf16.mxu1 %v12678_v15  ;;  %v13684_v15 = vld [vmem:[%s13469_s12 + $0x38] sm:$0xff]  ;;  %v9646_v20 = vcombine.high %v13676_v8, %v13681_v14 }
  0x38   : > { %1080 = vmatmul.mubr.bf16.gmra.mrb[4].mxu0 %v9649_v23  ;;  %v9645_v23 = vcombine.low %v13676_v8, %v13681_v14 }
  0x39   : > { %11457 = vmatpush3.bf16.msra.mxu0 %v12679_v16  ;;  %1137 = vmatmul.mubr.bf16.gmra.mrb[4].mxu1 %v9651_v27  ;;  %v13687_v16 = vld [vmem:[%s13469_s12 + $0x58] sm:$0xff]  ;;  %v1449_v27 = vshrl.u32 %v9745_v6, 16 }
  0x3a   : > { %11491 = vmatpush3.bf16.msra.mxu1 %v12680_v17  ;;  %11458 = vmatprep.subr.bf16.mxu0 %v12681_v18  ;;  %v13689_v17 = vrot.slane %v1372_v61, 3  ;;  %v13691_v18 = vrot.slane %v1375_v0, 4  ;;  %v9648_v21 = vcombine.high %v13684_v15, %v13687_v16  ;;  %v9647_v24 = vcombine.low %v13684_v15, %v13687_v16 }
  0x3b   : > { %11492 = vmatprep.subr.bf16.mxu1 %v12682_v19  ;;  %1087 = vmatprep.mubr.bf16.mxu0 %v9658_v46  ;;  %v1461_v19 = vshll.u32 %v9746_v62, 16  ;;  %v1479_v46 = vshll.u32 %v9748_v30, 16  ;;  %v12711_v62 = vld [vmem:[%s16948_s1 + $0x10] sm:$0xff]   ;;  %v1533_v0 = vshll.u32 %v9754_v45, 16  ;;  %v13834_v45 = vld [vmem:[%s13469_s12 + $0xb8] sm:$0xff] }
  0x3c   : > { %1144 = vmatprep.mubr.bf16.mxu1 %v9660_v51 }
  0x3d   : > { %11459 = vmatpush3.bf16.msra.mxu0 %v12683_v26  ;;  %v12702_v26 = vld [vmem:[%s16948_s1 + $0xc0] sm:$0xff]   ;;  %v13765_v61 = vrot.slane %v1479_v46, 4 }
  0x3e   : > { %11493 = vmatpush3.bf16.msra.mxu1 %v12684_v28  ;;  %11460 = vmatprep.subr.bf16.mxu0 %v12685_v29  ;;  %v12703_v28 = vld [vmem:[%s16948_s1] sm:$0xff]   ;;  %v13710_v29 = vrot.slane %v1458_v12, 3  ;;  %v9756_v12 = vcombine.high %v13624_v48, %v13624_v48 }
  0x3f   : > { %11494 = vmatprep.subr.bf16.mxu1 %v12686_v31  ;;  %v12704_v31 = vld [vmem:[%s16948_s1 + $0x80] sm:$0xff]  }
  0x40   : > { %1088 = vmatmul.mubr.bf16.gmra.mrb[8].mxu0 %v9657_v49  ;;  %v13741_v49 = vld [vmem:[%s13469_s12 + $0x90] sm:$0xff] }
  0x41   : > { %11461 = vmatpush3.bf16.msra.mxu0 %v12687_v32  ;;  %1145 = vmatmul.mubr.bf16.gmra.mrb[8].mxu1 %v9659_v38  ;;  %v13717_v32 = vrot.slane %v1461_v19, 4  ;;  %v9654_v38 = vcombine.high %v13738_v47, %v13741_v49  ;;  %v9653_v53 = vcombine.low %v13738_v47, %v13741_v49  ;;  %v12714_v19 = vld [vmem:[%s16948_s1 + $0xd8] sm:$0xff]  }
  0x42   : > { %11495 = vmatpush3.bf16.msra.mxu1 %v12688_v34  ;;  %11462 = vmatprep.subr.bf16.mxu0 %v12689_v36  ;;  %v1452_v34 = vshll.u32 %v9745_v6, 16  ;;  %v12706_v36 = vld [vmem:[%s16948_s1 + $0xc8] sm:$0xff]   ;;  %v12713_v6 = vld [vmem:[%s16948_s1 + $0x58] sm:$0xff]  }
  0x43   : > { %11496 = vmatprep.subr.bf16.mxu1 %v12690_v37  ;;  %1185 = vmatprep.mubr.bf16.mxu0 %v9646_v20  ;;  %v13727_v37 = vrot.slane %v1449_v27, 3  ;;  %v1336_v20 = vor.u32 %v13636_v39, %v13627_v50  ;;  %v12716_v50 = vld [vmem:[%s16948_s1 + $0x98] sm:$0xff]   ;;  %v13804_v39 = vld [vmem:[%s13469_s12 + $0xb0] sm:$0xff]  ;;  %v13811_v27 = vrot.slane %v1533_v0, 4 }
  0x44   : > { %1242 = vmatprep.mubr.bf16.mxu1 %v9648_v21  ;;  %v13743_v51 = vrot.slane %v1452_v34, 4  ;;  %v13791_v21 = vor.u32 %v13664_v2, %v13646_v57  ;;  %v13807_v57 = vld [vmem:[%s13469_s12 + $0xd0] sm:$0xff]  ;;  %v13809_v2 = vrot.slane %v1530_v59, 3  ;;  %v12718_v34 = vld [vmem:[%s16948_s1 + $0xe0] sm:$0xff]   ;;  %v9741_v59 = vcombine.low %v13681_v14, %v13738_v47 }
  0x45   : > { %11463 = vmatpush3.bf16.msra.mxu0 %v12691_v52  ;;  %v1467_v52 = vshrl.u32 %v9747_v35, 16  ;;  %v9661_v30 = vcombine.low %v13804_v39, %v13807_v57 }
  0x46   : > { %11497 = vmatpush3.bf16.msra.mxu1 %v12692_v54  ;;  %11464 = vmatprep.subr.bf16.mxu0 %v12693_v56  ;;  %v12709_v54 = vld [vmem:[%s16948_s1 + $0x50] sm:$0xff]   ;;  %v9753_v56 = vcombine.low %v13615_v41, %v13615_v41  ;;  %v1345_v35 = vsel %vm1311_vm0, %v1336_v20, %v13791_v21  ;;  %v9743_v20 = vcombine.low %v13687_v16, %v13758_v43 }
  0x47   : > { %11498 = vmatprep.subr.bf16.mxu1 %v12694_v42  ;;  %v12710_v42 = vld [vmem:[%s16948_s1 + $0xd0] sm:$0xff]  }
  0x49   : > { %11465 = vmatpush3.bf16.msra.mxu0 %v12695_v58  ;;  %v13760_v58 = vrot.slane %v1476_v44, 3  ;;  %v1551_v44 = vshll.u32 %v9756_v12, 16 }
  0x4a   : > { %11499 = vmatpush3.bf16.msra.mxu1 %v12696_v60  ;;  %11466 = vmatprep.subr.bf16.mxu0 %v12697_v63  ;;  %v13763_v60 = vld [vmem:[%s13469_s12 + $0x98] sm:$0xff] }
  0x4b   : > { %11500 = vmatprep.subr.bf16.mxu1 %v12698_v1  ;;  %v9656_v41 = vcombine.high %v13758_v43, %v13763_v60  ;;  %v9655_v63 = vcombine.low %v13758_v43, %v13763_v60  ;;  %v12712_v1 = vld [vmem:[%s16948_s1 + $0x90] sm:$0xff]  }
  0x4d   : > { %11467 = vmatpush3.bf16.msra.mxu0 %v12699_v3  ;;  %v1521_v3 = vshrl.u32 %v9753_v56, 16 }
  0x4e   : > { %11501 = vmatpush3.bf16.msra.mxu1 %v12700_v7  ;;  %11520 = vmatprep.subr.bf16.mxu0 %v12701_v25  ;;  %v13780_v7 = vrot.slane %v1467_v52, 3  ;;  %v1524_v25 = vshll.u32 %v9753_v56, 16 }
  0x4f   : > { %11554 = vmatprep.subr.bf16.mxu1 %v12702_v26  ;;  %v9755_v26 = vcombine.low %v13624_v48, %v13624_v48  ;;  %v9662_v48 = vcombine.high %v13804_v39, %v13807_v57 }
  0x50   : > { %1186 = vmatmul.mubr.bf16.vlgmr.msra.gmra.mrb[12].mxu0 %v9645_v23  ;;  %v13793_v23 = vrot.slane %v1470_v55, 4  ;;  %v13839_v46 = vrot.slane %v1524_v25, 4  ;;  %v12721_v55 = vld [vmem:[%s16948_s1 + $0x68] sm:$0xff]  }
  0x51   : > { %1243 = vmatmul.mubr.bf16.vlgmr.msra.gmra.mrb[12].mxu1 %v9647_v24  ;;  %11521 = vmatpush3.bf16.msra.mxu0 %v12703_v28  ;;  %v12715_v24 = vld [vmem:[%s16948_s1 + $0x18] sm:$0xff]   ;;  %v13813_v28 = vrot.slane %v1521_v3, 3  ;;  %v1539_v52 = vshrl.u32 %v9755_v26, 16  ;;  %v12725_v3 = vld [vmem:[%s16948_s1 + $0x70] sm:$0xff]  }
  0x52   : > { %11555 = vmatpush3.bf16.msra.mxu1 %v12704_v31  ;;  %11522 = vmatprep.subr.bf16.mxu0 %v12705_v33  ;;  %v12717_v31 = vld [vmem:[%s16948_s1 + $0x60] sm:$0xff]   ;;  %v1548_v33 = vshrl.u32 %v9756_v12, 16  ;;  %v12726_v12 = vld [vmem:[%s16948_s1 + $0xf0] sm:$0xff]  }
  0x53   : > { %11556 = vmatprep.subr.bf16.mxu1 %v12706_v36  ;;  %1193 = vmatprep.mubr.bf16.mxu0 %v9654_v38  ;;  %v1370_v36 = vor.u32 %v13678_v11, %v13669_v4  ;;  %v12719_v4 = vld [vmem:[%s16948_s1 + $0x20] sm:$0xff]  }
  0x54   : > { %1250 = vmatprep.mubr.bf16.mxu1 %v9656_v41  ;;  %v12722_v41 = vld [vmem:[%s16948_s1 + $0xe8] sm:$0xff]  }
  0x55   : > { %11523 = vmatpush3.bf16.msra.mxu0 %v12707_v40  ;;  %v13831_v40 = vor.u32 %v13691_v18, %v13689_v17  ;;  %v1542_v17 = vshll.u32 %v9755_v26, 16  ;;  %v12720_v18 = vld [vmem:[%s16948_s1 + $0xa0] sm:$0xff]   ;;  %v12728_v26 = vld [vmem:[%s16948_s1 + $0xb0] sm:$0xff]  }
  0x56   : > { %11557 = vmatpush3.bf16.msra.mxu1 %v12708_v22  ;;  %11524 = vmatprep.subr.bf16.mxu0 %v12709_v54  ;;  %v13837_v22 = vld [vmem:[%s13469_s12 + $0xd8] sm:$0xff]  ;;  %v13855_v54 = vcombine.high %v13681_v14, %v13738_v47  ;;  %v12724_v14 = vld [vmem:[%s16948_s1 + $0xa8] sm:$0xff]  }
  0x57   : > { %11558 = vmatprep.subr.bf16.mxu1 %v12710_v42  ;;  %v9664_v38 = vcombine.high %v13834_v45, %v13837_v22  ;;  %v9663_v11 = vcombine.low %v13834_v45, %v13837_v22  ;;  %v1379_v56 = vsel %vm1311_vm0, %v1370_v36, %v13831_v40  ;;  %v13862_v42 = vrot.slane %v1551_v44, 4  ;;  %v12732_v36 = vld [vmem:[%s16948_s1 + $0xb8] sm:$0xff]  }
  0x58   : > { %1194 = vmatmul.mubr.bf16.gmra.mrb[16].mxu0 %v9653_v53  ;;  %v13851_v53 = vrot.slane %v1548_v33, 3  ;;  %v13874_v0 = vrot.slane %v1542_v17, 4  ;;  %v1406_v47 = vshrl.u32 %v13855_v54, 16  ;;  %v12731_v33 = vld [vmem:[%s16948_s1 + $0x38] sm:$0xff]   ;;  %v1482_v44 = vor.u32 %v13765_v61, %v13760_v58  ;;  %v12736_v17 = vld [vmem:[%s16948_s1 + $0x180] sm:$0xff]  }
  0x59   : > { %11525 = vmatpush3.bf16.msra.mxu0 %v12711_v62  ;;  %1251 = vmatmul.mubr.bf16.gmra.mrb[16].mxu1 %v9655_v63  ;;  %v13869_v62 = vrot.slane %v1539_v52, 3  ;;  %v12723_v63 = vld [vmem:[%s16948_s1 + $0x28] sm:$0xff]  }
  0x5a   : > { %11559 = vmatpush3.bf16.msra.mxu1 %v12712_v1  ;;  %11526 = vmatprep.subr.bf16.mxu0 %v12713_v6  ;;  %v13878_v1 = vcombine.high %v13687_v16, %v13758_v43  ;;  %v1409_v6 = vshll.u32 %v13855_v54, 16  ;;  %v12729_v16 = vld [vmem:[%s16948_s1 + $0x78] sm:$0xff]   ;;  %v1392_v43 = vshll.u32 %v9741_v59, 16  ;;  %v1426_v54 = vshll.u32 %v9743_v20, 16 }
  0x5b   : > { %11560 = vmatprep.subr.bf16.mxu1 %v12714_v19  ;;  %1201 = vmatprep.mubr.bf16.mxu0 %v9662_v48  ;;  %v1389_v19 = vshrl.u32 %v9741_v59, 16  ;;  %v9749_v48 = vcombine.low %v13741_v49, %v13804_v39  ;;  %v1473_v59 = vor.u32 %v13793_v23, %v13780_v7  ;;  %v12740_v7 = vld [vmem:[%s16948_s1 + $0x188] sm:$0xff]   ;;  %v1554_v23 = vor.u32 %v13862_v42, %v13851_v53  ;;  %v12742_v53 = vld [vmem:[%s16948_s1 + $0x1d0] sm:$0xff]  }
  0x5c   : > { %1258 = vmatprep.mubr.bf16.mxu1 %v9664_v38  ;;  %v1440_v25 = vshrl.u32 %v13878_v1, 16  ;;  %v12733_v38 = vld [vmem:[%s16948_s1 + $0x140] sm:$0xff]  }
  0x5d   : > { %11527 = vmatpush3.bf16.msra.mxu0 %v12715_v24  ;;  %v12727_v24 = vld [vmem:[%s16948_s1 + $0x30] sm:$0xff]   ;;  %v1485_v52 = vshrl.u32 %v9749_v48, 16  ;;  %v1488_v61 = vshll.u32 %v9749_v48, 16  ;;  %v1474_v42 = vsel %vm1311_vm0, %v13541_v10, %v1473_v59  ;;  %v1555_v10 = vsel %vm1311_vm0, %v1482_v44, %v1554_v23 }
  0x5e   : > { %11561 = vmatpush3.bf16.msra.mxu1 %v12716_v50  ;;  %11528 = vmatprep.subr.bf16.mxu0 %v12717_v31  ;;  %v13900_v50 = vrot.slane %v1406_v47, 3  ;;  %v1391_v31 = vrot.slane %v1389_v19, 3  ;;  %v1443_v48 = vshll.u32 %v13878_v1, 16  ;;  %v12763_v23 = vld [vmem:[%s16948_s1 + $0x130] sm:$0xff]  }
  0x5f   : > { %11562 = vmatprep.subr.bf16.mxu1 %v12718_v34  ;;  %v1464_v34 = vor.u32 %v13717_v32, %v13710_v29  ;;  %v12734_v29 = vld [vmem:[%s16948_s1 + $0x1c0] sm:$0xff]   ;;  %v1487_v32 = vrot.slane %v1485_v52, 3 }
  0x60   : > { %1202 = vmatmul.mubr.bf16.gmra.mrb[20].mxu0 %v9661_v30  ;;  %v12730_v30 = vld [vmem:[%s16948_s1 + $0xf8] sm:$0xff]   ;;  %v12752_v52 = vld [vmem:[%s16948_s1 + $0x1e0] sm:$0xff]  }
  0x61   : > { %2032 = vmatprep.mubr.bf16.mxu0 %v1345_v35  ;;  %11529 = vmatpush3.bf16.msra.mxu0 %v12719_v4  ;;  %v1423_v35 = vshrl.u32 %v9743_v20, 16  ;;  %v1394_v4 = vrot.slane %v1392_v43, 4  ;;  %v1465_v58 = vsel %vm1311_vm0, %v13791_v21, %v1464_v34  ;;  %v12737_v21 = vld [vmem:[%s16948_s1 + $0x148] sm:$0xff]   ;;  %v13987_v20 = vcombine.high %v13741_v49, %v13804_v39  ;;  %v12745_v49 = vld [vmem:[%s16948_s1 + $0x158] sm:$0xff]  }
  0x62   : > { %11563 = vmatpush3.bf16.msra.mxu1 %v12720_v18  ;;  %11530 = vmatprep.subr.bf16.mxu0 %v12721_v55  ;;  %v1483_v18 = vsel %vm1311_vm0, %v13831_v40, %v1482_v44  ;;  %v9751_v55 = vcombine.low %v13763_v60, %v13834_v45  ;;  %v12738_v40 = vld [vmem:[%s16948_s1 + $0x1c8] sm:$0xff]   ;;  %v1527_v39 = vor.u32 %v13839_v46, %v13813_v28 }
  0x63   : > { %1259 = vmatmul.mubr.bf16.gmra.mrb[20].mxu1 %v9663_v11  ;;  %11564 = vmatprep.subr.bf16.mxu1 %v12722_v41  ;;  %v12735_v11 = vld [vmem:[%s16948_s1 + $0x100] sm:$0xff]   ;;  %v13950_v41 = vrot.slane %v1409_v6, 4  ;;  %v1494_v46 = vshrl.u32 %v13987_v20, 16 }
  0x64   : > { %2089 = vmatprep.mubr.bf16.mxu1 %v1379_v56  ;;  %v1490_v56 = vrot.slane %v1488_v61, 4  ;;  %v1503_v47 = vshrl.u32 %v9751_v55, 16 }
  0x65   : > { %11531 = vmatpush3.bf16.msra.mxu0 %v12723_v63  ;;  %v1425_v63 = vrot.slane %v1423_v35, 3  ;;  %v14044_v61 = vrot.slane %v1494_v46, 3 }
  0x66   : > { %11565 = vmatpush3.bf16.msra.mxu1 %v12724_v14  ;;  %11532 = vmatprep.subr.bf16.mxu0 %v12725_v3  ;;  %v13959_v14 = vor.u32 %v1490_v56, %v1487_v32  ;;  %v9752_v32 = vcombine.high %v13763_v60, %v13834_v45  ;;  %v12758_v60 = vld [vmem:[%s16948_s1 + $0x1e8] sm:$0xff]   ;;  %v1497_v45 = vshll.u32 %v13987_v20, 16  ;;  %v12768_v20 = vld [vmem:[%s16948_s1 + $0x1b8] sm:$0xff]  }
  0x67   : > { %11566 = vmatprep.subr.bf16.mxu1 %v12726_v12  ;;  %v1505_v12 = vrot.slane %v1503_v47, 3  ;;  %v12760_v56 = vld [vmem:[%s16948_s1 + $0x1a8] sm:$0xff]  }
  0x69   : > { %11533 = vmatpush3.bf16.msra.mxu0 %v12727_v24  ;;  %v1506_v24 = vshll.u32 %v9751_v55, 16  ;;  %v12759_v55 = vld [vmem:[%s16948_s1 + $0x128] sm:$0xff]  }
  0x6a   : > { %11567 = vmatpush3.bf16.msra.mxu1 %v12728_v26  ;;  %11534 = vmatprep.subr.bf16.mxu0 %v12729_v16  ;;  %v12744_v26 = vld [vmem:[%s16948_s1 + $0x190] sm:$0xff]   ;;  %v9757_v16 = vcombine.low %v13807_v57, %v13807_v57 }
  0x6b   : > { %11568 = vmatprep.subr.bf16.mxu1 %v12730_v30  ;;  %v1508_v43 = vrot.slane %v1506_v24, 4  ;;  %v12746_v30 = vld [vmem:[%s16948_s1 + $0x1d8] sm:$0xff]   ;;  %v252_v24 = vld [vmem:[%s13469_s12 + $0x10] sm:$0x88] }
  0x6d   : > { %11535 = vmatpush3.bf16.msra.mxu0 %v12731_v33  ;;  %v14008_v33 = vrot.slane %v1440_v25, 3  ;;  %v14016_v35 = vor.u32 %v1508_v43, %v1505_v12  ;;  %v12751_v25 = vld [vmem:[%s16948_s1 + $0x160] sm:$0xff]  }
  0x6e   : > { %11569 = vmatpush3.bf16.msra.mxu1 %v12732_v36  ;;  %11588 = vmatprep.subr.bf16.mxu0 %v12733_v38  ;;  %v14025_v36 = vrot.slane %v1443_v48, 4  ;;  %v9733_v48 = vcombine.low %v252_v24, %v13676_v8 }
  0x6f   : > { %11622 = vmatprep.subr.bf16.mxu1 %v12734_v29  ;;  %v12754_v29 = vld [vmem:[%s16948_s1 + $0x120] sm:$0xff]  }
  0x70   : > { %2033 = vmatmul.mubr.bf16.vlgmr.msra.gmra.mrb[24].mxu0 %v13539_v9  ;;  %v1455_v9 = vor.u32 %v13743_v51, %v13727_v37  ;;  %v1536_v37 = vor.u32 %v13811_v27, %v13809_v2  ;;  %v13957_v51 = vor.u32 %v1394_v4, %v1391_v31  ;;  %v12741_v2 = vld [vmem:[%s16948_s1 + $0x150] sm:$0xff]   ;;  %v1428_v27 = vrot.slane %v1426_v54, 4 }
  0x71   : > { %2090 = vmatmul.mubr.bf16.vlgmr.msra.gmra.mrb[24].mxu1 %v13551_v13  ;;  %11589 = vmatpush3.bf16.msra.mxu0 %v12735_v11  ;;  %v12739_v13 = vld [vmem:[%s16948_s1 + $0x108] sm:$0xff]   ;;  %v1545_v31 = vor.u32 %v13874_v0, %v13869_v62  ;;  %v12748_v62 = vld [vmem:[%s16948_s1 + $0x198] sm:$0xff]   ;;  %v1557_v0 = vshrl.u32 %v9757_v16, 16  ;;  %v1560_v11 = vshll.u32 %v9757_v16, 16  ;;  %v9734_v16 = vcombine.high %v252_v24, %v13676_v8  ;;  %v12769_v8 = vld [vmem:[%s16948_s1 + $0x440] sm:$0xff]  }
  0x72   : > { %11623 = vmatpush3.bf16.msra.mxu1 %v12736_v17  ;;  %2040 = vmatprep.mubr.bf16.mxu0 %v1465_v58  ;;  %v1456_v3 = vsel %vm1311_vm0, %v13529_v5, %v1455_v9  ;;  %v13974_v6 = vsel %vm1311_vm0, %v13957_v51, %v13959_v14  ;;  %v12743_v5 = vld [vmem:[%s16948_s1 + $0x110] sm:$0xff]   ;;  %v1537_v19 = vsel %vm1311_vm0, %v1464_v34, %v1536_v37  ;;  %v12747_v34 = vld [vmem:[%s16948_s1 + $0x118] sm:$0xff]   ;;  %v12755_v58 = vld [vmem:[%s16948_s1 + $0x1a0] sm:$0xff]   ;;  %v1381_v46 = vshrl.u32 %v9733_v48, 16 }
  0x73   : > { %11590 = vmatprep.subr.bf16.mxu0 %v12737_v21  ;;  %2097 = vmatprep.mubr.bf16.mxu1 %v1483_v18  ;;  %v14013_v28 = vor.u32 %v1428_v27, %v1425_v63  ;;  %v1528_v1 = vsel %vm1311_vm0, %v1455_v9, %v1527_v39  ;;  %v1546_v38 = vsel %vm1311_vm0, %v1473_v59, %v1545_v31  ;;  %v1559_v4 = vrot.slane %v1557_v0, 3  ;;  %v12757_v18 = vld [vmem:[%s16948_s1 + $0x168] sm:$0xff]   ;;  %v12761_v59 = vld [vmem:[%s16948_s1 + $0x170] sm:$0xff]   ;;  %v12765_v27 = vld [vmem:[%s16948_s1 + $0x178] sm:$0xff]  }
  0x74   : > { %11624 = vmatprep.subr.bf16.mxu1 %v12738_v40  ;;  %v9759_v17 = vcombine.low %v13837_v22, %v13837_v22  ;;  %v1562_v54 = vrot.slane %v1560_v11, 4  ;;  %v1512_v21 = vshrl.u32 %v9752_v32, 16  ;;  %v12762_v63 = vld [vmem:[%s16948_s1 + $0x1f0] sm:$0xff]   ;;  %v9760_v39 = vcombine.high %v13837_v22, %v13837_v22  ;;  %v12782_v24 = vld [vmem:[%s16948_s1 + $0x4d8] sm:$0xff]  }
  0x75   : > { %11591 = vmatpush3.bf16.msra.mxu0 %v12739_v13  ;;  %v14030_v44 = vsel %vm1311_vm0, %v14013_v28, %v14016_v35  ;;  %v1515_v13 = vshll.u32 %v9752_v32, 16  ;;  %v1401_v22 = vshll.u32 %v9734_v16, 16 }
  0x76   : > { %11625 = vmatpush3.bf16.msra.mxu1 %v12740_v7  ;;  %11592 = vmatprep.subr.bf16.mxu0 %v12741_v2  ;;  %v1563_v9 = vor.u32 %v1562_v54, %v1559_v4  ;;  %v1575_v40 = vshrl.u32 %v9759_v17, 16  ;;  %v1578_v47 = vshll.u32 %v9759_v17, 16  ;;  %v14079_v2 = vcombine.high %v13807_v57, %v13807_v57  ;;  %v12772_v54 = vld [vmem:[%s16948_s1 + $0x480] sm:$0xff]  }
  0x77   : > { %11626 = vmatprep.subr.bf16.mxu1 %v12742_v53  ;;  %v1514_v12 = vrot.slane %v1512_v21, 3  ;;  %v1517_v57 = vrot.slane %v1515_v13, 4 }
  0x78   : > { %2041 = vmatmul.mubr.bf16.gmra.mrb[28].mxu0 %v1456_v3  ;;  %v14066_v37 = vsel %vm1311_vm0, %v13959_v14, %v1563_v9  ;;  %v1577_v7 = vrot.slane %v1575_v40, 3  ;;  %v12764_v3 = vld [vmem:[%s16948_s1 + $0x1b0] sm:$0xff]   ;;  %v1499_v14 = vrot.slane %v1497_v45, 4  ;;  %v1580_v53 = vrot.slane %v1578_v47, 4  ;;  %v12773_v9 = vld [vmem:[%s16948_s1 + $0x448] sm:$0xff]  }
  0x79   : > { %11593 = vmatpush3.bf16.msra.mxu0 %v12743_v5  ;;  %2098 = vmatmul.mubr.bf16.gmra.mrb[28].mxu1 %v1474_v42  ;;  %v12766_v42 = vld [vmem:[%s16948_s1 + $0x1f8] sm:$0xff]   ;;  %v1569_v31 = vshll.u32 %v14079_v2, 16  ;;  %v1584_v45 = vshrl.u32 %v9760_v39, 16  ;;  %v1587_v40 = vshll.u32 %v9760_v39, 16  ;;  %v12775_v47 = vld [vmem:[%s16948_s1 + $0x408] sm:$0xff]   ;;  %v12790_v39 = vld [vmem:[%s16948_s1 + $0x420] sm:$0xff]  }
  0x7a   : > { %11627 = vmatpush3.bf16.msra.mxu1 %v12744_v26  ;;  %2048 = vmatprep.mubr.bf16.mxu0 %v1537_v19  ;;  %v12767_v5 = vld [vmem:[%s16948_s1 + $0x138] sm:$0xff]   ;;  %v1581_v19 = vor.u32 %v1580_v53, %v1577_v7  ;;  %v1412_v26 = vor.u32 %v13950_v41, %v13900_v50  ;;  %v1446_v41 = vor.u32 %v14025_v36, %v14008_v33  ;;  %v1403_v36 = vrot.slane %v1401_v22, 4 }
  0x7b   : > { %11594 = vmatprep.subr.bf16.mxu0 %v12745_v49  ;;  %2105 = vmatprep.mubr.bf16.mxu1 %v1555_v10  ;;  %v1566_v10 = vshrl.u32 %v14079_v2, 16  ;;  %v253_v49 = vld [vmem:[%s13469_s12 + $0x18] sm:$0x88]  ;;  %v1586_v2 = vrot.slane %v1584_v45, 3  ;;  %v1589_v53 = vrot.slane %v1587_v40, 4 }
  0x7c   : > { %11628 = vmatprep.subr.bf16.mxu1 %v12746_v30  ;;  %v14104_v43 = vsel %vm1311_vm0, %v14016_v35, %v1581_v19  ;;  %v9735_v30 = vcombine.low %v253_v49, %v13684_v15  ;;  %v9736_v50 = vcombine.high %v253_v49, %v13684_v15  ;;  %v12770_v35 = vld [vmem:[%s16948_s1 + $0x4c0] sm:$0xff]   ;;  %v12781_v19 = vld [vmem:[%s16948_s1 + $0x458] sm:$0xff]  }
  0x7d   : > { %11595 = vmatpush3.bf16.msra.mxu0 %v12747_v34  ;;  %v1398_v34 = vshrl.u32 %v9734_v16, 16  ;;  %v1568_v7 = vrot.slane %v1566_v10, 3  ;;  %v12784_v10 = vld [vmem:[%s16948_s1 + $0x498] sm:$0xff]   ;;  %v12787_v16 = vld [vmem:[%s16948_s1 + $0x460] sm:$0xff]  }
  0x7e   : > { %11629 = vmatpush3.bf16.msra.mxu1 %v12748_v62  ;;  %11596 = vmatprep.subr.bf16.mxu0 %v12751_v25  ;;  %v1384_v62 = vshll.u32 %v9733_v48, 16  ;;  %v1432_v0 = vshrl.u32 %v9736_v50, 16  ;;  %v1415_v15 = vshrl.u32 %v9735_v30, 16  ;;  %v1418_v25 = vshll.u32 %v9735_v30, 16  ;;  %v12793_v30 = vld [vmem:[%s16948_s1 + $0x468] sm:$0xff]   ;;  %v12801_v22 = vld [vmem:[%s16948_s1 + $0x478] sm:$0xff]  }
  0x7f   : > { %11630 = vmatprep.subr.bf16.mxu1 %v12752_v52  ;;  %v1400_v33 = vrot.slane %v1398_v34, 3  ;;  %v1383_v52 = vrot.slane %v1381_v46, 3  ;;  %v12799_v34 = vld [vmem:[%s16948_s1 + $0x430] sm:$0xff]   ;;  %v12802_v46 = vld [vmem:[%s16948_s1 + $0x4f8] sm:$0xff]  }
  0x80   : > { %2049 = vmatmul.mubr.bf16.gmra.mrb[32].mxu0 %v1528_v1  ;;  %v1435_v1 = vshll.u32 %v9736_v50, 16  ;;  %v1434_v4 = vrot.slane %v1432_v0, 3  ;;  %v1417_v32 = vrot.slane %v1415_v15, 3  ;;  %v1420_v11 = vrot.slane %v1418_v25, 4  ;;  %v12794_v50 = vld [vmem:[%s16948_s1 + $0x4e8] sm:$0xff]   ;;  %v2228_v0 = vld [vmem:[%s13469_s12 + $0x20] sm:$0xff] }
  0x81   : > { %11597 = vmatpush3.bf16.msra.mxu0 %v12754_v29  ;;  %2106 = vmatmul.mubr.bf16.gmra.mrb[32].mxu1 %v1546_v38  ;;  %v1386_v38 = vrot.slane %v1384_v62, 4  ;;  %v1404_v17 = vor.u32 %v1403_v36, %v1400_v33  ;;  %v12803_v62 = vld [vmem:[%s16948_s1 + $0x438] sm:$0xff]   ;;  %v2236_v15 = vld [vmem:[%s13469_s12 + $0x60] sm:$0xff] }
  0x82   : > { %11631 = vmatpush3.bf16.msra.mxu1 %v12755_v58  ;;  %11598 = vmatprep.subr.bf16.mxu0 %v12757_v18  ;;  %v1437_v29 = vrot.slane %v1435_v1, 4  ;;  %v12771_v58 = vld [vmem:[%s16948_s1 + $0x400] sm:$0xff]   ;;  %v1421_v21 = vor.u32 %v1420_v11, %v1417_v32  ;;  %v14235_v32 = vld [vmem:[%s13469_s12 + $0x88] sm:$0xff] }
  0x83   : > { %11632 = vmatprep.subr.bf16.mxu1 %v12758_v60  ;;  %v1387_v18 = vor.u32 %v1386_v38, %v1383_v52  ;;  %v1500_v60 = vor.u32 %v1499_v14, %v14044_v61  ;;  %v2232_v1 = vld [vmem:[%s13469_s12 + $0x40] sm:$0xff]  ;;  %v2229_v38 = vld [vmem:[%s13469_s12 + $0x28] sm:$0xff] }
  0x84   : > { %v14226_v25 = vld [vmem:[%s13469_s12 + $0x80] sm:$0xff]  ;;  %v9953_v33 = vcombine.low %v2228_v0, %v2232_v1  ;;  %v9954_v36 = vcombine.high %v2228_v0, %v2232_v1 }
  0x85   : > { %11599 = vmatpush3.bf16.msra.mxu0 %v12759_v55  ;;  %v1438_v55 = vor.u32 %v1437_v29, %v1434_v4  ;;  %v1396_v13 = vsel %vm1311_vm0, %v1387_v18, %v13957_v51  ;;  %v12776_v51 = vld [vmem:[%s16948_s1 + $0x488] sm:$0xff]   ;;  %v1501_v14 = vsel %vm1311_vm0, %v1412_v26, %v1500_v60  ;;  %v14229_v52 = vcombine.high %v2236_v15, %v14226_v25  ;;  %v2248_v0 = vld [vmem:[%s13469_s12 + $0xc0] sm:$0xff] }
  0x86   : > { %11633 = vmatpush3.bf16.msra.mxu1 %v12760_v56  ;;  %11600 = vmatprep.subr.bf16.mxu0 %v12761_v59  ;;  %v1518_v56 = vor.u32 %v1517_v57, %v1514_v12  ;;  %v1413_v59 = vsel %vm1311_vm0, %v1404_v17, %v1412_v26  ;;  %v12779_v12 = vld [vmem:[%s16948_s1 + $0x410] sm:$0xff]   ;;  %v12783_v26 = vld [vmem:[%s16948_s1 + $0x418] sm:$0xff]   ;;  %v2233_v4 = vld [vmem:[%s13469_s12 + $0x48] sm:$0xff]  ;;  %v14238_v17 = vcombine.low %v2236_v15, %v14226_v25  ;;  %v2515_v18 = vshrl.u32 %v9954_v36, 16 }
  0x87   : > { %11634 = vmatprep.subr.bf16.mxu1 %v12762_v63  ;;  %v12774_v63 = vld [vmem:[%s16948_s1 + $0x4c8] sm:$0xff]   ;;  %2146 = vmatprep.mubr.bf16.mxu0 %v1413_v59  ;;  %v1447_v61 = vsel %vm1311_vm0, %v1438_v55, %v1446_v41  ;;  %v9955_v11 = vcombine.low %v2229_v38, %v2233_v4  ;;  %v12805_v55 = vld [vmem:[%s16948_s1 + $0x540] sm:$0xff]   ;;  %v2505_v40 = vshll.u32 %v9953_v33, 16 }
  0x88   : > { %2203 = vmatprep.mubr.bf16.mxu1 %v1447_v61  ;;  %v2237_v29 = vld [vmem:[%s13469_s12 + $0x68] sm:$0xff]  ;;  %v12806_v61 = vld [vmem:[%s16948_s1 + $0x5c0] sm:$0xff]  }
  0x89   : > { %11601 = vmatpush3.bf16.msra.mxu0 %v12763_v23  ;;  %v1430_v23 = vsel %vm1311_vm0, %v1421_v21, %v14013_v28  ;;  %v12777_v28 = vld [vmem:[%s16948_s1 + $0x450] sm:$0xff]   ;;  %v14242_v45 = vcombine.high %v2237_v29, %v14235_v32 }
  0x8a   : > { %11635 = vmatpush3.bf16.msra.mxu1 %v12764_v3  ;;  %11602 = vmatprep.subr.bf16.mxu0 %v12765_v27  ;;  %v1571_v3 = vrot.slane %v1569_v31, 4  ;;  %v1519_v27 = vsel %vm1311_vm0, %v1446_v41, %v1518_v56  ;;  %v12795_v41 = vld [vmem:[%s16948_s1 + $0x428] sm:$0xff]   ;;  %v12797_v31 = vld [vmem:[%s16948_s1 + $0x470] sm:$0xff]  }
  0x8b   : > { %11636 = vmatprep.subr.bf16.mxu1 %v12766_v42  ;;  %v12778_v42 = vld [vmem:[%s16948_s1 + $0x4d0] sm:$0xff]  }
  0x8c   : > { %v1572_v57 = vor.u32 %v1571_v3, %v1568_v7  ;;  %v2510_v7 = vshll.u32 %v14238_v17, 16  ;;  %v14257_v3 = vcombine.low %v2237_v29, %v14235_v32 }
  0x8d   : > { %11603 = vmatpush3.bf16.msra.mxu0 %v12767_v5  ;;  %v12780_v5 = vld [vmem:[%s16948_s1 + $0x490] sm:$0xff]  }
  0x8e   : > { %11637 = vmatpush3.bf16.msra.mxu1 %v12768_v20  ;;  %11656 = vmatprep.subr.bf16.mxu0 %v12769_v8  ;;  %v1590_v20 = vor.u32 %v1589_v53, %v1586_v2  ;;  %v1573_v48 = vsel %vm1311_vm0, %v1500_v60, %v1572_v57  ;;  %v12796_v8 = vld [vmem:[%s16948_s1 + $0x4a8] sm:$0xff]   ;;  %v2522_v60 = vshll.u32 %v14229_v52, 16 }
  0x8f   : > { %11690 = vmatprep.subr.bf16.mxu1 %v12770_v35  ;;  %v12804_v35 = vld [vmem:[%s16948_s1 + $0x4b8] sm:$0xff]  }
  0x90   : > { %2147 = vmatmul.mubr.bf16.vlgmr.msra.gmra.mrb[36].mxu0 %v1396_v13  ;;  %v1591_v49 = vsel %vm1311_vm0, %v1518_v56, %v1590_v20  ;;  %v2503_v56 = vshrl.u32 %v9953_v33, 16  ;;  %v14249_v13 = vrot.slane %v2522_v60, 1  ;;  %v12808_v20 = vld [vmem:[%s16948_s1 + $0x580] sm:$0xff]   ;;  %v14324_v33 = vrot.slane %v2522_v60, 4 }
  0x91   : > { %2204 = vmatmul.mubr.bf16.vlgmr.msra.gmra.mrb[36].mxu1 %v1430_v23  ;;  %11657 = vmatpush3.bf16.msra.mxu0 %v12771_v58  ;;  %v9956_v58 = vcombine.high %v2229_v38, %v2233_v4  ;;  %v14330_v38 = vld [vmem:[%s13469_s12 + $0xa8] sm:$0xff]  ;;  %v14351_v60 = vrot.slane %v2510_v7, 4 }
  0x92   : > { %11691 = vmatpush3.bf16.msra.mxu1 %v12772_v54  ;;  %11658 = vmatprep.subr.bf16.mxu0 %v12773_v9  ;;  %v2517_v54 = vshll.u32 %v9954_v36, 16  ;;  %v2249_v4 = vld [vmem:[%s13469_s12 + $0xc8] sm:$0xff] }
  0x93   : > { %11692 = vmatprep.subr.bf16.mxu1 %v12774_v63  ;;  %2154 = vmatprep.mubr.bf16.mxu0 %v1501_v14  ;;  %v2539_v21 = vshrl.u32 %v9956_v58, 16  ;;  %v2541_v9 = vshll.u32 %v9956_v58, 16  ;;  %v2546_v63 = vshll.u32 %v14242_v45, 16 }
  0x94   : > { %2211 = vmatprep.mubr.bf16.mxu1 %v1519_v27  ;;  %v2519_v59 = vrot.slane %v2517_v54, 1  ;;  %v2529_v27 = vshll.u32 %v9955_v11, 16  ;;  %v14347_v54 = vcombine.low %v14330_v38, %v2249_v4 }
  0x95   : > { %11659 = vmatpush3.bf16.msra.mxu0 %v12775_v47  ;;  %v2543_v23 = vrot.slane %v2541_v9, 1  ;;  %v2507_v47 = vrot.slane %v2505_v40, 1  ;;  %v14259_v2 = vrot.slane %v2546_v63, 1  ;;  %v14338_v58 = vrot.slane %v2546_v63, 4  ;;  %v12821_v40 = vld [vmem:[%s16948_s1 + $0x560] sm:$0xff]  }
  0x96   : > { %11693 = vmatpush3.bf16.msra.mxu1 %v12776_v51  ;;  %11660 = vmatprep.subr.bf16.mxu0 %v12777_v28  ;;  %v2527_v51 = vshrl.u32 %v9955_v11, 16  ;;  %v2520_v14 = vor.u32 %v2519_v59, %v2515_v18  ;;  %v2512_v28 = vrot.slane %v2510_v7, 1  ;;  %v12819_v18 = vld [vmem:[%s16948_s1 + $0x518] sm:$0xff]  }
  0x97   : > { %11694 = vmatprep.subr.bf16.mxu1 %v12778_v42  ;;  %v2544_v53 = vor.u32 %v2543_v23, %v2539_v21  ;;  %v2508_v42 = vor.u32 %v2507_v47, %v2503_v56  ;;  %v12820_v21 = vld [vmem:[%s16948_s1 + $0x598] sm:$0xff]  }
  0x98   : > { %2155 = vmatmul.mubr.bf16.gmra.mrb[40].mxu0 %v13974_v6  ;;  %v12788_v6 = vld [vmem:[%s16948_s1 + $0x4e0] sm:$0xff]   ;;  %v2525_v57 = vsel %vm2501_vm1, %v2520_v14, %v14249_v13 }
  0x99   : > { %11661 = vmatpush3.bf16.msra.mxu0 %v12779_v12  ;;  %2212 = vmatmul.mubr.bf16.gmra.mrb[40].mxu1 %v14030_v44  ;;  %v12791_v44 = vld [vmem:[%s16948_s1 + $0x4a0] sm:$0xff]   ;;  %v2534_v12 = vshll.u32 %v14257_v3, 16 }
  0x9a   : > { %11695 = vmatpush3.bf16.msra.mxu1 %v12780_v5  ;;  %11662 = vmatprep.subr.bf16.mxu0 %v12781_v19  ;;  %v12807_v5 = vld [vmem:[%s16948_s1 + $0x500] sm:$0xff]   ;;  %v2531_v19 = vrot.slane %v2529_v27, 1 }
  0x9b   : > { %11696 = vmatprep.subr.bf16.mxu1 %v12782_v24  ;;  %2162 = vmatprep.mubr.bf16.mxu0 %v1573_v48  ;;  %v12809_v24 = vld [vmem:[%s16948_s1 + $0x548] sm:$0xff]   ;;  %v2536_v48 = vrot.slane %v2534_v12, 1  ;;  %v12823_v14 = vld [vmem:[%s16948_s1 + $0x520] sm:$0xff]  }
  0x9c   : > { %2219 = vmatprep.mubr.bf16.mxu1 %v1591_v49  ;;  %v12811_v49 = vld [vmem:[%s16948_s1 + $0x508] sm:$0xff]  }
  0x9d   : > { %11663 = vmatpush3.bf16.msra.mxu0 %v12783_v26  ;;  %v2549_v26 = vsel %vm2501_vm1, %v2544_v53, %v14259_v2 }
  0x9e   : > { %11697 = vmatpush3.bf16.msra.mxu1 %v12784_v10  ;;  %11664 = vmatprep.subr.bf16.mxu0 %v12787_v16  ;;  %v2513_v10 = vsel %vm2501_vm1, %v2508_v42, %v2512_v28  ;;  %v12810_v16 = vld [vmem:[%s16948_s1 + $0x5c8] sm:$0xff]   ;;  %v12824_v42 = vld [vmem:[%s16948_s1 + $0x5a0] sm:$0xff]  }
  0x9f   : > { %11698 = vmatprep.subr.bf16.mxu1 %v12788_v6  ;;  %v2532_v6 = vor.u32 %v2531_v19, %v2527_v51  ;;  %v12822_v51 = vld [vmem:[%s16948_s1 + $0x5e0] sm:$0xff]  }
  0xa0   : > { %2163 = vmatmul.mubr.bf16.gmra.mrb[44].mxu0 %v14066_v37  ;;  %v12798_v37 = vld [vmem:[%s16948_s1 + $0x4f0] sm:$0xff]  }
  0xa1   : > { %11665 = vmatpush3.bf16.msra.mxu0 %v12790_v39  ;;  %2220 = vmatmul.mubr.bf16.gmra.mrb[44].mxu1 %v14104_v43  ;;  %v12800_v43 = vld [vmem:[%s16948_s1 + $0x4b0] sm:$0xff]   ;;  %v2537_v39 = vsel %vm2501_vm1, %v2532_v6, %v2536_v48  ;;  %v2678_v6 = vshrl.u32 %v14347_v54, 16 }
  0xa2   : > { %11699 = vmatpush3.bf16.msra.mxu1 %v12791_v44  ;;  %11666 = vmatprep.subr.bf16.mxu0 %v12793_v30  ;;  %v12812_v44 = vld [vmem:[%s16948_s1 + $0x588] sm:$0xff]   ;;  %v12813_v30 = vld [vmem:[%s16948_s1 + $0x550] sm:$0xff]  }
  0xa3   : > { %11700 = vmatprep.subr.bf16.mxu1 %v12794_v50  ;;  %3166 = vmatprep.mubr.bf16.mxu0 %v2525_v57  ;;  %v12814_v50 = vld [vmem:[%s16948_s1 + $0x5d0] sm:$0xff]   ;;  %v12825_v57 = vld [vmem:[%s16948_s1 + $0x568] sm:$0xff]  }
  0xa4   : > { %3223 = vmatprep.mubr.bf16.mxu1 %v2549_v26  ;;  %v2253_v26 = vld [vmem:[%s13469_s12 + $0xe8] sm:$0x11] }
  0xa5   : > { %11667 = vmatpush3.bf16.msra.mxu0 %v12795_v41  ;;  %v2606_v41 = vshrl.u32 %v14229_v52, 16  ;;  %v14341_v52 = vcombine.high %v14330_v38, %v2249_v4  ;;  %v12834_v4 = vld [vmem:[%s16948_s1 + $0x5f0] sm:$0xff]  }
  0xa6   : > { %11701 = vmatpush3.bf16.msra.mxu1 %v12796_v8  ;;  %11668 = vmatprep.subr.bf16.mxu0 %v12797_v31  ;;  %v2622_v8 = vshrl.u32 %v14242_v45, 16  ;;  %v2598_v31 = vshrl.u32 %v14238_v17, 16 }
  0xa7   : > { %11702 = vmatprep.subr.bf16.mxu1 %v12798_v37  ;;  %v12815_v37 = vld [vmem:[%s16948_s1 + $0x510] sm:$0xff]   ;;  %v14320_v15 = vrot.slane %v2606_v41, 3  ;;  %v2608_v45 = vor.u32 %v2606_v41, %v14249_v13  ;;  %v2626_v59 = vshll.u32 %v14341_v52, 16  ;;  %v2618_v13 = vshll.u32 %v14347_v54, 16 }
  0xa8   : > { %v14336_v11 = vrot.slane %v2622_v8, 3  ;;  %v2600_v9 = vor.u32 %v2598_v31, %v2512_v28  ;;  %v2624_v17 = vor.u32 %v2622_v8, %v14259_v2  ;;  %v2686_v19 = vshrl.u32 %v14341_v52, 16 }
  0xa9   : > { %11669 = vmatpush3.bf16.msra.mxu0 %v12799_v34  ;;  %v2614_v34 = vshrl.u32 %v14257_v3, 16  ;;  %v2628_v23 = vrot.slane %v2626_v59, 1  ;;  %v2620_v47 = vrot.slane %v2618_v13, 1 }
  0xaa   : > { %11703 = vmatpush3.bf16.msra.mxu1 %v12800_v43  ;;  %11670 = vmatprep.subr.bf16.mxu0 %v12801_v22  ;;  %v12816_v43 = vld [vmem:[%s16948_s1 + $0x590] sm:$0xff]   ;;  %v12817_v22 = vld [vmem:[%s16948_s1 + $0x558] sm:$0xff]  }
  0xab   : > { %11704 = vmatprep.subr.bf16.mxu1 %v12802_v46  ;;  %v14309_v46 = vrot.slane %v2598_v31, 3  ;;  %v14318_v1 = vrot.slane %v2614_v34, 3  ;;  %v2616_v63 = vor.u32 %v2614_v34, %v2536_v48  ;;  %v2629_v27 = vsel %vm2501_vm1, %v2624_v17, %v2628_v23 }
  0xac   : > { %v2688_v31 = vor.u32 %v2686_v19, %v2628_v23 }
  0xad   : > { %11671 = vmatpush3.bf16.msra.mxu0 %v12803_v62  ;;  %v12818_v62 = vld [vmem:[%s16948_s1 + $0x5d8] sm:$0xff]   ;;  %v2621_v53 = vsel %vm2501_vm1, %v2616_v63, %v2620_v47 }
  0xae   : > { %11705 = vmatpush3.bf16.msra.mxu1 %v12804_v35  ;;  %11724 = vmatprep.subr.bf16.mxu0 %v12805_v55  ;;  %v14315_v35 = vld [vmem:[%s13469_s12 + $0xa0] sm:$0xff] }
  0xaf   : > { %11758 = vmatprep.subr.bf16.mxu1 %v12806_v61  ;;  %v14327_v36 = vcombine.high %v14315_v35, %v2248_v0  ;;  %v14334_v29 = vcombine.low %v14315_v35, %v2248_v0  ;;  %v12833_v0 = vld [vmem:[%s16948_s1 + $0x570] sm:$0xff]  }
  0xb0   : > { %3167 = vmatmul.mubr.bf16.vlgmr.msra.gmra.mrb[48].mxu0 %v2513_v10 }
  0xb1   : > { %11725 = vmatpush3.bf16.msra.mxu0 %v12807_v5  ;;  %3224 = vmatmul.mubr.bf16.vlgmr.msra.gmra.mrb[48].mxu1 %v2537_v39  ;;  %v2610_v55 = vshll.u32 %v14327_v36, 16  ;;  %v2602_v56 = vshll.u32 %v14334_v29, 16  ;;  %v2670_v5 = vshrl.u32 %v14327_v36, 16  ;;  %v2662_v10 = vshrl.u32 %v14334_v29, 16  ;;  %v12830_v39 = vld [vmem:[%s16948_s1 + $0x5a8] sm:$0xff]   ;;  %v12840_v36 = vld [vmem:[%s16948_s1 + $0x5b8] sm:$0xff]  }
  0xb2   : > { %11726 = vmatprep.subr.bf16.mxu0 %v12809_v24  ;;  %11759 = vmatpush3.bf16.msra.mxu1 %v12808_v20  ;;  %v12826_v20 = vld [vmem:[%s16948_s1 + $0x5e8] sm:$0xff]   ;;  %v2252_v24 = vld [vmem:[%s13469_s12 + $0xe0] sm:$0x11] }
  0xb3   : > { %11760 = vmatprep.subr.bf16.mxu1 %v12810_v16  ;;  %v2612_v7 = vrot.slane %v2610_v55, 1  ;;  %v2604_v61 = vrot.slane %v2602_v56, 1  ;;  %3231 = vmatprep.mubr.bf16.mxu1 %v2629_v27  ;;  %v9978_v48 = vcombine.high %v2252_v24, %v2252_v24  ;;  %v9980_v16 = vcombine.high %v2253_v26, %v2253_v26 }
  0xb4   : > { %v3645_v23 = vrot.slane %v2670_v5, 3  ;;  %v3653_v27 = vrot.slane %v2686_v19, 3  ;;  %v3650_v19 = vrot.slane %v2618_v13, 4 }
  0xb5   : > { %11727 = vmatpush3.bf16.msra.mxu0 %v12811_v49  ;;  %v2613_v2 = vsel %vm2501_vm1, %v2608_v45, %v2612_v7  ;;  %v2605_v28 = vsel %vm2501_vm1, %v2600_v9, %v2604_v61  ;;  %v12829_v49 = vld [vmem:[%s16948_s1 + $0x528] sm:$0xff]   ;;  %v2672_v41 = vor.u32 %v2670_v5, %v2612_v7  ;;  %v2674_v8 = vshll.u32 %v9978_v48, 16  ;;  %v12836_v9 = vld [vmem:[%s16948_s1 + $0x5b0] sm:$0xff]  }
  0xb6   : > { %11728 = vmatprep.subr.bf16.mxu0 %v12813_v30  ;;  %11761 = vmatpush3.bf16.msra.mxu1 %v12812_v44  ;;  %v9977_v44 = vcombine.low %v2252_v24, %v2252_v24  ;;  %v9979_v30 = vcombine.low %v2253_v26, %v2253_v26  ;;  %v2664_v34 = vor.u32 %v2662_v10, %v2604_v61  ;;  %v12837_v61 = vld [vmem:[%s16948_s1 + $0x578] sm:$0xff]   ;;  %v14456_v5 = vld [vmem:[%s13469_s12 + $0x90] sm:$0xff] }
  0xb7   : > { %11762 = vmatprep.subr.bf16.mxu1 %v12814_v50  ;;  %3174 = vmatprep.mubr.bf16.mxu0 %v2613_v2  ;;  %v3578_v50 = vrot.slane %v2534_v12, 4  ;;  %v2676_v3 = vrot.slane %v2674_v8, 1  ;;  %v14435_v2 = vor.u32 %v14324_v33, %v14320_v15  ;;  %v3654_v33 = vrot.slane %v2626_v59, 4  ;;  %v2231_v24 = vld [vmem:[%s13469_s12 + $0x38] sm:$0xff] }
  0xb8   : > { %3175 = vmatmul.mubr.bf16.gmra.mrb[52].mxu0 %v2605_v28  ;;  %v14439_v28 = vor.u32 %v14338_v58, %v14336_v11  ;;  %v3641_v11 = vrot.slane %v2662_v10, 3  ;;  %v2234_v58 = vld [vmem:[%s13469_s12 + $0x50] sm:$0xff]  ;;  %v2235_v26 = vld [vmem:[%s13469_s12 + $0x58] sm:$0xff] }
  0xb9   : > { %11729 = vmatpush3.bf16.msra.mxu0 %v12815_v37  ;;  %3232 = vmatmul.mubr.bf16.gmra.mrb[52].mxu1 %v2621_v53  ;;  %v2690_v37 = vshll.u32 %v9980_v16, 16  ;;  %v14447_v53 = vor.u32 %v14351_v60, %v14309_v46  ;;  %v3642_v46 = vrot.slane %v2602_v56, 4  ;;  %v3649_v60 = vrot.slane %v2678_v6, 3  ;;  %v2239_v10 = vld [vmem:[%s13469_s12 + $0x78] sm:$0xff] }
  0xba   : > { %11730 = vmatprep.subr.bf16.mxu0 %v12817_v22  ;;  %11763 = vmatpush3.bf16.msra.mxu1 %v12816_v43  ;;  %v2666_v43 = vshll.u32 %v9977_v44, 16  ;;  %v2680_v22 = vor.u32 %v2678_v6, %v2620_v47  ;;  %v12838_v47 = vld [vmem:[%s16948_s1 + $0x5f8] sm:$0xff]   ;;  %v9959_v29 = vcombine.low %v2231_v24, %v2235_v26  ;;  %v9960_v56 = vcombine.high %v2231_v24, %v2235_v26  ;;  %v12841_v44 = vld [vmem:[%s16948_s1 + $0x640] sm:$0xff]  }
  0xbb   : > { %11764 = vmatprep.subr.bf16.mxu1 %v12818_v62  ;;  %v2682_v62 = vshll.u32 %v9979_v30, 16  ;;  %v2692_v12 = vrot.slane %v2690_v37, 1  ;;  %v14482_v13 = vor.u32 %v3654_v33, %v3653_v27  ;;  %v14523_v27 = vor.u32 %v3650_v19, %v3649_v60 }
  0xbc   : > { %v2587_v30 = vshrl.u32 %v9960_v56, 16 }
  0xbd   : > { %11731 = vmatpush3.bf16.msra.mxu0 %v12819_v18  ;;  %v2668_v18 = vrot.slane %v2666_v43, 1  ;;  %v2684_v45 = vrot.slane %v2682_v62, 1  ;;  %v2693_v17 = vsel %vm2501_vm1, %v2688_v31, %v2692_v12 }
  0xbe   : > { %11732 = vmatprep.subr.bf16.mxu0 %v12821_v40  ;;  %11765 = vmatpush3.bf16.msra.mxu1 %v12820_v21  ;;  %v12835_v21 = vld [vmem:[%s16948_s1 + $0x530] sm:$0xff]   ;;  %v2677_v40 = vsel %vm2501_vm1, %v2672_v41, %v2676_v3  ;;  %v2575_v3 = vshrl.u32 %v9959_v29, 16 }
  0xbf   : > { %11766 = vmatprep.subr.bf16.mxu1 %v12822_v51  ;;  %3182 = vmatprep.mubr.bf16.mxu0 %v2677_v40  ;;  %v2669_v63 = vsel %vm2501_vm1, %v2664_v34, %v2668_v18  ;;  %v2685_v7 = vsel %vm2501_vm1, %v2680_v22, %v2684_v45  ;;  %v3646_v51 = vrot.slane %v2610_v55, 4  ;;  %v2230_v55 = vld [vmem:[%s13469_s12 + $0x30] sm:$0xff]  ;;  %v12842_v22 = vld [vmem:[%s16948_s1 + $0x6c0] sm:$0xff]  }
  0xc0   : > { %3239 = vmatprep.mubr.bf16.mxu1 %v2693_v17  ;;  %3183 = vmatmul.mubr.bf16.gmra.mrb[56].mxu0 %v2669_v63  ;;  %v9957_v52 = vcombine.low %v2230_v55, %v2234_v58  ;;  %v12843_v63 = vld [vmem:[%s16948_s1 + $0x600] sm:$0xff]  }
  0xc1   : > { %11733 = vmatpush3.bf16.msra.mxu0 %v12823_v14  ;;  %3240 = vmatmul.mubr.bf16.gmra.mrb[56].mxu1 %v2685_v7  ;;  %v12839_v14 = vld [vmem:[%s16948_s1 + $0x538] sm:$0xff]   ;;  %v14449_v15 = vor.u32 %v3646_v51, %v3645_v23  ;;  %v14512_v7 = vsel %vm1311_vm0, %v14439_v28, %v14482_v13  ;;  %v12845_v51 = vld [vmem:[%s16948_s1 + $0x648] sm:$0xff]  }
  0xc2   : > { %11734 = vmatprep.subr.bf16.mxu0 %v12825_v57  ;;  %11767 = vmatpush3.bf16.msra.mxu1 %v12824_v42  ;;  %v2238_v42 = vld [vmem:[%s13469_s12 + $0x70] sm:$0xff]  ;;  %v14459_v57 = vor.u32 %v3578_v50, %v14318_v1  ;;  %v14475_v1 = vld [vmem:[%s13469_s12 + $0x98] sm:$0xff]  ;;  %v2589_v50 = vshll.u32 %v9960_v56, 16  ;;  %v2551_v41 = vshrl.u32 %v9957_v52, 16  ;;  %v2553_v8 = vshll.u32 %v9957_v52, 16 }
  0xc3   : > { %11768 = vmatprep.subr.bf16.mxu1 %v12826_v20  ;;  %v9958_v20 = vcombine.high %v2230_v55, %v2234_v58  ;;  %v14466_v59 = vcombine.high %v2238_v42, %v14456_v5  ;;  %v14472_v48 = vcombine.low %v2238_v42, %v14456_v5  ;;  %v14480_v54 = vsel %vm1311_vm0, %v14435_v2, %v14449_v15  ;;  %v12846_v58 = vld [vmem:[%s16948_s1 + $0x6c8] sm:$0xff]   ;;  %v14548_v52 = vld [vmem:[%s13469_s12 + $0xb0] sm:$0xff] }
  0xc4   : > { %v2591_v62 = vrot.slane %v2589_v50, 1  ;;  %v14545_v19 = vsel %vm1311_vm0, %v14459_v57, %v14523_v27  ;;  %v12848_v50 = vld [vmem:[%s16948_s1 + $0x688] sm:$0xff]  }
  0xc5   : > { %11735 = vmatpush3.bf16.msra.mxu0 %v12829_v49  ;;  %v2563_v16 = vshrl.u32 %v9958_v20, 16  ;;  %v2565_v49 = vshll.u32 %v9958_v20, 16  ;;  %v2570_v6 = vshll.u32 %v14466_v59, 16  ;;  %v2558_v43 = vshll.u32 %v14472_v48, 16  ;;  %v2250_v20 = vld [vmem:[%s13469_s12 + $0xd0] sm:$0xff] }
  0xc6   : > { %11736 = vmatprep.subr.bf16.mxu0 %v12833_v0  ;;  %11769 = vmatpush3.bf16.msra.mxu1 %v12830_v39  ;;  %v14486_v39 = vcombine.high %v2239_v10, %v14475_v1  ;;  %v2555_v0 = vrot.slane %v2553_v8, 1  ;;  %v2638_v24 = vshrl.u32 %v14466_v59, 16  ;;  %v2630_v26 = vshrl.u32 %v14472_v48, 16  ;;  %v2255_v8 = vld [vmem:[%s13469_s12 + $0xf8] sm:$0x11] }
  0xc7   : > { %11770 = vmatprep.subr.bf16.mxu1 %v12834_v4  ;;  %v2567_v31 = vrot.slane %v2565_v49, 1  ;;  %v2572_v37 = vrot.slane %v2570_v6, 1  ;;  %v14499_v4 = vcombine.low %v2239_v10, %v14475_v1  ;;  %v2560_v45 = vrot.slane %v2558_v43, 1 }
  0xc8   : > { %v2594_v34 = vshll.u32 %v14486_v39, 16  ;;  %v2556_v40 = vor.u32 %v2555_v0, %v2551_v41  ;;  %v14562_v49 = vcombine.low %v14548_v52, %v2250_v20  ;;  %v14571_v41 = vrot.slane %v2630_v26, 3 }
  0xc9   : > { %11737 = vmatpush3.bf16.msra.mxu0 %v12835_v21  ;;  %v2568_v12 = vor.u32 %v2567_v31, %v2563_v16  ;;  %v2577_v21 = vshll.u32 %v9959_v29, 16  ;;  %v2582_v17 = vshll.u32 %v14499_v4, 16  ;;  %v14559_v16 = vcombine.high %v14548_v52, %v2250_v20  ;;  %v12854_v20 = vld [vmem:[%s16948_s1 + $0x6d8] sm:$0xff]  }
  0xca   : > { %11771 = vmatpush3.bf16.msra.mxu1 %v12836_v9  ;;  %11738 = vmatprep.subr.bf16.mxu0 %v12837_v61  ;;  %v2596_v18 = vrot.slane %v2594_v34, 1  ;;  %v2592_v9 = vor.u32 %v2591_v62, %v2587_v30  ;;  %v2561_v55 = vsel %vm2501_vm1, %v2556_v40, %v2560_v45  ;;  %v2654_v30 = vshrl.u32 %v14486_v39, 16  ;;  %v14717_v39 = vld [vmem:[%s13469_s12 + $0x40] sm:$0xff] }
  0xcb   : > { %11772 = vmatprep.subr.bf16.mxu1 %v12838_v47  ;;  %v2573_v61 = vsel %vm2501_vm1, %v2568_v12, %v2572_v37  ;;  %v2579_v23 = vrot.slane %v2577_v21, 1  ;;  %v12844_v47 = vld [vmem:[%s16948_s1 + $0x680] sm:$0xff]   ;;  %v2584_v33 = vrot.slane %v2582_v17, 1  ;;  %v2640_v31 = vor.u32 %v2638_v24, %v2572_v37  ;;  %v2251_v12 = vld [vmem:[%s13469_s12 + $0xd8] sm:$0xff]  ;;  %v12850_v21 = vld [vmem:[%s16948_s1 + $0x6d0] sm:$0xff]  }
  0xcc   : > { %3280 = vmatprep.mubr.bf16.mxu0 %v2573_v61  ;;  %v2632_v62 = vor.u32 %v2630_v26, %v2560_v45  ;;  %v16956_v0 = vshll.u32 %v14562_v49, 16  ;;  %v2646_v37 = vshrl.u32 %v14499_v4, 16  ;;  %v2656_v61 = vor.u32 %v2654_v30, %v2596_v18  ;;  %v12884_v4 = vld [vmem:[%s16948_s1 + $0x788] sm:$0xff]  }
  0xcd   : > { %11739 = vmatpush3.bf16.msra.mxu0 %v12839_v14  ;;  %v14521_v14 = vor.u32 %v3642_v46, %v3641_v11  ;;  %v12847_v11 = vld [vmem:[%s16948_s1 + $0x608] sm:$0xff]   ;;  %v2580_v46 = vor.u32 %v2579_v23, %v2575_v3  ;;  %v14580_v3 = vld [vmem:[%s13469_s12 + $0xb8] sm:$0xff]  ;;  %v12851_v23 = vld [vmem:[%s16948_s1 + $0x610] sm:$0xff]   ;;  %v9984_v10 = vcombine.high %v2255_v8, %v2255_v8 }
  0xce   : > { %11773 = vmatpush3.bf16.msra.mxu1 %v12840_v36  ;;  %11792 = vmatprep.subr.bf16.mxu0 %v12841_v44  ;;  %v2597_v36 = vsel %vm2501_vm1, %v2592_v9, %v2596_v18  ;;  %v12849_v44 = vld [vmem:[%s16948_s1 + $0x650] sm:$0xff]   ;;  %v14587_v9 = vcombine.high %v14580_v3, %v2251_v12  ;;  %v14590_v40 = vcombine.low %v14580_v3, %v2251_v12 }
  0xcf   : > { %11826 = vmatprep.subr.bf16.mxu1 %v12842_v22  ;;  %3337 = vmatprep.mubr.bf16.mxu1 %v2597_v36  ;;  %v14540_v60 = vsel %vm1311_vm0, %v14447_v53, %v14521_v14  ;;  %v2585_v56 = vsel %vm2501_vm1, %v2580_v46, %v2584_v33  ;;  %v2642_v22 = vshll.u32 %v14559_v16, 16  ;;  %v2648_v36 = vor.u32 %v2646_v37, %v2584_v33  ;;  %v2254_v12 = vld [vmem:[%s13469_s12 + $0xf0] sm:$0x11] }
  0xd0   : > { %3281 = vmatmul.mubr.bf16.vlgmr.msra.gmra.mrb[60].mxu0 %v2561_v55  ;;  %v16952_v55 = vshll.u32 %v14590_v40, 16 }
  0xd1   : > { %11793 = vmatpush3.bf16.msra.mxu0 %v12843_v63  ;;  %3338 = vmatmul.mubr.bf16.vlgmr.msra.gmra.mrb[60].mxu1 %v2585_v56  ;;  %v2644_v45 = vrot.slane %v2642_v22, 1  ;;  %v2636_v63 = vrot.slane %v16956_v0, 1  ;;  %v12855_v56 = vld [vmem:[%s16948_s1 + $0x618] sm:$0xff]  }
  0xd2   : > { %11794 = vmatprep.subr.bf16.mxu0 %v12845_v51  ;;  %11827 = vmatpush3.bf16.msra.mxu1 %v12844_v47  ;;  %v12852_v47 = vld [vmem:[%s16948_s1 + $0x690] sm:$0xff]   ;;  %v16954_v51 = vshll.u32 %v14587_v9, 16  ;;  %v2652_v26 = vrot.slane %v16952_v55, 1 }
  0xd3   : > { %11828 = vmatprep.subr.bf16.mxu1 %v12846_v58  ;;  %v14607_v58 = vrot.slane %v2646_v37, 3  ;;  %v2645_v18 = vsel %vm2501_vm1, %v2640_v31, %v2644_v45  ;;  %v2637_v46 = vsel %vm2501_vm1, %v2632_v62, %v2636_v63  ;;  %v12856_v62 = vld [vmem:[%s16948_s1 + $0x698] sm:$0xff]   ;;  %v9982_v37 = vcombine.high %v2254_v12, %v2254_v12 }
  0xd4   : > { %3288 = vmatprep.mubr.bf16.mxu0 %v2645_v18  ;;  %v2660_v33 = vrot.slane %v16954_v51, 1  ;;  %v2653_v31 = vsel %vm2501_vm1, %v2648_v36, %v2652_v26  ;;  %v9981_v18 = vcombine.low %v2254_v12, %v2254_v12  ;;  %v12860_v36 = vld [vmem:[%s16948_s1 + $0x6e0] sm:$0xff]  }
  0xd5   : > { %11795 = vmatpush3.bf16.msra.mxu0 %v12847_v11  ;;  %v12853_v11 = vld [vmem:[%s16948_s1 + $0x658] sm:$0xff]  }
  0xd6   : > { %11796 = vmatprep.subr.bf16.mxu0 %v12849_v44  ;;  %11829 = vmatpush3.bf16.msra.mxu1 %v12848_v50  ;;  %v2702_v44 = vshrl.u32 %v14559_v16, 16  ;;  %v2661_v50 = vsel %vm2501_vm1, %v2656_v61, %v2660_v33  ;;  %v16955_v61 = vshrl.u32 %v14587_v9, 16  ;;  %v2698_v29 = vshll.u32 %v9981_v18, 16  ;;  %v12888_v16 = vld [vmem:[%s16948_s1 + $0x790] sm:$0xff]  }
  0xd7   : > { %11830 = vmatprep.subr.bf16.mxu1 %v12850_v21  ;;  %v2694_v21 = vshrl.u32 %v14562_v49, 16  ;;  %3345 = vmatprep.mubr.bf16.mxu1 %v2661_v50  ;;  %v2706_v50 = vshll.u32 %v9982_v37, 16  ;;  %v2722_v37 = vshll.u32 %v9984_v10, 16  ;;  %v12866_v10 = vld [vmem:[%s16948_s1 + $0x6e8] sm:$0xff]  }
  0xd8   : > { %3289 = vmatmul.mubr.bf16.gmra.mrb[64].mxu0 %v2637_v46  ;;  %v12859_v46 = vld [vmem:[%s16948_s1 + $0x660] sm:$0xff]   ;;  %v2700_v55 = vrot.slane %v2698_v29, 1 }
  0xd9   : > { %11797 = vmatpush3.bf16.msra.mxu0 %v12851_v23  ;;  %3346 = vmatmul.mubr.bf16.gmra.mrb[64].mxu1 %v2653_v31  ;;  %v2704_v23 = vor.u32 %v2702_v44, %v2644_v45  ;;  %v2696_v12 = vor.u32 %v2694_v21, %v2636_v63  ;;  %v9983_v45 = vcombine.low %v2255_v8, %v2255_v8  ;;  %v3613_v31 = vrot.slane %v2638_v24, 3  ;;  %v12863_v63 = vld [vmem:[%s16948_s1 + $0x6a0] sm:$0xff]   ;;  %v12865_v24 = vld [vmem:[%s16948_s1 + $0x668] sm:$0xff]  }
  0xda   : > { %11831 = vmatpush3.bf16.msra.mxu1 %v12852_v47  ;;  %11798 = vmatprep.subr.bf16.mxu0 %v12853_v11  ;;  %v16953_v47 = vshrl.u32 %v14590_v40, 16  ;;  %v12862_v11 = vld [vmem:[%s16948_s1 + $0x620] sm:$0xff]   ;;  %v2708_v42 = vrot.slane %v2706_v50, 1  ;;  %v2724_v18 = vrot.slane %v2722_v37, 1  ;;  %v12871_v37 = vld [vmem:[%s16948_s1 + $0x630] sm:$0xff]  }
  0xdb   : > { %11832 = vmatprep.subr.bf16.mxu1 %v12854_v20  ;;  %v2720_v20 = vor.u32 %v16955_v61, %v2660_v33  ;;  %v2714_v8 = vshll.u32 %v9983_v45, 16 }
  0xdc   : > { %v2709_v29 = vsel %vm2501_vm1, %v2704_v23, %v2708_v42  ;;  %v12868_v42 = vld [vmem:[%s16948_s1 + $0x6a8] sm:$0xff]  }
  0xdd   : > { %11799 = vmatpush3.bf16.msra.mxu0 %v12855_v56  ;;  %v2712_v56 = vor.u32 %v16953_v47, %v2652_v26  ;;  %3296 = vmatprep.mubr.bf16.mxu0 %v2709_v29  ;;  %v2716_v33 = vrot.slane %v2714_v8, 1  ;;  %v12867_v26 = vld [vmem:[%s16948_s1 + $0x628] sm:$0xff]  }
  0xde   : > { %11833 = vmatpush3.bf16.msra.mxu1 %v12856_v62  ;;  %11800 = vmatprep.subr.bf16.mxu0 %v12859_v46  ;;  %v2701_v62 = vsel %vm2501_vm1, %v2696_v12, %v2700_v55  ;;  %v2725_v46 = vsel %vm2501_vm1, %v2720_v20, %v2724_v18  ;;  %v3614_v55 = vrot.slane %v2570_v6, 4  ;;  %v12869_v12 = vld [vmem:[%s16948_s1 + $0x670] sm:$0xff]  }
  0xdf   : > { %11834 = vmatprep.subr.bf16.mxu1 %v12860_v36  ;;  %3353 = vmatprep.mubr.bf16.mxu1 %v2725_v46  ;;  %v2717_v50 = vsel %vm2501_vm1, %v2712_v56, %v2716_v33  ;;  %v12870_v6 = vld [vmem:[%s16948_s1 + $0x6f0] sm:$0xff]   ;;  %v12875_v33 = vld [vmem:[%s16948_s1 + $0x638] sm:$0xff]  }
  0xe0   : > { %3297 = vmatmul.mubr.bf16.gmra.mrb[68].mxu0 %v2701_v62  ;;  %v14689_v20 = vor.u32 %v3614_v55, %v3613_v31  ;;  %v12873_v31 = vld [vmem:[%s16948_s1 + $0x678] sm:$0xff]  }
  0xe1   : > { %11801 = vmatpush3.bf16.msra.mxu0 %v12862_v11  ;;  %v3637_v11 = vrot.slane %v2654_v30, 3  ;;  %3354 = vmatmul.mubr.bf16.gmra.mrb[68].mxu1 %v2717_v50  ;;  %v12872_v30 = vld [vmem:[%s16948_s1 + $0x6b0] sm:$0xff]   ;;  %v12874_v62 = vld [vmem:[%s16948_s1 + $0x6f8] sm:$0xff]  }
  0xe2   : > { %11835 = vmatpush3.bf16.msra.mxu1 %v12863_v63  ;;  %11802 = vmatprep.subr.bf16.mxu0 %v12865_v24  ;;  %v12876_v46 = vld [vmem:[%s16948_s1 + $0x6b8] sm:$0xff]  }
  0xe3   : > { %11836 = vmatprep.subr.bf16.mxu1 %v12866_v10  ;;  %v3638_v10 = vrot.slane %v2594_v34, 4 }
  0xe5   : > { %11803 = vmatpush3.bf16.msra.mxu0 %v12867_v26  ;;  %v14714_v50 = vor.u32 %v3638_v10, %v3637_v11  ;;  %v12877_v11 = vld [vmem:[%s16948_s1 + $0x740] sm:$0xff]  }
  0xe6   : > { %11837 = vmatpush3.bf16.msra.mxu1 %v12868_v42  ;;  %11804 = vmatprep.subr.bf16.mxu0 %v12869_v12  ;;  %v3368_v42 = vld [vmem:[%s13469_s12 + $0x20] sm:$0x88] }
  0xe7   : > { %11838 = vmatprep.subr.bf16.mxu1 %v12870_v6  ;;  %v10177_v34 = vcombine.low %v3368_v42, %v14717_v39  ;;  %v10178_v12 = vcombine.high %v3368_v42, %v14717_v39  ;;  %v3369_v6 = vld [vmem:[%s13469_s12 + $0x28] sm:$0x88] }
  0xe9   : > { %11805 = vmatpush3.bf16.msra.mxu0 %v12871_v37  ;;  %v14723_v37 = vld [vmem:[%s13469_s12 + $0x48] sm:$0xff]  ;;  %v3549_v10 = vshll.u32 %v10177_v34, 16 }
  0xea   : > { %11839 = vmatpush3.bf16.msra.mxu1 %v12872_v30  ;;  %11806 = vmatprep.subr.bf16.mxu0 %v12873_v31  ;;  %v10180_v30 = vcombine.high %v3369_v6, %v14723_v37  ;;  %v3558_v31 = vshrl.u32 %v10178_v12, 16 }
  0xeb   : > { %11840 = vmatprep.subr.bf16.mxu1 %v12874_v62  ;;  %v3546_v62 = vshrl.u32 %v10177_v34, 16  ;;  %v3551_v47 = vrot.slane %v3549_v10, 4  ;;  %v12879_v34 = vld [vmem:[%s16948_s1 + $0x700] sm:$0xff]  }
  0xec   : > { %v3582_v42 = vshrl.u32 %v10180_v30, 16 }
  0xed   : > { %11807 = vmatpush3.bf16.msra.mxu0 %v12875_v33  ;;  %v3548_v23 = vrot.slane %v3546_v62, 3  ;;  %v3602_v62 = vrot.slane %v2558_v43, 4 }
  0xee   : > { %11841 = vmatpush3.bf16.msra.mxu1 %v12876_v46  ;;  %11860 = vmatprep.subr.bf16.mxu0 %v12877_v11  ;;  %v3584_v33 = vrot.slane %v3582_v42, 3 }
  0xef   : > { %v3552_v46 = vor.u32 %v3551_v47, %v3548_v23 }
  0xf1   : > { %v3556_v23 = vsel %vm1311_vm0, %v3552_v46, %v14447_v53  ;;  %v14765_v53 = vor.u32 %v3602_v62, %v14571_v41  ;;  %v3662_v41 = vrot.slane %v2642_v22, 4  ;;  %v12893_v46 = vld [vmem:[%s16948_s1 + $0x760] sm:$0xff]  }
  0xf2   : > { %v12896_v62 = vld [vmem:[%s16948_s1 + $0x7a0] sm:$0xff]  }
 0x103   : > { %v11400_v45 = vpop.f32.mrb[0].mxu0 }
 0x104   : > { %v11401_v63 = vpop.f32.mrb[1].mxu0  ;;  %v11434_v26 = vpop.f32.mrb[0].mxu1 }
 0x105   : > { %v11402_v56 = vadd.f32 %v11401_v63, %v11400_v45  ;;  %v11403_v8 = vpop.f32.mrb[2].mxu0  ;;  %v11435_v55 = vpop.f32.mrb[1].mxu1  ;;  %v10179_v63 = vcombine.low %v3369_v6, %v14723_v37  ;;  %v3560_v6 = vrot.slane %v3558_v31, 3 }
 0x106   : > { %v11404_v29 = vpop.f32.mrb[3].mxu0  ;;  %v11436_v45 = vadd.f32 %v11435_v55, %v11434_v26  ;;  %v12878_v26 = vld [vmem:[%s16948_s1 + $0x7c0] sm:$0xff]   ;;  %v3585_v55 = vshll.u32 %v10180_v30, 16 }
 0x107   : > { %v11405_v18 = vadd.f32 %v11404_v29, %v11403_v8  ;;  %v11437_v8 = vpop.f32.mrb[2].mxu1  ;;  %v3561_v29 = vshll.u32 %v10178_v12, 16  ;;  %v3570_v24 = vshrl.u32 %v10179_v63, 16  ;;  %v3573_v36 = vshll.u32 %v10179_v63, 16  ;;  %11894 = vmatprep.subr.bf16.mxu1 %v12878_v26  ;;  %v12880_v63 = vld [vmem:[%s16948_s1 + $0x780] sm:$0xff]   ;;  %v12890_v26 = vld [vmem:[%s16948_s1 + $0x7d8] sm:$0xff]  }
 0x108   : > { %v3587_v51 = vrot.slane %v3585_v55, 4  ;;  %v14739_v30 = vadd.f32 %v11436_v45, %v11402_v56  ;;  %v11438_v11 = vpop.f32.mrb[3].mxu1  ;;  %v12889_v45 = vld [vmem:[%s16948_s1 + $0x758] sm:$0xff]  }
 0x109   : > { %v3563_v59 = vrot.slane %v3561_v29, 4  ;;  %v3572_v12 = vrot.slane %v3570_v24, 3  ;;  %v3575_v61 = vrot.slane %v3573_v36, 4  ;;  %v12881_v24 = vld [vmem:[%s16948_s1 + $0x748] sm:$0xff]   ;;  %v11439_v36 = vadd.f32 %v11438_v11, %v11437_v8  ;;  %v12891_v55 = vld [vmem:[%s16948_s1 + $0x718] sm:$0xff]  }
 0x10a   : > { %v3588_v31 = vor.u32 %v3587_v51, %v3584_v33  ;;  %v3626_v51 = vrot.slane %v2582_v17, 4  ;;  %v12885_v17 = vld [vmem:[%s16948_s1 + $0x750] sm:$0xff]   ;;  %v12892_v33 = vld [vmem:[%s16948_s1 + $0x798] sm:$0xff]  }
 0x10b   : > { %v3564_v0 = vor.u32 %v3563_v59, %v3560_v6  ;;  %v3576_v29 = vor.u32 %v3575_v61, %v3572_v12  ;;  %v12882_v59 = vld [vmem:[%s16948_s1 + $0x7c8] sm:$0xff]   ;;  %v14762_v43 = vadd.f32 %v11439_v36, %v11405_v18 }
 0x10c   : > { %v3592_v61 = vsel %vm1311_vm0, %v3588_v31, %v14439_v28  ;;  %v14771_v28 = vor.u32 %v3626_v51, %v14607_v58  ;;  %v11406_v58 = vpop.f32.mrb[4].mxu0  ;;  %v11440_v56 = vpop.f32.mrb[4].mxu1  ;;  %v12894_v31 = vld [vmem:[%s16948_s1 + $0x7e0] sm:$0xff]  }
 0x10d   : > { %v3568_v47 = vsel %vm1311_vm0, %v3564_v0, %v14435_v2  ;;  %v3580_v48 = vsel %vm1311_vm0, %v3576_v29, %v14459_v57  ;;  %v12883_v2 = vld [vmem:[%s16948_s1 + $0x708] sm:$0xff]   ;;  %4242 = vmatprep.mubr.bf16.mxu1 %v3592_v61  ;;  %v3661_v57 = vrot.slane %v2702_v44, 3  ;;  %v12886_v0 = vld [vmem:[%s16948_s1 + $0x7d0] sm:$0xff]   ;;  %v11407_v22 = vpop.f32.mrb[5].mxu0  ;;  %v11441_v10 = vpop.f32.mrb[5].mxu1  ;;  %v3657_v29 = vrot.slane %v2694_v21, 3 }
 0x10e   : > { %4185 = vmatprep.mubr.bf16.mxu0 %v3568_v47  ;;  %4243 = vmatmul.mubr.bf16.vlgmr.msra.gmra.mrb[72].mxu1 %v3580_v48  ;;  %v12887_v44 = vld [vmem:[%s16948_s1 + $0x710] sm:$0xff]   ;;  %v11408_v8 = vadd.f32 %v11407_v22, %v11406_v58  ;;  %v11409_v42 = vpop.f32.mrb[6].mxu0  ;;  %v11443_v6 = vpop.f32.mrb[6].mxu1  ;;  %v12897_v21 = vld [vmem:[%s16948_s1 + $0x768] sm:$0xff]   ;;  %v14841_v61 = vld [vmem:[%s13469_s12 + $0xe0] sm:$0xff]  ;;  %v16985_v48 = vshrl.u32 %v14587_v9, 16 }
 0x10f   : > { %4186 = vmatmul.mubr.bf16.vlgmr.msra.gmra.mrb[72].mxu0 %v3556_v23  ;;  %11895 = vmatpush3.bf16.msra.mxu1 %v12880_v63  ;;  %v14787_v18 = vor.u32 %v3662_v41, %v3661_v57  ;;  %v11444_v11 = vpop.f32.mrb[7].mxu1  ;;  %v14850_v41 = vld [vmem:[%s13469_s12 + $0xe8] sm:$0xff] }
 0x110   : > { %11861 = vmatpush3.bf16.msra.mxu0 %v12879_v34  ;;  %11896 = vmatprep.subr.bf16.mxu1 %v12882_v59  ;;  %v11410_v34 = vpop.f32.mrb[7].mxu0 }
 0x111   : > { %11862 = vmatprep.subr.bf16.mxu0 %v12881_v24  ;;  %4193 = vmatprep.mubr.bf16.mxu0 %v14480_v54  ;;  %v14799_v54 = vsel %vm1311_vm0, %v14689_v20, %v14787_v18  ;;  %v11411_v63 = vadd.f32 %v11410_v34, %v11409_v42  ;;  %v16984_v24 = vshll.u32 %v14562_v49, 16  ;;  %v12898_v49 = vld [vmem:[%s16948_s1 + $0x7e8] sm:$0xff]  }
 0x112   : > { %4250 = vmatprep.mubr.bf16.mxu1 %v14512_v7  ;;  %v11442_v7 = vadd.f32 %v11441_v10, %v11440_v56  ;;  %v10188_v56 = vcombine.high %v14850_v41, %v14850_v41 }
 0x113   : > { %11897 = vmatpush3.bf16.msra.mxu1 %v12884_v4  ;;  %v3658_v36 = vrot.slane %v16984_v24, 4  ;;  %v11412_v23 = vpop.f32.mrb[8].mxu0  ;;  %v16986_v4 = vshll.u32 %v14587_v9, 16  ;;  %v12901_v9 = vld [vmem:[%s16948_s1 + $0x728] sm:$0xff]  }
 0x114   : > { %11863 = vmatpush3.bf16.msra.mxu0 %v12883_v2  ;;  %11898 = vmatprep.subr.bf16.mxu1 %v12886_v0  ;;  %v14811_v12 = vadd.f32 %v11442_v7, %v11408_v8  ;;  %v11446_v51 = vpop.f32.mrb[8].mxu1  ;;  %v3669_v2 = vrot.slane %v16985_v48, 3  ;;  %v10185_v0 = vcombine.low %v14841_v61, %v14841_v61  ;;  %v12902_v7 = vld [vmem:[%s16948_s1 + $0x7a8] sm:$0xff]   ;;  %v3704_v34 = vshll.u32 %v10188_v56, 16 }
 0x115   : > { %11864 = vmatprep.subr.bf16.mxu0 %v12885_v17  ;;  %v14835_v59 = vor.u32 %v3658_v36, %v3657_v29  ;;  %v3670_v57 = vrot.slane %v16986_v4, 4  ;;  %v10186_v17 = vcombine.high %v14841_v61, %v14841_v61  ;;  %v11447_v8 = vpop.f32.mrb[9].mxu1 }
 0x116   : > { %4251 = vmatmul.mubr.bf16.gmra.mrb[76].mxu1 %v14545_v19  ;;  %v12895_v19 = vld [vmem:[%s16948_s1 + $0x720] sm:$0xff]   ;;  %v3674_v42 = vshrl.u32 %v10185_v0, 16  ;;  %v3706_v24 = vrot.slane %v3704_v34, 4  ;;  %v3370_v34 = vld [vmem:[%s13469_s12 + $0x30] sm:$0x88] }
 0x117   : > { %4194 = vmatmul.mubr.bf16.gmra.mrb[76].mxu0 %v14540_v60  ;;  %11899 = vmatpush3.bf16.msra.mxu1 %v12888_v16  ;;  %v11445_v60 = vadd.f32 %v11444_v11, %v11443_v6  ;;  %v14857_v58 = vsel %vm1311_vm0, %v14765_v53, %v14835_v59  ;;  %v10187_v16 = vcombine.low %v14850_v41, %v14850_v41  ;;  %v3683_v10 = vshrl.u32 %v10186_v17, 16  ;;  %v12905_v6 = vld [vmem:[%s16948_s1 + $0x770] sm:$0xff]  }
 0x118   : > { %11865 = vmatpush3.bf16.msra.mxu0 %v12887_v44  ;;  %11900 = vmatprep.subr.bf16.mxu1 %v12890_v26  ;;  %v11413_v44 = vpop.f32.mrb[9].mxu0  ;;  %v14866_v22 = vor.u32 %v3670_v57, %v3669_v2  ;;  %v3686_v26 = vshll.u32 %v10186_v17, 16 }
 0x119   : > { %11866 = vmatprep.subr.bf16.mxu0 %v12889_v45  ;;  %v14830_v47 = vadd.f32 %v11445_v60, %v11411_v63  ;;  %v11414_v45 = vadd.f32 %v11413_v44, %v11412_v23  ;;  %v3695_v63 = vshll.u32 %v10187_v16, 16  ;;  %v3685_v11 = vrot.slane %v3683_v10, 3  ;;  %v11415_v4 = vpop.f32.mrb[10].mxu0 }
 0x11a   : > { %v3676_v60 = vrot.slane %v3674_v42, 3  ;;  %v16987_v44 = vshrl.u32 %v14590_v40, 16  ;;  %v16988_v10 = vshll.u32 %v14590_v40, 16  ;;  %v11449_v42 = vpop.f32.mrb[10].mxu1  ;;  %v12910_v40 = vld [vmem:[%s16948_s1 + $0x7f8] sm:$0xff]  }
 0x11b   : > { %11901 = vmatpush3.bf16.msra.mxu1 %v12892_v33  ;;  %v3701_v33 = vshrl.u32 %v10188_v56, 16  ;;  %v3697_v23 = vrot.slane %v3695_v63, 4 }
 0x11c   : > { %11867 = vmatpush3.bf16.msra.mxu0 %v12891_v55  ;;  %11902 = vmatprep.subr.bf16.mxu1 %v12894_v31  ;;  %v3677_v55 = vshll.u32 %v10185_v0, 16  ;;  %v3688_v31 = vrot.slane %v3686_v26, 4  ;;  %v12907_v0 = vld [vmem:[%s16948_s1 + $0x730] sm:$0xff]   ;;  %v3665_v56 = vrot.slane %v16987_v44, 3  ;;  %v3666_v26 = vrot.slane %v16988_v10, 4 }
 0x11d   : > { %11868 = vmatprep.subr.bf16.mxu0 %v12893_v46  ;;  %v3692_v46 = vshrl.u32 %v10187_v16, 16 }
 0x11e   : > { %v3679_v29 = vrot.slane %v3677_v55, 4  ;;  %v3689_v48 = vor.u32 %v3688_v31, %v3685_v11  ;;  %v11416_v55 = vpop.f32.mrb[11].mxu0  ;;  %v14923_v31 = vld [vmem:[%s13469_s12 + $0x50] sm:$0xff] }
 0x11f   : > { %11903 = vmatpush3.bf16.msra.mxu1 %v12896_v62  ;;  %v3694_v36 = vrot.slane %v3692_v46, 3  ;;  %v12906_v62 = vld [vmem:[%s16948_s1 + $0x7f0] sm:$0xff]  }
 0x120   : > { %11869 = vmatpush3.bf16.msra.mxu0 %v12895_v19  ;;  %11904 = vmatprep.subr.bf16.mxu1 %v12898_v49  ;;  %v3703_v19 = vrot.slane %v3701_v33, 3  ;;  %v3680_v2 = vor.u32 %v3679_v29, %v3676_v60  ;;  %v11448_v49 = vadd.f32 %v11447_v8, %v11446_v51  ;;  %v12908_v51 = vld [vmem:[%s16948_s1 + $0x7b0] sm:$0xff]   ;;  %v12912_v33 = vld [vmem:[%s16948_s1 + $0x7b8] sm:$0xff]   ;;  %v10181_v60 = vcombine.low %v3370_v34, %v14923_v31 }
 0x121   : > { %11870 = vmatprep.subr.bf16.mxu0 %v12897_v21  ;;  %v14880_v21 = vsel %vm1311_vm0, %v14714_v50, %v14866_v22  ;;  %v3698_v17 = vor.u32 %v3697_v23, %v3694_v36  ;;  %v10182_v29 = vcombine.high %v3370_v34, %v14923_v31 }
 0x122   : > { %v3707_v57 = vor.u32 %v3706_v24, %v3703_v19  ;;  %v3681_v16 = vsel %vm1311_vm0, %v14521_v14, %v3680_v2  ;;  %v14894_v8 = vadd.f32 %v11448_v49, %v11414_v45  ;;  %v12909_v14 = vld [vmem:[%s16948_s1 + $0x778] sm:$0xff]   ;;  %v14908_v45 = vor.u32 %v3666_v26, %v3665_v56 }
 0x123   : > { %11905 = vmatpush3.bf16.msra.mxu1 %v12902_v7  ;;  %v11468_v11 = vpop.f32.mrb[12].mxu0  ;;  %v3371_v19 = vld [vmem:[%s13469_s12 + $0x38] sm:$0x88]  ;;  %v3606_v49 = vshrl.u32 %v10182_v29, 16 }
 0x124   : > { %11871 = vmatpush3.bf16.msra.mxu0 %v12901_v9  ;;  %v3690_v9 = vsel %vm1311_vm0, %v14449_v15, %v3689_v48  ;;  %11906 = vmatprep.subr.bf16.mxu1 %v12906_v62  ;;  %v3708_v7 = vsel %vm1311_vm0, %v14482_v13, %v3707_v57  ;;  %v3699_v15 = vsel %vm1311_vm0, %v14523_v27, %v3698_v17  ;;  %v12911_v13 = vld [vmem:[%s16948_s1 + $0x738] sm:$0xff]   ;;  %v12913_v48 = vld [vmem:[%s16948_s1 + $0x840] sm:$0xff]   ;;  %v3594_v57 = vshrl.u32 %v10181_v60, 16 }
 0x125   : > { %11872 = vmatprep.subr.bf16.mxu0 %v12905_v6  ;;  %4201 = vmatprep.mubr.bf16.mxu0 %v3690_v9  ;;  %v11417_v27 = vadd.f32 %v11416_v55, %v11415_v4  ;;  %v11450_v6 = vpop.f32.mrb[11].mxu1  ;;  %v14920_v46 = vsel %vm1311_vm0, %v14771_v28, %v14908_v45  ;;  %v14929_v24 = vld [vmem:[%s13469_s12 + $0x58] sm:$0xff]  ;;  %v3609_v4 = vshll.u32 %v10182_v29, 16  ;;  %v3597_v17 = vshll.u32 %v10181_v60, 16  ;;  %v12915_v55 = vld [vmem:[%s16948_s1 + $0x800] sm:$0xff]   ;;  %v12917_v60 = vld [vmem:[%s16948_s1 + $0x848] sm:$0xff]  }
 0x126   : > { %4258 = vmatprep.mubr.bf16.mxu1 %v3708_v7  ;;  %4202 = vmatmul.mubr.bf16.gmra.mrb[80].mxu0 %v3681_v16  ;;  %v11451_v63 = vadd.f32 %v11450_v6, %v11449_v42  ;;  %v10183_v36 = vcombine.low %v3371_v19, %v14929_v24  ;;  %v10184_v23 = vcombine.high %v3371_v19, %v14929_v24  ;;  %v11502_v62 = vpop.f32.mrb[12].mxu1  ;;  %v3596_v26 = vrot.slane %v3594_v57, 3  ;;  %v12916_v6 = vld [vmem:[%s16948_s1 + $0x880] sm:$0xff]  }
 0x127   : > { %4259 = vmatmul.mubr.bf16.gmra.mrb[80].mxu1 %v3699_v15  ;;  %v3611_v10 = vrot.slane %v3609_v4, 4  ;;  %v3599_v7 = vrot.slane %v3597_v17, 4  ;;  %v11503_v19 = vpop.f32.mrb[13].mxu1 }
 0x128   : > { %11873 = vmatpush3.bf16.msra.mxu0 %v12907_v0  ;;  %11907 = vmatpush3.bf16.msra.mxu1 %v12908_v51  ;;  %v14936_v2 = vadd.f32 %v11451_v63, %v11417_v27  ;;  %v12914_v0 = vld [vmem:[%s16948_s1 + $0x8c0] sm:$0xff]   ;;  %v3630_v44 = vshrl.u32 %v10184_v23, 16  ;;  %v3633_v56 = vshll.u32 %v10184_v23, 16  ;;  %v3618_v9 = vshrl.u32 %v10183_v36, 16 }
 0x129   : > { %11874 = vmatprep.subr.bf16.mxu0 %v12909_v14  ;;  %11908 = vmatprep.subr.bf16.mxu1 %v12910_v40  ;;  %v3621_v16 = vshll.u32 %v10183_v36, 16  ;;  %v3608_v51 = vrot.slane %v3606_v49, 3  ;;  %v3600_v27 = vor.u32 %v3599_v7, %v3596_v26  ;;  %v11504_v49 = vadd.f32 %v11503_v19, %v11502_v62  ;;  %v12920_v62 = vld [vmem:[%s16948_s1 + $0x888] sm:$0xff]   ;;  %v12924_v7 = vld [vmem:[%s16948_s1 + $0x890] sm:$0xff]  }
 0x12a   : > { %v3632_v15 = vrot.slane %v3630_v44, 3  ;;  %v3635_v14 = vrot.slane %v3633_v56, 4  ;;  %v3620_v42 = vrot.slane %v3618_v9, 3 }
 0x12b   : > { %v3623_v40 = vrot.slane %v3621_v16, 4  ;;  %v3604_v23 = vsel %vm1311_vm0, %v3600_v27, %v14765_v53  ;;  %v11505_v53 = vpop.f32.mrb[14].mxu1 }
 0x12c   : > { %11875 = vmatpush3.bf16.msra.mxu0 %v12911_v13  ;;  %11909 = vmatpush3.bf16.msra.mxu1 %v12912_v33  ;;  %v3612_v13 = vor.u32 %v3611_v10, %v3608_v51  ;;  %v11469_v33 = vpop.f32.mrb[13].mxu0  ;;  %v3636_v34 = vor.u32 %v3635_v14, %v3632_v15  ;;  %v11506_v56 = vpop.f32.mrb[15].mxu1  ;;  %v12923_v51 = vld [vmem:[%s16948_s1 + $0x810] sm:$0xff]  }
 0x12d   : > { %11928 = vmatprep.subr.bf16.mxu0 %v12913_v48  ;;  %11962 = vmatprep.subr.bf16.mxu1 %v12914_v0  ;;  %v3624_v63 = vor.u32 %v3623_v40, %v3620_v42  ;;  %v11470_v29 = vadd.f32 %v11469_v33, %v11468_v11  ;;  %v12918_v48 = vld [vmem:[%s16948_s1 + $0x8c8] sm:$0xff]   ;;  %v11471_v4 = vpop.f32.mrb[14].mxu0  ;;  %v11507_v9 = vadd.f32 %v11506_v56, %v11505_v53  ;;  %v11508_v40 = vpop.f32.mrb[16].mxu1  ;;  %v12928_v33 = vld [vmem:[%s16948_s1 + $0x898] sm:$0xff]  }
 0x12e   : > { %v3616_v36 = vsel %vm1311_vm0, %v3612_v13, %v14689_v20  ;;  %v3640_v57 = vsel %vm1311_vm0, %v3636_v34, %v14714_v50  ;;  %v12919_v20 = vld [vmem:[%s16948_s1 + $0x808] sm:$0xff]   ;;  %v11472_v0 = vpop.f32.mrb[15].mxu0  ;;  %v12921_v50 = vld [vmem:[%s16948_s1 + $0x850] sm:$0xff]   ;;  %v12927_v13 = vld [vmem:[%s16948_s1 + $0x818] sm:$0xff]  }
 0x12f   : > { %4299 = vmatprep.mubr.bf16.mxu0 %v3616_v36  ;;  %v3628_v11 = vsel %vm1311_vm0, %v3624_v63, %v14771_v28  ;;  %v1188_v17 = vadd.f32 %v11470_v29, %v14739_v30  ;;  %4356 = vmatprep.mubr.bf16.mxu1 %v3640_v57  ;;  %v11473_v44 = vadd.f32 %v11472_v0, %v11471_v4  ;;  %v12922_v30 = vld [vmem:[%s16948_s1 + $0x8d0] sm:$0xff]   ;;  %v11474_v16 = vpop.f32.mrb[16].mxu0  ;;  %v15019_v53 = vld [vmem:[%s13469_s12 + $0xf8] sm:$0xff] }
 0x130   : > { %4300 = vmatmul.mubr.bf16.vlgmr.msra.gmra.mrb[84].mxu0 %v3604_v23  ;;  %4357 = vmatmul.mubr.bf16.vlgmr.msra.gmra.mrb[84].mxu1 %v3628_v11  ;;  %v11475_v26 = vpop.f32.mrb[17].mxu0  ;;  %v15002_v34 = vld [vmem:[%s13469_s12 + $0xf0] sm:$0xff]  ;;  %v10191_v0 = vcombine.low %v15019_v53, %v15019_v53 }
 0x131   : > { %11929 = vmatpush3.bf16.msra.mxu0 %v12915_v55  ;;  %v14971_v28 = vadd.f32 %v11504_v49, %v1188_v17  ;;  %11963 = vmatpush3.bf16.msra.mxu1 %v12916_v6  ;;  %v1191_v10 = vadd.f32 %v11473_v44, %v14762_v43  ;;  %v11476_v15 = vadd.f32 %v11475_v26, %v11474_v16  ;;  %v11477_v14 = vpop.f32.mrb[18].mxu0  ;;  %v12926_v43 = vld [vmem:[%s16948_s1 + $0x8d8] sm:$0xff]   ;;  %v11509_v6 = vpop.f32.mrb[17].mxu1  ;;  %v12935_v26 = vld [vmem:[%s16948_s1 + $0x8a0] sm:$0xff]  }
 0x132   : > { %11930 = vmatprep.subr.bf16.mxu0 %v12917_v60  ;;  %11964 = vmatprep.subr.bf16.mxu1 %v12918_v48  ;;  %v11478_v55 = vpop.f32.mrb[19].mxu0  ;;  %v11510_v63 = vadd.f32 %v11509_v6, %v11508_v40  ;;  %v11511_v60 = vpop.f32.mrb[18].mxu1  ;;  %v10189_v19 = vcombine.low %v15002_v34, %v15002_v34 }
 0x133   : > { %4307 = vmatprep.mubr.bf16.mxu0 %v14799_v54  ;;  %4364 = vmatprep.mubr.bf16.mxu1 %v14880_v21  ;;  %v12925_v54 = vld [vmem:[%s16948_s1 + $0x858] sm:$0xff]   ;;  %v14988_v42 = vadd.f32 %v11507_v9, %v1191_v10  ;;  %v1196_v21 = vadd.f32 %v11476_v15, %v14811_v12  ;;  %v11479_v27 = vadd.f32 %v11478_v55, %v11477_v14  ;;  %v11480_v29 = vpop.f32.mrb[20].mxu0  ;;  %v11512_v23 = vpop.f32.mrb[19].mxu1  ;;  %v3731_v15 = vshll.u32 %v10191_v0, 16  ;;  %v12937_v14 = vld [vmem:[%s16948_s1 + $0x868] sm:$0xff]  }
 0x134   : > { %v10190_v12 = vcombine.high %v15002_v34, %v15002_v34  ;;  %v11513_v49 = vadd.f32 %v11512_v23, %v11511_v60  ;;  %v11481_v4 = vpop.f32.mrb[21].mxu0  ;;  %v3713_v17 = vshll.u32 %v10189_v19, 16 }
 0x135   : > { %11931 = vmatpush3.bf16.msra.mxu0 %v12919_v20  ;;  %11965 = vmatpush3.bf16.msra.mxu1 %v12920_v62  ;;  %v1199_v36 = vadd.f32 %v11479_v27, %v14830_v47  ;;  %v15016_v48 = vadd.f32 %v11510_v63, %v1196_v21  ;;  %v3710_v20 = vshrl.u32 %v10189_v19, 16  ;;  %v12934_v47 = vld [vmem:[%s16948_s1 + $0x820] sm:$0xff]   ;;  %v10192_v62 = vcombine.high %v15019_v53, %v15019_v53  ;;  %v12939_v19 = vld [vmem:[%s16948_s1 + $0x828] sm:$0xff]  }
 0x136   : > { %11932 = vmatprep.subr.bf16.mxu0 %v12921_v50  ;;  %11966 = vmatprep.subr.bf16.mxu1 %v12922_v30  ;;  %v3719_v57 = vshrl.u32 %v10190_v12, 16  ;;  %v3722_v11 = vshll.u32 %v10190_v12, 16  ;;  %v11482_v44 = vadd.f32 %v11481_v4, %v11480_v29  ;;  %v3715_v16 = vrot.slane %v3713_v17, 4  ;;  %v12938_v29 = vld [vmem:[%s16948_s1 + $0x8e8] sm:$0xff]   ;;  %v11483_v12 = vpop.f32.mrb[22].mxu0  ;;  %v12941_v4 = vld [vmem:[%s16948_s1 + $0x870] sm:$0xff]  }
 0x137   : > { %v15028_v50 = vadd.f32 %v11513_v49, %v1199_v36  ;;  %v3712_v9 = vrot.slane %v3710_v20, 3  ;;  %v3740_v10 = vshll.u32 %v10192_v62, 16  ;;  %v11484_v23 = vpop.f32.mrb[23].mxu0 }
 0x138   : > { %4308 = vmatmul.mubr.bf16.gmra.mrb[88].mxu0 %v14857_v58  ;;  %4365 = vmatmul.mubr.bf16.gmra.mrb[88].mxu1 %v14920_v46  ;;  %v12931_v58 = vld [vmem:[%s16948_s1 + $0x860] sm:$0xff]   ;;  %v3721_v56 = vrot.slane %v3719_v57, 3  ;;  %v3724_v30 = vrot.slane %v3722_v11, 4  ;;  %v1204_v55 = vadd.f32 %v11482_v44, %v14894_v8  ;;  %v11485_v57 = vadd.f32 %v11484_v23, %v11483_v12 }
 0x139   : > { %11933 = vmatpush3.bf16.msra.mxu0 %v12923_v51  ;;  %11967 = vmatpush3.bf16.msra.mxu1 %v12924_v7  ;;  %v12932_v46 = vld [vmem:[%s16948_s1 + $0x8e0] sm:$0xff]   ;;  %v3737_v51 = vshrl.u32 %v10192_v62, 16  ;;  %v3728_v7 = vshrl.u32 %v10191_v0, 16  ;;  %v3716_v40 = vor.u32 %v3715_v16, %v3712_v9  ;;  %v3742_v27 = vrot.slane %v3740_v10, 4  ;;  %v12944_v62 = vld [vmem:[%s16948_s1 + $0x8b0] sm:$0xff]   ;;  %v12947_v10 = vld [vmem:[%s16948_s1 + $0x838] sm:$0xff]  }
 0x13a   : > { %11934 = vmatprep.subr.bf16.mxu0 %v12925_v54  ;;  %11968 = vmatprep.subr.bf16.mxu1 %v12926_v43  ;;  %v3725_v54 = vor.u32 %v3724_v30, %v3721_v56  ;;  %v15037_v43 = vld [vmem:[%s13469_s12 + $0x60] sm:$0xff]  ;;  %v12945_v30 = vld [vmem:[%s16948_s1 + $0x878] sm:$0xff]   ;;  %v16989_v23 = vcombine.high %v14226_v25, %v14315_v35 }
 0x13b   : > { %v10386_v21 = vcombine.high %v14717_v39, %v15037_v43  ;;  %v3730_v6 = vrot.slane %v3728_v7, 3  ;;  %v3717_v60 = vsel %vm1311_vm0, %v14835_v59, %v3716_v40  ;;  %v15056_v59 = vld [vmem:[%s13469_s12 + $0x68] sm:$0xff]  ;;  %v13279_v40 = vld [vmem:[%s13469_s12 + $0x40] sm:$0xff] }
 0x13c   : > { %v3726_v63 = vsel %vm1311_vm0, %v14787_v18, %v3725_v54  ;;  %v12940_v18 = vld [vmem:[%s16948_s1 + $0x8a8] sm:$0xff]   ;;  %v10388_v36 = vcombine.high %v14723_v37, %v15056_v59  ;;  %v12942_v37 = vld [vmem:[%s16948_s1 + $0x8f0] sm:$0xff]  }
 0x13d   : > { %11935 = vmatpush3.bf16.msra.mxu0 %v12927_v13  ;;  %11969 = vmatpush3.bf16.msra.mxu1 %v12928_v33  ;;  %v3739_v13 = vrot.slane %v3737_v51, 3  ;;  %v3733_v33 = vrot.slane %v3731_v15, 4  ;;  %v12948_v15 = vld [vmem:[%s16948_s1 + $0x8b8] sm:$0xff]  }
 0x13e   : > { %11936 = vmatprep.subr.bf16.mxu0 %v12931_v58  ;;  %11970 = vmatprep.subr.bf16.mxu1 %v12932_v46  ;;  %v11514_v58 = vpop.f32.mrb[20].mxu1 }
 0x13f   : > { %4315 = vmatprep.mubr.bf16.mxu0 %v3726_v63  ;;  %v3743_v39 = vor.u32 %v3742_v27, %v3739_v13  ;;  %v3734_v8 = vor.u32 %v3733_v33, %v3730_v6  ;;  %v11515_v11 = vpop.f32.mrb[21].mxu1  ;;  %v12950_v6 = vld [vmem:[%s16948_s1 + $0x9c0] sm:$0xff]   ;;  %v13280_v63 = vld [vmem:[%s13469_s12 + $0x48] sm:$0xff] }
 0x140   : > { %4316 = vmatmul.mubr.bf16.gmra.mrb[92].mxu0 %v3717_v60  ;;  %v11516_v20 = vadd.f32 %v11515_v11, %v11514_v58  ;;  %v11517_v17 = vpop.f32.mrb[22].mxu1  ;;  %v10387_v60 = vcombine.low %v13280_v63, %v15056_v59  ;;  %v12953_v58 = vld [vmem:[%s16948_s1 + $0x948] sm:$0xff]   ;;  %v12964_v63 = vld [vmem:[%s16948_s1 + $0x998] sm:$0xff]  }
 0x141   : > { %11937 = vmatpush3.bf16.msra.mxu0 %v12934_v47  ;;  %11971 = vmatpush3.bf16.msra.mxu1 %v12935_v26  ;;  %v3744_v46 = vsel %vm1311_vm0, %v14866_v22, %v3743_v39  ;;  %v3735_v49 = vsel %vm1311_vm0, %v14908_v45, %v3734_v8  ;;  %v12943_v22 = vld [vmem:[%s16948_s1 + $0x830] sm:$0xff]   ;;  %v1207_v45 = vadd.f32 %v11485_v57, %v14936_v2  ;;  %v11518_v47 = vpop.f32.mrb[23].mxu1  ;;  %v12946_v2 = vld [vmem:[%s16948_s1 + $0x8f8] sm:$0xff]   ;;  %v12956_v11 = vld [vmem:[%s16948_s1 + $0x988] sm:$0xff]  }
 0x142   : > { %11938 = vmatprep.subr.bf16.mxu0 %v12937_v14  ;;  %11972 = vmatprep.subr.bf16.mxu1 %v12938_v29  ;;  %v15077_v0 = vadd.f32 %v11516_v20, %v1204_v55  ;;  %v11519_v44 = vadd.f32 %v11518_v47, %v11517_v17  ;;  %v12949_v55 = vld [vmem:[%s16948_s1 + $0x940] sm:$0xff]  }
 0x143   : > { %4980 = vmatprep.mubr.bf16.mxu0 %v10386_v21  ;;  %4372 = vmatprep.mubr.bf16.mxu1 %v3744_v46  ;;  %v11536_v56 = vpop.f32.mrb[24].mxu0  ;;  %v10385_v21 = vcombine.low %v13279_v40, %v15037_v43  ;;  %v12951_v43 = vld [vmem:[%s16948_s1 + $0x900] sm:$0xff]   ;;  %v12961_v40 = vld [vmem:[%s16948_s1 + $0x958] sm:$0xff]  }
 0x144   : > { %4373 = vmatmul.mubr.bf16.gmra.mrb[92].mxu1 %v3735_v49  ;;  %v11570_v9 = vpop.f32.mrb[24].mxu1  ;;  %v15085_v16 = vadd.f32 %v11519_v44, %v1207_v45  ;;  %v11537_v51 = vpop.f32.mrb[25].mxu0  ;;  %v13281_v44 = vld [vmem:[%s13469_s12 + $0xc0] sm:$0xff] }
 0x145   : > { %11939 = vmatpush3.bf16.msra.mxu0 %v12939_v19  ;;  %11973 = vmatpush3.bf16.msra.mxu1 %v12940_v18  ;;  %v11538_v26 = vadd.f32 %v11537_v51, %v11536_v56  ;;  %v11571_v7 = vpop.f32.mrb[25].mxu1  ;;  %v11539_v54 = vpop.f32.mrb[26].mxu0  ;;  %v10402_v56 = vcombine.high %v13281_v44, %v14841_v61 }
 0x146   : > { %11940 = vmatprep.subr.bf16.mxu0 %v12941_v4  ;;  %5037 = vmatprep.mubr.bf16.mxu1 %v10388_v36  ;;  %v11572_v14 = vadd.f32 %v11571_v7, %v11570_v9  ;;  %v11573_v27 = vpop.f32.mrb[26].mxu1  ;;  %v11540_v33 = vpop.f32.mrb[27].mxu0  ;;  %v12954_v36 = vld [vmem:[%s16948_s1 + $0x9c8] sm:$0xff]  }
 0x147   : > { %11974 = vmatprep.subr.bf16.mxu1 %v12942_v37  ;;  %v2035_v13 = vadd.f32 %v11538_v26, %v14971_v28  ;;  %v11541_v12 = vadd.f32 %v11540_v33, %v11539_v54  ;;  %v11574_v39 = vpop.f32.mrb[27].mxu1  ;;  %v12952_v28 = vld [vmem:[%s16948_s1 + $0x980] sm:$0xff]   ;;  %v12955_v4 = vld [vmem:[%s16948_s1 + $0x908] sm:$0xff]   ;;  %v16990_v37 = vcombine.high %v14235_v32, %v14330_v38  ;;  %v12963_v33 = vld [vmem:[%s16948_s1 + $0x918] sm:$0xff]  }
 0x148   : > { %v11575_v8 = vadd.f32 %v11574_v39, %v11573_v27  ;;  %v13282_v26 = vld [vmem:[%s13469_s12 + $0xc8] sm:$0xff]  ;;  %v10401_v39 = vcombine.low %v13281_v44, %v14841_v61  ;;  %v12967_v61 = vld [vmem:[%s16948_s1 + $0x920] sm:$0xff]   ;;  %v12978_v44 = vld [vmem:[%s16948_s1 + $0x9f8] sm:$0xff]  }
 0x149   : > { %11941 = vmatpush3.bf16.msra.mxu0 %v12943_v22  ;;  %11975 = vmatpush3.bf16.msra.mxu1 %v12944_v62  ;;  %v15107_v29 = vadd.f32 %v11572_v14, %v2035_v13  ;;  %v2038_v18 = vadd.f32 %v11541_v12, %v14988_v42  ;;  %v12957_v22 = vld [vmem:[%s16948_s1 + $0x950] sm:$0xff]   ;;  %v10404_v7 = vcombine.high %v13282_v26, %v14850_v41  ;;  %v12965_v12 = vld [vmem:[%s16948_s1 + $0x960] sm:$0xff]  }
 0x14a   : > { %11942 = vmatprep.subr.bf16.mxu0 %v12945_v30  ;;  %11976 = vmatprep.subr.bf16.mxu1 %v12946_v2  ;;  %v12958_v62 = vld [vmem:[%s16948_s1 + $0x9d0] sm:$0xff]  }
 0x14b   : > { %v11542_v19 = vpop.f32.mrb[28].mxu0  ;;  %v15125_v42 = vadd.f32 %v11575_v8, %v2038_v18  ;;  %v15182_v8 = vld [vmem:[%s13469_s12 + $0x70] sm:$0xff]  ;;  %v10403_v18 = vcombine.low %v13282_v26, %v14850_v41  ;;  %v12970_v41 = vld [vmem:[%s16948_s1 + $0x9e8] sm:$0xff]   ;;  %v12982_v26 = vld [vmem:[%s16948_s1 + $0xac0] sm:$0xff]  }
 0x14c   : > { %v11543_v59 = vpop.f32.mrb[29].mxu0  ;;  %v11576_v57 = vpop.f32.mrb[28].mxu1 }
 0x14d   : > { %11943 = vmatpush3.bf16.msra.mxu0 %v12947_v10  ;;  %11977 = vmatpush3.bf16.msra.mxu1 %v12948_v15  ;;  %v11544_v46 = vadd.f32 %v11543_v59, %v11542_v19  ;;  %v11545_v49 = vpop.f32.mrb[30].mxu0  ;;  %v11577_v47 = vpop.f32.mrb[29].mxu1  ;;  %v12960_v10 = vld [vmem:[%s16948_s1 + $0x990] sm:$0xff]  }
 0x14e   : > { %11996 = vmatprep.subr.bf16.mxu0 %v12949_v55  ;;  %12030 = vmatprep.subr.bf16.mxu1 %v12950_v6  ;;  %v11546_v17 = vpop.f32.mrb[31].mxu0  ;;  %v11578_v30 = vadd.f32 %v11577_v47, %v11576_v57  ;;  %v11579_v9 = vpop.f32.mrb[30].mxu1  ;;  %v12962_v55 = vld [vmem:[%s16948_s1 + $0x9d8] sm:$0xff]   ;;  %v12976_v47 = vld [vmem:[%s16948_s1 + $0x9b0] sm:$0xff]  }
 0x14f   : > { %v2043_v20 = vadd.f32 %v11544_v46, %v15016_v48  ;;  %v11547_v45 = vadd.f32 %v11546_v17, %v11545_v49  ;;  %v12959_v48 = vld [vmem:[%s16948_s1 + $0x910] sm:$0xff]   ;;  %v11580_v51 = vpop.f32.mrb[31].mxu1  ;;  %v13284_v46 = vld [vmem:[%s13469_s12 + $0x78] sm:$0xff] }
 0x150   : > { %4981 = vmatmul.mubr.bf16.vlgmr.msra.gmra.mrb[96].mxu0 %v10385_v21  ;;  %5038 = vmatmul.mubr.bf16.vlgmr.msra.gmra.mrb[96].mxu1 %v10387_v60  ;;  %v11581_v14 = vadd.f32 %v11580_v51, %v11579_v9  ;;  %v10392_v49 = vcombine.high %v14929_v24, %v13284_v46  ;;  %v12973_v17 = vld [vmem:[%s16948_s1 + $0x970] sm:$0xff]   ;;  %v12980_v9 = vld [vmem:[%s16948_s1 + $0x9b8] sm:$0xff]   ;;  %v12981_v51 = vld [vmem:[%s16948_s1 + $0xa40] sm:$0xff]  }
 0x151   : > { %11997 = vmatpush3.bf16.msra.mxu0 %v12951_v43  ;;  %4988 = vmatprep.mubr.bf16.mxu0 %v16989_v23  ;;  %v2046_v2 = vadd.f32 %v11547_v45, %v15028_v50  ;;  %v15151_v15 = vadd.f32 %v11578_v30, %v2043_v20  ;;  %v16991_v50 = vcombine.low %v14226_v25, %v14315_v35  ;;  %v12968_v23 = vld [vmem:[%s16948_s1 + $0x9a0] sm:$0xff]   ;;  %v12972_v20 = vld [vmem:[%s16948_s1 + $0x9a8] sm:$0xff]   ;;  %v12975_v45 = vld [vmem:[%s16948_s1 + $0x930] sm:$0xff]  }
 0x152   : > { %11998 = vmatprep.subr.bf16.mxu0 %v12953_v58  ;;  %12031 = vmatpush3.bf16.msra.mxu1 %v12952_v28  ;;  %v16992_v25 = vcombine.low %v14235_v32, %v14330_v38  ;;  %v12966_v28 = vld [vmem:[%s16948_s1 + $0x9e0] sm:$0xff]  }
 0x153   : > { %5045 = vmatprep.mubr.bf16.mxu1 %v16990_v37  ;;  %12032 = vmatprep.subr.bf16.mxu1 %v12954_v36  ;;  %v11548_v54 = vpop.f32.mrb[32].mxu0  ;;  %v15162_v13 = vadd.f32 %v11581_v14, %v2046_v2  ;;  %v12971_v37 = vld [vmem:[%s16948_s1 + $0x928] sm:$0xff]   ;;  %v10389_v2 = vcombine.low %v14923_v31, %v15182_v8 }
 0x154   : > { %v11549_v21 = vpop.f32.mrb[33].mxu0  ;;  %v11582_v35 = vpop.f32.mrb[32].mxu1 }
 0x155   : > { %11999 = vmatpush3.bf16.msra.mxu0 %v12955_v4  ;;  %v11550_v27 = vadd.f32 %v11549_v21, %v11548_v54  ;;  %v11551_v6 = vpop.f32.mrb[34].mxu0  ;;  %v11583_v38 = vpop.f32.mrb[33].mxu1  ;;  %v10391_v54 = vcombine.low %v14929_v24, %v13284_v46  ;;  %v12984_v21 = vld [vmem:[%s16948_s1 + $0xa80] sm:$0xff]   ;;  %v12985_v24 = vld [vmem:[%s16948_s1 + $0xa48] sm:$0xff]  }
 0x156   : > { %12000 = vmatprep.subr.bf16.mxu0 %v12957_v22  ;;  %12033 = vmatpush3.bf16.msra.mxu1 %v12956_v11  ;;  %v11552_v43 = vpop.f32.mrb[35].mxu0  ;;  %v11584_v19 = vadd.f32 %v11583_v38, %v11582_v35  ;;  %v11585_v58 = vpop.f32.mrb[34].mxu1  ;;  %v12969_v11 = vld [vmem:[%s16948_s1 + $0x968] sm:$0xff]   ;;  %v12974_v22 = vld [vmem:[%s16948_s1 + $0x9f0] sm:$0xff]  }
 0x157   : > { %12034 = vmatprep.subr.bf16.mxu1 %v12958_v62  ;;  %v2051_v60 = vadd.f32 %v11550_v27, %v15077_v0  ;;  %v11553_v32 = vadd.f32 %v11552_v43, %v11551_v6  ;;  %v10390_v0 = vcombine.high %v14923_v31, %v15182_v8  ;;  %v11586_v36 = vpop.f32.mrb[35].mxu1  ;;  %v12977_v62 = vld [vmem:[%s16948_s1 + $0x978] sm:$0xff]   ;;  %v12989_v8 = vld [vmem:[%s16948_s1 + $0xa50] sm:$0xff]  }
 0x158   : > { %4989 = vmatmul.mubr.bf16.gmra.mrb[100].mxu0 %v16991_v50  ;;  %5046 = vmatmul.mubr.bf16.gmra.mrb[100].mxu1 %v16992_v25  ;;  %v11587_v57 = vadd.f32 %v11586_v36, %v11585_v58  ;;  %v16993_v25 = vcombine.high %v14456_v5, %v14548_v52  ;;  %v12990_v58 = vld [vmem:[%s16948_s1 + $0xad0] sm:$0xff]  }
 0x159   : > { %12001 = vmatpush3.bf16.msra.mxu0 %v12959_v48  ;;  %4996 = vmatprep.mubr.bf16.mxu0 %v10402_v56  ;;  %v2054_v59 = vadd.f32 %v11553_v32, %v15085_v16  ;;  %v15196_v4 = vadd.f32 %v11584_v19, %v2051_v60  ;;  %v12979_v56 = vld [vmem:[%s16948_s1 + $0x938] sm:$0xff]   ;;  %v12987_v60 = vld [vmem:[%s16948_s1 + $0xa08] sm:$0xff]   ;;  %v16994_v32 = vcombine.high %v14475_v1, %v14580_v3  ;;  %v12991_v36 = vld [vmem:[%s16948_s1 + $0xa10] sm:$0xff]  }
 0x15a   : > { %12002 = vmatprep.subr.bf16.mxu0 %v12961_v40  ;;  %12035 = vmatpush3.bf16.msra.mxu1 %v12960_v10  ;;  %v12983_v40 = vld [vmem:[%s16948_s1 + $0xa00] sm:$0xff]  }
 0x15b   : > { %5053 = vmatprep.mubr.bf16.mxu1 %v10404_v7  ;;  %12036 = vmatprep.subr.bf16.mxu1 %v12962_v55  ;;  %v15204_v16 = vadd.f32 %v11587_v57, %v2054_v59  ;;  %v13286_v57 = vld [vmem:[%s13469_s12 + $0xd8] sm:$0xff] }
 0x15d   : > { %12003 = vmatpush3.bf16.msra.mxu0 %v12963_v33  ;;  %v12986_v33 = vld [vmem:[%s16948_s1 + $0xac8] sm:$0xff]  }
 0x15e   : > { %12004 = vmatprep.subr.bf16.mxu0 %v12965_v12  ;;  %12037 = vmatpush3.bf16.msra.mxu1 %v12964_v63 }
 0x15f   : > { %12038 = vmatprep.subr.bf16.mxu1 %v12966_v28 }
 0x160   : > { %4997 = vmatmul.mubr.bf16.gmra.mrb[104].mxu0 %v10401_v39  ;;  %5054 = vmatmul.mubr.bf16.gmra.mrb[104].mxu1 %v10403_v18  ;;  %v12988_v39 = vld [vmem:[%s16948_s1 + $0xa88] sm:$0xff]  }
 0x161   : > { %12005 = vmatpush3.bf16.msra.mxu0 %v12967_v61  ;;  %5094 = vmatprep.mubr.bf16.mxu0 %v10390_v0  ;;  %v13285_v61 = vld [vmem:[%s13469_s12 + $0xd0] sm:$0xff] }
 0x162   : > { %12006 = vmatprep.subr.bf16.mxu0 %v12969_v11  ;;  %12039 = vmatpush3.bf16.msra.mxu1 %v12968_v23  ;;  %v10406_v18 = vcombine.high %v13285_v61, %v15002_v34  ;;  %v10408_v11 = vcombine.high %v13286_v57, %v15019_v53 }
 0x163   : > { %5151 = vmatprep.mubr.bf16.mxu1 %v10392_v49  ;;  %12040 = vmatprep.subr.bf16.mxu1 %v12970_v41  ;;  %v11604_v30 = vpop.f32.mrb[36].mxu0  ;;  %v12992_v49 = vld [vmem:[%s16948_s1 + $0xa90] sm:$0xff]  }
 0x164   : > { %v11638_v48 = vpop.f32.mrb[36].mxu1  ;;  %v11605_v10 = vpop.f32.mrb[37].mxu0 }
 0x165   : > { %12007 = vmatpush3.bf16.msra.mxu0 %v12971_v37  ;;  %v11606_v7 = vadd.f32 %v11605_v10, %v11604_v30  ;;  %v11639_v14 = vpop.f32.mrb[37].mxu1  ;;  %v11607_v50 = vpop.f32.mrb[38].mxu0  ;;  %v12998_v10 = vld [vmem:[%s16948_s1 + $0xae0] sm:$0xff]  }
 0x166   : > { %12008 = vmatprep.subr.bf16.mxu0 %v12973_v17  ;;  %12041 = vmatpush3.bf16.msra.mxu1 %v12972_v20  ;;  %v11640_v31 = vadd.f32 %v11639_v14, %v11638_v48  ;;  %v11641_v27 = vpop.f32.mrb[38].mxu1  ;;  %v11608_v6 = vpop.f32.mrb[39].mxu0  ;;  %v16995_v20 = vcombine.low %v14456_v5, %v14548_v52  ;;  %v16996_v5 = vcombine.low %v14475_v1, %v14580_v3  ;;  %v12995_v52 = vld [vmem:[%s16948_s1 + $0xa18] sm:$0xff]   ;;  %v12997_v3 = vld [vmem:[%s16948_s1 + $0xa60] sm:$0xff]  }
 0x167   : > { %12042 = vmatprep.subr.bf16.mxu1 %v12974_v22  ;;  %v2149_v55 = vadd.f32 %v11606_v7, %v15107_v29  ;;  %v11609_v29 = vadd.f32 %v11608_v6, %v11607_v50  ;;  %v11642_v63 = vpop.f32.mrb[39].mxu1  ;;  %v10405_v1 = vcombine.low %v13285_v61, %v15002_v34  ;;  %v12999_v7 = vld [vmem:[%s16948_s1 + $0xa20] sm:$0xff]   ;;  %v10407_v34 = vcombine.low %v13286_v57, %v15019_v53  ;;  %v13002_v53 = vld [vmem:[%s16948_s1 + $0xae8] sm:$0xff]  }
 0x168   : > { %v11643_v43 = vadd.f32 %v11642_v63, %v11641_v27  ;;  %v13003_v6 = vld [vmem:[%s16948_s1 + $0xa28] sm:$0xff]  }
 0x169   : > { %12009 = vmatpush3.bf16.msra.mxu0 %v12975_v45  ;;  %v15261_v35 = vadd.f32 %v11640_v31, %v2149_v55  ;;  %v2152_v38 = vadd.f32 %v11609_v29, %v15125_v42  ;;  %v12994_v45 = vld [vmem:[%s16948_s1 + $0xad8] sm:$0xff]   ;;  %v13004_v29 = vld [vmem:[%s16948_s1 + $0xaa8] sm:$0xff]  }
 0x16a   : > { %12010 = vmatprep.subr.bf16.mxu0 %v12977_v62  ;;  %12043 = vmatpush3.bf16.msra.mxu1 %v12976_v47 }
 0x16b   : > { %12044 = vmatprep.subr.bf16.mxu1 %v12978_v44  ;;  %v11610_v12 = vpop.f32.mrb[40].mxu0  ;;  %v15281_v59 = vadd.f32 %v11643_v43, %v2152_v38  ;;  %v13007_v43 = vld [vmem:[%s16948_s1 + $0xa30] sm:$0xff]   ;;  %v13011_v38 = vld [vmem:[%s16948_s1 + $0xa38] sm:$0xff]  }
 0x16c   : > { %v11611_v28 = vpop.f32.mrb[41].mxu0  ;;  %v11644_v42 = vpop.f32.mrb[40].mxu1 }
 0x16d   : > { %12011 = vmatpush3.bf16.msra.mxu0 %v12979_v56  ;;  %v11612_v0 = vadd.f32 %v11611_v28, %v11610_v12  ;;  %v11613_v19 = vpop.f32.mrb[42].mxu0  ;;  %v11645_v37 = vpop.f32.mrb[41].mxu1  ;;  %v13008_v12 = vld [vmem:[%s16948_s1 + $0xab0] sm:$0xff]   ;;  %v13012_v28 = vld [vmem:[%s16948_s1 + $0xab8] sm:$0xff]  }
 0x16e   : > { %12064 = vmatprep.subr.bf16.mxu0 %v12981_v51  ;;  %12045 = vmatpush3.bf16.msra.mxu1 %v12980_v9  ;;  %v11614_v46 = vpop.f32.mrb[43].mxu0  ;;  %v11646_v17 = vadd.f32 %v11645_v37, %v11644_v42  ;;  %v11647_v22 = vpop.f32.mrb[42].mxu1  ;;  %v12996_v9 = vld [vmem:[%s16948_s1 + $0xa98] sm:$0xff]   ;;  %v5183_v42 = vld [vmem:[%s13469_s12 + $0x48] sm:$0xff] }
 0x16f   : > { %12098 = vmatprep.subr.bf16.mxu1 %v12982_v26  ;;  %v2157_v23 = vadd.f32 %v11612_v0, %v15151_v15  ;;  %v11615_v41 = vadd.f32 %v11614_v46, %v11613_v19  ;;  %v12993_v15 = vld [vmem:[%s16948_s1 + $0xa58] sm:$0xff]   ;;  %v11648_v62 = vpop.f32.mrb[43].mxu1  ;;  %v5186_v0 = vld [vmem:[%s13469_s12 + $0x60] sm:$0xff]  ;;  %v5191_v46 = vld [vmem:[%s13469_s12 + $0x88] sm:$0xff] }
 0x170   : > { %5095 = vmatmul.mubr.bf16.vlgmr.msra.gmra.mrb[108].mxu0 %v10389_v2  ;;  %v11649_v56 = vadd.f32 %v11648_v62, %v11647_v22  ;;  %v5190_v19 = vld [vmem:[%s13469_s12 + $0x80] sm:$0xff] }
 0x171   : > { %12065 = vmatpush3.bf16.msra.mxu0 %v12983_v40  ;;  %5102 = vmatprep.mubr.bf16.mxu0 %v16993_v25  ;;  %v2160_v47 = vadd.f32 %v11615_v41, %v15162_v13  ;;  %v15308_v44 = vadd.f32 %v11646_v17, %v2157_v23  ;;  %v13000_v40 = vld [vmem:[%s16948_s1 + $0xaa0] sm:$0xff]   ;;  %v5187_v23 = vld [vmem:[%s13469_s12 + $0x68] sm:$0xff] }
 0x172   : > { %5152 = vmatmul.mubr.bf16.vlgmr.msra.gmra.mrb[108].mxu1 %v10391_v54  ;;  %12066 = vmatprep.subr.bf16.mxu0 %v12985_v24  ;;  %v10603_v37 = vcombine.low %v5183_v42, %v5187_v23 }
 0x173   : > { %12099 = vmatpush3.bf16.msra.mxu1 %v12984_v21  ;;  %5159 = vmatprep.mubr.bf16.mxu1 %v16994_v32  ;;  %v11616_v30 = vpop.f32.mrb[44].mxu0  ;;  %v15317_v48 = vadd.f32 %v11649_v56, %v2160_v47  ;;  %v13001_v21 = vld [vmem:[%s16948_s1 + $0xa68] sm:$0xff]   ;;  %v13010_v32 = vld [vmem:[%s16948_s1 + $0xaf8] sm:$0xff]   ;;  %v13013_v47 = vld [vmem:[%s16948_s1 + $0xb40] sm:$0xff]  }
 0x174   : > { %12100 = vmatprep.subr.bf16.mxu1 %v12986_v33  ;;  %v11617_v13 = vpop.f32.mrb[45].mxu0  ;;  %v11650_v26 = vpop.f32.mrb[44].mxu1 }
 0x175   : > { %12067 = vmatpush3.bf16.msra.mxu0 %v12987_v60  ;;  %v11618_v2 = vadd.f32 %v11617_v13, %v11616_v30  ;;  %v11619_v51 = vpop.f32.mrb[46].mxu0  ;;  %v11651_v50 = vpop.f32.mrb[45].mxu1  ;;  %v13006_v60 = vld [vmem:[%s16948_s1 + $0xaf0] sm:$0xff]  }
 0x176   : > { %12068 = vmatprep.subr.bf16.mxu0 %v12989_v8  ;;  %v11620_v54 = vpop.f32.mrb[47].mxu0  ;;  %v11652_v55 = vadd.f32 %v11651_v50, %v11650_v26  ;;  %v11653_v27 = vpop.f32.mrb[46].mxu1  ;;  %v5182_v8 = vld [vmem:[%s13469_s12 + $0x40] sm:$0xff]  ;;  %v5480_v26 = vshrl.u32 %v10603_v37, 16 }
 0x177   : > { %12101 = vmatpush3.bf16.msra.mxu1 %v12988_v39  ;;  %v2165_v14 = vadd.f32 %v11618_v2, %v15196_v4  ;;  %v11621_v31 = vadd.f32 %v11620_v54, %v11619_v51  ;;  %v11654_v24 = vpop.f32.mrb[47].mxu1  ;;  %v13009_v39 = vld [vmem:[%s16948_s1 + $0xa78] sm:$0xff]   ;;  %v10601_v61 = vcombine.low %v5182_v8, %v5186_v0 }
 0x178   : > { %5103 = vmatmul.mubr.bf16.gmra.mrb[112].mxu0 %v16995_v20  ;;  %12102 = vmatprep.subr.bf16.mxu1 %v12990_v58  ;;  %v11655_v25 = vadd.f32 %v11654_v24, %v11653_v27  ;;  %v15375_v58 = vld [vmem:[%s13469_s12 + $0xa0] sm:$0xff]  ;;  %v10604_v20 = vcombine.high %v5183_v42, %v5187_v23  ;;  %v13026_v23 = vld [vmem:[%s16948_s1 + $0xbd8] sm:$0xff]  }
 0x179   : > { %12069 = vmatpush3.bf16.msra.mxu0 %v12991_v36  ;;  %5110 = vmatprep.mubr.bf16.mxu0 %v10406_v18  ;;  %v2168_v4 = vadd.f32 %v11621_v31, %v15204_v16  ;;  %v15340_v33 = vadd.f32 %v11652_v55, %v2165_v14  ;;  %v13005_v16 = vld [vmem:[%s16948_s1 + $0xa70] sm:$0xff]   ;;  %v10602_v18 = vcombine.high %v5182_v8, %v5186_v0  ;;  %v5456_v22 = vshrl.u32 %v10601_v61, 16 }
 0x17a   : > { %5160 = vmatmul.mubr.bf16.gmra.mrb[112].mxu1 %v16996_v5  ;;  %12070 = vmatprep.subr.bf16.mxu0 %v12993_v15  ;;  %v15379_v36 = vcombine.high %v5190_v19, %v15375_v58  ;;  %v15387_v57 = vcombine.low %v5190_v19, %v15375_v58  ;;  %v5492_v5 = vshrl.u32 %v10604_v20, 16  ;;  %v5482_v14 = vshll.u32 %v10603_v37, 16 }
 0x17b   : > { %12103 = vmatpush3.bf16.msra.mxu1 %v12992_v49  ;;  %5167 = vmatprep.mubr.bf16.mxu1 %v10408_v11  ;;  %v15348_v63 = vadd.f32 %v11655_v25, %v2168_v4  ;;  %v15384_v49 = vld [vmem:[%s13469_s12 + $0xa8] sm:$0xff]  ;;  %v5468_v11 = vshrl.u32 %v10602_v18, 16  ;;  %v5470_v41 = vshll.u32 %v10602_v18, 16  ;;  %v13025_v18 = vld [vmem:[%s16948_s1 + $0xb58] sm:$0xff]  }
 0x17c   : > { %12104 = vmatprep.subr.bf16.mxu1 %v12994_v45  ;;  %v5475_v15 = vshll.u32 %v15379_v36, 16  ;;  %v15391_v17 = vcombine.high %v5191_v46, %v15384_v49  ;;  %v5458_v45 = vshll.u32 %v10601_v61, 16  ;;  %v16974_v56 = vshll.u32 %v15387_v57, 16  ;;  %v13017_v4 = vld [vmem:[%s16948_s1 + $0xb48] sm:$0xff]   ;;  %v13024_v61 = vld [vmem:[%s16948_s1 + $0xb90] sm:$0xff]  }
 0x17d   : > { %12071 = vmatpush3.bf16.msra.mxu0 %v12995_v52  ;;  %v5472_v62 = vrot.slane %v5470_v41, 1  ;;  %v5494_v52 = vshll.u32 %v10604_v20, 16  ;;  %v5484_v55 = vrot.slane %v5482_v14, 1  ;;  %v13019_v25 = vld [vmem:[%s16948_s1 + $0xb08] sm:$0xff]  }
 0x17e   : > { %12072 = vmatprep.subr.bf16.mxu0 %v12997_v3  ;;  %v5477_v30 = vrot.slane %v5475_v15, 1  ;;  %v5460_v13 = vrot.slane %v5458_v45, 1  ;;  %v13014_v3 = vld [vmem:[%s16948_s1 + $0xbc0] sm:$0xff]   ;;  %v16976_v8 = vshrl.u32 %v15391_v17, 16 }
 0x17f   : > { %12105 = vmatpush3.bf16.msra.mxu1 %v12996_v9  ;;  %v16975_v9 = vshll.u32 %v15391_v17, 16  ;;  %v5473_v2 = vor.u32 %v5472_v62, %v5468_v11  ;;  %v5496_v51 = vrot.slane %v5494_v52, 1  ;;  %v5202_v11 = vld [vmem:[%s13469_s12 + $0xe0] sm:$0xff]  ;;  %v5203_v62 = vld [vmem:[%s13469_s12 + $0xe8] sm:$0xff] }
 0x180   : > { %5111 = vmatmul.mubr.bf16.gmra.mrb[116].mxu0 %v10405_v1  ;;  %12106 = vmatprep.subr.bf16.mxu1 %v12998_v10  ;;  %v15401_v1 = vcombine.low %v5191_v46, %v15384_v49  ;;  %v15408_v10 = vrot.slane %v16974_v56, 1  ;;  %v15468_v46 = vld [vmem:[%s13469_s12 + $0xc0] sm:$0xff] }
 0x181   : > { %12073 = vmatpush3.bf16.msra.mxu0 %v12999_v7  ;;  %v15412_v7 = vrot.slane %v16975_v9, 1  ;;  %v5478_v31 = vsel %vm2501_vm1, %v5473_v2, %v5477_v30  ;;  %v5497_v50 = vor.u32 %v5496_v51, %v5492_v5  ;;  %v15474_v45 = vcombine.high %v15468_v46, %v5202_v11  ;;  %v13027_v2 = vld [vmem:[%s16948_s1 + $0xb18] sm:$0xff]  }
 0x182   : > { %5168 = vmatmul.mubr.bf16.gmra.mrb[116].mxu1 %v10407_v34  ;;  %12074 = vmatprep.subr.bf16.mxu0 %v13001_v21  ;;  %v5461_v34 = vor.u32 %v5460_v13, %v5456_v22  ;;  %v16973_v54 = vshll.u32 %v15401_v1, 16  ;;  %v15481_v5 = vcombine.low %v15468_v46, %v5202_v11  ;;  %v5207_v11 = vld [vmem:[%s13469_s12 + $0x108] sm:$0x11] }
 0x183   : > { %12107 = vmatpush3.bf16.msra.mxu1 %v13000_v40  ;;  %v13015_v40 = vld [vmem:[%s16948_s1 + $0xb00] sm:$0xff]   ;;  %6119 = vmatprep.mubr.bf16.mxu0 %v5478_v31  ;;  %v5502_v24 = vsel %vm2501_vm1, %v5497_v50, %v15412_v7  ;;  %v11672_v42 = vpop.f32.mrb[48].mxu0  ;;  %v16968_v14 = vshll.u32 %v15474_v45, 16  ;;  %v13028_v31 = vld [vmem:[%s16948_s1 + $0xb98] sm:$0xff]  }
 0x184   : > { %12108 = vmatprep.subr.bf16.mxu1 %v13002_v53  ;;  %v5466_v21 = vsel %vm2501_vm1, %v5461_v34, %v15408_v10  ;;  %v5489_v27 = vrot.slane %v16973_v54, 1  ;;  %v13016_v53 = vld [vmem:[%s16948_s1 + $0xb80] sm:$0xff]   ;;  %6176 = vmatprep.mubr.bf16.mxu1 %v5502_v24  ;;  %v11706_v37 = vpop.f32.mrb[48].mxu1  ;;  %v11673_v20 = vpop.f32.mrb[49].mxu0 }
 0x185   : > { %12075 = vmatpush3.bf16.msra.mxu0 %v13003_v6  ;;  %v5485_v6 = vor.u32 %v5484_v55, %v5480_v26  ;;  %v11674_v52 = vadd.f32 %v11673_v20, %v11672_v42  ;;  %v11707_v13 = vpop.f32.mrb[49].mxu1  ;;  %v13029_v55 = vld [vmem:[%s16948_s1 + $0xb60] sm:$0xff]   ;;  %v10628_v20 = vcombine.high %v5207_v11, %v5207_v11 }
 0x186   : > { %12076 = vmatprep.subr.bf16.mxu0 %v13005_v16  ;;  %v5559_v16 = vshrl.u32 %v15379_v36, 16  ;;  %v11708_v26 = vadd.f32 %v11707_v13, %v11706_v37  ;;  %v11709_v34 = vpop.f32.mrb[50].mxu1  ;;  %v5206_v42 = vld [vmem:[%s13469_s12 + $0x100] sm:$0x11] }
 0x187   : > { %12109 = vmatpush3.bf16.msra.mxu1 %v13004_v29  ;;  %v13018_v29 = vld [vmem:[%s16948_s1 + $0xbc8] sm:$0xff]   ;;  %v10626_v37 = vcombine.high %v5206_v42, %v5206_v42  ;;  %v11710_v13 = vpop.f32.mrb[51].mxu1 }
 0x188   : > { %12110 = vmatprep.subr.bf16.mxu1 %v13006_v60  ;;  %v5490_v60 = vsel %vm2501_vm1, %v5485_v6, %v5489_v27  ;;  %v5561_v41 = vor.u32 %v5559_v16, %v5477_v30  ;;  %v15471_v22 = vrot.slane %v5559_v16, 3  ;;  %v15506_v6 = vadd.f32 %v11708_v26, %v11674_v52  ;;  %v13031_v16 = vld [vmem:[%s16948_s1 + $0xb20] sm:$0xff]   ;;  %v13037_v52 = vld [vmem:[%s16948_s1 + $0xb28] sm:$0xff]  }
 0x189   : > { %12077 = vmatpush3.bf16.msra.mxu0 %v13007_v43  ;;  %v13020_v43 = vld [vmem:[%s16948_s1 + $0xb88] sm:$0xff]  }
 0x18a   : > { %12078 = vmatprep.subr.bf16.mxu0 %v13009_v39  ;;  %v5551_v39 = vshrl.u32 %v15387_v57, 16 }
 0x18b   : > { %12111 = vmatpush3.bf16.msra.mxu1 %v13008_v12  ;;  %v13021_v12 = vld [vmem:[%s16948_s1 + $0xb50] sm:$0xff]  }
 0x18c   : > { %12112 = vmatprep.subr.bf16.mxu1 %v13010_v32  ;;  %v13022_v32 = vld [vmem:[%s16948_s1 + $0xbd0] sm:$0xff]   ;;  %v15454_v0 = vrot.slane %v5551_v39, 3  ;;  %v5553_v50 = vor.u32 %v5551_v39, %v15408_v10 }
 0x18d   : > { %12079 = vmatpush3.bf16.msra.mxu0 %v13011_v38  ;;  %v5567_v38 = vshrl.u32 %v15401_v1, 16 }
 0x18e   : > { %12132 = vmatprep.subr.bf16.mxu0 %v13013_v47  ;;  %v15477_v47 = vld [vmem:[%s13469_s12 + $0xc8] sm:$0xff] }
 0x18f   : > { %12113 = vmatpush3.bf16.msra.mxu1 %v13012_v28  ;;  %v13023_v28 = vld [vmem:[%s16948_s1 + $0xb10] sm:$0xff]   ;;  %v15456_v19 = vrot.slane %v5567_v38, 3  ;;  %16997 = vst [vmem:[#allocation2_spill] sm:$0xff] %v15477_v47  ;;  %v15484_v30 = vcombine.high %v15477_v47, %v5203_v62  ;;  %v15490_v51 = vcombine.low %v15477_v47, %v5203_v62 }
 0x190   : > { %12166 = vmatprep.subr.bf16.mxu1 %v13014_v3  ;;  %6120 = vmatmul.mubr.bf16.vlgmr.msra.gmra.mrb[120].mxu0 %v5466_v21  ;;  %v11675_v3 = vpop.f32.mrb[50].mxu0  ;;  %v16960_v21 = vshll.u32 %v15481_v5, 16 }
 0x191   : > { %12133 = vmatpush3.bf16.msra.mxu0 %v13015_v40  ;;  %v5577_v40 = vor.u32 %v16976_v8, %v15412_v7  ;;  %v16957_v24 = vshll.u32 %v15490_v51, 16  ;;  %v5565_v7 = vrot.slane %v16968_v14, 1 }
 0x192   : > { %12134 = vmatprep.subr.bf16.mxu0 %v13017_v4  ;;  %6177 = vmatmul.mubr.bf16.vlgmr.msra.gmra.mrb[120].mxu1 %v5490_v60  ;;  %v5569_v4 = vor.u32 %v5567_v38, %v5489_v27  ;;  %v5557_v10 = vrot.slane %v16960_v21, 1  ;;  %v13030_v27 = vld [vmem:[%s16948_s1 + $0xbe0] sm:$0xff]   ;;  %v16970_v38 = vshrl.u32 %v15474_v45, 16 }
 0x193   : > { %12167 = vmatpush3.bf16.msra.mxu1 %v13016_v53  ;;  %v16966_v53 = vshll.u32 %v15484_v30, 16  ;;  %v5566_v60 = vsel %vm2501_vm1, %v5561_v41, %v5565_v7  ;;  %v11676_v41 = vpop.f32.mrb[51].mxu0 }
 0x194   : > { %12168 = vmatprep.subr.bf16.mxu1 %v13018_v29  ;;  %v5573_v29 = vrot.slane %v16957_v24, 1  ;;  %6127 = vmatprep.mubr.bf16.mxu0 %v5566_v60  ;;  %v11677_v26 = vadd.f32 %v11676_v41, %v11675_v3  ;;  %v13042_v60 = vld [vmem:[%s16948_s1 + $0xbf0] sm:$0xff]  }
 0x195   : > { %12135 = vmatpush3.bf16.msra.mxu0 %v13019_v25  ;;  %v5581_v25 = vrot.slane %v16966_v53, 1 }
 0x196   : > { %12136 = vmatprep.subr.bf16.mxu0 %v13021_v12  ;;  %v5574_v39 = vsel %vm2501_vm1, %v5569_v4, %v5573_v29  ;;  %v5643_v4 = vshll.u32 %v10628_v20, 16 }
 0x197   : > { %12169 = vmatpush3.bf16.msra.mxu1 %v13020_v43  ;;  %v5558_v43 = vsel %vm2501_vm1, %v5553_v50, %v5557_v10  ;;  %v5582_v12 = vsel %vm2501_vm1, %v5577_v40, %v5581_v25  ;;  %v11711_v40 = vadd.f32 %v11710_v13, %v11709_v34  ;;  %v16961_v50 = vshrl.u32 %v15481_v5, 16  ;;  %v11712_v13 = vpop.f32.mrb[52].mxu1 }
 0x198   : > { %12170 = vmatprep.subr.bf16.mxu1 %v13022_v32  ;;  %v13032_v32 = vld [vmem:[%s16948_s1 + $0xba0] sm:$0xff]   ;;  %6184 = vmatprep.mubr.bf16.mxu1 %v5582_v12  ;;  %v5645_v12 = vrot.slane %v5643_v4, 1  ;;  %v5192_v4 = vld [vmem:[%s13469_s12 + $0x90] sm:$0xff] }
 0x199   : > { %12137 = vmatpush3.bf16.msra.mxu0 %v13023_v28  ;;  %v13033_v28 = vld [vmem:[%s16948_s1 + $0xb68] sm:$0xff]   ;;  %v5617_v3 = vor.u32 %v16961_v50, %v5557_v10  ;;  %v13044_v10 = vld [vmem:[%s16948_s1 + $0xbb0] sm:$0xff]  }
 0x19a   : > { %12138 = vmatprep.subr.bf16.mxu0 %v13025_v18  ;;  %6128 = vmatmul.mubr.bf16.gmra.mrb[124].mxu0 %v5558_v43  ;;  %v13034_v18 = vld [vmem:[%s16948_s1 + $0xbe8] sm:$0xff]  }
 0x19b   : > { %12171 = vmatpush3.bf16.msra.mxu1 %v13024_v61  ;;  %v16967_v61 = vshrl.u32 %v15484_v30, 16 }
 0x19c   : > { %12172 = vmatprep.subr.bf16.mxu1 %v13026_v23  ;;  %6185 = vmatmul.mubr.bf16.gmra.mrb[124].mxu1 %v5574_v39  ;;  %v5625_v23 = vor.u32 %v16970_v38, %v5565_v7  ;;  %v10627_v7 = vcombine.low %v5207_v11, %v5207_v11 }
 0x19d   : > { %12139 = vmatpush3.bf16.msra.mxu0 %v13027_v2  ;;  %v5641_v62 = vor.u32 %v16967_v61, %v5581_v25  ;;  %v13038_v2 = vld [vmem:[%s16948_s1 + $0xba8] sm:$0xff]   ;;  %v16959_v25 = vshrl.u32 %v15490_v51, 16 }
 0x19e   : > { %12140 = vmatprep.subr.bf16.mxu0 %v13029_v55  ;;  %v5627_v55 = vshll.u32 %v10626_v37, 16 }
 0x19f   : > { %12173 = vmatpush3.bf16.msra.mxu1 %v13028_v31  ;;  %v10625_v31 = vcombine.low %v5206_v42, %v5206_v42  ;;  %v5633_v39 = vor.u32 %v16959_v25, %v5573_v29  ;;  %v5646_v11 = vsel %vm2501_vm1, %v5641_v62, %v5645_v12  ;;  %v13045_v29 = vld [vmem:[%s16948_s1 + $0xb78] sm:$0xff]   ;;  %v11678_v62 = vpop.f32.mrb[52].mxu0 }
 0x1a0   : > { %12174 = vmatprep.subr.bf16.mxu1 %v13030_v27  ;;  %v13041_v27 = vld [vmem:[%s16948_s1 + $0xb70] sm:$0xff]   ;;  %v5629_v43 = vrot.slane %v5627_v55, 1  ;;  %6192 = vmatprep.mubr.bf16.mxu1 %v5646_v11 }
 0x1a1   : > { %12141 = vmatpush3.bf16.msra.mxu0 %v13031_v16  ;;  %v15554_v16 = vadd.f32 %v11711_v40, %v11677_v26  ;;  %v5619_v34 = vshll.u32 %v10625_v31, 16  ;;  %v5184_v26 = vld [vmem:[%s13469_s12 + $0x50] sm:$0xff]  ;;  %v11679_v40 = vpop.f32.mrb[53].mxu0  ;;  %v11713_v31 = vpop.f32.mrb[53].mxu1 }
 0x1a2   : > { %12142 = vmatprep.subr.bf16.mxu0 %v13033_v28  ;;  %v13043_v28 = vld [vmem:[%s16948_s1 + $0xb30] sm:$0xff]   ;;  %v5630_v42 = vsel %vm2501_vm1, %v5625_v23, %v5629_v43  ;;  %v13046_v23 = vld [vmem:[%s16948_s1 + $0xbf8] sm:$0xff]   ;;  %v6519_v43 = vrot.slane %v5475_v15, 4 }
 0x1a3   : > { %12175 = vmatpush3.bf16.msra.mxu1 %v13032_v32  ;;  %v5635_v32 = vshll.u32 %v10627_v7, 16  ;;  %6135 = vmatprep.mubr.bf16.mxu0 %v5630_v42  ;;  %v5188_v55 = vld [vmem:[%s13469_s12 + $0x70] sm:$0xff] }
 0x1a4   : > { %12176 = vmatprep.subr.bf16.mxu1 %v13034_v18  ;;  %v5621_v18 = vrot.slane %v5619_v34, 1  ;;  %v15589_v7 = vld [vmem:[%s13469_s12 + $0xb0] sm:$0xff]  ;;  %v11681_v34 = vpop.f32.mrb[54].mxu0  ;;  %v10605_v12 = vcombine.low %v5184_v26, %v5188_v55 }
 0x1a5   : > { %12143 = vmatpush3.bf16.msra.mxu0 %v13037_v52  ;;  %v5637_v41 = vrot.slane %v5635_v32, 1  ;;  %v13047_v52 = vld [vmem:[%s16948_s1 + $0xb38] sm:$0xff]   ;;  %v15594_v32 = vcombine.high %v5192_v4, %v15589_v7  ;;  %v15600_v42 = vcombine.low %v5192_v4, %v15589_v7  ;;  %v11682_v11 = vpop.f32.mrb[55].mxu0 }
 0x1a6   : > { %12144 = vmatprep.subr.bf16.mxu0 %v13041_v27  ;;  %v5622_v37 = vsel %vm2501_vm1, %v5617_v3, %v5621_v18  ;;  %v11680_v27 = vadd.f32 %v11679_v40, %v11678_v62  ;;  %v11714_v3 = vadd.f32 %v11713_v31, %v11712_v13  ;;  %v5189_v18 = vld [vmem:[%s13469_s12 + $0x78] sm:$0xff]  ;;  %v11683_v15 = vadd.f32 %v11682_v11, %v11681_v34 }
 0x1a7   : > { %12177 = vmatpush3.bf16.msra.mxu1 %v13038_v2  ;;  %6136 = vmatmul.mubr.bf16.gmra.mrb[128].mxu0 %v5622_v37  ;;  %v5638_v20 = vsel %vm2501_vm1, %v5633_v39, %v5637_v41  ;;  %v13048_v2 = vld [vmem:[%s16948_s1 + $0xbb8] sm:$0xff]   ;;  %v10606_v39 = vcombine.high %v5184_v26, %v5188_v55  ;;  %v16958_v26 = vshll.u32 %v15594_v32, 16  ;;  %v5504_v4 = vshrl.u32 %v10605_v12, 16 }
 0x1a8   : > { %12178 = vmatprep.subr.bf16.mxu1 %v13042_v60  ;;  %6193 = vmatmul.mubr.bf16.gmra.mrb[128].mxu1 %v5638_v20  ;;  %v11715_v60 = vpop.f32.mrb[54].mxu1  ;;  %v15605_v36 = vadd.f32 %v11714_v3, %v11680_v27  ;;  %v5506_v27 = vshll.u32 %v10605_v12, 16 }
 0x1a9   : > { %12145 = vmatpush3.bf16.msra.mxu0 %v13043_v28  ;;  %v5185_v28 = vld [vmem:[%s13469_s12 + $0x58] sm:$0xff]  ;;  %v11716_v41 = vpop.f32.mrb[55].mxu1  ;;  %v5516_v62 = vshrl.u32 %v10606_v39, 16  ;;  %v5518_v13 = vshll.u32 %v10606_v39, 16  ;;  %v5525_v34 = vrot.slane %v16958_v26, 1  ;;  %v16963_v39 = vshll.u32 %v15600_v42, 16 }
 0x1aa   : > { %12146 = vmatprep.subr.bf16.mxu0 %v13045_v29  ;;  %v15603_v29 = vld [vmem:[%s13469_s12 + $0xb8] sm:$0xff]  ;;  %v10607_v37 = vcombine.low %v5185_v28, %v5189_v18  ;;  %v10608_v20 = vcombine.high %v5185_v28, %v5189_v18  ;;  %v13050_v28 = vld [vmem:[%s16948_s1 + $0xcc0] sm:$0xff]   ;;  %v5508_v11 = vrot.slane %v5506_v27, 1 }
 0x1ab   : > { %12179 = vmatpush3.bf16.msra.mxu1 %v13044_v10  ;;  %v5193_v10 = vld [vmem:[%s13469_s12 + $0x98] sm:$0xff]  ;;  %v5520_v3 = vrot.slane %v5518_v13, 1  ;;  %v5513_v26 = vrot.slane %v16963_v39, 1 }
 0x1ac   : > { %12180 = vmatprep.subr.bf16.mxu1 %v13046_v23  ;;  %v15607_v23 = vpop.f32.mrb[56].mxu0  ;;  %v15611_v40 = vcombine.high %v5193_v10, %v15603_v29  ;;  %v5540_v31 = vshrl.u32 %v10608_v20, 16  ;;  %v5542_v55 = vshll.u32 %v10608_v20, 16  ;;  %v15624_v24 = vcombine.low %v5193_v10, %v15603_v29 }
 0x1ad   : > { %12147 = vmatpush3.bf16.msra.mxu0 %v13047_v52  ;;  %v13049_v52 = vld [vmem:[%s16948_s1 + $0xc40] sm:$0xff]   ;;  %v5528_v20 = vshrl.u32 %v10607_v37, 16  ;;  %v5521_v12 = vor.u32 %v5520_v3, %v5516_v62  ;;  %v5530_v25 = vshll.u32 %v10607_v37, 16  ;;  %v5509_v21 = vor.u32 %v5508_v11, %v5504_v4  ;;  %v13053_v37 = vld [vmem:[%s16948_s1 + $0xc48] sm:$0xff]   ;;  %v13058_v4 = vld [vmem:[%s16948_s1 + $0xcd0] sm:$0xff]  }
 0x1ae   : > { %12200 = vmatprep.subr.bf16.mxu0 %v13049_v52  ;;  %v5544_v18 = vrot.slane %v5542_v55, 1  ;;  %v16962_v50 = vshll.u32 %v15624_v24, 16  ;;  %v13051_v55 = vld [vmem:[%s16948_s1 + $0xc00] sm:$0xff]   ;;  %v11717_v10 = vadd.f32 %v11716_v41, %v11715_v60  ;;  %v16972_v39 = vshrl.u32 %v15611_v40, 16 }
 0x1af   : > { %12181 = vmatpush3.bf16.msra.mxu1 %v13048_v2  ;;  %v16964_v2 = vshll.u32 %v15611_v40, 16  ;;  %v5526_v27 = vsel %vm2501_vm1, %v5521_v12, %v5525_v34  ;;  %v5532_v62 = vrot.slane %v5530_v25, 1  ;;  %v13052_v3 = vld [vmem:[%s16948_s1 + $0xc80] sm:$0xff]   ;;  %v5514_v25 = vsel %vm2501_vm1, %v5509_v21, %v5513_v26  ;;  %v5204_v12 = vld [vmem:[%s13469_s12 + $0xf0] sm:$0xff] }
 0x1b0   : > { %12234 = vmatprep.subr.bf16.mxu1 %v13050_v28  ;;  %v5545_v52 = vor.u32 %v5544_v18, %v5540_v31  ;;  %v15642_v31 = vor.u32 %v6519_v43, %v15471_v22  ;;  %6233 = vmatprep.mubr.bf16.mxu0 %v5526_v27  ;;  %v5537_v41 = vrot.slane %v16962_v50, 1  ;;  %v15650_v28 = vadd.f32 %v11717_v10, %v11683_v15  ;;  %v13054_v18 = vld [vmem:[%s16948_s1 + $0xcc8] sm:$0xff]   ;;  %v15663_v15 = vld [vmem:[%s13469_s12 + $0xd0] sm:$0xff]  ;;  %v5205_v50 = vld [vmem:[%s13469_s12 + $0xf8] sm:$0xff] }
 0x1b1   : > { %v5549_v13 = vrot.slane %v16964_v2, 1  ;;  %v13055_v22 = vld [vmem:[%s16948_s1 + $0xc08] sm:$0xff]   ;;  %6234 = vmatmul.mubr.bf16.vlgmr.msra.gmra.mrb[132].mxu0 %v5514_v25  ;;  %v5533_v43 = vor.u32 %v5532_v62, %v5528_v20  ;;  %v5583_v10 = vshrl.u32 %v15600_v42, 16  ;;  %v15672_v62 = vcombine.high %v15663_v15, %v5204_v12  ;;  %v11718_v25 = vpop.f32.mrb[56].mxu1 }
 0x1b2   : > { %12201 = vmatpush3.bf16.msra.mxu0 %v13051_v55  ;;  %v15675_v55 = vcombine.low %v15663_v15, %v5204_v12  ;;  %v13056_v27 = vld [vmem:[%s16948_s1 + $0xc88] sm:$0xff]   ;;  %v11719_v61 = vpop.f32.mrb[57].mxu1  ;;  %v5599_v14 = vshrl.u32 %v15624_v24, 16 }
 0x1b3   : > { %v5550_v60 = vsel %vm2501_vm1, %v5545_v52, %v5549_v13  ;;  %v16965_v52 = vshrl.u32 %v15594_v32, 16  ;;  %v5538_v20 = vsel %vm2501_vm1, %v5533_v43, %v5537_v41  ;;  %12202 = vmatprep.subr.bf16.mxu0 %v13053_v37  ;;  %v15685_v37 = vrot.slane %v5583_v10, 3  ;;  %v11721_v54 = vpop.f32.mrb[58].mxu1 }
 0x1b4   : > { %6290 = vmatprep.mubr.bf16.mxu1 %v5550_v60  ;;  %v13057_v60 = vld [vmem:[%s16948_s1 + $0xc50] sm:$0xff]   ;;  %v16969_v21 = vshll.u32 %v15672_v62, 16  ;;  %v5585_v12 = vor.u32 %v5583_v10, %v5513_v26  ;;  %v16971_v11 = vshll.u32 %v15675_v55, 16  ;;  %v15728_v8 = vrot.slane %v5599_v14, 3  ;;  %v11722_v47 = vpop.f32.mrb[59].mxu1 }
 0x1b5   : > { %6291 = vmatmul.mubr.bf16.vlgmr.msra.gmra.mrb[132].mxu1 %v5538_v20  ;;  %v5593_v43 = vor.u32 %v16965_v52, %v5525_v34  ;;  %v15693_v20 = vld [vmem:[%s13469_s12 + $0xd8] sm:$0xff]  ;;  %v13059_v26 = vld [vmem:[%s16948_s1 + $0xc10] sm:$0xff]   ;;  %v11685_v52 = vpop.f32.mrb[57].mxu0 }
 0x1b6   : > { %12235 = vmatpush3.bf16.msra.mxu1 %v13052_v3  ;;  %12203 = vmatpush3.bf16.msra.mxu0 %v13055_v22  ;;  %v15698_v34 = vcombine.high %v15693_v20, %v5205_v50  ;;  %v15704_v3 = vcombine.low %v15693_v20, %v5205_v50  ;;  %v5597_v10 = vrot.slane %v16969_v21, 1  ;;  %v5589_v2 = vrot.slane %v16971_v11, 1  ;;  %v13060_v22 = vld [vmem:[%s16948_s1 + $0xc90] sm:$0xff]   ;;  %v11687_v38 = vpop.f32.mrb[58].mxu0 }
 0x1b7   : > { %12236 = vmatprep.subr.bf16.mxu1 %v13054_v18  ;;  %12204 = vmatprep.subr.bf16.mxu0 %v13057_v60  ;;  %v5609_v18 = vor.u32 %v16972_v39, %v5549_v13  ;;  %v11686_v50 = vadd.f32 %v11685_v52, %v15607_v23  ;;  %v13061_v60 = vld [vmem:[%s16948_s1 + $0xc58] sm:$0xff]   ;;  %v11720_v39 = vadd.f32 %v11719_v61, %v11718_v25  ;;  %v11688_v56 = vpop.f32.mrb[59].mxu0  ;;  %v16982_v25 = vshrl.u32 %v15672_v62, 16 }
 0x1b8   : > { %v16980_v53 = vshll.u32 %v15698_v34, 16  ;;  %v16979_v21 = vshll.u32 %v15704_v3, 16  ;;  %v5598_v13 = vsel %vm2501_vm1, %v5593_v43, %v5597_v10  ;;  %v5590_v11 = vsel %vm2501_vm1, %v5585_v12, %v5589_v2 }
 0x1b9   : > { %6241 = vmatprep.mubr.bf16.mxu0 %v5598_v13  ;;  %v5601_v52 = vor.u32 %v5599_v14, %v5537_v41  ;;  %v11689_v43 = vadd.f32 %v11688_v56, %v11687_v38  ;;  %v11723_v61 = vadd.f32 %v11722_v47, %v11721_v54  ;;  %v13063_v14 = vld [vmem:[%s16948_s1 + $0xc18] sm:$0xff]   ;;  %v5208_v47 = vld [vmem:[%s13469_s12 + $0x110] sm:$0x11]  ;;  %v16983_v38 = vshrl.u32 %v15698_v34, 16  ;;  %v11740_v13 = vpop.f32.mrb[60].mxu0 }
 0x1ba   : > { %12237 = vmatpush3.bf16.msra.mxu1 %v13056_v27  ;;  %v5613_v23 = vrot.slane %v16980_v53, 1  ;;  %v5605_v9 = vrot.slane %v16979_v21, 1  ;;  %6242 = vmatmul.mubr.bf16.gmra.mrb[136].mxu0 %v5590_v11  ;;  %v15730_v27 = vadd.f32 %v11720_v39, %v11686_v50  ;;  %v16981_v39 = vshrl.u32 %v15675_v55, 16  ;;  %v13064_v54 = vld [vmem:[%s16948_s1 + $0xc98] sm:$0xff]   ;;  %v13068_v50 = vld [vmem:[%s16948_s1 + $0xce0] sm:$0xff]   ;;  %v11774_v21 = vpop.f32.mrb[60].mxu1 }
 0x1bb   : > { %12238 = vmatprep.subr.bf16.mxu1 %v13058_v4  ;;  %v13062_v4 = vld [vmem:[%s16948_s1 + $0xcd8] sm:$0xff]   ;;  %12205 = vmatpush3.bf16.msra.mxu0 %v13059_v26  ;;  %v15742_v56 = vadd.f32 %v11723_v61, %v11689_v43  ;;  %v10630_v11 = vcombine.high %v5208_v47, %v5208_v47  ;;  %v10629_v26 = vcombine.low %v5208_v47, %v5208_v47 }
 0x1bc   : > { %v5614_v41 = vsel %vm2501_vm1, %v5609_v18, %v5613_v23  ;;  %v5606_v12 = vsel %vm2501_vm1, %v5601_v52, %v5605_v9  ;;  %12206 = vmatprep.subr.bf16.mxu0 %v13061_v60  ;;  %v13067_v18 = vld [vmem:[%s16948_s1 + $0xc60] sm:$0xff]   ;;  %v5657_v52 = vor.u32 %v16982_v25, %v5597_v10  ;;  %v5649_v60 = vor.u32 %v16981_v39, %v5589_v2  ;;  %v11775_v25 = vpop.f32.mrb[61].mxu1 }
 0x1bd   : > { %6298 = vmatprep.mubr.bf16.mxu1 %v5614_v41  ;;  %v5659_v43 = vshll.u32 %v10630_v11, 16  ;;  %v5651_v61 = vshll.u32 %v10629_v26, 16  ;;  %v5209_v41 = vld [vmem:[%s13469_s12 + $0x118] sm:$0x11]  ;;  %v5673_v10 = vor.u32 %v16983_v38, %v5613_v23  ;;  %v13071_v2 = vld [vmem:[%s16948_s1 + $0xca0] sm:$0xff]   ;;  %v11741_v11 = vpop.f32.mrb[61].mxu0 }
 0x1be   : > { %12239 = vmatpush3.bf16.msra.mxu1 %v13060_v22  ;;  %v5663_v22 = vshrl.u32 %v15704_v3, 16  ;;  %v10631_v47 = vcombine.low %v5209_v41, %v5209_v41  ;;  %v11742_v39 = vadd.f32 %v11741_v11, %v11740_v13  ;;  %v11743_v13 = vpop.f32.mrb[62].mxu0  ;;  %v13078_v11 = vld [vmem:[%s16948_s1 + $0xcf0] sm:$0xff]  }
 0x1bf   : > { %6299 = vmatmul.mubr.bf16.gmra.mrb[136].mxu1 %v5606_v12  ;;  %12240 = vmatprep.subr.bf16.mxu1 %v13062_v4  ;;  %v10632_v12 = vcombine.high %v5209_v41, %v5209_v41  ;;  %v13070_v4 = vld [vmem:[%s16948_s1 + $0xc20] sm:$0xff]   ;;  %v5661_v53 = vrot.slane %v5659_v43, 1  ;;  %v13073_v43 = vld [vmem:[%s16948_s1 + $0xc68] sm:$0xff]  }
 0x1c0   : > { %12207 = vmatpush3.bf16.msra.mxu0 %v13063_v14  ;;  %v5653_v14 = vrot.slane %v5651_v61, 1  ;;  %v5665_v26 = vor.u32 %v5663_v22, %v5605_v9  ;;  %v11776_v61 = vadd.f32 %v11775_v25, %v11774_v21  ;;  %v3283_v38 = vadd.f32 %v11742_v39, %v15506_v6  ;;  %v13074_v9 = vld [vmem:[%s16948_s1 + $0xce8] sm:$0xff]   ;;  %v11744_v39 = vpop.f32.mrb[63].mxu0 }
 0x1c1   : > { %12208 = vmatprep.subr.bf16.mxu0 %v13067_v18  ;;  %v5667_v18 = vshll.u32 %v10631_v47, 16  ;;  %v11777_v47 = vpop.f32.mrb[62].mxu1  ;;  %v13076_v6 = vld [vmem:[%s16948_s1 + $0xca8] sm:$0xff]  }
 0x1c2   : > { %12241 = vmatpush3.bf16.msra.mxu1 %v13064_v54  ;;  %v5675_v54 = vshll.u32 %v10632_v12, 16  ;;  %v5654_v23 = vsel %vm2501_vm1, %v5649_v60, %v5653_v14  ;;  %v11778_v60 = vpop.f32.mrb[63].mxu1  ;;  %v11745_v14 = vadd.f32 %v11744_v39, %v11743_v13 }
 0x1c3   : > { %12242 = vmatprep.subr.bf16.mxu1 %v13068_v50  ;;  %v5662_v50 = vsel %vm2501_vm1, %v5657_v52, %v5661_v53  ;;  %v5669_v12 = vrot.slane %v5667_v18, 1  ;;  %v13075_v53 = vld [vmem:[%s16948_s1 + $0xc28] sm:$0xff]   ;;  %v3340_v52 = vadd.f32 %v11776_v61, %v3283_v38 }
 0x1c4   : > { %12209 = vmatpush3.bf16.msra.mxu0 %v13070_v4  ;;  %6249 = vmatprep.mubr.bf16.mxu0 %v5662_v50  ;;  %v5677_v41 = vrot.slane %v5675_v54, 1  ;;  %v13077_v4 = vld [vmem:[%s16948_s1 + $0xc70] sm:$0xff]   ;;  %v11746_v54 = vpop.f32.mrb[64].mxu0  ;;  %v3286_v18 = vadd.f32 %v11745_v14, %v15554_v16  ;;  %v13081_v16 = vld [vmem:[%s16948_s1 + $0xc78] sm:$0xff]   ;;  %v6321_v14 = vld [vmem:[%s13469_s12 + $0x40] sm:$0x88] }
 0x1c5   : > { %6250 = vmatmul.mubr.bf16.gmra.mrb[140].mxu0 %v5654_v23  ;;  %12210 = vmatprep.subr.bf16.mxu0 %v13073_v43  ;;  %v5670_v25 = vsel %vm2501_vm1, %v5665_v26, %v5669_v12  ;;  %v15794_v38 = vadd.f32 %v3340_v52, %v15261_v35  ;;  %v13079_v43 = vld [vmem:[%s16948_s1 + $0xc30] sm:$0xff]   ;;  %v11747_v50 = vpop.f32.mrb[65].mxu0  ;;  %v13083_v52 = vld [vmem:[%s16948_s1 + $0xc38] sm:$0xff]   ;;  %v17000_v26 = vshll.u32 %v15387_v57, 16  ;;  %v13087_v57 = vld [vmem:[%s16948_s1 + $0xd00] sm:$0xff]  }
 0x1c6   : > { %12243 = vmatpush3.bf16.msra.mxu1 %v13071_v2  ;;  %v5678_v21 = vsel %vm2501_vm1, %v5673_v10, %v5677_v41  ;;  %v11779_v2 = vadd.f32 %v11778_v60, %v11777_v47  ;;  %v13080_v23 = vld [vmem:[%s16948_s1 + $0xcb0] sm:$0xff]   ;;  %v11748_v61 = vadd.f32 %v11747_v50, %v11746_v54  ;;  %v11749_v41 = vpop.f32.mrb[66].mxu0 }
 0x1c7   : > { %12244 = vmatprep.subr.bf16.mxu1 %v13074_v9  ;;  %6306 = vmatprep.mubr.bf16.mxu1 %v5678_v21  ;;  %v11780_v9 = vpop.f32.mrb[64].mxu1  ;;  %v11750_v21 = vpop.f32.mrb[67].mxu0  ;;  %v6507_v35 = vrot.slane %v17000_v26, 4 }
 0x1c8   : > { %12211 = vmatpush3.bf16.msra.mxu0 %v13075_v53  ;;  %6307 = vmatmul.mubr.bf16.gmra.mrb[140].mxu1 %v5670_v25  ;;  %v3343_v12 = vadd.f32 %v11779_v2, %v3286_v18  ;;  %v3291_v47 = vadd.f32 %v11748_v61, %v15605_v36  ;;  %v13082_v53 = vld [vmem:[%s16948_s1 + $0xcf8] sm:$0xff]   ;;  %v11781_v39 = vpop.f32.mrb[65].mxu1  ;;  %v15831_v2 = vld [vmem:[%s13469_s12 + $0x60] sm:$0xff]  ;;  %v6322_v18 = vld [vmem:[%s13469_s12 + $0x48] sm:$0x88] }
 0x1c9   : > { %12212 = vmatprep.subr.bf16.mxu0 %v13077_v4  ;;  %v13084_v36 = vld [vmem:[%s16948_s1 + $0xcb8] sm:$0xff]   ;;  %v11782_v60 = vadd.f32 %v11781_v39, %v11780_v9  ;;  %v11783_v4 = vpop.f32.mrb[66].mxu1  ;;  %v10826_v54 = vcombine.high %v6321_v14, %v15831_v2 }
 0x1ca   : > { %12245 = vmatpush3.bf16.msra.mxu1 %v13076_v6  ;;  %v15820_v25 = vadd.f32 %v3343_v12, %v15281_v59  ;;  %v11751_v6 = vadd.f32 %v11750_v21, %v11749_v41  ;;  %v15839_v41 = vld [vmem:[%s13469_s12 + $0x68] sm:$0xff] }
 0x1cb   : > { %12246 = vmatprep.subr.bf16.mxu1 %v13078_v11  ;;  %v10825_v11 = vcombine.low %v6321_v14, %v15831_v2  ;;  %v3348_v61 = vadd.f32 %v11782_v60, %v3291_v47  ;;  %v10827_v12 = vcombine.low %v6322_v18, %v15839_v41  ;;  %v6511_v21 = vshrl.u32 %v10826_v54, 16  ;;  %v13086_v47 = vld [vmem:[%s16948_s1 + $0xdc0] sm:$0xff]  }
 0x1cc   : > { %12213 = vmatpush3.bf16.msra.mxu0 %v13079_v43  ;;  %v3294_v59 = vadd.f32 %v11751_v6, %v15650_v28  ;;  %v16998_v43 = vshrl.u32 %v15391_v17, 16  ;;  %v16999_v28 = vshll.u32 %v15391_v17, 16 }
 0x1cd   : > { %12214 = vmatprep.subr.bf16.mxu0 %v13081_v16  ;;  %v10828_v16 = vcombine.high %v6322_v18, %v15839_v41  ;;  %v6499_v39 = vshrl.u32 %v10825_v11, 16  ;;  %v15852_v60 = vadd.f32 %v3348_v61, %v15308_v44  ;;  %v6523_v61 = vshrl.u32 %v10827_v12, 16 }
 0x1ce   : > { %12247 = vmatpush3.bf16.msra.mxu1 %v13080_v23  ;;  %v6542_v50 = vrot.slane %v16998_v43, 3  ;;  %v11784_v23 = vpop.f32.mrb[67].mxu1  ;;  %v6543_v9 = vrot.slane %v16999_v28, 4  ;;  %v6513_v43 = vrot.slane %v6511_v21, 3  ;;  %v15862_v21 = vor.u32 %v6507_v35, %v15454_v0 }
 0x1cf   : > { %12248 = vmatprep.subr.bf16.mxu1 %v13082_v53  ;;  %v13085_v53 = vld [vmem:[%s16948_s1 + $0xd40] sm:$0xff]   ;;  %v11785_v6 = vadd.f32 %v11784_v23, %v11783_v4  ;;  %v6535_v14 = vshrl.u32 %v10828_v16, 16  ;;  %v6538_v18 = vshll.u32 %v10828_v16, 16  ;;  %v6502_v23 = vshll.u32 %v10825_v11, 16 }
 0x1d0   : > { %12215 = vmatpush3.bf16.msra.mxu0 %v13083_v52  ;;  %v6514_v52 = vshll.u32 %v10826_v54, 16  ;;  %v15854_v17 = vor.u32 %v6543_v9, %v6542_v50  ;;  %v6526_v16 = vshll.u32 %v10827_v12, 16  ;;  %v11752_v50 = vpop.f32.mrb[68].mxu0 }
 0x1d1   : > { %12268 = vmatprep.subr.bf16.mxu0 %v13085_v53  ;;  %v3351_v13 = vadd.f32 %v11785_v6, %v3294_v59  ;;  %v6537_v54 = vrot.slane %v6535_v14, 3  ;;  %v6540_v4 = vrot.slane %v6538_v18, 4  ;;  %v6504_v53 = vrot.slane %v6502_v23, 4  ;;  %v11753_v26 = vpop.f32.mrb[69].mxu0 }
 0x1d2   : > { %12249 = vmatpush3.bf16.msra.mxu1 %v13084_v36  ;;  %v6516_v28 = vrot.slane %v6514_v52, 4  ;;  %v6501_v36 = vrot.slane %v6499_v39, 3  ;;  %v17001_v59 = vshll.u32 %v15401_v1, 16  ;;  %v6528_v11 = vrot.slane %v6526_v16, 4  ;;  %v13088_v1 = vld [vmem:[%s16948_s1 + $0xd80] sm:$0xff]   ;;  %v13089_v39 = vld [vmem:[%s16948_s1 + $0xd48] sm:$0xff]  }
 0x1d3   : > { %12302 = vmatprep.subr.bf16.mxu1 %v13086_v47  ;;  %v15859_v44 = vadd.f32 %v3351_v13, %v15317_v48  ;;  %v6541_v9 = vor.u32 %v6540_v4, %v6537_v54  ;;  %v6525_v13 = vrot.slane %v6523_v61, 3  ;;  %v11754_v12 = vadd.f32 %v11753_v26, %v11752_v50  ;;  %v11786_v47 = vpop.f32.mrb[68].mxu1  ;;  %v13094_v26 = vld [vmem:[%s16948_s1 + $0xdd0] sm:$0xff]  }
 0x1d4   : > { %v6517_v10 = vor.u32 %v6516_v28, %v6513_v43  ;;  %v6531_v52 = vrot.slane %v17001_v59, 4  ;;  %v6505_v0 = vor.u32 %v6504_v53, %v6501_v36  ;;  %v13091_v28 = vld [vmem:[%s16948_s1 + $0xd08] sm:$0xff]   ;;  %v11787_v54 = vpop.f32.mrb[69].mxu1 }
 0x1d5   : > { %v6545_v6 = vsel %vm1311_vm0, %v6541_v9, %v15854_v17  ;;  %v6529_v14 = vor.u32 %v6528_v11, %v6525_v13  ;;  %v3299_v18 = vadd.f32 %v11754_v12, %v15730_v27  ;;  %v13092_v27 = vld [vmem:[%s16948_s1 + $0xd88] sm:$0xff]   ;;  %v11788_v61 = vadd.f32 %v11787_v54, %v11786_v47  ;;  %v11789_v16 = vpop.f32.mrb[70].mxu1  ;;  %v13093_v9 = vld [vmem:[%s16948_s1 + $0xd50] sm:$0xff]  }
 0x1d6   : > { %v6521_v48 = vsel %vm1311_vm0, %v6517_v10, %v15642_v31  ;;  %v15874_v35 = vor.u32 %v6531_v52, %v15456_v19  ;;  %v11755_v10 = vpop.f32.mrb[70].mxu0  ;;  %7195 = vmatprep.mubr.bf16.mxu1 %v6545_v6  ;;  %v6509_v43 = vsel %vm1311_vm0, %v6505_v0, %v15862_v21  ;;  %v13090_v19 = vld [vmem:[%s16948_s1 + $0xdc8] sm:$0xff]   ;;  %v11790_v50 = vpop.f32.mrb[71].mxu1  ;;  %v13095_v12 = vld [vmem:[%s16948_s1 + $0xd10] sm:$0xff]   ;;  %v17008_v54 = vshrl.u32 %v15490_v51, 16 }
 0x1d7   : > { %7138 = vmatprep.mubr.bf16.mxu0 %v6521_v48  ;;  %v11756_v36 = vpop.f32.mrb[71].mxu0  ;;  %v3356_v59 = vadd.f32 %v11788_v61, %v3299_v18  ;;  %v11791_v52 = vadd.f32 %v11790_v50, %v11789_v16  ;;  %v17002_v48 = vshrl.u32 %v15474_v45, 16  ;;  %v13096_v0 = vld [vmem:[%s16948_s1 + $0xd90] sm:$0xff]   ;;  %v13098_v18 = vld [vmem:[%s16948_s1 + $0xdd8] sm:$0xff]  }
 0x1d8   : > { %7139 = vmatmul.mubr.bf16.vlgmr.msra.gmra.mrb[144].mxu0 %v6509_v43  ;;  %v6533_v4 = vsel %vm1311_vm0, %v6529_v14, %v15874_v35  ;;  %v11757_v23 = vadd.f32 %v11756_v36, %v11755_v10  ;;  %v17005_v10 = vshll.u32 %v15484_v30, 16  ;;  %v13100_v16 = vld [vmem:[%s16948_s1 + $0xd98] sm:$0xff]  }
 0x1d9   : > { %7196 = vmatmul.mubr.bf16.vlgmr.msra.gmra.mrb[144].mxu1 %v6533_v4  ;;  %12269 = vmatpush3.bf16.msra.mxu0 %v13087_v57  ;;  %v6598_v13 = vrot.slane %v17002_v48, 3  ;;  %v15906_v57 = vadd.f32 %v3356_v59, %v15340_v33  ;;  %v17004_v33 = vshrl.u32 %v15484_v30, 16  ;;  %v17007_v30 = vshll.u32 %v15481_v5, 16  ;;  %v13102_v59 = vld [vmem:[%s16948_s1 + $0xde0] sm:$0xff]  }
 0x1da   : > { %12303 = vmatpush3.bf16.msra.mxu1 %v13088_v1  ;;  %12270 = vmatprep.subr.bf16.mxu0 %v13089_v39  ;;  %v3302_v53 = vadd.f32 %v11757_v23, %v15742_v56  ;;  %v17003_v56 = vshll.u32 %v15474_v45, 16  ;;  %v13097_v1 = vld [vmem:[%s16948_s1 + $0xd58] sm:$0xff]   ;;  %v6607_v47 = vrot.slane %v17005_v10, 4  ;;  %v17009_v23 = vshll.u32 %v15490_v51, 16  ;;  %v13101_v51 = vld [vmem:[%s16948_s1 + $0xd60] sm:$0xff]   ;;  %v15989_v10 = vld [vmem:[%s13469_s12 + $0x108] sm:$0xff] }
 0x1db   : > { %12304 = vmatprep.subr.bf16.mxu1 %v13090_v19  ;;  %v6606_v39 = vrot.slane %v17004_v33, 3  ;;  %v17006_v19 = vshrl.u32 %v15481_v5, 16  ;;  %v6595_v36 = vrot.slane %v17007_v30, 4  ;;  %v15982_v33 = vld [vmem:[%s13469_s12 + $0x100] sm:$0xff] }
 0x1dc   : > { %v3359_v11 = vadd.f32 %v11791_v52, %v3302_v53  ;;  %v6599_v6 = vrot.slane %v17003_v56, 4  ;;  %v6603_v61 = vrot.slane %v17009_v23, 4  ;;  %v13103_v52 = vld [vmem:[%s16948_s1 + $0xd20] sm:$0xff]   ;;  %v13105_v56 = vld [vmem:[%s16948_s1 + $0xd68] sm:$0xff]  }
 0x1dd   : > { %12271 = vmatpush3.bf16.msra.mxu0 %v13091_v28  ;;  %v15931_v43 = vor.u32 %v6607_v47, %v6606_v39  ;;  %v6594_v28 = vrot.slane %v17006_v19, 3  ;;  %v10834_v39 = vcombine.high %v15982_v33, %v15982_v33  ;;  %v10836_v19 = vcombine.high %v15989_v10, %v15989_v10 }
 0x1de   : > { %12305 = vmatpush3.bf16.msra.mxu1 %v13092_v27  ;;  %v15924_v14 = vadd.f32 %v3359_v11, %v15348_v63  ;;  %12272 = vmatprep.subr.bf16.mxu0 %v13093_v9  ;;  %v15926_v45 = vor.u32 %v6599_v6, %v6598_v13  ;;  %v6602_v63 = vrot.slane %v17008_v54, 3  ;;  %v13099_v27 = vld [vmem:[%s16948_s1 + $0xd18] sm:$0xff]   ;;  %v13106_v6 = vld [vmem:[%s16948_s1 + $0xde8] sm:$0xff]   ;;  %v10835_v54 = vcombine.low %v15989_v10, %v15989_v10 }
 0x1df   : > { %12306 = vmatprep.subr.bf16.mxu1 %v13094_v26  ;;  %v6609_v5 = vsel %vm1311_vm0, %v15854_v17, %v15931_v43  ;;  %v15953_v50 = vor.u32 %v6595_v36, %v6594_v28  ;;  %v13109_v28 = vld [vmem:[%s16948_s1 + $0xd28] sm:$0xff]  }
 0x1e0   : > { %v6601_v4 = vsel %vm1311_vm0, %v15642_v31, %v15926_v45  ;;  %v15955_v9 = vor.u32 %v6603_v61, %v6602_v63  ;;  %7203 = vmatprep.mubr.bf16.mxu1 %v6609_v5  ;;  %v6636_v63 = vshrl.u32 %v10834_v39, 16  ;;  %v6654_v5 = vshrl.u32 %v10836_v19, 16 }
 0x1e1   : > { %12273 = vmatpush3.bf16.msra.mxu0 %v13095_v12  ;;  %7146 = vmatprep.mubr.bf16.mxu0 %v6601_v4  ;;  %v11842_v53 = vpop.f32.mrb[72].mxu1  ;;  %v6597_v17 = vsel %vm1311_vm0, %v15862_v21, %v15953_v50  ;;  %v13104_v21 = vld [vmem:[%s16948_s1 + $0xda0] sm:$0xff]   ;;  %v6639_v4 = vshll.u32 %v10834_v39, 16 }
 0x1e2   : > { %v11808_v31 = vpop.f32.mrb[72].mxu0  ;;  %12307 = vmatpush3.bf16.msra.mxu1 %v13096_v0  ;;  %12274 = vmatprep.subr.bf16.mxu0 %v13097_v1  ;;  %v11843_v48 = vpop.f32.mrb[73].mxu1  ;;  %v6605_v13 = vsel %vm1311_vm0, %v15874_v35, %v15955_v9 }
 0x1e3   : > { %12308 = vmatprep.subr.bf16.mxu1 %v13098_v18  ;;  %v11809_v26 = vpop.f32.mrb[73].mxu0  ;;  %7147 = vmatmul.mubr.bf16.gmra.mrb[148].mxu0 %v6597_v17  ;;  %v11844_v12 = vadd.f32 %v11843_v48, %v11842_v53  ;;  %v11845_v1 = vpop.f32.mrb[74].mxu1  ;;  %v10833_v18 = vcombine.low %v15982_v33, %v15982_v33  ;;  %v6638_v53 = vrot.slane %v6636_v63, 3  ;;  %v6641_v17 = vrot.slane %v6639_v4, 4  ;;  %v13113_v48 = vld [vmem:[%s16948_s1 + $0xd70] sm:$0xff]  }
 0x1e4   : > { %v11810_v11 = vadd.f32 %v11809_v26, %v11808_v31  ;;  %7204 = vmatmul.mubr.bf16.gmra.mrb[148].mxu1 %v6605_v13  ;;  %v11811_v0 = vpop.f32.mrb[74].mxu0  ;;  %v11846_v36 = vpop.f32.mrb[75].mxu1  ;;  %v6656_v13 = vrot.slane %v6654_v5, 3  ;;  %v17011_v63 = vshll.u32 %v15594_v32, 16 }
 0x1e5   : > { %12275 = vmatpush3.bf16.msra.mxu0 %v13099_v27  ;;  %v11812_v47 = vpop.f32.mrb[75].mxu0  ;;  %v13110_v27 = vld [vmem:[%s16948_s1 + $0xda8] sm:$0xff]   ;;  %v11847_v23 = vadd.f32 %v11846_v36, %v11845_v1  ;;  %v6627_v61 = vshrl.u32 %v10833_v18, 16  ;;  %v6630_v31 = vshll.u32 %v10833_v18, 16  ;;  %v6648_v1 = vshll.u32 %v10835_v54, 16  ;;  %v13116_v36 = vld [vmem:[%s16948_s1 + $0xdb0] sm:$0xff]  }
 0x1e6   : > { %12309 = vmatpush3.bf16.msra.mxu1 %v13100_v16  ;;  %12276 = vmatprep.subr.bf16.mxu0 %v13101_v51  ;;  %v15984_v35 = vadd.f32 %v11844_v12, %v11810_v11  ;;  %v11813_v30 = vadd.f32 %v11812_v47, %v11811_v0  ;;  %v6657_v16 = vshll.u32 %v10836_v19, 16  ;;  %v6645_v51 = vshrl.u32 %v10835_v54, 16  ;;  %v13115_v47 = vld [vmem:[%s16948_s1 + $0xd30] sm:$0xff]  }
 0x1e7   : > { %12310 = vmatprep.subr.bf16.mxu1 %v13102_v59  ;;  %v6629_v26 = vrot.slane %v6627_v61, 3  ;;  %v6632_v12 = vrot.slane %v6630_v31, 4  ;;  %v6642_v0 = vor.u32 %v6641_v17, %v6638_v53  ;;  %v17010_v18 = vshrl.u32 %v15594_v32, 16  ;;  %v13119_v61 = vld [vmem:[%s16948_s1 + $0xd38] sm:$0xff]  }
 0x1e8   : > { %v16003_v59 = vadd.f32 %v11847_v23, %v11813_v30  ;;  %v6659_v11 = vrot.slane %v6657_v16, 4  ;;  %v6650_v30 = vrot.slane %v6648_v1, 4  ;;  %v6567_v4 = vrot.slane %v17011_v63, 4  ;;  %v13120_v31 = vld [vmem:[%s16948_s1 + $0xdb8] sm:$0xff]  }
 0x1e9   : > { %12277 = vmatpush3.bf16.msra.mxu0 %v13103_v52  ;;  %v6647_v52 = vrot.slane %v6645_v51, 3  ;;  %v6633_v39 = vor.u32 %v6632_v12, %v6629_v26  ;;  %v6643_v19 = vsel %vm1311_vm0, %v15926_v45, %v6642_v0  ;;  %v13117_v45 = vld [vmem:[%s16948_s1 + $0xd78] sm:$0xff]   ;;  %v17013_v32 = vshll.u32 %v15611_v40, 16  ;;  %v6323_v51 = vld [vmem:[%s13469_s12 + $0x50] sm:$0x88] }
 0x1ea   : > { %12311 = vmatpush3.bf16.msra.mxu1 %v13104_v21  ;;  %12278 = vmatprep.subr.bf16.mxu0 %v13105_v56  ;;  %v13114_v21 = vld [vmem:[%s16948_s1 + $0xdf0] sm:$0xff]   ;;  %v6660_v56 = vor.u32 %v6659_v11, %v6656_v13  ;;  %v6324_v53 = vld [vmem:[%s13469_s12 + $0x58] sm:$0x88]  ;;  %v17014_v17 = vshll.u32 %v15600_v42, 16  ;;  %v17015_v12 = vshll.u32 %v15624_v24, 16  ;;  %v13121_v42 = vld [vmem:[%s16948_s1 + $0xe40] sm:$0xff]  }
 0x1eb   : > { %12312 = vmatprep.subr.bf16.mxu1 %v13106_v6  ;;  %v6566_v6 = vrot.slane %v17010_v18, 3  ;;  %7154 = vmatprep.mubr.bf16.mxu0 %v6643_v19  ;;  %v6634_v54 = vsel %vm1311_vm0, %v15953_v50, %v6633_v39  ;;  %v17012_v50 = vshrl.u32 %v15611_v40, 16  ;;  %v6591_v5 = vrot.slane %v17013_v32, 4  ;;  %v13122_v39 = vld [vmem:[%s16948_s1 + $0xec0] sm:$0xff]  }
 0x1ec   : > { %7155 = vmatmul.mubr.bf16.gmra.mrb[152].mxu0 %v6634_v54  ;;  %v6555_v26 = vrot.slane %v17014_v17, 4  ;;  %v13123_v32 = vld [vmem:[%s16948_s1 + $0xe00] sm:$0xff]  }
 0x1ed   : > { %12279 = vmatpush3.bf16.msra.mxu0 %v13109_v28  ;;  %v6661_v28 = vsel %vm1311_vm0, %v15931_v43, %v6660_v56  ;;  %v13118_v43 = vld [vmem:[%s16948_s1 + $0xdf8] sm:$0xff]   ;;  %v6590_v23 = vrot.slane %v17012_v50, 3  ;;  %v16063_v0 = vor.u32 %v6567_v4, %v6566_v6 }
 0x1ee   : > { %12313 = vmatpush3.bf16.msra.mxu1 %v13110_v27  ;;  %12280 = vmatprep.subr.bf16.mxu0 %v13113_v48  ;;  %v6651_v27 = vor.u32 %v6650_v30, %v6647_v52  ;;  %v16050_v48 = vld [vmem:[%s13469_s12 + $0x70] sm:$0xff]  ;;  %v6579_v52 = vrot.slane %v17015_v12, 4  ;;  %v16069_v56 = vor.u32 %v6555_v26, %v15685_v37  ;;  %v13125_v26 = vld [vmem:[%s16948_s1 + $0xe48] sm:$0xff]  }
 0x1ef   : > { %12314 = vmatprep.subr.bf16.mxu1 %v13114_v21  ;;  %7211 = vmatprep.mubr.bf16.mxu1 %v6661_v28  ;;  %v10829_v40 = vcombine.low %v6323_v51, %v16050_v48  ;;  %v10830_v13 = vcombine.high %v6323_v51, %v16050_v48  ;;  %v16066_v21 = vor.u32 %v6591_v5, %v6590_v23  ;;  %v13124_v51 = vld [vmem:[%s16948_s1 + $0xe80] sm:$0xff]  }
 0x1f0   : > { %v6652_v16 = vsel %vm1311_vm0, %v15955_v9, %v6651_v27  ;;  %v16055_v9 = vld [vmem:[%s13469_s12 + $0x78] sm:$0xff] }
 0x1f1   : > { %12281 = vmatpush3.bf16.msra.mxu0 %v13115_v47  ;;  %7212 = vmatmul.mubr.bf16.gmra.mrb[152].mxu1 %v6652_v16  ;;  %v10831_v11 = vcombine.low %v6324_v53, %v16055_v9  ;;  %v10832_v1 = vcombine.high %v6324_v53, %v16055_v9  ;;  %v11814_v47 = vpop.f32.mrb[76].mxu0  ;;  %v6559_v24 = vshrl.u32 %v10830_v13, 16  ;;  %v6562_v18 = vshll.u32 %v10830_v13, 16 }
 0x1f2   : > { %12315 = vmatpush3.bf16.msra.mxu1 %v13116_v36  ;;  %12282 = vmatprep.subr.bf16.mxu0 %v13117_v45  ;;  %v6547_v19 = vshrl.u32 %v10829_v40, 16  ;;  %v6550_v30 = vshll.u32 %v10829_v40, 16  ;;  %v11848_v36 = vpop.f32.mrb[76].mxu1  ;;  %v11815_v53 = vpop.f32.mrb[77].mxu0 }
 0x1f3   : > { %12316 = vmatprep.subr.bf16.mxu1 %v13118_v43  ;;  %v6583_v6 = vshrl.u32 %v10832_v1, 16  ;;  %v6586_v28 = vshll.u32 %v10832_v1, 16  ;;  %v6571_v54 = vshrl.u32 %v10831_v11, 16  ;;  %v6574_v45 = vshll.u32 %v10831_v11, 16  ;;  %v11849_v17 = vpop.f32.mrb[77].mxu1 }
 0x1f4   : > { %v6561_v63 = vrot.slane %v6559_v24, 3  ;;  %v6564_v37 = vrot.slane %v6562_v18, 4  ;;  %v6549_v4 = vrot.slane %v6547_v19, 3  ;;  %v6552_v27 = vrot.slane %v6550_v30, 4  ;;  %v11851_v1 = vpop.f32.mrb[78].mxu1 }
 0x1f5   : > { %12283 = vmatpush3.bf16.msra.mxu0 %v13119_v61  ;;  %v6585_v43 = vrot.slane %v6583_v6, 3  ;;  %v6588_v50 = vrot.slane %v6586_v28, 4  ;;  %v6573_v23 = vrot.slane %v6571_v54, 3  ;;  %v6576_v61 = vrot.slane %v6574_v45, 4  ;;  %v11852_v24 = vpop.f32.mrb[79].mxu1  ;;  %v13127_v54 = vld [vmem:[%s16948_s1 + $0xe08] sm:$0xff]  }
 0x1f6   : > { %12317 = vmatpush3.bf16.msra.mxu1 %v13120_v31  ;;  %12336 = vmatprep.subr.bf16.mxu0 %v13121_v42  ;;  %v6565_v5 = vor.u32 %v6564_v37, %v6561_v63  ;;  %v6553_v16 = vor.u32 %v6552_v27, %v6549_v4  ;;  %v16078_v31 = vor.u32 %v6579_v52, %v15728_v8  ;;  %v11817_v42 = vpop.f32.mrb[78].mxu0  ;;  %v17016_v45 = vshrl.u32 %v15672_v62, 16  ;;  %v13128_v37 = vld [vmem:[%s16948_s1 + $0xe88] sm:$0xff]  }
 0x1f7   : > { %12370 = vmatprep.subr.bf16.mxu1 %v13122_v39  ;;  %v6589_v40 = vor.u32 %v6588_v50, %v6585_v43  ;;  %v6577_v13 = vor.u32 %v6576_v61, %v6573_v23  ;;  %v11816_v11 = vadd.f32 %v11815_v53, %v11814_v47  ;;  %v11850_v12 = vadd.f32 %v11849_v17, %v11848_v36  ;;  %v11818_v39 = vpop.f32.mrb[79].mxu0  ;;  %v13126_v36 = vld [vmem:[%s16948_s1 + $0xec8] sm:$0xff]   ;;  %v13130_v17 = vld [vmem:[%s16948_s1 + $0xed0] sm:$0xff]  }
 0x1f8   : > { %v6569_v8 = vsel %vm1311_vm0, %v6565_v5, %v16063_v0  ;;  %v6557_v52 = vsel %vm1311_vm0, %v6553_v16, %v16069_v56  ;;  %v11819_v47 = vadd.f32 %v11818_v39, %v11817_v42  ;;  %v11853_v28 = vadd.f32 %v11852_v24, %v11851_v1 }
 0x1f9   : > { %7252 = vmatprep.mubr.bf16.mxu0 %v6569_v8  ;;  %v6593_v18 = vsel %vm1311_vm0, %v6589_v40, %v16066_v21  ;;  %v6581_v19 = vsel %vm1311_vm0, %v6577_v13, %v16078_v31  ;;  %v16094_v30 = vadd.f32 %v11850_v12, %v11816_v11  ;;  %v11820_v6 = vpop.f32.mrb[80].mxu0  ;;  %v6614_v63 = vrot.slane %v17016_v45, 3  ;;  %v13131_v13 = vld [vmem:[%s16948_s1 + $0xe10] sm:$0xff]   ;;  %v13134_v45 = vld [vmem:[%s16948_s1 + $0xed8] sm:$0xff]  }
 0x1fa   : > { %7309 = vmatprep.mubr.bf16.mxu1 %v6593_v18  ;;  %7253 = vmatmul.mubr.bf16.vlgmr.msra.gmra.mrb[156].mxu0 %v6557_v52  ;;  %v17017_v4 = vshll.u32 %v15672_v62, 16  ;;  %v17018_v43 = vshrl.u32 %v15675_v55, 16  ;;  %v17019_v23 = vshll.u32 %v15675_v55, 16  ;;  %v16113_v5 = vadd.f32 %v11853_v28, %v11819_v47  ;;  %v11854_v16 = vpop.f32.mrb[80].mxu1  ;;  %v11821_v1 = vpop.f32.mrb[81].mxu0  ;;  %v13133_v47 = vld [vmem:[%s16948_s1 + $0xe58] sm:$0xff]  }
 0x1fb   : > { %7310 = vmatmul.mubr.bf16.vlgmr.msra.gmra.mrb[156].mxu1 %v6581_v19  ;;  %12337 = vmatpush3.bf16.msra.mxu0 %v13123_v32  ;;  %v13129_v32 = vld [vmem:[%s16948_s1 + $0xe50] sm:$0xff]   ;;  %v17020_v55 = vshrl.u32 %v15698_v34, 16  ;;  %v17021_v40 = vshll.u32 %v15698_v34, 16  ;;  %v11855_v8 = vpop.f32.mrb[81].mxu1  ;;  %v6618_v52 = vrot.slane %v5663_v22, 3  ;;  %v11822_v39 = vadd.f32 %v11821_v1, %v11820_v6  ;;  %v11823_v19 = vpop.f32.mrb[82].mxu0 }
 0x1fc   : > { %v6615_v27 = vrot.slane %v17017_v4, 4  ;;  %v6610_v50 = vrot.slane %v17018_v43, 3  ;;  %v6611_v61 = vrot.slane %v17019_v23, 4  ;;  %12371 = vmatpush3.bf16.msra.mxu1 %v13124_v51  ;;  %12338 = vmatprep.subr.bf16.mxu0 %v13125_v26  ;;  %v13132_v34 = vld [vmem:[%s16948_s1 + $0xe90] sm:$0xff]   ;;  %v11856_v24 = vadd.f32 %v11855_v8, %v11854_v16  ;;  %v11824_v22 = vpop.f32.mrb[83].mxu0  ;;  %v13136_v43 = vld [vmem:[%s16948_s1 + $0xe98] sm:$0xff]  }
 0x1fd   : > { %12372 = vmatprep.subr.bf16.mxu1 %v13126_v36  ;;  %v6622_v51 = vrot.slane %v17020_v55, 3  ;;  %v6623_v26 = vrot.slane %v17021_v40, 4  ;;  %v16185_v8 = vld [vmem:[%s13469_s12 + $0x118] sm:$0xff] }
 0x1fe   : > { %v16118_v53 = vor.u32 %v6615_v27, %v6614_v63  ;;  %v16120_v62 = vor.u32 %v6611_v61, %v6610_v50  ;;  %v16153_v6 = vadd.f32 %v11856_v24, %v11822_v39  ;;  %v16170_v50 = vld [vmem:[%s13469_s12 + $0x110] sm:$0xff]  ;;  %v10840_v39 = vcombine.high %v16185_v8, %v16185_v8 }
 0x1ff   : > { %12339 = vmatpush3.bf16.msra.mxu0 %v13127_v54  ;;  %v16138_v42 = vor.u32 %v6623_v26, %v6622_v51  ;;  %v11825_v54 = vadd.f32 %v11824_v22, %v11823_v19  ;;  %v10838_v16 = vcombine.high %v16170_v50, %v16170_v50  ;;  %v13140_v51 = vld [vmem:[%s16948_s1 + $0xee0] sm:$0xff]   ;;  %v10839_v24 = vcombine.low %v16185_v8, %v16185_v8 }
 0x200   : > { %v6617_v11 = vsel %vm1311_vm0, %v16063_v0, %v16118_v53  ;;  %v6613_v12 = vsel %vm1311_vm0, %v16069_v56, %v16120_v62  ;;  %12373 = vmatpush3.bf16.msra.mxu1 %v13128_v37  ;;  %v17022_v0 = vshll.u32 %v15704_v3, 16  ;;  %v11857_v56 = vpop.f32.mrb[82].mxu1  ;;  %12340 = vmatprep.subr.bf16.mxu0 %v13129_v32  ;;  %v6693_v22 = vshll.u32 %v10840_v39, 16 }
 0x201   : > { %7260 = vmatprep.mubr.bf16.mxu0 %v6617_v11  ;;  %12374 = vmatprep.subr.bf16.mxu1 %v13130_v17  ;;  %v6625_v36 = vsel %vm1311_vm0, %v16066_v21, %v16138_v42  ;;  %v11858_v28 = vpop.f32.mrb[83].mxu1  ;;  %v13135_v21 = vld [vmem:[%s16948_s1 + $0xe18] sm:$0xff]   ;;  %v13139_v17 = vld [vmem:[%s16948_s1 + $0xe60] sm:$0xff]   ;;  %v6672_v11 = vshrl.u32 %v10838_v16, 16 }
 0x202   : > { %v6619_v18 = vrot.slane %v17022_v0, 4  ;;  %7261 = vmatmul.mubr.bf16.gmra.mrb[160].mxu0 %v6613_v12  ;;  %7317 = vmatprep.mubr.bf16.mxu1 %v6625_v36  ;;  %v11859_v37 = vadd.f32 %v11858_v28, %v11857_v56  ;;  %v6675_v12 = vshll.u32 %v10838_v16, 16  ;;  %v6690_v36 = vshrl.u32 %v10840_v39, 16  ;;  %v13143_v28 = vld [vmem:[%s16948_s1 + $0xea0] sm:$0xff]  }
 0x203   : > { %v11876_v63 = vpop.f32.mrb[84].mxu0  ;;  %12341 = vmatpush3.bf16.msra.mxu0 %v13131_v13  ;;  %v11910_v4 = vpop.f32.mrb[84].mxu1 }
 0x204   : > { %v16155_v3 = vor.u32 %v6619_v18, %v6618_v52  ;;  %12375 = vmatpush3.bf16.msra.mxu1 %v13132_v34  ;;  %12342 = vmatprep.subr.bf16.mxu0 %v13133_v47  ;;  %v11877_v23 = vpop.f32.mrb[85].mxu0  ;;  %v11911_v61 = vpop.f32.mrb[85].mxu1  ;;  %v16172_v32 = vadd.f32 %v11859_v37, %v11825_v54  ;;  %v13142_v52 = vld [vmem:[%s16948_s1 + $0xe20] sm:$0xff]   ;;  %v6674_v18 = vrot.slane %v6672_v11, 3  ;;  %v6677_v19 = vrot.slane %v6675_v12, 4  ;;  %v13147_v12 = vld [vmem:[%s16948_s1 + $0xe28] sm:$0xff]  }
 0x205   : > { %12376 = vmatprep.subr.bf16.mxu1 %v13134_v45  ;;  %v11879_v55 = vpop.f32.mrb[86].mxu0  ;;  %v11878_v40 = vadd.f32 %v11877_v23, %v11876_v63  ;;  %v11912_v26 = vadd.f32 %v11911_v61, %v11910_v4  ;;  %v11913_v13 = vpop.f32.mrb[86].mxu1  ;;  %v6681_v54 = vshrl.u32 %v10839_v24, 16  ;;  %v6684_v45 = vshll.u32 %v10839_v24, 16  ;;  %v13145_v63 = vld [vmem:[%s16948_s1 + $0xe68] sm:$0xff]   ;;  %v16202_v4 = vld [vmem:[%s13469_s12 + $0x80] sm:$0xff] }
 0x206   : > { %v6621_v27 = vsel %vm1311_vm0, %v16078_v31, %v16155_v3  ;;  %v10837_v31 = vcombine.low %v16170_v50, %v16170_v50  ;;  %v6678_v37 = vor.u32 %v6677_v19, %v6674_v18  ;;  %v6695_v23 = vrot.slane %v6693_v22, 4  ;;  %v13149_v18 = vld [vmem:[%s16948_s1 + $0xe70] sm:$0xff]  }
 0x207   : > { %7318 = vmatmul.mubr.bf16.gmra.mrb[160].mxu1 %v6621_v27  ;;  %12343 = vmatpush3.bf16.msra.mxu0 %v13135_v21  ;;  %v4302_v0 = vadd.f32 %v11878_v40, %v15984_v35  ;;  %v11034_v27 = vcombine.high %v15831_v2, %v16202_v4  ;;  %v6683_v61 = vrot.slane %v6681_v54, 3  ;;  %v6686_v16 = vrot.slane %v6684_v45, 4  ;;  %v13146_v2 = vld [vmem:[%s16948_s1 + $0xee8] sm:$0xff]   ;;  %v11880_v40 = vpop.f32.mrb[87].mxu0  ;;  %v13153_v54 = vld [vmem:[%s16948_s1 + $0xe78] sm:$0xff]  }
 0x208   : > { %v6663_v34 = vshrl.u32 %v10837_v31, 16  ;;  %v6666_v1 = vshll.u32 %v10837_v31, 16  ;;  %12377 = vmatpush3.bf16.msra.mxu1 %v13136_v43  ;;  %12344 = vmatprep.subr.bf16.mxu0 %v13139_v17  ;;  %v6692_v43 = vrot.slane %v6690_v36, 3  ;;  %v6679_v31 = vsel %vm1311_vm0, %v16118_v53, %v6678_v37  ;;  %v13154_v37 = vld [vmem:[%s16948_s1 + $0xef8] sm:$0xff]  }
 0x209   : > { %12378 = vmatprep.subr.bf16.mxu1 %v13140_v51  ;;  %v4359_v21 = vadd.f32 %v11912_v26, %v4302_v0  ;;  %7268 = vmatprep.mubr.bf16.mxu0 %v6679_v31  ;;  %v6687_v11 = vor.u32 %v6686_v16, %v6683_v61  ;;  %v11881_v53 = vadd.f32 %v11880_v40, %v11879_v55  ;;  %v13293_v16 = vld [vmem:[%s13469_s12 + $0x60] sm:$0xff] }
 0x20a   : > { %v6665_v56 = vrot.slane %v6663_v34, 3  ;;  %v6668_v47 = vrot.slane %v6666_v1, 4  ;;  %v6696_v26 = vor.u32 %v6695_v23, %v6692_v43  ;;  %v11914_v34 = vpop.f32.mrb[87].mxu1  ;;  %v13156_v43 = vld [vmem:[%s16948_s1 + $0xeb8] sm:$0xff]   ;;  %v11033_v31 = vcombine.low %v13293_v16, %v16202_v4  ;;  %v13168_v16 = vld [vmem:[%s16948_s1 + $0xf90] sm:$0xff]  }
 0x20b   : > { %12345 = vmatpush3.bf16.msra.mxu0 %v13142_v52  ;;  %v16211_v51 = vadd.f32 %v4359_v21, %v15794_v38  ;;  %v13148_v38 = vld [vmem:[%s16948_s1 + $0xea8] sm:$0xff]   ;;  %v11882_v1 = vpop.f32.mrb[88].mxu0  ;;  %v6688_v55 = vsel %vm1311_vm0, %v16155_v3, %v6687_v11  ;;  %v4305_v0 = vadd.f32 %v11881_v53, %v16003_v59  ;;  %v13151_v59 = vld [vmem:[%s16948_s1 + $0xe30] sm:$0xff]   ;;  %v11916_v3 = vpop.f32.mrb[88].mxu1  ;;  %v13158_v53 = vld [vmem:[%s16948_s1 + $0xfc0] sm:$0xff]  }
 0x20c   : > { %v6669_v35 = vor.u32 %v6668_v47, %v6665_v56  ;;  %12379 = vmatpush3.bf16.msra.mxu1 %v13143_v28  ;;  %12346 = vmatprep.subr.bf16.mxu0 %v13145_v63  ;;  %v16223_v52 = vld [vmem:[%s13469_s12 + $0x88] sm:$0xff]  ;;  %v6697_v24 = vsel %vm1311_vm0, %v16138_v42, %v6696_v26  ;;  %v13152_v47 = vld [vmem:[%s16948_s1 + $0xeb0] sm:$0xff]   ;;  %v11917_v63 = vpop.f32.mrb[89].mxu1 }
 0x20d   : > { %12380 = vmatprep.subr.bf16.mxu1 %v13146_v2  ;;  %v11036_v39 = vcombine.high %v15839_v41, %v16223_v52  ;;  %7325 = vmatprep.mubr.bf16.mxu1 %v6697_v24  ;;  %v13150_v41 = vld [vmem:[%s16948_s1 + $0xef0] sm:$0xff]   ;;  %v13294_v2 = vld [vmem:[%s13469_s12 + $0x68] sm:$0xff] }
 0x20e   : > { %v6670_v17 = vsel %vm1311_vm0, %v16120_v62, %v6669_v35  ;;  %v11915_v62 = vadd.f32 %v11914_v34, %v11913_v13  ;;  %v11883_v13 = vpop.f32.mrb[89].mxu0  ;;  %v11919_v35 = vpop.f32.mrb[90].mxu1  ;;  %v11035_v40 = vcombine.low %v13294_v2, %v16223_v52  ;;  %v13161_v24 = vld [vmem:[%s16948_s1 + $0xf48] sm:$0xff]  }
 0x20f   : > { %7269 = vmatmul.mubr.bf16.gmra.mrb[164].mxu0 %v6670_v17  ;;  %v11884_v19 = vadd.f32 %v11883_v13, %v11882_v1  ;;  %v11885_v42 = vpop.f32.mrb[90].mxu0  ;;  %7326 = vmatmul.mubr.bf16.gmra.mrb[164].mxu1 %v6688_v55 }
 0x210   : > { %12347 = vmatpush3.bf16.msra.mxu0 %v13147_v12  ;;  %7933 = vmatprep.mubr.bf16.mxu0 %v11034_v27  ;;  %v4362_v56 = vadd.f32 %v11915_v62, %v4305_v0  ;;  %v11886_v22 = vpop.f32.mrb[91].mxu0  ;;  %v11920_v27 = vpop.f32.mrb[91].mxu1 }
 0x211   : > { %12381 = vmatpush3.bf16.msra.mxu1 %v13148_v38  ;;  %12348 = vmatprep.subr.bf16.mxu0 %v13149_v18  ;;  %v4310_v36 = vadd.f32 %v11884_v19, %v16094_v30  ;;  %v11887_v45 = vadd.f32 %v11886_v22, %v11885_v42  ;;  %v11918_v30 = vadd.f32 %v11917_v63, %v11916_v3  ;;  %v13159_v38 = vld [vmem:[%s16948_s1 + $0xf00] sm:$0xff]   ;;  %v13164_v3 = vld [vmem:[%s16948_s1 + $0xf88] sm:$0xff]  }
 0x212   : > { %12382 = vmatprep.subr.bf16.mxu1 %v13150_v41  ;;  %7990 = vmatprep.mubr.bf16.mxu1 %v11036_v39  ;;  %v16246_v28 = vadd.f32 %v4362_v56, %v15820_v25  ;;  %v13155_v25 = vld [vmem:[%s16948_s1 + $0xe38] sm:$0xff]   ;;  %v11921_v61 = vadd.f32 %v11920_v27, %v11919_v35  ;;  %v17023_v41 = vcombine.high %v15375_v58, %v15468_v46  ;;  %v17024_v56 = vld [vmem:[#allocation2_spill] sm:$0xff] }
 0x213   : > { %v4313_v21 = vadd.f32 %v11887_v45, %v16113_v5  ;;  %v4367_v23 = vadd.f32 %v11918_v30, %v4310_v36  ;;  %v11888_v17 = vpop.f32.mrb[92].mxu0  ;;  %v13157_v5 = vld [vmem:[%s16948_s1 + $0xf40] sm:$0xff]  }
 0x214   : > { %12349 = vmatpush3.bf16.msra.mxu0 %v13151_v59  ;;  %v11889_v26 = vpop.f32.mrb[93].mxu0  ;;  %v17025_v59 = vcombine.high %v15384_v49, %v17024_v56  ;;  %v13295_v35 = vld [vmem:[%s13469_s12 + $0xe0] sm:$0xff] }
 0x215   : > { %12383 = vmatpush3.bf16.msra.mxu1 %v13152_v47  ;;  %12350 = vmatprep.subr.bf16.mxu0 %v13153_v54  ;;  %v16269_v11 = vadd.f32 %v4367_v23, %v15852_v60  ;;  %v4370_v12 = vadd.f32 %v11921_v61, %v4313_v21  ;;  %v11890_v4 = vadd.f32 %v11889_v26, %v11888_v17  ;;  %v11891_v34 = vpop.f32.mrb[94].mxu0  ;;  %v13160_v60 = vld [vmem:[%s16948_s1 + $0xf80] sm:$0xff]   ;;  %v13167_v21 = vld [vmem:[%s16948_s1 + $0xf10] sm:$0xff]   ;;  %v13296_v23 = vld [vmem:[%s13469_s12 + $0xe8] sm:$0xff] }
 0x216   : > { %12384 = vmatprep.subr.bf16.mxu1 %v13154_v37  ;;  %v11892_v39 = vpop.f32.mrb[95].mxu0  ;;  %v13166_v37 = vld [vmem:[%s16948_s1 + $0xfd0] sm:$0xff]   ;;  %v13170_v26 = vld [vmem:[%s16948_s1 + $0xfd8] sm:$0xff]  }
 0x217   : > { %v11922_v62 = vpop.f32.mrb[92].mxu1  ;;  %v16278_v1 = vadd.f32 %v4370_v12, %v15859_v44  ;;  %v4318_v52 = vadd.f32 %v11890_v4, %v16153_v6  ;;  %v11893_v55 = vadd.f32 %v11892_v39, %v11891_v34  ;;  %v13162_v44 = vld [vmem:[%s16948_s1 + $0xfc8] sm:$0xff]   ;;  %v13172_v4 = vld [vmem:[%s16948_s1 + $0xf98] sm:$0xff]  }
 0x218   : > { %12351 = vmatpush3.bf16.msra.mxu0 %v13155_v25  ;;  %v11923_v0 = vpop.f32.mrb[93].mxu1  ;;  %v13163_v6 = vld [vmem:[%s16948_s1 + $0xf08] sm:$0xff]   ;;  %v11050_v25 = vcombine.high %v13295_v35, %v15982_v33 }
 0x219   : > { %12385 = vmatpush3.bf16.msra.mxu1 %v13156_v43  ;;  %12404 = vmatprep.subr.bf16.mxu0 %v13157_v5  ;;  %v11924_v18 = vadd.f32 %v11923_v0, %v11922_v62  ;;  %v11925_v13 = vpop.f32.mrb[94].mxu1  ;;  %v4321_v19 = vadd.f32 %v11893_v55, %v16172_v32  ;;  %v13165_v32 = vld [vmem:[%s16948_s1 + $0xf50] sm:$0xff]  }
 0x21a   : > { %12438 = vmatprep.subr.bf16.mxu1 %v13158_v53  ;;  %v11926_v42 = vpop.f32.mrb[95].mxu1  ;;  %v16356_v0 = vld [vmem:[%s13469_s12 + $0x90] sm:$0xff] }
 0x21b   : > { %7934 = vmatmul.mubr.bf16.vlgmr.msra.gmra.mrb[168].mxu0 %v11033_v31  ;;  %v4375_v47 = vadd.f32 %v11924_v18, %v4318_v52  ;;  %v11927_v36 = vadd.f32 %v11926_v42, %v11925_v13  ;;  %v17026_v31 = vcombine.low %v15375_v58, %v15468_v46  ;;  %v13171_v46 = vld [vmem:[%s16948_s1 + $0xf18] sm:$0xff]   ;;  %v11051_v52 = vcombine.low %v13296_v23, %v15989_v10  ;;  %v13175_v18 = vld [vmem:[%s16948_s1 + $0xf20] sm:$0xff]  }
 0x21c   : > { %7991 = vmatmul.mubr.bf16.vlgmr.msra.gmra.mrb[168].mxu1 %v11035_v40  ;;  %12405 = vmatpush3.bf16.msra.mxu0 %v13159_v38  ;;  %v13169_v40 = vld [vmem:[%s16948_s1 + $0xf58] sm:$0xff]   ;;  %v11049_v38 = vcombine.low %v13295_v35, %v15982_v33  ;;  %v11038_v33 = vcombine.high %v16050_v48, %v16356_v0 }
 0x21d   : > { %12439 = vmatpush3.bf16.msra.mxu1 %v13160_v60  ;;  %7941 = vmatprep.mubr.bf16.mxu0 %v17023_v41  ;;  %v16307_v45 = vadd.f32 %v4375_v47, %v15906_v57  ;;  %v4378_v63 = vadd.f32 %v11927_v36, %v4321_v19  ;;  %v11052_v57 = vcombine.high %v13296_v23, %v15989_v10  ;;  %v13173_v60 = vld [vmem:[%s16948_s1 + $0xf60] sm:$0xff]   ;;  %v16364_v10 = vld [vmem:[%s13469_s12 + $0x98] sm:$0xff]  ;;  %v13178_v47 = vld [vmem:[%s16948_s1 + $0xfe8] sm:$0xff]  }
 0x21e   : > { %12406 = vmatprep.subr.bf16.mxu0 %v13161_v24  ;;  %7998 = vmatprep.mubr.bf16.mxu1 %v17025_v59  ;;  %v13174_v24 = vld [vmem:[%s16948_s1 + $0xfe0] sm:$0xff]   ;;  %v11040_v13 = vcombine.high %v16055_v9, %v16364_v10  ;;  %v13177_v59 = vld [vmem:[%s16948_s1 + $0xf68] sm:$0xff]  }
 0x21f   : > { %12440 = vmatprep.subr.bf16.mxu1 %v13162_v44  ;;  %v16320_v61 = vadd.f32 %v4378_v63, %v15924_v14  ;;  %v17027_v14 = vcombine.low %v15384_v49, %v17024_v56  ;;  %v13176_v19 = vld [vmem:[%s16948_s1 + $0xfa0] sm:$0xff]  }
 0x220   : > { %12407 = vmatpush3.bf16.msra.mxu0 %v13163_v6 }
 0x221   : > { %12441 = vmatpush3.bf16.msra.mxu1 %v13164_v3  ;;  %12408 = vmatprep.subr.bf16.mxu0 %v13165_v32  ;;  %v13179_v32 = vld [vmem:[%s16948_s1 + $0xf28] sm:$0xff]  }
 0x222   : > { %12442 = vmatprep.subr.bf16.mxu1 %v13166_v37  ;;  %v13180_v37 = vld [vmem:[%s16948_s1 + $0xfa8] sm:$0xff]  }
 0x223   : > { %v11944_v22 = vpop.f32.mrb[96].mxu0  ;;  %v11978_v54 = vpop.f32.mrb[96].mxu1  ;;  %7942 = vmatmul.mubr.bf16.gmra.mrb[172].mxu0 %v17026_v31 }
 0x224   : > { %v11945_v30 = vpop.f32.mrb[97].mxu0  ;;  %v11979_v43 = vpop.f32.mrb[97].mxu1  ;;  %12409 = vmatpush3.bf16.msra.mxu0 %v13167_v21  ;;  %7999 = vmatmul.mubr.bf16.gmra.mrb[172].mxu1 %v17027_v14  ;;  %v13185_v14 = vld [vmem:[%s16948_s1 + $0xf78] sm:$0xff]  }
 0x225   : > { %v11946_v27 = vadd.f32 %v11945_v30, %v11944_v22  ;;  %v11980_v17 = vadd.f32 %v11979_v43, %v11978_v54  ;;  %v11947_v2 = vpop.f32.mrb[98].mxu0  ;;  %v11981_v5 = vpop.f32.mrb[98].mxu1  ;;  %12443 = vmatpush3.bf16.msra.mxu1 %v13168_v16  ;;  %7949 = vmatprep.mubr.bf16.mxu0 %v11050_v25  ;;  %v13181_v25 = vld [vmem:[%s16948_s1 + $0xf70] sm:$0xff]  }
 0x226   : > { %v11948_v58 = vpop.f32.mrb[99].mxu0  ;;  %12410 = vmatprep.subr.bf16.mxu0 %v13169_v40  ;;  %8006 = vmatprep.mubr.bf16.mxu1 %v11052_v57  ;;  %v11982_v49 = vpop.f32.mrb[99].mxu1  ;;  %v13183_v57 = vld [vmem:[%s16948_s1 + $0xf30] sm:$0xff]  }
 0x227   : > { %v16337_v12 = vadd.f32 %v11980_v17, %v11946_v27  ;;  %v11949_v53 = vadd.f32 %v11948_v58, %v11947_v2  ;;  %12444 = vmatprep.subr.bf16.mxu1 %v13170_v26  ;;  %v11983_v34 = vadd.f32 %v11982_v49, %v11981_v5  ;;  %v13182_v27 = vld [vmem:[%s16948_s1 + $0xff0] sm:$0xff]   ;;  %v13186_v26 = vld [vmem:[%s16948_s1 + $0xff8] sm:$0xff]  }
 0x228   : > { %12411 = vmatpush3.bf16.msra.mxu0 %v13171_v46  ;;  %v13184_v17 = vld [vmem:[%s16948_s1 + $0xfb0] sm:$0xff]  }
 0x229   : > { %12445 = vmatpush3.bf16.msra.mxu1 %v13172_v4  ;;  %v16353_v55 = vadd.f32 %v11983_v34, %v11949_v53  ;;  %12412 = vmatprep.subr.bf16.mxu0 %v13173_v60  ;;  %v13187_v53 = vld [vmem:[%s16948_s1 + $0xf38] sm:$0xff]  }
 0x22a   : > { %12446 = vmatprep.subr.bf16.mxu1 %v13174_v24  ;;  %v13188_v34 = vld [vmem:[%s16948_s1 + $0xfb8] sm:$0xff]  }
 0x22b   : > { %v11950_v62 = vpop.f32.mrb[100].mxu0  ;;  %v11984_v39 = vpop.f32.mrb[100].mxu1  ;;  %7950 = vmatmul.mubr.bf16.gmra.mrb[176].mxu0 %v11049_v38  ;;  %v11037_v38 = vcombine.low %v16050_v48, %v16356_v0  ;;  %v13191_v48 = vld [vmem:[%s16948_s1 + $0x1000] sm:$0xff]  }
 0x22c   : > { %v11951_v44 = vpop.f32.mrb[101].mxu0  ;;  %v11985_v6 = vpop.f32.mrb[101].mxu1  ;;  %12413 = vmatpush3.bf16.msra.mxu0 %v13175_v18  ;;  %8007 = vmatmul.mubr.bf16.gmra.mrb[176].mxu1 %v11051_v52  ;;  %v11039_v52 = vcombine.low %v16055_v9, %v16364_v10  ;;  %v13192_v10 = vld [vmem:[%s16948_s1 + $0x1080] sm:$0xff]  }
 0x22d   : > { %v11952_v41 = vadd.f32 %v11951_v44, %v11950_v62  ;;  %v11986_v42 = vadd.f32 %v11985_v6, %v11984_v39  ;;  %v11953_v56 = vpop.f32.mrb[102].mxu0  ;;  %v11987_v3 = vpop.f32.mrb[102].mxu1  ;;  %12447 = vmatpush3.bf16.msra.mxu1 %v13176_v19  ;;  %8047 = vmatprep.mubr.bf16.mxu0 %v11038_v33  ;;  %v13189_v39 = vld [vmem:[%s16948_s1 + $0x1040] sm:$0xff]   ;;  %v13193_v6 = vld [vmem:[%s16948_s1 + $0x1048] sm:$0xff]  }
 0x22e   : > { %v11954_v22 = vpop.f32.mrb[103].mxu0  ;;  %12414 = vmatprep.subr.bf16.mxu0 %v13177_v59  ;;  %8104 = vmatprep.mubr.bf16.mxu1 %v11040_v13  ;;  %v11988_v63 = vpop.f32.mrb[103].mxu1  ;;  %v13190_v33 = vld [vmem:[%s16948_s1 + $0x10c0] sm:$0xff]   ;;  %v17028_v59 = vcombine.high %v15589_v7, %v15663_v15 }
 0x22f   : > { %v16377_v36 = vadd.f32 %v11986_v42, %v11952_v41  ;;  %v11955_v54 = vadd.f32 %v11954_v22, %v11953_v56  ;;  %12448 = vmatprep.subr.bf16.mxu1 %v13178_v47  ;;  %v11989_v30 = vadd.f32 %v11988_v63, %v11987_v3  ;;  %v13194_v56 = vld [vmem:[%s16948_s1 + $0x10c8] sm:$0xff]   ;;  %v17029_v22 = vcombine.high %v15603_v29, %v15693_v20 }
 0x230   : > { %12415 = vmatpush3.bf16.msra.mxu0 %v13179_v32  ;;  %v13195_v47 = vld [vmem:[%s16948_s1 + $0x1008] sm:$0xff]  }
 0x231   : > { %12449 = vmatpush3.bf16.msra.mxu1 %v13180_v37  ;;  %v16391_v43 = vadd.f32 %v11989_v30, %v11955_v54  ;;  %12416 = vmatprep.subr.bf16.mxu0 %v13181_v25  ;;  %v13196_v63 = vld [vmem:[%s16948_s1 + $0x1088] sm:$0xff]  }
 0x232   : > { %12450 = vmatprep.subr.bf16.mxu1 %v13182_v27 }
 0x233   : > { %v11956_v35 = vpop.f32.mrb[104].mxu0  ;;  %v11990_v21 = vpop.f32.mrb[104].mxu1 }
 0x234   : > { %v11957_v23 = vpop.f32.mrb[105].mxu0  ;;  %v11991_v31 = vpop.f32.mrb[105].mxu1  ;;  %12417 = vmatpush3.bf16.msra.mxu0 %v13183_v57  ;;  %v13299_v57 = vld [vmem:[%s13469_s12 + $0xf0] sm:$0xff] }
 0x235   : > { %v11958_v16 = vadd.f32 %v11957_v23, %v11956_v35  ;;  %v11992_v2 = vadd.f32 %v11991_v31, %v11990_v21  ;;  %v11959_v40 = vpop.f32.mrb[106].mxu0  ;;  %v11993_v5 = vpop.f32.mrb[106].mxu1  ;;  %12451 = vmatpush3.bf16.msra.mxu1 %v13184_v17  ;;  %12418 = vmatprep.subr.bf16.mxu0 %v13185_v14  ;;  %v13197_v35 = vld [vmem:[%s16948_s1 + $0x1050] sm:$0xff]  }
 0x236   : > { %v11960_v46 = vpop.f32.mrb[107].mxu0  ;;  %v11994_v4 = vpop.f32.mrb[107].mxu1  ;;  %12452 = vmatprep.subr.bf16.mxu1 %v13186_v26  ;;  %v13198_v23 = vld [vmem:[%s16948_s1 + $0x10d0] sm:$0xff]  }
 0x237   : > { %v16405_v58 = vadd.f32 %v11992_v2, %v11958_v16  ;;  %v11961_v49 = vadd.f32 %v11960_v46, %v11959_v40  ;;  %v11995_v62 = vadd.f32 %v11994_v4, %v11993_v5  ;;  %v11054_v16 = vcombine.high %v13299_v57, %v16170_v50  ;;  %v13199_v2 = vld [vmem:[%s16948_s1 + $0x1010] sm:$0xff]   ;;  %v13201_v4 = vld [vmem:[%s16948_s1 + $0x1058] sm:$0xff]  }
 0x238   : > { %12419 = vmatpush3.bf16.msra.mxu0 %v13187_v53  ;;  %v17030_v5 = vcombine.low %v15589_v7, %v15663_v15  ;;  %v13200_v26 = vld [vmem:[%s16948_s1 + $0x1090] sm:$0xff]  }
 0x239   : > { %12453 = vmatpush3.bf16.msra.mxu1 %v13188_v34  ;;  %v16423_v44 = vadd.f32 %v11995_v62, %v11961_v49  ;;  %12472 = vmatprep.subr.bf16.mxu0 %v13189_v39  ;;  %v17031_v49 = vcombine.low %v15603_v29, %v15693_v20  ;;  %v13203_v29 = vld [vmem:[%s16948_s1 + $0x1018] sm:$0xff]  }
 0x23a   : > { %12506 = vmatprep.subr.bf16.mxu1 %v13190_v33 }
 0x23b   : > { %8048 = vmatmul.mubr.bf16.vlgmr.msra.gmra.mrb[180].mxu0 %v11037_v38 }
 0x23c   : > { %8105 = vmatmul.mubr.bf16.vlgmr.msra.gmra.mrb[180].mxu1 %v11039_v52  ;;  %12473 = vmatpush3.bf16.msra.mxu0 %v13191_v48  ;;  %v11053_v52 = vcombine.low %v13299_v57, %v16170_v50 }
 0x23d   : > { %12507 = vmatpush3.bf16.msra.mxu1 %v13192_v10  ;;  %8055 = vmatprep.mubr.bf16.mxu0 %v17028_v59 }
 0x23e   : > { %12474 = vmatprep.subr.bf16.mxu0 %v13193_v6  ;;  %8112 = vmatprep.mubr.bf16.mxu1 %v17029_v22 }
 0x23f   : > { %12508 = vmatprep.subr.bf16.mxu1 %v13194_v56  ;;  %v13209_v56 = vld [vmem:[%s16948_s1 + $0x1068] sm:$0xff]  }
 0x240   : > { %12475 = vmatpush3.bf16.msra.mxu0 %v13195_v47  ;;  %v13210_v47 = vld [vmem:[%s16948_s1 + $0x10e8] sm:$0xff]  }
 0x241   : > { %12509 = vmatpush3.bf16.msra.mxu1 %v13196_v63  ;;  %12476 = vmatprep.subr.bf16.mxu0 %v13197_v35  ;;  %v13214_v35 = vld [vmem:[%s16948_s1 + $0x10f0] sm:$0xff]  }
 0x242   : > { %12510 = vmatprep.subr.bf16.mxu1 %v13198_v23  ;;  %v13216_v23 = vld [vmem:[%s16948_s1 + $0x10b0] sm:$0xff]  }
 0x243   : > { %v12012_v60 = vpop.f32.mrb[108].mxu0  ;;  %8056 = vmatmul.mubr.bf16.gmra.mrb[184].mxu0 %v17030_v5 }
 0x244   : > { %v12013_v18 = vpop.f32.mrb[109].mxu0  ;;  %12477 = vmatpush3.bf16.msra.mxu0 %v13199_v2  ;;  %8113 = vmatmul.mubr.bf16.gmra.mrb[184].mxu1 %v17031_v49 }
 0x245   : > { %v12046_v24 = vpop.f32.mrb[108].mxu1  ;;  %v12014_v0 = vadd.f32 %v12013_v18, %v12012_v60  ;;  %v12015_v41 = vpop.f32.mrb[110].mxu0  ;;  %12511 = vmatpush3.bf16.msra.mxu1 %v13200_v26  ;;  %8063 = vmatprep.mubr.bf16.mxu0 %v11054_v16  ;;  %v13204_v60 = vld [vmem:[%s16948_s1 + $0x1098] sm:$0xff]   ;;  %v13205_v18 = vld [vmem:[%s16948_s1 + $0x1060] sm:$0xff]  }
 0x246   : > { %v12047_v9 = vpop.f32.mrb[109].mxu1  ;;  %v12016_v3 = vpop.f32.mrb[111].mxu0  ;;  %12478 = vmatprep.subr.bf16.mxu0 %v13201_v4  ;;  %v8143_v26 = vld [vmem:[%s13469_s12 + $0xa0] sm:$0xff]  ;;  %v8136_v4 = vld [vmem:[%s13469_s12 + $0x68] sm:$0xff] }
 0x247   : > { %v12048_v13 = vadd.f32 %v12047_v9, %v12046_v24  ;;  %v5097_v19 = vadd.f32 %v12014_v0, %v16337_v12  ;;  %v12049_v42 = vpop.f32.mrb[110].mxu1  ;;  %v12017_v32 = vadd.f32 %v12016_v3, %v12015_v41  ;;  %v13207_v41 = vld [vmem:[%s16948_s1 + $0x1020] sm:$0xff]  }
 0x248   : > { %v12050_v54 = vpop.f32.mrb[111].mxu1  ;;  %12479 = vmatpush3.bf16.msra.mxu0 %v13203_v29  ;;  %v8144_v29 = vld [vmem:[%s13469_s12 + $0xa8] sm:$0xff] }
 0x249   : > { %v5154_v12 = vadd.f32 %v12048_v13, %v5097_v19  ;;  %v12051_v37 = vadd.f32 %v12050_v54, %v12049_v42  ;;  %v5100_v21 = vadd.f32 %v12017_v32, %v16353_v55  ;;  %12480 = vmatprep.subr.bf16.mxu0 %v13205_v18  ;;  %v13212_v54 = vld [vmem:[%s16948_s1 + $0x10a8] sm:$0xff]  }
 0x24b   : > { %v12018_v30 = vpop.f32.mrb[112].mxu0  ;;  %v16454_v25 = vadd.f32 %v5154_v12, %v16211_v51  ;;  %v13300_v51 = vld [vmem:[%s13469_s12 + $0xf8] sm:$0xff]  ;;  %v5157_v55 = vadd.f32 %v12051_v37, %v5100_v21  ;;  %8064 = vmatmul.mubr.bf16.gmra.mrb[188].mxu0 %v11053_v52 }
 0x24c   : > { %v12019_v27 = vpop.f32.mrb[113].mxu0  ;;  %v11056_v40 = vcombine.high %v13300_v51, %v16185_v8  ;;  %v11055_v48 = vcombine.low %v13300_v51, %v16185_v8  ;;  %v13208_v8 = vld [vmem:[%s16948_s1 + $0x10a0] sm:$0xff]   ;;  %12481 = vmatpush3.bf16.msra.mxu0 %v13207_v41 }
 0x24d   : > { %v12020_v31 = vadd.f32 %v12019_v27, %v12018_v30  ;;  %v12021_v17 = vpop.f32.mrb[114].mxu0  ;;  %v12052_v14 = vpop.f32.mrb[112].mxu1  ;;  %v16481_v7 = vadd.f32 %v5157_v55, %v16246_v28  ;;  %12482 = vmatprep.subr.bf16.mxu0 %v13209_v56  ;;  %v13213_v30 = vld [vmem:[%s16948_s1 + $0x1070] sm:$0xff]   ;;  %v8135_v55 = vld [vmem:[%s13469_s12 + $0x60] sm:$0xff] }
 0x24e   : > { %v12022_v53 = vpop.f32.mrb[115].mxu0  ;;  %v12053_v34 = vpop.f32.mrb[113].mxu1  ;;  %8120 = vmatprep.mubr.bf16.mxu1 %v11056_v40  ;;  %v13215_v27 = vld [vmem:[%s16948_s1 + $0x1030] sm:$0xff]   ;;  %v13220_v40 = vld [vmem:[%s16948_s1 + $0x10b8] sm:$0xff]  }
 0x24f   : > { %v5105_v46 = vadd.f32 %v12020_v31, %v16377_v36  ;;  %v12023_v15 = vadd.f32 %v12022_v53, %v12021_v17  ;;  %v13202_v36 = vld [vmem:[%s16948_s1 + $0x10d8] sm:$0xff]   ;;  %v12054_v38 = vadd.f32 %v12053_v34, %v12052_v14  ;;  %v12055_v62 = vpop.f32.mrb[114].mxu1  ;;  %8121 = vmatmul.mubr.bf16.gmra.mrb[188].mxu1 %v11055_v48  ;;  %v8139_v14 = vld [vmem:[%s13469_s12 + $0x80] sm:$0xff] }
 0x250   : > { %v12056_v28 = vpop.f32.mrb[115].mxu1  ;;  %12512 = vmatprep.subr.bf16.mxu1 %v13202_v36  ;;  %v13218_v31 = vld [vmem:[%s16948_s1 + $0x10f8] sm:$0xff]   ;;  %v11249_v53 = vcombine.low %v8135_v55, %v8139_v14  ;;  %v11250_v49 = vcombine.high %v8135_v55, %v8139_v14  ;;  %v13229_v14 = vld [vmem:[%s16948_s1 + $0x1150] sm:$0xff]  }
 0x251   : > { %v5108_v20 = vadd.f32 %v12023_v15, %v16391_v43  ;;  %v5162_v39 = vadd.f32 %v12054_v38, %v5105_v46  ;;  %v12057_v24 = vadd.f32 %v12056_v28, %v12055_v62  ;;  %12513 = vmatpush3.bf16.msra.mxu1 %v13204_v60  ;;  %v13206_v43 = vld [vmem:[%s16948_s1 + $0x10e0] sm:$0xff]   ;;  %v8140_v62 = vld [vmem:[%s13469_s12 + $0x88] sm:$0xff] }
 0x252   : > { %12514 = vmatprep.subr.bf16.mxu1 %v13206_v43  ;;  %v8147_v46 = vld [vmem:[%s13469_s12 + $0xc0] sm:$0xff]  ;;  %v8421_v60 = vshrl.u32 %v11250_v49, 16  ;;  %v8423_v52 = vshll.u32 %v11250_v49, 16 }
 0x253   : > { %v12024_v33 = vpop.f32.mrb[116].mxu0  ;;  %v16502_v9 = vadd.f32 %v5162_v39, %v16269_v11  ;;  %v5165_v50 = vadd.f32 %v12057_v24, %v5108_v20  ;;  %v16564_v36 = vcombine.low %v8143_v26, %v8147_v46  ;;  %v16566_v38 = vcombine.high %v8143_v26, %v8147_v46  ;;  %v8148_v20 = vld [vmem:[%s13469_s12 + $0xc8] sm:$0xff]  ;;  %v13221_v43 = vld [vmem:[%s16948_s1 + $0x1140] sm:$0xff]   ;;  %v13230_v26 = vld [vmem:[%s16948_s1 + $0x11d0] sm:$0xff]  }
 0x254   : > { %v12025_v0 = vpop.f32.mrb[117].mxu0  ;;  %v11251_v39 = vcombine.low %v8136_v4, %v8140_v62  ;;  %v11252_v24 = vcombine.high %v8136_v4, %v8140_v62  ;;  %v16572_v18 = vcombine.low %v8144_v29, %v8148_v20  ;;  %v16574_v48 = vcombine.high %v8144_v29, %v8148_v20  ;;  %v13232_v4 = vld [vmem:[%s16948_s1 + $0x1190] sm:$0xff]  }
 0x255   : > { %v12026_v10 = vadd.f32 %v12025_v0, %v12024_v33  ;;  %v12027_v13 = vpop.f32.mrb[118].mxu0  ;;  %v12058_v6 = vpop.f32.mrb[116].mxu1  ;;  %v16511_v19 = vadd.f32 %v5165_v50, %v16278_v1  ;;  %12515 = vmatpush3.bf16.msra.mxu1 %v13208_v8  ;;  %v13211_v1 = vld [vmem:[%s16948_s1 + $0x1028] sm:$0xff]   ;;  %v8428_v33 = vshll.u32 %v16566_v38, 16  ;;  %v8409_v0 = vshrl.u32 %v11249_v53, 16  ;;  %v13222_v50 = vld [vmem:[%s16948_s1 + $0x11c0] sm:$0xff]  }
 0x256   : > { %v12028_v42 = vpop.f32.mrb[119].mxu0  ;;  %v12059_v3 = vpop.f32.mrb[117].mxu1  ;;  %12516 = vmatprep.subr.bf16.mxu1 %v13210_v47  ;;  %12483 = vmatpush3.bf16.msra.mxu0 %v13211_v1  ;;  %v8447_v41 = vshll.u32 %v11252_v24, 16  ;;  %v8433_v56 = vshrl.u32 %v11251_v39, 16  ;;  %v8512_v55 = vshrl.u32 %v16566_v38, 16  ;;  %v8504_v46 = vshrl.u32 %v16564_v36, 16 }
 0x257   : > { %v5113_v11 = vadd.f32 %v12026_v10, %v16405_v58  ;;  %v12029_v59 = vadd.f32 %v12028_v42, %v12027_v13  ;;  %v12060_v22 = vadd.f32 %v12059_v3, %v12058_v6  ;;  %v12061_v12 = vpop.f32.mrb[118].mxu1  ;;  %12484 = vmatprep.subr.bf16.mxu0 %v13213_v30  ;;  %v8425_v10 = vrot.slane %v8423_v52, 1  ;;  %v8155_v38 = vld [vmem:[%s13469_s12 + $0x100] sm:$0xff]  ;;  %v8156_v52 = vld [vmem:[%s13469_s12 + $0x108] sm:$0xff] }
 0x258   : > { %v12062_v32 = vpop.f32.mrb[119].mxu1  ;;  %v8445_v13 = vshrl.u32 %v11252_v24, 16  ;;  %v8411_v6 = vshll.u32 %v11249_v53, 16  ;;  %v8430_v8 = vrot.slane %v8428_v33, 1  ;;  %v8416_v42 = vshll.u32 %v16564_v36, 16  ;;  %v13231_v53 = vld [vmem:[%s16948_s1 + $0x1110] sm:$0xff]  }
 0x259   : > { %v5116_v58 = vadd.f32 %v12029_v59, %v16423_v44  ;;  %v5170_v63 = vadd.f32 %v12060_v22, %v5113_v11  ;;  %v12063_v37 = vadd.f32 %v12062_v32, %v12061_v12  ;;  %12517 = vmatpush3.bf16.msra.mxu1 %v13212_v54  ;;  %v8452_v11 = vshll.u32 %v16574_v48, 16  ;;  %v13223_v32 = vld [vmem:[%s16948_s1 + $0x1100] sm:$0xff]  }
 0x25a   : > { %12518 = vmatprep.subr.bf16.mxu1 %v13214_v35  ;;  %12485 = vmatpush3.bf16.msra.mxu0 %v13215_v27  ;;  %v8426_v59 = vor.u32 %v8425_v10, %v8421_v60  ;;  %v8449_v3 = vrot.slane %v8447_v41, 1  ;;  %v8413_v47 = vrot.slane %v8411_v6, 1  ;;  %v8435_v22 = vshll.u32 %v11251_v39, 16  ;;  %v13225_v27 = vld [vmem:[%s16948_s1 + $0x1148] sm:$0xff]   ;;  %v13234_v6 = vld [vmem:[%s16948_s1 + $0x11d8] sm:$0xff]  }
 0x25b   : > { %v16534_v44 = vadd.f32 %v5170_v63, %v16307_v45  ;;  %v5173_v21 = vadd.f32 %v12063_v37, %v5116_v58  ;;  %v13217_v45 = vld [vmem:[%s16948_s1 + $0x1078] sm:$0xff]   ;;  %v16584_v12 = vrot.slane %v8452_v11, 1  ;;  %v8418_v1 = vrot.slane %v8416_v42, 1  ;;  %v8152_v60 = vld [vmem:[%s13469_s12 + $0xe8] sm:$0xff] }
 0x25c   : > { %12486 = vmatprep.subr.bf16.mxu0 %v13217_v45  ;;  %v8440_v58 = vshll.u32 %v16572_v18, 16  ;;  %v8431_v63 = vsel %vm2501_vm1, %v8426_v59, %v8430_v8  ;;  %v8450_v37 = vor.u32 %v8449_v3, %v8445_v13  ;;  %v8414_v30 = vor.u32 %v8413_v47, %v8409_v0  ;;  %v13226_v45 = vld [vmem:[%s16948_s1 + $0x11c8] sm:$0xff]   ;;  %v13235_v11 = vld [vmem:[%s16948_s1 + $0x1118] sm:$0xff]  }
 0x25d   : > { %v16543_v57 = vadd.f32 %v5173_v21, %v16320_v61  ;;  %12519 = vmatpush3.bf16.msra.mxu1 %v13216_v23  ;;  %v13219_v61 = vld [vmem:[%s16948_s1 + $0x1038] sm:$0xff]   ;;  %v8437_v35 = vrot.slane %v8435_v22, 1  ;;  %v13224_v21 = vld [vmem:[%s16948_s1 + $0x1180] sm:$0xff]   ;;  %9072 = vmatprep.mubr.bf16.mxu0 %v8431_v63  ;;  %v8520_v62 = vshrl.u32 %v16572_v18, 16  ;;  %v8514_v36 = vor.u32 %v8512_v55, %v8430_v8 }
 0x25e   : > { %12520 = vmatprep.subr.bf16.mxu1 %v13218_v31  ;;  %12487 = vmatpush3.bf16.msra.mxu0 %v13219_v61  ;;  %v8442_v23 = vrot.slane %v8440_v58, 1  ;;  %v8455_v31 = vsel %vm2501_vm1, %v8450_v37, %v16584_v12  ;;  %v11268_v0 = vcombine.high %v8152_v60, %v8156_v52  ;;  %v8506_v18 = vor.u32 %v8504_v46, %v8418_v1 }
 0x25f   : > { %12540 = vmatprep.subr.bf16.mxu0 %v13221_v43  ;;  %v8438_v61 = vor.u32 %v8437_v35, %v8433_v56  ;;  %9129 = vmatprep.mubr.bf16.mxu1 %v8455_v31  ;;  %v13233_v43 = vld [vmem:[%s16948_s1 + $0x1158] sm:$0xff]  }
 0x260   : > { %v8532_v3 = vshll.u32 %v11268_v0, 16  ;;  %v8522_v47 = vor.u32 %v8520_v62, %v8442_v23  ;;  %v8592_v31 = vshrl.u32 %v11268_v0, 16 }
 0x261   : > { %12521 = vmatpush3.bf16.msra.mxu1 %v13220_v40  ;;  %v8443_v40 = vsel %vm2501_vm1, %v8438_v61, %v8442_v23  ;;  %v8159_v61 = vld [vmem:[%s13469_s12 + $0x120] sm:$0x11] }
 0x262   : > { %12574 = vmatprep.subr.bf16.mxu1 %v13222_v50  ;;  %v16639_v50 = vcombine.low %v8152_v60, %v8156_v52  ;;  %v13248_v52 = vld [vmem:[%s16948_s1 + $0x11a8] sm:$0xff]  }
 0x263   : > { %v12080_v16 = vpop.f32.mrb[120].mxu0 }
 0x264   : > { %v12081_v17 = vpop.f32.mrb[121].mxu0  ;;  %9130 = vmatmul.mubr.bf16.vlgmr.msra.gmra.mrb[192].mxu1 %v8443_v40  ;;  %v8524_v22 = vshll.u32 %v16639_v50, 16 }
 0x265   : > { %v12082_v2 = vadd.f32 %v12081_v17, %v12080_v16  ;;  %v12083_v51 = vpop.f32.mrb[122].mxu0  ;;  %v12114_v15 = vpop.f32.mrb[120].mxu1  ;;  %v8419_v17 = vsel %vm2501_vm1, %v8414_v30, %v8418_v1  ;;  %12575 = vmatpush3.bf16.msra.mxu1 %v13224_v21 }
 0x266   : > { %v12084_v5 = vpop.f32.mrb[123].mxu0  ;;  %v12115_v28 = vpop.f32.mrb[121].mxu1  ;;  %9073 = vmatmul.mubr.bf16.vlgmr.msra.gmra.mrb[192].mxu0 %v8419_v17  ;;  %12576 = vmatprep.subr.bf16.mxu1 %v13226_v45  ;;  %v8526_v63 = vrot.slane %v8524_v22, 1  ;;  %v13239_v45 = vld [vmem:[%s16948_s1 + $0x1120] sm:$0xff]  }
 0x267   : > { %v16562_v34 = vadd.f32 %v12084_v5, %v12083_v51  ;;  %v12116_v54 = vadd.f32 %v12115_v28, %v12114_v15  ;;  %v13227_v51 = vld [vmem:[%s16948_s1 + $0x1108] sm:$0xff]   ;;  %12541 = vmatpush3.bf16.msra.mxu0 %v13223_v32  ;;  %v8528_v5 = vshrl.u32 %v16574_v48, 16  ;;  %v12117_v49 = vpop.f32.mrb[122].mxu1  ;;  %v8151_v15 = vld [vmem:[%s13469_s12 + $0xe0] sm:$0xff] }
 0x268   : > { %12542 = vmatprep.subr.bf16.mxu0 %v13225_v27  ;;  %v12118_v29 = vpop.f32.mrb[123].mxu1  ;;  %v16630_v28 = vcombine.high %v8151_v15, %v8155_v38  ;;  %v16634_v39 = vcombine.low %v8151_v15, %v8155_v38  ;;  %v8527_v21 = vsel %vm2501_vm1, %v8522_v47, %v8526_v63  ;;  %v13238_v27 = vld [vmem:[%s16948_s1 + $0x11e0] sm:$0xff]   ;;  %v8584_v15 = vshrl.u32 %v16639_v50, 16  ;;  %v13254_v47 = vld [vmem:[%s16948_s1 + $0x11f8] sm:$0xff]  }
 0x269   : > { %v16600_v16 = vadd.f32 %v12116_v54, %v12082_v2  ;;  %v13228_v2 = vld [vmem:[%s16948_s1 + $0x1188] sm:$0xff]   ;;  %v12119_v24 = vadd.f32 %v12118_v29, %v12117_v49  ;;  %v8530_v59 = vor.u32 %v8528_v5, %v16584_v12  ;;  %v8534_v54 = vrot.slane %v8532_v3, 1  ;;  %v13237_v12 = vld [vmem:[%s16948_s1 + $0x1160] sm:$0xff]  }
 0x26a   : > { %12577 = vmatpush3.bf16.msra.mxu1 %v13228_v2  ;;  %v8516_v41 = vshll.u32 %v16630_v28, 16  ;;  %v8508_v8 = vshll.u32 %v16634_v39, 16  ;;  %v8576_v23 = vshrl.u32 %v16630_v28, 16  ;;  %v13240_v17 = vld [vmem:[%s16948_s1 + $0x11a0] sm:$0xff]   ;;  %v8568_v40 = vshrl.u32 %v16634_v39, 16  ;;  %v13244_v49 = vld [vmem:[%s16948_s1 + $0x11e8] sm:$0xff]  }
 0x26b   : > { %12543 = vmatpush3.bf16.msra.mxu0 %v13227_v51  ;;  %12578 = vmatprep.subr.bf16.mxu1 %v13230_v26  ;;  %v16650_v42 = vadd.f32 %v12119_v24, %v16562_v34  ;;  %v13236_v34 = vld [vmem:[%s16948_s1 + $0x1198] sm:$0xff]   ;;  %v8535_v35 = vsel %vm2501_vm1, %v8530_v59, %v8534_v54  ;;  %v8160_v51 = vld [vmem:[%s13469_s12 + $0x128] sm:$0x11]  ;;  %v11274_v2 = vcombine.high %v8159_v61, %v8159_v61 }
 0x26c   : > { %12544 = vmatprep.subr.bf16.mxu0 %v13229_v14  ;;  %v8518_v1 = vrot.slane %v8516_v41, 1  ;;  %v8510_v58 = vrot.slane %v8508_v8, 1  ;;  %9137 = vmatprep.mubr.bf16.mxu1 %v8535_v35  ;;  %v11276_v55 = vcombine.high %v8160_v51, %v8160_v51  ;;  %v13243_v14 = vld [vmem:[%s16948_s1 + $0x1168] sm:$0xff]   ;;  %v11273_v5 = vcombine.low %v8159_v61, %v8159_v61  ;;  %v13251_v41 = vld [vmem:[%s16948_s1 + $0x1130] sm:$0xff]  }
 0x26d   : > { %v12086_v20 = vpop.f32.mrb[124].mxu0  ;;  %9138 = vmatmul.mubr.bf16.gmra.mrb[196].mxu1 %v8527_v21  ;;  %v8580_v38 = vshll.u32 %v11274_v2, 16  ;;  %v13247_v28 = vld [vmem:[%s16948_s1 + $0x1128] sm:$0xff]   ;;  %v13252_v8 = vld [vmem:[%s16948_s1 + $0x11b0] sm:$0xff]  }
 0x26e   : > { %v12087_v48 = vpop.f32.mrb[125].mxu0  ;;  %12579 = vmatpush3.bf16.msra.mxu1 %v13232_v4  ;;  %v8519_v37 = vsel %vm2501_vm1, %v8514_v36, %v8518_v1  ;;  %v8511_v30 = vsel %vm2501_vm1, %v8506_v18, %v8510_v58  ;;  %v8578_v46 = vor.u32 %v8576_v23, %v8518_v1  ;;  %v11275_v4 = vcombine.low %v8160_v51, %v8160_v51  ;;  %v8141_v35 = vld [vmem:[%s13469_s12 + $0x90] sm:$0xff] }
 0x26f   : > { %v12120_v33 = vpop.f32.mrb[124].mxu1  ;;  %v12088_v10 = vadd.f32 %v12087_v48, %v12086_v20  ;;  %12545 = vmatpush3.bf16.msra.mxu0 %v13231_v53  ;;  %12580 = vmatprep.subr.bf16.mxu1 %v13234_v6  ;;  %v12089_v26 = vpop.f32.mrb[126].mxu0  ;;  %v8594_v53 = vor.u32 %v8592_v31, %v8534_v54  ;;  %v8596_v62 = vshll.u32 %v11276_v55, 16  ;;  %v8570_v29 = vor.u32 %v8568_v40, %v8510_v58  ;;  %v13249_v48 = vld [vmem:[%s16948_s1 + $0x1170] sm:$0xff]   ;;  %v13255_v58 = vld [vmem:[%s16948_s1 + $0x1138] sm:$0xff]  }
 0x270   : > { %v12121_v13 = vpop.f32.mrb[125].mxu1  ;;  %12546 = vmatprep.subr.bf16.mxu0 %v13233_v43  ;;  %9080 = vmatprep.mubr.bf16.mxu0 %v8519_v37  ;;  %v8572_v20 = vshll.u32 %v11273_v5, 16  ;;  %v8586_v36 = vor.u32 %v8584_v15, %v8526_v63  ;;  %v8588_v60 = vshll.u32 %v11275_v4, 16  ;;  %v8582_v39 = vrot.slane %v8580_v38, 1  ;;  %v13250_v43 = vld [vmem:[%s16948_s1 + $0x11f0] sm:$0xff]   ;;  %v13256_v63 = vld [vmem:[%s16948_s1 + $0x11b8] sm:$0xff]  }
 0x271   : > { %v12122_v56 = vadd.f32 %v12121_v13, %v12120_v33  ;;  %9081 = vmatmul.mubr.bf16.gmra.mrb[196].mxu0 %v8511_v30  ;;  %v8598_v24 = vrot.slane %v8596_v62, 1  ;;  %v12123_v6 = vpop.f32.mrb[126].mxu1  ;;  %v8145_v21 = vld [vmem:[%s13469_s12 + $0xb0] sm:$0xff]  ;;  %v8138_v55 = vld [vmem:[%s13469_s12 + $0x78] sm:$0xff] }
 0x272   : > { %12581 = vmatpush3.bf16.msra.mxu1 %v13236_v34  ;;  %v8574_v33 = vrot.slane %v8572_v20, 1  ;;  %v8590_v0 = vrot.slane %v8588_v60, 1  ;;  %v8583_v18 = vsel %vm2501_vm1, %v8578_v46, %v8582_v39  ;;  %v12124_v3 = vpop.f32.mrb[127].mxu1  ;;  %v8137_v34 = vld [vmem:[%s13469_s12 + $0x70] sm:$0xff]  ;;  %v8146_v5 = vld [vmem:[%s13469_s12 + $0xb8] sm:$0xff]  ;;  %v13325_v20 = vmov 0  }
 0x273   : > { %v16654_v32 = vadd.f32 %v12122_v56, %v12088_v10  ;;  %12547 = vmatpush3.bf16.msra.mxu0 %v13235_v11  ;;  %12582 = vmatprep.subr.bf16.mxu1 %v13238_v27  ;;  %v8599_v50 = vsel %vm2501_vm1, %v8594_v53, %v8598_v24  ;;  %v12090_v11 = vpop.f32.mrb[127].mxu0  ;;  %v13253_v56 = vld [vmem:[%s16948_s1 + $0x1178] sm:$0xff]   ;;  %v12125_v22 = vadd.f32 %v12124_v3, %v12123_v6  ;;  %v8149_v27 = vld [vmem:[%s13469_s12 + $0xd0] sm:$0xff] }
 0x274   : > { %12548 = vmatprep.subr.bf16.mxu0 %v13237_v12  ;;  %v8575_v10 = vsel %vm2501_vm1, %v8570_v29, %v8574_v33  ;;  %9088 = vmatprep.mubr.bf16.mxu0 %v8583_v18  ;;  %v8591_v13 = vsel %vm2501_vm1, %v8586_v36, %v8590_v0  ;;  %v12091_v59 = vadd.f32 %v12090_v11, %v12089_v26  ;;  %v8150_v53 = vld [vmem:[%s13469_s12 + $0xd8] sm:$0xff]  ;;  %v8157_v18 = vld [vmem:[%s13469_s12 + $0x110] sm:$0xff] }
 0x275   : > { %9145 = vmatprep.mubr.bf16.mxu1 %v8599_v50  ;;  %v11253_v61 = vcombine.low %v8137_v34, %v8141_v35  ;;  %v11254_v51 = vcombine.high %v8137_v34, %v8141_v35  ;;  %v16728_v40 = vcombine.low %v8145_v21, %v8149_v27  ;;  %v16730_v2 = vcombine.high %v8145_v21, %v8149_v27  ;;  %v8158_v11 = vld [vmem:[%s13469_s12 + $0x118] sm:$0xff]  ;;  %v9323_v35 = vld [vmem:[%s16950_s3] sm:$0xff] }
 0x276   : > { %12583 = vmatpush3.bf16.msra.mxu1 %v13240_v17  ;;  %v16721_v12 = vadd.f32 %v12125_v22, %v12091_v59  ;;  %12635 = vset.pattern.permute.xlu0 %v13325_v20  ;;  %v16753_v24 = vcombine.high %v8146_v5, %v8150_v53 }
 0x277   : > { %12549 = vmatpush3.bf16.msra.mxu0 %v13239_v45  ;;  %12584 = vmatprep.subr.bf16.mxu1 %v13244_v49  ;;  %v8471_v36 = vshll.u32 %v11254_v51, 16  ;;  %v8476_v60 = vshll.u32 %v16730_v2, 16  ;;  %v8457_v0 = vshrl.u32 %v11253_v61, 16  ;;  %v8464_v6 = vshll.u32 %v16728_v40, 16 }
 0x278   : > { %12550 = vmatprep.subr.bf16.mxu0 %v13243_v14  ;;  %9146 = vmatmul.mubr.bf16.gmra.mrb[200].mxu1 %v8591_v13  ;;  %v8142_v14 = vld [vmem:[%s13469_s12 + $0x98] sm:$0xff]  ;;  %v8500_v59 = vshll.u32 %v16753_v24, 16 }
 0x279   : > { %9089 = vmatmul.mubr.bf16.gmra.mrb[200].mxu0 %v8575_v10  ;;  %v11255_v49 = vcombine.low %v8138_v55, %v8142_v14  ;;  %v11256_v4 = vcombine.high %v8138_v55, %v8142_v14  ;;  %12636 = vset.pattern.permute.xlu1 %v13325_v20  ;;  %v8473_v10 = vrot.slane %v8471_v36, 1  ;;  %v8478_v13 = vrot.slane %v8476_v60, 1 }
 0x27a   : > { %12585 = vmatpush3.bf16.msra.mxu1 %v13248_v52  ;;  %v12092_v1 = vpop.f32.mrb[128].mxu0  ;;  %v16748_v52 = vcombine.low %v8146_v5, %v8150_v53  ;;  %v8502_v27 = vrot.slane %v8500_v59, 1  ;;  %9331 = vperm.xlu0 %12635, %v9323_v35   ;;  %v8544_v5 = vshrl.u32 %v16730_v2, 16  ;;  %v9324_v53 = vld [vmem:[%s16950_s3 + $0x8] sm:$0xff]  ;;  %v9326_v2 = vld [vmem:[%s16950_s3 + $0x18] sm:$0xff] }
 0x27b   : > { %12551 = vmatpush3.bf16.msra.mxu0 %v13247_v28  ;;  %12586 = vmatprep.subr.bf16.mxu1 %v13250_v43  ;;  %v12126_v54 = vpop.f32.mrb[128].mxu1  ;;  %v12093_v37 = vpop.f32.mrb[129].mxu0  ;;  %v8469_v28 = vshrl.u32 %v11254_v51, 16  ;;  %v8493_v33 = vshrl.u32 %v11256_v4, 16  ;;  %v8153_v43 = vld [vmem:[%s13469_s12 + $0xf0] sm:$0xff]  ;;  %v8481_v3 = vshrl.u32 %v11255_v49, 16 }
 0x27c   : > { %12552 = vmatprep.subr.bf16.mxu0 %v13249_v48  ;;  %v12127_v30 = vpop.f32.mrb[129].mxu1  ;;  %v12094_v23 = vadd.f32 %v12093_v37, %v12092_v1  ;;  %v12095_v31 = vpop.f32.mrb[130].mxu0  ;;  %v8495_v48 = vshll.u32 %v11256_v4, 16  ;;  %v8488_v34 = vshll.u32 %v16748_v52, 16  ;;  %v8162_v35 = vld [vmem:[%s13469_s12 + $0x138] sm:$0x11] }
 0x27d   : > { %v12128_v45 = vadd.f32 %v12127_v30, %v12126_v54  ;;  %v16726_v17 = vpop.f32.mrb[130].mxu1  ;;  %v12096_v26 = vpop.f32.mrb[131].mxu0 }
 0x27e   : > { %12587 = vmatpush3.bf16.msra.mxu1 %v13252_v8  ;;  %v16735_v46 = vpop.f32.mrb[131].mxu1  ;;  %v16740_v38 = vadd.f32 %v12096_v26, %v12095_v31  ;;  %v8154_v8 = vld [vmem:[%s13469_s12 + $0xf8] sm:$0xff]  ;;  %v8490_v14 = vrot.slane %v8488_v34, 1  ;;  %9336 = vperm.xlu0 %12635, %v9324_v53  }
 0x27f   : > { %12553 = vmatpush3.bf16.msra.mxu0 %v13251_v41  ;;  %12588 = vmatprep.subr.bf16.mxu1 %v13254_v47  ;;  %v16738_v15 = vadd.f32 %v12128_v45, %v12094_v23  ;;  %v8459_v41 = vshll.u32 %v11253_v61, 16  ;;  %v8483_v47 = vshll.u32 %v11255_v49, 16  ;;  %v16775_v45 = vcombine.high %v8153_v43, %v8157_v18  ;;  %v9325_v61 = vld [vmem:[%s16950_s3 + $0x10] sm:$0xff] }
 0x280   : > { %12554 = vmatprep.subr.bf16.mxu0 %v13253_v56  ;;  %v8497_v56 = vrot.slane %v8495_v48, 1  ;;  %9341 = vperm.xlu1 %12636, %v9325_v61   ;;  %v11272_v36 = vcombine.high %v8154_v8, %v8158_v11 }
 0x281   : > { %v8461_v54 = vrot.slane %v8459_v41, 1  ;;  %v8485_v23 = vrot.slane %v8483_v47, 1  ;;  %v11269_v41 = vcombine.low %v8153_v43, %v8157_v18  ;;  %v11271_v43 = vcombine.low %v8154_v8, %v8158_v11  ;;  %v9328_v8 = vld [vmem:[%s16950_s3 + $0x28] sm:$0xff] }
 0x282   : > { %12589 = vmatpush3.bf16.msra.mxu1 %v13256_v63  ;;  %v8466_v63 = vrot.slane %v8464_v6, 1  ;;  %v8498_v21 = vor.u32 %v8497_v56, %v8493_v33  ;;  %v8564_v47 = vshll.u32 %v11272_v36, 16  ;;  %v8552_v18 = vshrl.u32 %v16748_v52, 16 }
 0x283   : > { %12555 = vmatpush3.bf16.msra.mxu0 %v13255_v58  ;;  %v8474_v58 = vor.u32 %v8473_v10, %v8469_v28  ;;  %v8462_v55 = vor.u32 %v8461_v54, %v8457_v0  ;;  %v8486_v4 = vor.u32 %v8485_v23, %v8481_v3  ;;  %v8548_v28 = vshll.u32 %v16775_v45, 16  ;;  %v8161_v54 = vld [vmem:[%s13469_s12 + $0x130] sm:$0x11]  ;;  %v9327_v23 = vld [vmem:[%s16950_s3 + $0x20] sm:$0xff]  ;;  %s12609_s12 = smul.u32 40, %s17037_s15 }
 0x284   : > { %v16742_v62 = vpop.f32.mrb[132].mxu0  ;;  %v8503_v49 = vsel %vm2501_vm1, %v8498_v21, %v8502_v27  ;;  %v8546_v0 = vor.u32 %v8544_v5, %v8478_v13  ;;  %v8560_v10 = vshrl.u32 %v16753_v24, 16  ;;  %v8540_v24 = vshll.u32 %v11269_v41, 16  ;;  %9346 = vperm.xlu1 %12636, %v9326_v2   ;;  %9351 = vperm.xlu0 %12635, %v9327_v23  }
 0x285   : > { %v16750_v39 = vpop.f32.mrb[133].mxu0  ;;  %v8479_v51 = vsel %vm2501_vm1, %v8474_v58, %v8478_v13  ;;  %9243 = vmatprep.mubr.bf16.mxu1 %v8503_v49  ;;  %v8467_v48 = vsel %vm2501_vm1, %v8462_v55, %v8466_v63  ;;  %v8491_v59 = vsel %vm2501_vm1, %v8486_v4, %v8490_v14  ;;  %v8550_v3 = vrot.slane %v8548_v28, 1  ;;  %s16895_s5 = scalar_lea.vmem %s16951_s4, %s12609_s12 }
 0x286   : > { %v16763_v22 = vpop.f32.mrb[134].mxu0  ;;  %9186 = vmatprep.mubr.bf16.mxu0 %v8479_v51  ;;  %v8536_v58 = vshrl.u32 %v16728_v40, 16  ;;  %9244 = vmatmul.mubr.bf16.vlgmr.msra.gmra.mrb[204].mxu1 %v8491_v59  ;;  %v8562_v13 = vor.u32 %v8560_v10, %v8502_v27  ;;  %v8566_v61 = vrot.slane %v8564_v47, 1  ;;  %v12131_v55 = vadd.f32 %v16735_v46, %v16726_v17  ;;  %9365 = vst [vmem:[%s16895_s5] sm:$0xf] %v13325_v20 }
 0x287   : > { %v16768_v37 = vpop.f32.mrb[135].mxu0  ;;  %9187 = vmatmul.mubr.bf16.vlgmr.msra.gmra.mrb[204].mxu0 %v8467_v48  ;;  %v8551_v40 = vsel %vm2501_vm1, %v8546_v0, %v8550_v3  ;;  %v8542_v52 = vrot.slane %v8540_v24, 1  ;;  %v8554_v11 = vor.u32 %v8552_v18, %v8490_v14  ;;  %v8556_v27 = vshll.u32 %v11271_v43, 16  ;;  %9366 = vst [vmem:[%s16895_s5 + $0x4] sm:$0xf] %v13325_v20 }
 0x288   : > { %v16744_v29 = vpop.f32.mrb[132].mxu1  ;;  %v8538_v51 = vor.u32 %v8536_v58, %v8466_v63  ;;  %9194 = vmatprep.mubr.bf16.mxu0 %v8551_v40  ;;  %v11278_v5 = vcombine.high %v8161_v54, %v8161_v54  ;;  %v8567_v53 = vsel %vm2501_vm1, %v8562_v13, %v8566_v61  ;;  %v16824_v49 = vadd.f32 %v12131_v55, %v16740_v38 }
 0x289   : > { %v16757_v50 = vpop.f32.mrb[133].mxu1  ;;  %v8608_v4 = vshrl.u32 %v16775_v45, 16  ;;  %v11280_v63 = vcombine.high %v8162_v35, %v8162_v35  ;;  %9251 = vmatprep.mubr.bf16.mxu1 %v8567_v53  ;;  %v8558_v46 = vrot.slane %v8556_v27, 1  ;;  %v8624_v2 = vshrl.u32 %v11272_v36, 16  ;;  %9356 = vperm.xlu1 %12636, %v9328_v8   ;;  %9397 = vst [vmem:[%s16895_s5 + $0x20] sm:$0xf] %v13325_v20 }
 0x28a   : > { %v16765_v1 = vpop.f32.mrb[134].mxu1  ;;  %v8543_v17 = vsel %vm2501_vm1, %v8538_v51, %v8542_v52  ;;  %v8612_v28 = vshll.u32 %v11278_v5, 16  ;;  %v11277_v0 = vcombine.low %v8161_v54, %v8161_v54  ;;  %v8600_v10 = vshrl.u32 %v11269_v41, 16  ;;  %9398 = vst [vmem:[%s16895_s5 + $0x24] sm:$0xf] %v13325_v20 }
 0x28b   : > { %v16770_v30 = vpop.f32.mrb[135].mxu1  ;;  %v8610_v48 = vor.u32 %v8608_v4, %v8550_v3  ;;  %v8628_v14 = vshll.u32 %v11280_v63, 16  ;;  %v8559_v47 = vsel %vm2501_vm1, %v8554_v11, %v8558_v46  ;;  %v8626_v58 = vor.u32 %v8624_v2, %v8566_v61 }
 0x28c   : > { %v8614_v38 = vrot.slane %v8612_v28, 1  ;;  %v11279_v13 = vcombine.low %v8162_v35, %v8162_v35  ;;  %v8602_v18 = vor.u32 %v8600_v10, %v8542_v52  ;;  %v8604_v23 = vshll.u32 %v11277_v0, 16 }
 0x28d   : > { %v16777_v31 = vpop.f32.mrb[136].mxu0  ;;  %v8630_v24 = vrot.slane %v8628_v14, 1  ;;  %v8616_v40 = vshrl.u32 %v11271_v43, 16  ;;  %v12150_v41 = vadd.f32 %v16750_v39, %v16742_v62  ;;  %v12184_v54 = vadd.f32 %v16757_v50, %v16744_v29 }
 0x28e   : > { %v16784_v26 = vpop.f32.mrb[137].mxu0  ;;  %9252 = vmatmul.mubr.bf16.gmra.mrb[208].mxu1 %v8559_v47  ;;  %v8615_v36 = vsel %vm2501_vm1, %v8610_v48, %v8614_v38  ;;  %v8620_v3 = vshll.u32 %v11279_v13, 16  ;;  %v8606_v8 = vrot.slane %v8604_v23, 1  ;;  %v12153_v43 = vadd.f32 %v16768_v37, %v16763_v22 }
 0x28f   : > { %v16791_v60 = vpop.f32.mrb[138].mxu0  ;;  %9195 = vmatmul.mubr.bf16.gmra.mrb[208].mxu0 %v8543_v17  ;;  %v8631_v35 = vsel %vm2501_vm1, %v8626_v58, %v8630_v24  ;;  %v8618_v52 = vor.u32 %v8616_v40, %v8558_v46  ;;  %v6236_v5 = vadd.f32 %v12150_v41, %v16600_v16  ;;  %v12187_v62 = vadd.f32 %v16770_v30, %v16765_v1 }
 0x290   : > { %v16800_v6 = vpop.f32.mrb[139].mxu0  ;;  %9202 = vmatprep.mubr.bf16.mxu0 %v8615_v36  ;;  %9259 = vmatprep.mubr.bf16.mxu1 %v8631_v35  ;;  %v8622_v27 = vrot.slane %v8620_v3, 1  ;;  %v12156_v29 = vadd.f32 %v16784_v26, %v16777_v31  ;;  %v8607_v50 = vsel %vm2501_vm1, %v8602_v18, %v8606_v8  ;;  %v6239_v53 = vadd.f32 %v12153_v43, %v16650_v42 }
 0x291   : > { %v12159_v4 = vadd.f32 %v16800_v6, %v16791_v60  ;;  %v6293_v63 = vadd.f32 %v12184_v54, %v6236_v5 }
 0x292   : > { %v16793_v33 = vpop.f32.mrb[136].mxu1  ;;  %v8623_v16 = vsel %vm2501_vm1, %v8618_v52, %v8622_v27  ;;  %v6244_v1 = vadd.f32 %v12156_v29, %v16654_v32  ;;  %v6296_v31 = vadd.f32 %v12187_v62, %v6239_v53 }
 0x293   : > { %v16802_v56 = vpop.f32.mrb[137].mxu1  ;;  %v6247_v26 = vadd.f32 %v12159_v4, %v16721_v12  ;;  %v16854_v46 = vadd.f32 %v6293_v63, %v16454_v25 }
 0x294   : > { %v16807_v34 = vpop.f32.mrb[138].mxu1  ;;  %v12190_v22 = vadd.f32 %v16802_v56, %v16793_v33  ;;  %v16857_v56 = vadd.f32 %v6296_v31, %v16481_v7 }
 0x295   : > { %v16811_v21 = vpop.f32.mrb[139].mxu1 }
 0x296   : > { %v12193_v30 = vadd.f32 %v16811_v21, %v16807_v34  ;;  %v6301_v60 = vadd.f32 %v12190_v22, %v6244_v1  ;;  %9260 = vmatmul.mubr.bf16.gmra.mrb[212].mxu1 %v8623_v16 }
 0x297   : > { %9203 = vmatmul.mubr.bf16.gmra.mrb[212].mxu0 %v8607_v50 }
 0x298   : > { %v12160_v59 = vpop.f32.mrb[140].mxu0  ;;  %v6304_v28 = vadd.f32 %v12193_v30, %v6247_v26  ;;  %v16862_v12 = vadd.f32 %v6301_v60, %v16502_v9 }
 0x299   : > { %v12161_v45 = vpop.f32.mrb[141].mxu0 }
 0x29a   : > { %v12163_v51 = vpop.f32.mrb[142].mxu0  ;;  %v12162_v17 = vadd.f32 %v12161_v45, %v12160_v59  ;;  %v16865_v21 = vadd.f32 %v6304_v28, %v16511_v19 }
 0x29b   : > { %v12194_v55 = vpop.f32.mrb[140].mxu1  ;;  %v12164_v61 = vpop.f32.mrb[143].mxu0 }
 0x29c   : > { %v12195_v11 = vpop.f32.mrb[141].mxu1  ;;  %v12165_v42 = vadd.f32 %v12164_v61, %v12163_v51  ;;  %v6252_v32 = vadd.f32 %v12162_v17, %v16738_v15 }
 0x29d   : > { %v12197_v39 = vpop.f32.mrb[142].mxu1  ;;  %v12196_v6 = vadd.f32 %v12195_v11, %v12194_v55 }
 0x29e   : > { %v12198_v37 = vpop.f32.mrb[143].mxu1  ;;  %v6255_v34 = vadd.f32 %v12165_v42, %v16824_v49 }
 0x29f   : > { %v12199_v33 = vadd.f32 %v12198_v37, %v12197_v39  ;;  %v6309_v25 = vadd.f32 %v12196_v6, %v6252_v32 }
 0x2a1   : > { %v6312_v2 = vadd.f32 %v12199_v33, %v6255_v34  ;;  %v16868_v48 = vadd.f32 %v6309_v25, %v16534_v44 }
 0x2a3   : > { %v16871_v7 = vadd.f32 %v6312_v2, %v16543_v57 }
 0x2ab   : > { %v12216_v14 = vpop.f32.mrb[144].mxu0 }
 0x2ac   : > { %v12250_v0 = vpop.f32.mrb[144].mxu1  ;;  %v12217_v15 = vpop.f32.mrb[145].mxu0 }
 0x2ad   : > { %v12218_v10 = vadd.f32 %v12217_v15, %v12216_v14  ;;  %v12251_v49 = vpop.f32.mrb[145].mxu1  ;;  %v12219_v59 = vpop.f32.mrb[146].mxu0 }
 0x2ae   : > { %v12252_v47 = vadd.f32 %v12251_v49, %v12250_v0  ;;  %v12253_v9 = vpop.f32.mrb[146].mxu1  ;;  %v12220_v38 = vpop.f32.mrb[147].mxu0 }
 0x2af   : > { %v12221_v58 = vadd.f32 %v12220_v38, %v12219_v59  ;;  %v12254_v19 = vpop.f32.mrb[147].mxu1 }
 0x2b0   : > { %v7198_v13 = vadd.f32 %v12252_v47, %v12218_v10  ;;  %v12255_v45 = vadd.f32 %v12254_v19, %v12253_v9 }
 0x2b2   : > { %v7201_v24 = vadd.f32 %v12255_v45, %v12221_v58 }
 0x2b6   : > { %v12222_v18 = vpop.f32.mrb[148].mxu0 }
 0x2b7   : > { %v12256_v44 = vpop.f32.mrb[148].mxu1  ;;  %v12223_v23 = vpop.f32.mrb[149].mxu0 }
 0x2b8   : > { %v12224_v40 = vadd.f32 %v12223_v23, %v12222_v18  ;;  %v12257_v57 = vpop.f32.mrb[149].mxu1  ;;  %v12225_v51 = vpop.f32.mrb[150].mxu0 }
 0x2b9   : > { %v12258_v36 = vadd.f32 %v12257_v57, %v12256_v44  ;;  %v12259_v3 = vpop.f32.mrb[150].mxu1  ;;  %v12226_v41 = vpop.f32.mrb[151].mxu0 }
 0x2ba   : > { %v12227_v54 = vadd.f32 %v12226_v41, %v12225_v51  ;;  %v12260_v55 = vpop.f32.mrb[151].mxu1 }
 0x2bb   : > { %v7206_v61 = vadd.f32 %v12258_v36, %v12224_v40  ;;  %v12261_v35 = vadd.f32 %v12260_v55, %v12259_v3 }
 0x2bd   : > { %v7209_v8 = vadd.f32 %v12261_v35, %v12227_v54 }
 0x2bf   : > { %v12228_v52 = vpop.f32.mrb[152].mxu0 }
 0x2c0   : > { %v12229_v43 = vpop.f32.mrb[153].mxu0 }
 0x2c1   : > { %v12230_v11 = vadd.f32 %v12229_v43, %v12228_v52  ;;  %v12231_v27 = vpop.f32.mrb[154].mxu0 }
 0x2c2   : > { %v12232_v62 = vpop.f32.mrb[155].mxu0 }
 0x2c3   : > { %v12233_v39 = vadd.f32 %v12232_v62, %v12231_v27 }
 0x2c4   : > { %v12262_v5 = vpop.f32.mrb[152].mxu1 }
 0x2c5   : > { %v12263_v29 = vpop.f32.mrb[153].mxu1 }
 0x2c6   : > { %v12264_v50 = vadd.f32 %v12263_v29, %v12262_v5  ;;  %v12265_v53 = vpop.f32.mrb[154].mxu1 }
 0x2c7   : > { %v12266_v4 = vpop.f32.mrb[155].mxu1 }
 0x2c8   : > { %v7214_v22 = vadd.f32 %v12264_v50, %v12230_v11  ;;  %v12267_v37 = vadd.f32 %v12266_v4, %v12265_v53 }
 0x2ca   : > { %v7217_v16 = vadd.f32 %v12267_v37, %v12233_v39 }
 0x2cd   : > { %v12284_v63 = vpop.f32.mrb[156].mxu0 }
 0x2ce   : > { %v12318_v1 = vpop.f32.mrb[156].mxu1  ;;  %v12285_v30 = vpop.f32.mrb[157].mxu0 }
 0x2cf   : > { %v12286_v31 = vadd.f32 %v12285_v30, %v12284_v63  ;;  %v12319_v26 = vpop.f32.mrb[157].mxu1  ;;  %v12287_v17 = vpop.f32.mrb[158].mxu0 }
 0x2d0   : > { %v12320_v42 = vadd.f32 %v12319_v26, %v12318_v1  ;;  %v12321_v60 = vpop.f32.mrb[158].mxu1  ;;  %v12288_v6 = vpop.f32.mrb[159].mxu0 }
 0x2d1   : > { %v7255_v33 = vadd.f32 %v12286_v31, %v7198_v13  ;;  %v12289_v28 = vadd.f32 %v12288_v6, %v12287_v17  ;;  %v12322_v32 = vpop.f32.mrb[159].mxu1 }
 0x2d2   : > { %v12323_v34 = vadd.f32 %v12322_v32, %v12321_v60 }
 0x2d3   : > { %v7312_v25 = vadd.f32 %v12320_v42, %v7255_v33  ;;  %v7258_v2 = vadd.f32 %v12289_v28, %v7201_v24 }
 0x2d5   : > { %v16874_v14 = vadd.f32 %v7312_v25, %v16854_v46  ;;  %v7315_v0 = vadd.f32 %v12323_v34, %v7258_v2  ;;  %v12290_v15 = vpop.f32.mrb[160].mxu0 }
 0x2d6   : > { %v12291_v10 = vpop.f32.mrb[161].mxu0 }
 0x2d7   : > { %v16877_v49 = vadd.f32 %v7315_v0, %v16857_v56  ;;  %v12292_v59 = vadd.f32 %v12291_v10, %v12290_v15  ;;  %v12293_v47 = vpop.f32.mrb[162].mxu0 }
 0x2d8   : > { %v12294_v38 = vpop.f32.mrb[163].mxu0 }
 0x2d9   : > { %v7263_v58 = vadd.f32 %v12292_v59, %v7206_v61  ;;  %v12295_v19 = vadd.f32 %v12294_v38, %v12293_v47 }
 0x2da   : > { %v12324_v9 = vpop.f32.mrb[160].mxu1 }
 0x2db   : > { %v12325_v13 = vpop.f32.mrb[161].mxu1  ;;  %v7266_v44 = vadd.f32 %v12295_v19, %v7209_v8 }
 0x2dc   : > { %v12326_v45 = vadd.f32 %v12325_v13, %v12324_v9  ;;  %v12327_v18 = vpop.f32.mrb[162].mxu1 }
 0x2dd   : > { %v12328_v24 = vpop.f32.mrb[163].mxu1 }
 0x2de   : > { %v7320_v23 = vadd.f32 %v12326_v45, %v7263_v58  ;;  %v12329_v46 = vadd.f32 %v12328_v24, %v12327_v18 }
 0x2e0   : > { %v16880_v40 = vadd.f32 %v7320_v23, %v16862_v12  ;;  %v7323_v57 = vadd.f32 %v12329_v46, %v7266_v44 }
 0x2e2   : > { %v16883_v56 = vadd.f32 %v7323_v57, %v16865_v21  ;;  %v12296_v51 = vpop.f32.mrb[164].mxu0  ;;  %v12330_v54 = vpop.f32.mrb[164].mxu1 }
 0x2e3   : > { %v12297_v36 = vpop.f32.mrb[165].mxu0  ;;  %v12331_v52 = vpop.f32.mrb[165].mxu1 }
 0x2e4   : > { %v12298_v3 = vadd.f32 %v12297_v36, %v12296_v51  ;;  %v12299_v41 = vpop.f32.mrb[166].mxu0  ;;  %v12332_v8 = vadd.f32 %v12331_v52, %v12330_v54  ;;  %v12333_v43 = vpop.f32.mrb[166].mxu1 }
 0x2e5   : > { %v12300_v55 = vpop.f32.mrb[167].mxu0  ;;  %v12334_v27 = vpop.f32.mrb[167].mxu1 }
 0x2e6   : > { %v7271_v61 = vadd.f32 %v12298_v3, %v7214_v22  ;;  %v12301_v35 = vadd.f32 %v12300_v55, %v12299_v41  ;;  %v12335_v12 = vadd.f32 %v12334_v27, %v12333_v43 }
 0x2e8   : > { %v7274_v11 = vadd.f32 %v12301_v35, %v7217_v16  ;;  %v7328_v5 = vadd.f32 %v12332_v8, %v7271_v61 }
 0x2ea   : > { %v16886_v62 = vadd.f32 %v7328_v5, %v16868_v48  ;;  %v7331_v21 = vadd.f32 %v12335_v12, %v7274_v11 }
 0x2ec   : > { %v16889_v29 = vadd.f32 %v7331_v21, %v16871_v7 }
 0x2ee   : > { %v12352_v39 = vpop.f32.mrb[168].mxu0 }
 0x2ef   : > { %v12386_v50 = vpop.f32.mrb[168].mxu1  ;;  %v12353_v53 = vpop.f32.mrb[169].mxu0 }
 0x2f0   : > { %v12354_v4 = vadd.f32 %v12353_v53, %v12352_v39  ;;  %v12387_v22 = vpop.f32.mrb[169].mxu1  ;;  %v12355_v37 = vpop.f32.mrb[170].mxu0 }
 0x2f1   : > { %v12388_v63 = vadd.f32 %v12387_v22, %v12386_v50  ;;  %v12389_v1 = vpop.f32.mrb[170].mxu1  ;;  %v12356_v30 = vpop.f32.mrb[171].mxu0 }
 0x2f2   : > { %v12357_v16 = vadd.f32 %v12356_v30, %v12355_v37  ;;  %v12390_v31 = vpop.f32.mrb[171].mxu1 }
 0x2f3   : > { %v7993_v26 = vadd.f32 %v12388_v63, %v12354_v4  ;;  %v12391_v17 = vadd.f32 %v12390_v31, %v12389_v1 }
 0x2f5   : > { %v7996_v42 = vadd.f32 %v12391_v17, %v12357_v16 }
 0x2f6   : > { %v12358_v48 = vpop.f32.mrb[172].mxu0 }
 0x2f7   : > { %v12392_v60 = vpop.f32.mrb[172].mxu1  ;;  %v12359_v6 = vpop.f32.mrb[173].mxu0 }
 0x2f8   : > { %v12360_v33 = vadd.f32 %v12359_v6, %v12358_v48  ;;  %v12393_v7 = vpop.f32.mrb[173].mxu1  ;;  %v12361_v28 = vpop.f32.mrb[174].mxu0 }
 0x2f9   : > { %v12394_v32 = vadd.f32 %v12393_v7, %v12392_v60  ;;  %v12395_v34 = vpop.f32.mrb[174].mxu1  ;;  %v12362_v25 = vpop.f32.mrb[175].mxu0 }
 0x2fa   : > { %v12363_v2 = vadd.f32 %v12362_v25, %v12361_v28  ;;  %v12396_v0 = vpop.f32.mrb[175].mxu1 }
 0x2fb   : > { %v8001_v15 = vadd.f32 %v12394_v32, %v12360_v33  ;;  %v12397_v10 = vadd.f32 %v12396_v0, %v12395_v34 }
 0x2fd   : > { %v8004_v59 = vadd.f32 %v12397_v10, %v12363_v2 }
 0x2fe   : > { %v12364_v47 = vpop.f32.mrb[176].mxu0 }
 0x2ff   : > { %v12398_v9 = vpop.f32.mrb[176].mxu1  ;;  %v12365_v38 = vpop.f32.mrb[177].mxu0 }
 0x300   : > { %v12366_v58 = vadd.f32 %v12365_v38, %v12364_v47  ;;  %v12399_v19 = vpop.f32.mrb[177].mxu1  ;;  %v12367_v13 = vpop.f32.mrb[178].mxu0 }
 0x301   : > { %v12400_v45 = vadd.f32 %v12399_v19, %v12398_v9  ;;  %v12401_v18 = vpop.f32.mrb[178].mxu1  ;;  %v12368_v44 = vpop.f32.mrb[179].mxu0 }
 0x302   : > { %v12369_v24 = vadd.f32 %v12368_v44, %v12367_v13  ;;  %v12402_v23 = vpop.f32.mrb[179].mxu1 }
 0x303   : > { %v8009_v46 = vadd.f32 %v12400_v45, %v12366_v58  ;;  %v12403_v57 = vadd.f32 %v12402_v23, %v12401_v18 }
 0x305   : > { %v8012_v51 = vadd.f32 %v12403_v57, %v12369_v24 }
 0x30e   : > { %v12420_v36 = vpop.f32.mrb[180].mxu0 }
 0x30f   : > { %v12454_v3 = vpop.f32.mrb[180].mxu1  ;;  %v12421_v41 = vpop.f32.mrb[181].mxu0 }
 0x310   : > { %v12422_v54 = vadd.f32 %v12421_v41, %v12420_v36  ;;  %v12455_v55 = vpop.f32.mrb[181].mxu1  ;;  %v12423_v61 = vpop.f32.mrb[182].mxu0 }
 0x311   : > { %v12456_v35 = vadd.f32 %v12455_v55, %v12454_v3  ;;  %v12457_v52 = vpop.f32.mrb[182].mxu1  ;;  %v12424_v8 = vpop.f32.mrb[183].mxu0 }
 0x312   : > { %v8050_v43 = vadd.f32 %v12422_v54, %v7993_v26  ;;  %v12425_v11 = vadd.f32 %v12424_v8, %v12423_v61  ;;  %v12458_v27 = vpop.f32.mrb[183].mxu1 }
 0x313   : > { %v12459_v5 = vadd.f32 %v12458_v27, %v12457_v52 }
 0x314   : > { %v8107_v12 = vadd.f32 %v12456_v35, %v8050_v43  ;;  %v8053_v21 = vadd.f32 %v12425_v11, %v7996_v42 }
 0x316   : > { %v16906_v39 = vadd.f32 %v8107_v12, %v16874_v14  ;;  %v8110_v20 = vadd.f32 %v12459_v5, %v8053_v21  ;;  %v12426_v50 = vpop.f32.mrb[184].mxu0 }
 0x317   : > { %v12427_v53 = vpop.f32.mrb[185].mxu0  ;;  %v12460_v4 = vpop.f32.mrb[184].mxu1 }
 0x318   : > { %v16909_v22 = vadd.f32 %v8110_v20, %v16877_v49  ;;  %v12428_v37 = vadd.f32 %v12427_v53, %v12426_v50  ;;  %v12429_v63 = vpop.f32.mrb[186].mxu0  ;;  %v12461_v1 = vpop.f32.mrb[185].mxu1 }
 0x319   : > { %v12430_v30 = vpop.f32.mrb[187].mxu0  ;;  %v12462_v16 = vadd.f32 %v12461_v1, %v12460_v4  ;;  %v12463_v31 = vpop.f32.mrb[186].mxu1 }
 0x31a   : > { %v8058_v26 = vadd.f32 %v12428_v37, %v8001_v15  ;;  %v12431_v17 = vadd.f32 %v12430_v30, %v12429_v63  ;;  %v12464_v48 = vpop.f32.mrb[187].mxu1 }
 0x31b   : > { %v12465_v42 = vadd.f32 %v12464_v48, %v12463_v31 }
 0x31c   : > { %v8061_v60 = vadd.f32 %v12431_v17, %v8004_v59  ;;  %v8115_v14 = vadd.f32 %v12462_v16, %v8058_v26 }
 0x31e   : > { %v16912_v6 = vadd.f32 %v8115_v14, %v16880_v40  ;;  %v8118_v33 = vadd.f32 %v12465_v42, %v8061_v60  ;;  %v12432_v7 = vpop.f32.mrb[188].mxu0 }
 0x31f   : > { %v12433_v28 = vpop.f32.mrb[189].mxu0 }
 0x320   : > { %v16915_v32 = vadd.f32 %v8118_v33, %v16883_v56  ;;  %v12434_v34 = vadd.f32 %v12433_v28, %v12432_v7  ;;  %v12435_v25 = vpop.f32.mrb[190].mxu0 }
 0x321   : > { %v12436_v0 = vpop.f32.mrb[191].mxu0 }
 0x322   : > { %v12466_v49 = vpop.f32.mrb[188].mxu1  ;;  %v8066_v47 = vadd.f32 %v12434_v34, %v8009_v46  ;;  %v12437_v9 = vadd.f32 %v12436_v0, %v12435_v25 }
 0x323   : > { %v12467_v2 = vpop.f32.mrb[189].mxu1 }
 0x324   : > { %v12468_v15 = vadd.f32 %v12467_v2, %v12466_v49  ;;  %v12469_v10 = vpop.f32.mrb[190].mxu1  ;;  %v8069_v58 = vadd.f32 %v12437_v9, %v8012_v51 }
 0x325   : > { %v12470_v59 = vpop.f32.mrb[191].mxu1 }
 0x326   : > { %v12471_v38 = vadd.f32 %v12470_v59, %v12469_v10  ;;  %v8123_v40 = vadd.f32 %v12468_v15, %v8066_v47 }
 0x328   : > { %v16918_v19 = vadd.f32 %v8123_v40, %v16886_v62  ;;  %v8126_v13 = vadd.f32 %v12471_v38, %v8069_v58 }
 0x32a   : > { %v16921_v45 = vadd.f32 %v8126_v13, %v16889_v29  ;;  %v11345_v13 = vld [vmem:[%s16949_s2] ss:$0 sm:$0xff] }
 0x337   : > { %v12522_v44 = vpop.f32.mrb[192].mxu1 }
 0x338   : > { %v12523_v57 = vpop.f32.mrb[193].mxu1 }
 0x339   : > { %v12488_v56 = vpop.f32.mrb[192].mxu0  ;;  %v12524_v46 = vadd.f32 %v12523_v57, %v12522_v44  ;;  %v12525_v3 = vpop.f32.mrb[194].mxu1 }
 0x33a   : > { %v12489_v18 = vpop.f32.mrb[193].mxu0  ;;  %v12526_v54 = vpop.f32.mrb[195].mxu1 }
 0x33b   : > { %v12490_v24 = vadd.f32 %v12489_v18, %v12488_v56  ;;  %v12491_v23 = vpop.f32.mrb[194].mxu0  ;;  %v12527_v55 = vadd.f32 %v12526_v54, %v12525_v3 }
 0x33c   : > { %v12492_v36 = vpop.f32.mrb[195].mxu0 }
 0x33d   : > { %v12493_v41 = vadd.f32 %v12492_v36, %v12491_v23  ;;  %v9132_v51 = vadd.f32 %v12524_v46, %v12490_v24 }
 0x33f   : > { %v9135_v61 = vadd.f32 %v12527_v55, %v12493_v41 }
 0x340   : > { %v12528_v35 = vpop.f32.mrb[196].mxu1 }
 0x341   : > { %v12529_v29 = vpop.f32.mrb[197].mxu1 }
 0x342   : > { %v12530_v11 = vadd.f32 %v12529_v29, %v12528_v35  ;;  %v12531_v27 = vpop.f32.mrb[198].mxu1 }
 0x343   : > { %v12532_v21 = vpop.f32.mrb[199].mxu1 }
 0x344   : > { %v12494_v62 = vpop.f32.mrb[196].mxu0  ;;  %v12533_v50 = vadd.f32 %v12532_v21, %v12531_v27 }
 0x345   : > { %v12495_v52 = vpop.f32.mrb[197].mxu0 }
 0x346   : > { %v12496_v8 = vadd.f32 %v12495_v52, %v12494_v62  ;;  %v12497_v43 = vpop.f32.mrb[198].mxu0 }
 0x347   : > { %v12498_v5 = vpop.f32.mrb[199].mxu0 }
 0x348   : > { %v12499_v12 = vadd.f32 %v12498_v5, %v12497_v43  ;;  %v9140_v20 = vadd.f32 %v12530_v11, %v12496_v8 }
 0x34a   : > { %v9143_v53 = vadd.f32 %v12533_v50, %v12499_v12 }
 0x34b   : > { %v12534_v37 = vpop.f32.mrb[200].mxu1 }
 0x34c   : > { %v12500_v4 = vpop.f32.mrb[200].mxu0  ;;  %v12535_v1 = vpop.f32.mrb[201].mxu1 }
 0x34d   : > { %v12501_v63 = vpop.f32.mrb[201].mxu0  ;;  %v12536_v16 = vadd.f32 %v12535_v1, %v12534_v37  ;;  %v12537_v26 = vpop.f32.mrb[202].mxu1 }
 0x34e   : > { %v12502_v30 = vadd.f32 %v12501_v63, %v12500_v4  ;;  %v12503_v31 = vpop.f32.mrb[202].mxu0  ;;  %v12538_v48 = vpop.f32.mrb[203].mxu1 }
 0x34f   : > { %v12504_v17 = vpop.f32.mrb[203].mxu0  ;;  %v12539_v14 = vadd.f32 %v12538_v48, %v12537_v26 }
 0x350   : > { %v9148_v42 = vadd.f32 %v12536_v16, %v12502_v30  ;;  %v12505_v60 = vadd.f32 %v12504_v17, %v12503_v31 }
 0x352   : > { %v16923_v33 = vadd.f32 %v12539_v14, %v12505_v60 }
 0x359   : > { %v12590_v28 = vpop.f32.mrb[204].mxu1 }
 0x35a   : > { %v12556_v7 = vpop.f32.mrb[204].mxu0  ;;  %v12591_v25 = vpop.f32.mrb[205].mxu1 }
 0x35b   : > { %v12557_v49 = vpop.f32.mrb[205].mxu0  ;;  %v12592_v0 = vadd.f32 %v12591_v25, %v12590_v28  ;;  %v12593_v15 = vpop.f32.mrb[206].mxu1 }
 0x35c   : > { %v12558_v34 = vadd.f32 %v12557_v49, %v12556_v7  ;;  %v12559_v2 = vpop.f32.mrb[206].mxu0  ;;  %v12594_v59 = vpop.f32.mrb[207].mxu1 }
 0x35d   : > { %v12560_v10 = vpop.f32.mrb[207].mxu0  ;;  %v12595_v38 = vadd.f32 %v12594_v59, %v12593_v15 }
 0x35e   : > { %v9189_v47 = vadd.f32 %v12558_v34, %v9132_v51  ;;  %v12561_v9 = vadd.f32 %v12560_v10, %v12559_v2  ;;  %v9332_v2 = vpop.permute.xlu0 %9331 }
 0x360   : > { %v9246_v58 = vadd.f32 %v12592_v0, %v9189_v47  ;;  %v9192_v40 = vadd.f32 %v12561_v9, %v9135_v61 }
 0x361   : > { %v12596_v24 = vpop.f32.mrb[208].mxu1 }
 0x362   : > { %v9268_v56 = vadd.f32 %v9246_v58, %v16906_v39  ;;  %v9249_v18 = vadd.f32 %v12595_v38, %v9192_v40  ;;  %v12562_v44 = vpop.f32.mrb[208].mxu0  ;;  %v12597_v46 = vpop.f32.mrb[209].mxu1 }
 0x363   : > { %v12563_v23 = vpop.f32.mrb[209].mxu0  ;;  %v12598_v54 = vadd.f32 %v12597_v46, %v12596_v24  ;;  %v12599_v51 = vpop.f32.mrb[210].mxu1 }
 0x364   : > { %v9269_v57 = vadd.f32 %v9249_v18, %v16909_v22  ;;  %v12564_v36 = vadd.f32 %v12563_v23, %v12562_v44  ;;  %v12565_v3 = vpop.f32.mrb[210].mxu0  ;;  %v9281_v41 = vadd.f32 %v11345_v13, %v9268_v56  ;;  %v12600_v35 = vpop.f32.mrb[211].mxu1 }
 0x365   : > { %v12566_v55 = vpop.f32.mrb[211].mxu0  ;;  %v12601_v8 = vadd.f32 %v12600_v35, %v12599_v51 }
 0x366   : > { %v9197_v61 = vadd.f32 %v12564_v36, %v9140_v20  ;;  %v12567_v62 = vadd.f32 %v12566_v55, %v12565_v3  ;;  %v9293_v52 = vmin.f32 %v9281_v41, 0.0  ;;  %v9282_v29 = vadd.f32 %v11345_v13, %v9269_v57  ;;  %v9342_v57 = vpop.permute.xlu1 %9341 }
 0x367   : > { %vm9287_vm2 = vcmp.gt.f32.partialorder %v9281_v41, 0.0 }
 0x368   : > { %v9254_v39 = vadd.f32 %v12598_v54, %v9197_v61  ;;  %v9200_v43 = vadd.f32 %v12567_v62, %v9143_v53  ;;  %v9299_v11 = vmul.f32 1.442695, %v9293_v52  ;;  %v9294_v27 = vmin.f32 %v9282_v29, 0.0 }
 0x369   : > { %v12602_v21 = vpop.f32.mrb[212].mxu1  ;;  %vm9288_vm3 = vcmp.gt.f32.partialorder %v9282_v29, 0.0 }
 0x36a   : > { %v9270_v5 = vadd.f32 %v9254_v39, %v16912_v6  ;;  %v9257_v22 = vadd.f32 %v12601_v8, %v9200_v43  ;;  %v12568_v12 = vpop.f32.mrb[212].mxu0  ;;  %13261 = vpow2.f32 %v9299_v11  ;;  %v9301_v4 = vmul.f32 1.442695, %v9294_v27  ;;  %v12603_v63 = vpop.f32.mrb[213].mxu1 }
 0x36b   : > { %v12569_v50 = vpop.f32.mrb[213].mxu0  ;;  %v12604_v16 = vadd.f32 %v12603_v63, %v12602_v21  ;;  %v12605_v31 = vpop.f32.mrb[214].mxu1 }
 0x36c   : > { %v9271_v37 = vadd.f32 %v9257_v22, %v16915_v32  ;;  %v12570_v20 = vadd.f32 %v12569_v50, %v12568_v12  ;;  %v12571_v1 = vpop.f32.mrb[214].mxu0  ;;  %v9283_v30 = vadd.f32 %v11345_v13, %v9270_v5  ;;  %13263 = vpow2.f32 %v9301_v4  ;;  %v12606_v48 = vpop.f32.mrb[215].mxu1 }
 0x36d   : > { %v12572_v26 = vpop.f32.mrb[215].mxu0  ;;  %v12607_v60 = vadd.f32 %v12606_v48, %v12605_v31  ;;  %v9347_v54 = vpop.permute.xlu1 %9346 }
 0x36e   : > { %v9205_v53 = vadd.f32 %v12570_v20, %v9148_v42  ;;  %v12573_v17 = vadd.f32 %v12572_v26, %v12571_v1  ;;  %v9295_v6 = vmin.f32 %v9283_v30, 0.0  ;;  %v9284_v14 = vadd.f32 %v11345_v13, %v9271_v37 }
 0x36f   : > { %vm9289_vm4 = vcmp.gt.f32.partialorder %v9283_v30, 0.0 }
 0x370   : > { %v9262_v7 = vadd.f32 %v12604_v16, %v9205_v53  ;;  %v9208_v28 = vadd.f32 %v12573_v17, %v16923_v33  ;;  %v9303_v49 = vmul.f32 1.442695, %v9295_v6  ;;  %v9296_v34 = vmin.f32 %v9284_v14, 0.0  ;;  %v9337_v33 = vpop.permute.xlu0 %9336 }
 0x371   : > { %vm9290_vm5 = vcmp.gt.f32.partialorder %v9284_v14, 0.0  ;;  %v9357_v43 = vpop.permute.xlu1 %9356 }
 0x372   : > { %v9272_v32 = vadd.f32 %v9262_v7, %v16918_v19  ;;  %v9265_v25 = vadd.f32 %v12607_v60, %v9208_v28  ;;  %13265 = vpow2.f32 %v9303_v49  ;;  %v9305_v0 = vmul.f32 1.442695, %v9296_v34 }
 0x374   : > { %v13262_v15 = vpop.eup %13261  ;;  %v9273_v10 = vadd.f32 %v9265_v25, %v16921_v45  ;;  %v9285_v42 = vadd.f32 %v11345_v13, %v9272_v32  ;;  %13267 = vpow2.f32 %v9305_v0  ;;  %v9352_v27 = vpop.permute.xlu0 %9351 }
 0x375   : > { %v11346_v47 = vadd.f32 -1.0, %v13262_v15 }
 0x376   : > { %v9286_v9 = vadd.f32 %v11345_v13, %v9273_v10  ;;  %v9297_v59 = vmin.f32 %v9285_v42, 0.0  ;;  %v13264_v38 = vpop.eup %13263  ;;  %vm9291_vm6 = vcmp.gt.f32.partialorder %v9285_v42, 0.0 }
 0x377   : > { %v9317_v58 = vsel %vm9287_vm2, %v9281_v41, %v11346_v47  ;;  %v11347_v40 = vadd.f32 -1.0, %v13264_v38 }
 0x378   : > { %v9298_v56 = vmin.f32 %v9286_v9, 0.0  ;;  %v9307_v19 = vmul.f32 1.442695, %v9297_v59  ;;  %v9359_v24 = vmul.f32 %v9332_v2, %v9317_v58  ;;  %vm9292_vm7 = vcmp.gt.f32.partialorder %v9286_v9, 0.0 }
 0x379   : > { %v9318_v18 = vsel %vm9288_vm3, %v9282_v29, %v11347_v40 }
 0x37a   : > { %v9309_v44 = vmul.f32 1.442695, %v9298_v56  ;;  %v9360_v23 = vmul.f32 %v9337_v33, %v9318_v18  ;;  %13269 = vpow2.f32 %v9307_v19 }
 0x37c   : > { %v13266_v45 = vpop.eup %13265  ;;  %13271 = vpow2.f32 %v9309_v44  ;;  %v11369_v13 = vpack.c.bf16 %v9360_v23, %v9359_v24 }
 0x37d   : > { %v11348_v36 = vadd.f32 -1.0, %v13266_v45 }
 0x37e   : > { %v13268_v46 = vpop.eup %13267  ;;  %11381 = vst [vmem:[%s16895_s5 + $0x8] sm:$0xff] %v11369_v13  }
 0x37f   : > { %v9319_v3 = vsel %vm9289_vm4, %v9283_v30, %v11348_v36  ;;  %v11349_v41 = vadd.f32 -1.0, %v13268_v46 }
 0x380   : > { %v9361_v55 = vmul.f32 %v9342_v57, %v9319_v3 }
 0x381   : > { %v9320_v51 = vsel %vm9290_vm5, %v9284_v14, %v11349_v41 }
 0x382   : > { %v9362_v61 = vmul.f32 %v9347_v54, %v9320_v51 }
 0x384   : > { %v13270_v62 = vpop.eup %13269  ;;  %v11374_v35 = vpack.c.bf16 %v9362_v61, %v9361_v55 }
 0x385   : > { %v11350_v8 = vadd.f32 -1.0, %v13270_v62 }
 0x386   : > { %v13272_v52 = vpop.eup %13271  ;;  %11382 = vst [vmem:[%s16895_s5 + $0x10] sm:$0xff] %v11374_v35  }
 0x387   : > { %v11351_v29 = vadd.f32 -1.0, %v13272_v52  ;;  %v9321_v39 = vsel %vm9291_vm6, %v9285_v42, %v11350_v8 }
 0x388   : > { %v9363_v22 = vmul.f32 %v9352_v27, %v9321_v39 }
 0x389   : > { %v9322_v11 = vsel %vm9292_vm7, %v9286_v9, %v11351_v29 }
 0x38a   : > { %v9364_v5 = vmul.f32 %v9357_v43, %v9322_v11 }
 0x38c   : > { %v11379_v12 = vpack.c.bf16 %v9364_v5, %v9363_v22 }
 0x38e   : > { %11383 = vst [vmem:[%s16895_s5 + $0x18] sm:$0xff] %v11379_v12  }
 0x38f PF: > { %s14_s17 = sadd.s32 1, %s13323_s17   ;;  %s17032_s15 = smov %s13319_s16 }
 0x390   : > { %p11_p5 = scmp.ge.s32.totalorder %s14_s17, 4   ;;  %s17033_s16 = smov %s17035_s18 }
 0x392   :  { %13 = sbr.rel (!%p11_p5) target bundleno = 2 (0x2), region = 80 }

</bundles_post_ra>
